<compile_context>
chip_gen: v7x
topology: tpu7x:2x2x1
jax: 0.10.0
libtpu: 0.0.40
codegen_flags: <defaults>
</compile_context>

<pallas_src>
import functools

import jax
import jax.numpy as jnp
from jax.experimental import pallas as pl
from jax.experimental.pallas import tpu as pltpu


# ----------------------------- Pallas kernel ------------------------------- #
def _same_pad_conv_kernel(x_cur_ref, x_halo_ref, w_ref, b_ref, o_ref, xs_ref,
                          *, tap_offsets, sub_m):
    """One tile of flat output rows, taps packed into the contraction dim.

    x_cur_ref  : [tile_m, C_in]      current flat-row tile
    x_halo_ref : [halo,   C_in]      rows just after the tile (tap halo)
    w_ref      : [T*C_in, C_out]     single-buffered packed weight
    b_ref      : [1, C_out]
    o_ref      : [tile_m, C_out]     last dim == full C_out (no lane padding)
    xs_ref     : [tile_m + halo, C_in] VMEM scratch (tile + halo, contiguous)
    """
    tile_m, _ = x_cur_ref.shape

    # Assemble current tile + halo into one contiguous scratch (aligned copies).
    xs_ref[0:tile_m, :] = x_cur_ref[...]
    xs_ref[tile_m:, :] = x_halo_ref[...]

    w = w_ref[...]            # [T*C_in, C_out]  (constant across the grid)
    b = b_ref[...]            # [1, C_out]

    # One big-K MXU dot per sub-tile; no register-resident accumulator.
    for s in range(tile_m // sub_m):
        r0 = s * sub_m
        xp = jnp.concatenate(
            [xs_ref[r0 + off:r0 + off + sub_m, :] for off in tap_offsets],
            axis=-1)                                   # [sub_m, T*C_in]
        acc = jnp.dot(xp, w, preferred_element_type=jnp.float32)
        o_ref[r0:r0 + sub_m, :] = (acc + b).astype(o_ref.dtype)


# ------------------------------- Wrapper ----------------------------------- #
def same_pad_conv_timedim(x, weight, bias, *, kernel_size, stride, groups,
                          tile_m=512):
    """Forward pass of SamePadConv_timedim.

    x:      [N, C_in, H, W]            (NCHW, like PyTorch)
    weight: [C_out, C_in // groups, KH, KW]
    bias:   [C_out]
    returns [N, C_out, H_out, W_out]   (NCHW)
    """
    KH, KW = kernel_size
    SH, SW = stride
    N, C_in, H, W = x.shape
    C_out = weight.shape[0]
    C_in_g = C_in // groups
    C_out_g = C_out // groups

    # Padding exactly as in the PyTorch module (nn.Conv2d semantics).
    pad_row = (KW - 1) // 2      # width padding
    pad_col = (KH - 1) // 2      # height padding
    H_p, W_p = H + 2 * pad_col, W + 2 * pad_row
    H_out = (H_p - KH) // SH + 1
    W_out = (W_p - KW) // SW + 1

    # Row stride of the flat layout padded to a multiple of 8 so the KH row-tap
    # offsets (kh * W_p8) are sublane-aligned inside the kernel.
    W_p8 = ((W_p + 7) // 8) * 8

    # --- weight prep: [C_out, C_in_g, KH, KW] -> packed [T*C_in, C_out] -----
    T = KH * KW
    w_taps = jnp.transpose(weight, (2, 3, 1, 0)).reshape(T, C_in_g, C_out)
    if groups == 1:
        w_full = w_taps                                   # [T, C_in, C_out]
    else:
        # TODO(synk): replace the zero-filled block-diagonal with a group grid
        # axis for large grouped / depthwise convs (saves groups x FLOPs+VMEM).
        w_full = jnp.zeros((T, C_in, C_out), weight.dtype)
        for g in range(groups):
            w_full = w_full.at[:, g * C_in_g:(g + 1) * C_in_g,
                               g * C_out_g:(g + 1) * C_out_g].set(
                w_taps[:, :, g * C_out_g:(g + 1) * C_out_g])
    w_mat = w_full.reshape(T * C_in, C_out)               # big-K packed weight
    b_mat = bias.reshape(1, C_out).astype(w_mat.dtype)

    # --- input prep: NCHW -> padded NHWC -> flat [N*H_p*W_p8, C_in] ---------
    # TODO(synk): accept/emit NHWC at the module boundary to drop this HBM pass.
    x_nhwc = jnp.transpose(x, (0, 2, 3, 1))
    x_sp = jnp.pad(x_nhwc, ((0, 0), (pad_col, pad_col),
                            (pad_row, pad_row + (W_p8 - W_p)), (0, 0)))
    x_flat = x_sp.reshape(N * H_p * W_p8, C_in)
    M_rows = N * H_p * W_p8

    max_off = (KH - 1) * W_p8 + (KW - 1)                  # largest tap shift

    def _next_pow2(v):
        return 1 << max(3, (int(v) - 1).bit_length())

    tm = _next_pow2(max(tile_m, max_off, 8))              # rows per grid step
    halo = 8
    while halo < max_off:                                  # small halo block
        halo *= 2
    halo = min(halo, tm)                                   # halo divides tm
    sub_m = min(128, tm)                                   # inner MXU sub-tile

    num_blocks = -(-M_rows // tm)                          # cdiv
    rows_total = num_blocks * tm + halo                    # halo always valid
    x_flat = jnp.pad(x_flat, ((0, rows_total - M_rows), (0, 0)))

    tap_offsets = tuple(kh * W_p8 + kw for kh in range(KH) for kw in range(KW))

    # Per-step VMEM estimate (lane-padded) -> explicit limit / early error.
    def _lanes(n):
        return ((n + 127) // 128) * 128
    itemsize = jnp.dtype(x.dtype).itemsize
    vmem_est = itemsize * (
        2 * tm * _lanes(C_in)             # double-buffered current tile
        + 2 * halo * _lanes(C_in)         # double-buffered halo
        + 2 * tm * _lanes(C_out)          # double-buffered output tile
        + (tm + halo) * _lanes(C_in)      # xs scratch
        + (T * C_in) * _lanes(C_out)      # single-buffered weight
        + _lanes(C_out))                  # bias
    if vmem_est > 48 * 2 ** 20:
        raise ValueError(
            f"per-step VMEM estimate {vmem_est / 2**20:.1f} MiB is too large; "
            "lower tile_m or add a C_out/K grid axis.")

    halo_ratio = tm // halo
    kernel = functools.partial(_same_pad_conv_kernel,
                               tap_offsets=tap_offsets, sub_m=sub_m)

    out_flat = pl.pallas_call(
        kernel,
        out_shape=jax.ShapeDtypeStruct((num_blocks * tm, C_out), x.dtype),
        grid_spec=pltpu.PrefetchScalarGridSpec(
            num_scalar_prefetch=0,
            grid=(num_blocks,),
            in_specs=[
                # current tile of flat rows
                pl.BlockSpec((tm, C_in), lambda i: (i, 0)),
                # small halo: only `halo` rows starting right after the tile
                pl.BlockSpec((halo, C_in), lambda i: ((i + 1) * halo_ratio, 0)),
                # constant weight / bias: whole array in VMEM, single-buffered
                pl.BlockSpec(memory_space=pltpu.MemorySpace.VMEM),
                pl.BlockSpec(memory_space=pltpu.MemorySpace.VMEM),
            ],
            out_specs=pl.BlockSpec((tm, C_out), lambda i: (i, 0)),
            scratch_shapes=[
                pltpu.VMEM((tm + halo, C_in), x.dtype),    # tile + halo scratch
            ],
        ),
        compiler_params=pltpu.CompilerParams(
            dimension_semantics=("parallel",),
            vmem_limit_bytes=int(min(max(2 * vmem_est, 32 * 2 ** 20),
                                     64 * 2 ** 20)),
        ),
    )(x_flat, x_flat, w_mat, b_mat)

    # Keep only valid positions: rows ho*SH, cols wo*SW (against original W_p).
    # Stride > 1 computes the stride-1 response and subsamples here (this
    # module's typical use is stride (1,1), so this costs nothing).
    out = out_flat[:M_rows].reshape(N, H_p, W_p8, C_out)
    out = out[:, 0:(H_out - 1) * SH + 1:SH, 0:(W_out - 1) * SW + 1:SW, :]
    return jnp.transpose(out, (0, 3, 1, 2))               # back to NCHW


# ------------------------------- Main -------------------------------------- #
if __name__ == "__main__":
    # Module config (mirrors SamePadConv_timedim.__init__ args).
    in_channels = 4
    out_channels = 8
    kernel_size = (3, 5)     # (KH, KW)
    stride = (1, 1)
    groups = 1

    key = jax.random.PRNGKey(0)
    k_x, k_w, k_b = jax.random.split(key, 3)
    N, H, W = 2, 16, 16
    x = jax.random.normal(k_x, (N, in_channels, H, W), dtype=jnp.float32)
    weight = 0.1 * jax.random.normal(
        k_w, (out_channels, in_channels // groups, *kernel_size),
        dtype=jnp.float32)
    bias = 0.1 * jax.random.normal(k_b, (out_channels,), dtype=jnp.float32)

    fwd = jax.jit(functools.partial(
        same_pad_conv_timedim,
        kernel_size=kernel_size, stride=stride, groups=groups))
    out = jax.block_until_ready(fwd(x, weight, bias))

    # Reference check against XLA's conv (same semantics as torch.nn.Conv2d).
    pad_row = (kernel_size[1] - 1) // 2
    pad_col = (kernel_size[0] - 1) // 2
    ref = jax.lax.conv_general_dilated(
        x, weight, window_strides=stride,
        padding=((pad_col, pad_col), (pad_row, pad_row)),
        dimension_numbers=("NCHW", "OIHW", "NCHW"),
        feature_group_count=groups,
    ) + bias.reshape(1, -1, 1, 1)
    ref = jax.block_until_ready(ref)

    assert out.shape == ref.shape, (out.shape, ref.shape)
    assert float(jnp.max(jnp.abs(out - ref))) < 1e-4

    print("KERNEL_OK")
</pallas_src>

<mosaic_0001>
module attributes {stable_mosaic.version = 11 : i64} {
  func.func @_same_pad_conv_kernel(%arg0: i32, %arg1: memref<512x4xf32, #tpu.memory_space<vmem>>, %arg2: memref<64x4xf32, #tpu.memory_space<vmem>>, %arg3: memref<60x8xf32, #tpu.memory_space<vmem>>, %arg4: memref<1x8xf32, #tpu.memory_space<vmem>>, %arg5: memref<512x8xf32, #tpu.memory_space<vmem>>, %arg6: memref<576x4xf32, #tpu.memory_space<vmem>>) attributes {dimension_semantics = [#tpu.dimension_semantics<parallel>], iteration_bounds = array<i64: 2>, scalar_prefetch = 0 : i64, scratch_operands = 1 : i64, tpu.core_type = #tpu.core_type<tc>, window_params = [{transform_indices = @transform_0, window_bounds = array<i64: 512, 4>}, {transform_indices = @transform_1, window_bounds = array<i64: 64, 4>}, {pipeline_mode = #tpu.pipeline_mode<synchronous>, transform_indices = @transform_2, window_bounds = array<i64: 60, 8>}, {pipeline_mode = #tpu.pipeline_mode<synchronous>, transform_indices = @transform_3, window_bounds = array<i64: 1, 8>}, {transform_indices = @transform_4, window_bounds = array<i64: 512, 8>}]} {
    %c0 = arith.constant 0 : index
    %c0_0 = arith.constant 0 : index
    %0 = vector.load %arg1[%c0, %c0_0] : memref<512x4xf32, #tpu.memory_space<vmem>>, vector<512x4xf32>
    %c0_1 = arith.constant 0 : index
    %c0_2 = arith.constant 0 : index
    %1 = vector.load %arg6[%c0_1, %c0_2] : memref<576x4xf32, #tpu.memory_space<vmem>>, vector<512x4xf32>
    tpu.vector_store %arg6[%c0_1, %c0_2], %0 {strides = array<i32>} : memref<576x4xf32, #tpu.memory_space<vmem>>, vector<512x4xf32>,
    %c0_3 = arith.constant 0 : index
    %c0_4 = arith.constant 0 : index
    %2 = vector.load %arg2[%c0_3, %c0_4] : memref<64x4xf32, #tpu.memory_space<vmem>>, vector<64x4xf32>
    %c512 = arith.constant 512 : index
    %c0_5 = arith.constant 0 : index
    %3 = vector.load %arg6[%c512, %c0_5] : memref<576x4xf32, #tpu.memory_space<vmem>>, vector<64x4xf32>
    tpu.vector_store %arg6[%c512, %c0_5], %2 {strides = array<i32>} : memref<576x4xf32, #tpu.memory_space<vmem>>, vector<64x4xf32>,
    %c0_6 = arith.constant 0 : index
    %c0_7 = arith.constant 0 : index
    %4 = vector.load %arg3[%c0_6, %c0_7] : memref<60x8xf32, #tpu.memory_space<vmem>>, vector<60x8xf32>
    %c0_8 = arith.constant 0 : index
    %c0_9 = arith.constant 0 : index
    %5 = vector.load %arg4[%c0_8, %c0_9] : memref<1x8xf32, #tpu.memory_space<vmem>>, vector<1x8xf32>
    %c0_10 = arith.constant 0 : index
    %c0_11 = arith.constant 0 : index
    %6 = vector.load %arg6[%c0_10, %c0_11] : memref<576x4xf32, #tpu.memory_space<vmem>>, vector<128x4xf32>
    %c1 = arith.constant 1 : index
    %c0_12 = arith.constant 0 : index
    %7 = vector.load %arg6[%c1, %c0_12] : memref<576x4xf32, #tpu.memory_space<vmem>>, vector<128x4xf32>
    %c2 = arith.constant 2 : index
    %c0_13 = arith.constant 0 : index
    %8 = vector.load %arg6[%c2, %c0_13] : memref<576x4xf32, #tpu.memory_space<vmem>>, vector<128x4xf32>
    %c3 = arith.constant 3 : index
    %c0_14 = arith.constant 0 : index
    %9 = vector.load %arg6[%c3, %c0_14] : memref<576x4xf32, #tpu.memory_space<vmem>>, vector<128x4xf32>
    %c4 = arith.constant 4 : index
    %c0_15 = arith.constant 0 : index
    %10 = vector.load %arg6[%c4, %c0_15] : memref<576x4xf32, #tpu.memory_space<vmem>>, vector<128x4xf32>
    %c24 = arith.constant 24 : index
    %c0_16 = arith.constant 0 : index
    %11 = vector.load %arg6[%c24, %c0_16] : memref<576x4xf32, #tpu.memory_space<vmem>>, vector<128x4xf32>
    %c25 = arith.constant 25 : index
    %c0_17 = arith.constant 0 : index
    %12 = vector.load %arg6[%c25, %c0_17] : memref<576x4xf32, #tpu.memory_space<vmem>>, vector<128x4xf32>
    %c26 = arith.constant 26 : index
    %c0_18 = arith.constant 0 : index
    %13 = vector.load %arg6[%c26, %c0_18] : memref<576x4xf32, #tpu.memory_space<vmem>>, vector<128x4xf32>
    %c27 = arith.constant 27 : index
    %c0_19 = arith.constant 0 : index
    %14 = vector.load %arg6[%c27, %c0_19] : memref<576x4xf32, #tpu.memory_space<vmem>>, vector<128x4xf32>
    %c28 = arith.constant 28 : index
    %c0_20 = arith.constant 0 : index
    %15 = vector.load %arg6[%c28, %c0_20] : memref<576x4xf32, #tpu.memory_space<vmem>>, vector<128x4xf32>
    %c48 = arith.constant 48 : index
    %c0_21 = arith.constant 0 : index
    %16 = vector.load %arg6[%c48, %c0_21] : memref<576x4xf32, #tpu.memory_space<vmem>>, vector<128x4xf32>
    %c49 = arith.constant 49 : index
    %c0_22 = arith.constant 0 : index
    %17 = vector.load %arg6[%c49, %c0_22] : memref<576x4xf32, #tpu.memory_space<vmem>>, vector<128x4xf32>
    %c50 = arith.constant 50 : index
    %c0_23 = arith.constant 0 : index
    %18 = vector.load %arg6[%c50, %c0_23] : memref<576x4xf32, #tpu.memory_space<vmem>>, vector<128x4xf32>
    %c51 = arith.constant 51 : index
    %c0_24 = arith.constant 0 : index
    %19 = vector.load %arg6[%c51, %c0_24] : memref<576x4xf32, #tpu.memory_space<vmem>>, vector<128x4xf32>
    %c52 = arith.constant 52 : index
    %c0_25 = arith.constant 0 : index
    %20 = vector.load %arg6[%c52, %c0_25] : memref<576x4xf32, #tpu.memory_space<vmem>>, vector<128x4xf32>
    %21 = tpu.concatenate %6, %7, %8, %9, %10, %11, %12, %13, %14, %15, %16, %17, %18, %19, %20 in 1 : vector<128x4xf32>, vector<128x4xf32>, vector<128x4xf32>, vector<128x4xf32>, vector<128x4xf32>, vector<128x4xf32>, vector<128x4xf32>, vector<128x4xf32>, vector<128x4xf32>, vector<128x4xf32>, vector<128x4xf32>, vector<128x4xf32>, vector<128x4xf32>, vector<128x4xf32>, vector<128x4xf32> -> vector<128x60xf32>
    %cst = arith.constant dense<0.000000e+00> : vector<128x8xf32>
    %22 = tpu.matmul %21, %4, %cst {dimension_numbers = #tpu.dot_dimension_numbers<[1], [0], [0], [1], [0, 0, 1, 1], [], []>} : vector<128x60xf32>, vector<60x8xf32>, vector<128x8xf32> -> vector<128x8xf32>
    %23 = vector.broadcast %5 : vector<1x8xf32> to vector<128x8xf32>
    %24 = arith.addf %22, %23 : vector<128x8xf32>
    %c0_26 = arith.constant 0 : index
    %c0_27 = arith.constant 0 : index
    %25 = vector.load %arg5[%c0_26, %c0_27] : memref<512x8xf32, #tpu.memory_space<vmem>>, vector<128x8xf32>
    tpu.vector_store %arg5[%c0_26, %c0_27], %24 {strides = array<i32>} : memref<512x8xf32, #tpu.memory_space<vmem>>, vector<128x8xf32>,
    %c128 = arith.constant 128 : index
    %c0_28 = arith.constant 0 : index
    %26 = vector.load %arg6[%c128, %c0_28] : memref<576x4xf32, #tpu.memory_space<vmem>>, vector<128x4xf32>
    %c129 = arith.constant 129 : index
    %c0_29 = arith.constant 0 : index
    %27 = vector.load %arg6[%c129, %c0_29] : memref<576x4xf32, #tpu.memory_space<vmem>>, vector<128x4xf32>
    %c130 = arith.constant 130 : index
    %c0_30 = arith.constant 0 : index
    %28 = vector.load %arg6[%c130, %c0_30] : memref<576x4xf32, #tpu.memory_space<vmem>>, vector<128x4xf32>
    %c131 = arith.constant 131 : index
    %c0_31 = arith.constant 0 : index
    %29 = vector.load %arg6[%c131, %c0_31] : memref<576x4xf32, #tpu.memory_space<vmem>>, vector<128x4xf32>
    %c132 = arith.constant 132 : index
    %c0_32 = arith.constant 0 : index
    %30 = vector.load %arg6[%c132, %c0_32] : memref<576x4xf32, #tpu.memory_space<vmem>>, vector<128x4xf32>
    %c152 = arith.constant 152 : index
    %c0_33 = arith.constant 0 : index
    %31 = vector.load %arg6[%c152, %c0_33] : memref<576x4xf32, #tpu.memory_space<vmem>>, vector<128x4xf32>
    %c153 = arith.constant 153 : index
    %c0_34 = arith.constant 0 : index
    %32 = vector.load %arg6[%c153, %c0_34] : memref<576x4xf32, #tpu.memory_space<vmem>>, vector<128x4xf32>
    %c154 = arith.constant 154 : index
    %c0_35 = arith.constant 0 : index
    %33 = vector.load %arg6[%c154, %c0_35] : memref<576x4xf32, #tpu.memory_space<vmem>>, vector<128x4xf32>
    %c155 = arith.constant 155 : index
    %c0_36 = arith.constant 0 : index
    %34 = vector.load %arg6[%c155, %c0_36] : memref<576x4xf32, #tpu.memory_space<vmem>>, vector<128x4xf32>
    %c156 = arith.constant 156 : index
    %c0_37 = arith.constant 0 : index
    %35 = vector.load %arg6[%c156, %c0_37] : memref<576x4xf32, #tpu.memory_space<vmem>>, vector<128x4xf32>
    %c176 = arith.constant 176 : index
    %c0_38 = arith.constant 0 : index
    %36 = vector.load %arg6[%c176, %c0_38] : memref<576x4xf32, #tpu.memory_space<vmem>>, vector<128x4xf32>
    %c177 = arith.constant 177 : index
    %c0_39 = arith.constant 0 : index
    %37 = vector.load %arg6[%c177, %c0_39] : memref<576x4xf32, #tpu.memory_space<vmem>>, vector<128x4xf32>
    %c178 = arith.constant 178 : index
    %c0_40 = arith.constant 0 : index
    %38 = vector.load %arg6[%c178, %c0_40] : memref<576x4xf32, #tpu.memory_space<vmem>>, vector<128x4xf32>
    %c179 = arith.constant 179 : index
    %c0_41 = arith.constant 0 : index
    %39 = vector.load %arg6[%c179, %c0_41] : memref<576x4xf32, #tpu.memory_space<vmem>>, vector<128x4xf32>
    %c180 = arith.constant 180 : index
    %c0_42 = arith.constant 0 : index
    %40 = vector.load %arg6[%c180, %c0_42] : memref<576x4xf32, #tpu.memory_space<vmem>>, vector<128x4xf32>
    %41 = tpu.concatenate %26, %27, %28, %29, %30, %31, %32, %33, %34, %35, %36, %37, %38, %39, %40 in 1 : vector<128x4xf32>, vector<128x4xf32>, vector<128x4xf32>, vector<128x4xf32>, vector<128x4xf32>, vector<128x4xf32>, vector<128x4xf32>, vector<128x4xf32>, vector<128x4xf32>, vector<128x4xf32>, vector<128x4xf32>, vector<128x4xf32>, vector<128x4xf32>, vector<128x4xf32>, vector<128x4xf32> -> vector<128x60xf32>
    %cst_43 = arith.constant dense<0.000000e+00> : vector<128x8xf32>
    %42 = tpu.matmul %41, %4, %cst_43 {dimension_numbers = #tpu.dot_dimension_numbers<[1], [0], [0], [1], [0, 0, 1, 1], [], []>} : vector<128x60xf32>, vector<60x8xf32>, vector<128x8xf32> -> vector<128x8xf32>
    %43 = vector.broadcast %5 : vector<1x8xf32> to vector<128x8xf32>
    %44 = arith.addf %42, %43 : vector<128x8xf32>
    %c128_44 = arith.constant 128 : index
    %c0_45 = arith.constant 0 : index
    %45 = vector.load %arg5[%c128_44, %c0_45] : memref<512x8xf32, #tpu.memory_space<vmem>>, vector<128x8xf32>
    tpu.vector_store %arg5[%c128_44, %c0_45], %44 {strides = array<i32>} : memref<512x8xf32, #tpu.memory_space<vmem>>, vector<128x8xf32>,
    %c256 = arith.constant 256 : index
    %c0_46 = arith.constant 0 : index
    %46 = vector.load %arg6[%c256, %c0_46] : memref<576x4xf32, #tpu.memory_space<vmem>>, vector<128x4xf32>
    %c257 = arith.constant 257 : index
    %c0_47 = arith.constant 0 : index
    %47 = vector.load %arg6[%c257, %c0_47] : memref<576x4xf32, #tpu.memory_space<vmem>>, vector<128x4xf32>
    %c258 = arith.constant 258 : index
    %c0_48 = arith.constant 0 : index
    %48 = vector.load %arg6[%c258, %c0_48] : memref<576x4xf32, #tpu.memory_space<vmem>>, vector<128x4xf32>
    %c259 = arith.constant 259 : index
    %c0_49 = arith.constant 0 : index
    %49 = vector.load %arg6[%c259, %c0_49] : memref<576x4xf32, #tpu.memory_space<vmem>>, vector<128x4xf32>
    %c260 = arith.constant 260 : index
    %c0_50 = arith.constant 0 : index
    %50 = vector.load %arg6[%c260, %c0_50] : memref<576x4xf32, #tpu.memory_space<vmem>>, vector<128x4xf32>
    %c280 = arith.constant 280 : index
    %c0_51 = arith.constant 0 : index
    %51 = vector.load %arg6[%c280, %c0_51] : memref<576x4xf32, #tpu.memory_space<vmem>>, vector<128x4xf32>
    %c281 = arith.constant 281 : index
    %c0_52 = arith.constant 0 : index
    %52 = vector.load %arg6[%c281, %c0_52] : memref<576x4xf32, #tpu.memory_space<vmem>>, vector<128x4xf32>
    %c282 = arith.constant 282 : index
    %c0_53 = arith.constant 0 : index
    %53 = vector.load %arg6[%c282, %c0_53] : memref<576x4xf32, #tpu.memory_space<vmem>>, vector<128x4xf32>
    %c283 = arith.constant 283 : index
    %c0_54 = arith.constant 0 : index
    %54 = vector.load %arg6[%c283, %c0_54] : memref<576x4xf32, #tpu.memory_space<vmem>>, vector<128x4xf32>
    %c284 = arith.constant 284 : index
    %c0_55 = arith.constant 0 : index
    %55 = vector.load %arg6[%c284, %c0_55] : memref<576x4xf32, #tpu.memory_space<vmem>>, vector<128x4xf32>
    %c304 = arith.constant 304 : index
    %c0_56 = arith.constant 0 : index
    %56 = vector.load %arg6[%c304, %c0_56] : memref<576x4xf32, #tpu.memory_space<vmem>>, vector<128x4xf32>
    %c305 = arith.constant 305 : index
    %c0_57 = arith.constant 0 : index
    %57 = vector.load %arg6[%c305, %c0_57] : memref<576x4xf32, #tpu.memory_space<vmem>>, vector<128x4xf32>
    %c306 = arith.constant 306 : index
    %c0_58 = arith.constant 0 : index
    %58 = vector.load %arg6[%c306, %c0_58] : memref<576x4xf32, #tpu.memory_space<vmem>>, vector<128x4xf32>
    %c307 = arith.constant 307 : index
    %c0_59 = arith.constant 0 : index
    %59 = vector.load %arg6[%c307, %c0_59] : memref<576x4xf32, #tpu.memory_space<vmem>>, vector<128x4xf32>
    %c308 = arith.constant 308 : index
    %c0_60 = arith.constant 0 : index
    %60 = vector.load %arg6[%c308, %c0_60] : memref<576x4xf32, #tpu.memory_space<vmem>>, vector<128x4xf32>
    %61 = tpu.concatenate %46, %47, %48, %49, %50, %51, %52, %53, %54, %55, %56, %57, %58, %59, %60 in 1 : vector<128x4xf32>, vector<128x4xf32>, vector<128x4xf32>, vector<128x4xf32>, vector<128x4xf32>, vector<128x4xf32>, vector<128x4xf32>, vector<128x4xf32>, vector<128x4xf32>, vector<128x4xf32>, vector<128x4xf32>, vector<128x4xf32>, vector<128x4xf32>, vector<128x4xf32>, vector<128x4xf32> -> vector<128x60xf32>
    %cst_61 = arith.constant dense<0.000000e+00> : vector<128x8xf32>
    %62 = tpu.matmul %61, %4, %cst_61 {dimension_numbers = #tpu.dot_dimension_numbers<[1], [0], [0], [1], [0, 0, 1, 1], [], []>} : vector<128x60xf32>, vector<60x8xf32>, vector<128x8xf32> -> vector<128x8xf32>
    %63 = vector.broadcast %5 : vector<1x8xf32> to vector<128x8xf32>
    %64 = arith.addf %62, %63 : vector<128x8xf32>
    %c256_62 = arith.constant 256 : index
    %c0_63 = arith.constant 0 : index
    %65 = vector.load %arg5[%c256_62, %c0_63] : memref<512x8xf32, #tpu.memory_space<vmem>>, vector<128x8xf32>
    tpu.vector_store %arg5[%c256_62, %c0_63], %64 {strides = array<i32>} : memref<512x8xf32, #tpu.memory_space<vmem>>, vector<128x8xf32>,
    %c384 = arith.constant 384 : index
    %c0_64 = arith.constant 0 : index
    %66 = vector.load %arg6[%c384, %c0_64] : memref<576x4xf32, #tpu.memory_space<vmem>>, vector<128x4xf32>
    %c385 = arith.constant 385 : index
    %c0_65 = arith.constant 0 : index
    %67 = vector.load %arg6[%c385, %c0_65] : memref<576x4xf32, #tpu.memory_space<vmem>>, vector<128x4xf32>
    %c386 = arith.constant 386 : index
    %c0_66 = arith.constant 0 : index
    %68 = vector.load %arg6[%c386, %c0_66] : memref<576x4xf32, #tpu.memory_space<vmem>>, vector<128x4xf32>
    %c387 = arith.constant 387 : index
    %c0_67 = arith.constant 0 : index
    %69 = vector.load %arg6[%c387, %c0_67] : memref<576x4xf32, #tpu.memory_space<vmem>>, vector<128x4xf32>
    %c388 = arith.constant 388 : index
    %c0_68 = arith.constant 0 : index
    %70 = vector.load %arg6[%c388, %c0_68] : memref<576x4xf32, #tpu.memory_space<vmem>>, vector<128x4xf32>
    %c408 = arith.constant 408 : index
    %c0_69 = arith.constant 0 : index
    %71 = vector.load %arg6[%c408, %c0_69] : memref<576x4xf32, #tpu.memory_space<vmem>>, vector<128x4xf32>
    %c409 = arith.constant 409 : index
    %c0_70 = arith.constant 0 : index
    %72 = vector.load %arg6[%c409, %c0_70] : memref<576x4xf32, #tpu.memory_space<vmem>>, vector<128x4xf32>
    %c410 = arith.constant 410 : index
    %c0_71 = arith.constant 0 : index
    %73 = vector.load %arg6[%c410, %c0_71] : memref<576x4xf32, #tpu.memory_space<vmem>>, vector<128x4xf32>
    %c411 = arith.constant 411 : index
    %c0_72 = arith.constant 0 : index
    %74 = vector.load %arg6[%c411, %c0_72] : memref<576x4xf32, #tpu.memory_space<vmem>>, vector<128x4xf32>
    %c412 = arith.constant 412 : index
    %c0_73 = arith.constant 0 : index
    %75 = vector.load %arg6[%c412, %c0_73] : memref<576x4xf32, #tpu.memory_space<vmem>>, vector<128x4xf32>
    %c432 = arith.constant 432 : index
    %c0_74 = arith.constant 0 : index
    %76 = vector.load %arg6[%c432, %c0_74] : memref<576x4xf32, #tpu.memory_space<vmem>>, vector<128x4xf32>
    %c433 = arith.constant 433 : index
    %c0_75 = arith.constant 0 : index
    %77 = vector.load %arg6[%c433, %c0_75] : memref<576x4xf32, #tpu.memory_space<vmem>>, vector<128x4xf32>
    %c434 = arith.constant 434 : index
    %c0_76 = arith.constant 0 : index
    %78 = vector.load %arg6[%c434, %c0_76] : memref<576x4xf32, #tpu.memory_space<vmem>>, vector<128x4xf32>
    %c435 = arith.constant 435 : index
    %c0_77 = arith.constant 0 : index
    %79 = vector.load %arg6[%c435, %c0_77] : memref<576x4xf32, #tpu.memory_space<vmem>>, vector<128x4xf32>
    %c436 = arith.constant 436 : index
    %c0_78 = arith.constant 0 : index
    %80 = vector.load %arg6[%c436, %c0_78] : memref<576x4xf32, #tpu.memory_space<vmem>>, vector<128x4xf32>
    %81 = tpu.concatenate %66, %67, %68, %69, %70, %71, %72, %73, %74, %75, %76, %77, %78, %79, %80 in 1 : vector<128x4xf32>, vector<128x4xf32>, vector<128x4xf32>, vector<128x4xf32>, vector<128x4xf32>, vector<128x4xf32>, vector<128x4xf32>, vector<128x4xf32>, vector<128x4xf32>, vector<128x4xf32>, vector<128x4xf32>, vector<128x4xf32>, vector<128x4xf32>, vector<128x4xf32>, vector<128x4xf32> -> vector<128x60xf32>
    %cst_79 = arith.constant dense<0.000000e+00> : vector<128x8xf32>
    %82 = tpu.matmul %81, %4, %cst_79 {dimension_numbers = #tpu.dot_dimension_numbers<[1], [0], [0], [1], [0, 0, 1, 1], [], []>} : vector<128x60xf32>, vector<60x8xf32>, vector<128x8xf32> -> vector<128x8xf32>
    %83 = vector.broadcast %5 : vector<1x8xf32> to vector<128x8xf32>
    %84 = arith.addf %82, %83 : vector<128x8xf32>
    %c384_80 = arith.constant 384 : index
    %c0_81 = arith.constant 0 : index
    %85 = vector.load %arg5[%c384_80, %c0_81] : memref<512x8xf32, #tpu.memory_space<vmem>>, vector<128x8xf32>
    tpu.vector_store %arg5[%c384_80, %c0_81], %84 {strides = array<i32>} : memref<512x8xf32, #tpu.memory_space<vmem>>, vector<128x8xf32>,
    return
  }
  func.func @transform_0(%arg0: i32) -> (i32, i32) {
    %c0_i32 = arith.constant 0 : i32
    %c0_i32_0 = arith.constant 0 : i32
    return %arg0, %c0_i32 : i32, i32
  }
  func.func @transform_1(%arg0: i32) -> (i32, i32) {
    %c1_i32 = arith.constant 1 : i32
    %0 = arith.addi %arg0, %c1_i32 : i32
    %c8_i32 = arith.constant 8 : i32
    %1 = arith.muli %0, %c8_i32 : i32
    %c0_i32 = arith.constant 0 : i32
    %c0_i32_0 = arith.constant 0 : i32
    return %1, %c0_i32 : i32, i32
  }
  func.func @transform_2(%arg0: i32) -> (i32, i32) {
    %c0_i32 = arith.constant 0 : i32
    %c0_i32_0 = arith.constant 0 : i32
    %c0_i32_1 = arith.constant 0 : i32
    return %c0_i32, %c0_i32_0 : i32, i32
  }
  func.func @transform_3(%arg0: i32) -> (i32, i32) {
    %c0_i32 = arith.constant 0 : i32
    %c0_i32_0 = arith.constant 0 : i32
    %c0_i32_1 = arith.constant 0 : i32
    return %c0_i32, %c0_i32_0 : i32, i32
  }
  func.func @transform_4(%arg0: i32) -> (i32, i32) {
    %c0_i32 = arith.constant 0 : i32
    %c0_i32_0 = arith.constant 0 : i32
    return %arg0, %c0_i32 : i32, i32
  }
}

</mosaic_0001>

<bundles_post_ra>
// kernel: same_pad_conv_timedim.1
= control target key start
LH: loop header
LB: loop body
LE: loop exit
PB: predicated region body
PF: predicated region fallthrough
CT: control target
= control target key end

     0   :  { %s6408_s15 = smov 0   ;;  %s12411_s0 = inlined_call_operand.vmem [shape: f32[1088,4], index: 0, kind: input, shape index: {}, may-alias: {0,1}]   ;;  %s12412_s1 = inlined_call_operand.vmem [shape: f32[1088,4], index: 1, kind: input, shape index: {}, may-alias: {0,1}]   ;;  %s12413_s2 = inlined_call_operand.vmem [shape: f32[60,8], index: 2, kind: input, shape index: {}]   ;;  %s12414_s3 = inlined_call_operand.vmem [shape: f32[1,8], index: 3, kind: input, shape index: {}]   ;;  %s12415_s4 = inlined_call_operand.vmem [shape: f32[1024,8], index: 4, kind: output, shape index: {}]  }
   0x1 LB: > { %s5791_s16 = sadd.s32 4294967295, %s6366_s15   ;;  %p5797_p0 = scmp.ge.s32.totalorder %s6366_s15, 1  ;;  %s6366_s15 = sphi %s6408_s15, %s14_s15  }
   0x2   : > { %p190_p1 = scmp.lt.s32.totalorder %s6366_s15, 3 }
   0x4   : > { %p191_p2 = pnand %p5797_p0, %p190_p1 }
   0x6   : > { %194 = sbr.rel (%p191_p2) target bundleno = 2163 (0x873), region = 36 }
   0xd   : > { %s6416_s17 = sshll.u32 %s5791_s16, 6  ;;  %vm321_vm0 = vcmask 31744   ;;  %s6368_s23 = smov 4   ;;  %vm1592_vm1 = vcmask 1043456   ;;  %vm6381_vm2 = vmmov 1   ;;  %vm1316_vm4 = vcmask 64512  }
   0xe   : > { %p232_p3 = scmp.lt.s32.totalorder %s6416_s17, 135  ;;  %s6369_s24 = smov 8   ;;  %vm7381_vm3 = vmpackc.low %vm1592_vm1, %vm6381_vm2  ;;  %vm1333_vm5 = vcmask 97280   ;;  %vm1350_vm6 = vcmask 130048   ;;  %vm1367_vm7 = vcmask 162816   ;;  %vm1384_vm8 = vcmask 195584  }
   0xf   : > { %s6370_s25 = smov 12   ;;  %s6371_s26 = smov 16   ;;  %vm1401_vm9 = vcmask 228352   ;;  %vm1418_vm10 = vcmask 261120   ;;  %vm1435_vm11 = vcmask 293888   ;;  %vm1452_vm12 = vcmask 326656  }
  0x10   : > { %s233_s18 = scalar_select %p232_p3, %s6416_s17, 135  ;;  %vm1469_vm13 = vcmask 359424   ;;  %vm1486_vm14 = vcmask 392192   ;;  %vm1503_vm15 = vcmask 424960   ;;  %vm1520_vm1 = vcmask 457728  }
  0x11   : > { %s6372_s27 = smov 20   ;;  %s6373_s28 = smov 24   ;;  %vm1543_vm2 = vcmask 490496  }
  0x12   : > { %s5799_s19 = sshll.u32 %s233_s18, 3  ;;  %s6374_s29 = smov 28  }
  0x13   : > { %s6423_s22 = scalar_lea.vmem %s12411_s0, %s5799_s19  ;;  %s6375_s30 = smov 32  }
  0x14   : > { %v259_v0 = vld [vmem:[%s6423_s22 + $0x10] sm:$0xff]  ;;  %v260_v1 = vld [vmem:[%s6423_s22 + $0x18] sm:$0xff]  ;;  %v257_v2 = vld [vmem:[%s6423_s22] sm:$0xff]  ;;  %s6376_s5 = smov 36   ;;  %s6377_s6 = smov 40  }
  0x15   : > { %324 = vst.msk [vmem:[#allocation2 + $0x10] sm:$0xff] %vm321_vm0, %v259_v0  ;;  %325 = vst.msk [vmem:[#allocation2 + $0x18] sm:$0xff] %vm321_vm0, %v260_v1  ;;  %v258_v3 = vld [vmem:[%s6423_s22 + $0x8] sm:$0xff]  ;;  %v261_v4 = vld [vmem:[%s6423_s22 + $0x20] sm:$0xff]  ;;  %s6378_s7 = smov 44   ;;  %s6379_s8 = smov 48  }
  0x16   : > { %322 = vst.msk [vmem:[#allocation2] sm:$0xff] %vm321_vm0, %v257_v2  ;;  %v262_v5 = vld [vmem:[%s6423_s22 + $0x28] sm:$0xff]  ;;  %323 = vst.msk [vmem:[#allocation2 + $0x8] sm:$0xff] %vm321_vm0, %v258_v3  ;;  %v263_v6 = vld [vmem:[%s6423_s22 + $0x30] sm:$0xff]  ;;  %s6380_s9 = smov 52   ;;  %s6382_s18 = smov 56  }
  0x17   : > { %326 = vst.msk [vmem:[#allocation2 + $0x20] sm:$0xff] %vm321_vm0, %v261_v4  ;;  %327 = vst.msk [vmem:[#allocation2 + $0x28] sm:$0xff] %vm321_vm0, %v262_v5  ;;  %v264_v7 = vld [vmem:[%s6423_s22 + $0x38] sm:$0xff]  ;;  %v265_v8 = vld [vmem:[%s6423_s22 + $0x40] sm:$0xff]  ;;  %p252_p4 = scmp.lt.s32.totalorder %s6416_s17, 127 }
  0x18   : > { %328 = vst.msk [vmem:[#allocation2 + $0x30] sm:$0xff] %vm321_vm0, %v263_v6  ;;  %329 = vst.msk [vmem:[#allocation2 + $0x38] sm:$0xff] %vm321_vm0, %v264_v7  ;;  %v266_v9 = vld [vmem:[%s6423_s22 + $0x48] sm:$0xff]  ;;  %v267_v10 = vld [vmem:[%s6423_s22 + $0x50] sm:$0xff] }
  0x19   : > { %330 = vst.msk [vmem:[#allocation2 + $0x40] sm:$0xff] %vm321_vm0, %v265_v8  ;;  %v268_v11 = vld [vmem:[%s6423_s22 + $0x58] sm:$0xff]  ;;  %331 = vst.msk [vmem:[#allocation2 + $0x48] sm:$0xff] %vm321_vm0, %v266_v9  ;;  %v269_v12 = vld [vmem:[%s6423_s22 + $0x60] sm:$0xff]  ;;  %s253_s19 = scalar_select %p252_p4, %s6416_s17, 127 }
  0x1a   : > { %332 = vst.msk [vmem:[#allocation2 + $0x50] sm:$0xff] %vm321_vm0, %v267_v10  ;;  %333 = vst.msk [vmem:[#allocation2 + $0x58] sm:$0xff] %vm321_vm0, %v268_v11  ;;  %v270_v13 = vld [vmem:[%s6423_s22 + $0x68] sm:$0xff]  ;;  %v271_v14 = vld [vmem:[%s6423_s22 + $0x70] sm:$0xff] }
  0x1b   : > { %334 = vst.msk [vmem:[#allocation2 + $0x60] sm:$0xff] %vm321_vm0, %v269_v12  ;;  %335 = vst.msk [vmem:[#allocation2 + $0x68] sm:$0xff] %vm321_vm0, %v270_v13  ;;  %v272_v15 = vld [vmem:[%s6423_s22 + $0x78] sm:$0xff]  ;;  %v273_v16 = vld [vmem:[%s6423_s22 + $0x80] sm:$0xff]  ;;  %s5804_s20 = sshll.u32 %s253_s19, 3  ;;  %s5884_s19 = sadd.s32 64, %s6416_s17 }
  0x1c   : > { %336 = vst.msk [vmem:[#allocation2 + $0x70] sm:$0xff] %vm321_vm0, %v271_v14  ;;  %337 = vst.msk [vmem:[#allocation2 + $0x78] sm:$0xff] %vm321_vm0, %v272_v15  ;;  %v429_v17 = vld [vmem:[#allocation2 + $0x11] sm:$0xff]  ;;  %v274_v34 = vld [vmem:[%s6423_s22 + $0x88] sm:$0xff]  ;;  %s8702_s13 = scalar_lea.vmem %s12415_s4, %s5804_s20  ;;  %p244_p5 = scmp.lt.s32.totalorder %s5884_s19, 135 }
  0x1d   : > { %338 = vst.msk [vmem:[#allocation2 + $0x80] sm:$0xff] %vm321_vm0, %v273_v16  ;;  %541 = vrot.lane.b32.xlu1 %v429_v17, %s6368_s23  ;;  %v427_v18 = vld [vmem:[#allocation2 + $0x1] sm:$0xff]  ;;  %v428_v20 = vld [vmem:[#allocation2 + $0x9] sm:$0xff]  ;;  %339 = vst.msk [vmem:[#allocation2 + $0x88] sm:$0xff] %vm321_vm0, %v274_v34 }
  0x1e   : > { %537 = vrot.lane.b32.xlu0 %v427_v18, %s6368_s23  ;;  %v6461_v19 = vld [vmem:[#allocation2 + $0x19] sm:$0xff]  ;;  %v6468_v22 = vld [vmem:[#allocation2 + $0x21] sm:$0xff]  ;;  %v275_v33 = vld [vmem:[%s6423_s22 + $0x90] sm:$0xff]  ;;  %s13769_s19 = smov (!%p244_p5, %s5884_s19), 135 }
  0x1f   : > { %v6466_v21 = vld [vmem:[#allocation2 + $0x29] sm:$0xff]  ;;  %v6476_v24 = vld [vmem:[#allocation2 + $0x31] sm:$0xff]  ;;  %340 = vst.msk [vmem:[#allocation2 + $0x90] sm:$0xff] %vm321_vm0, %v275_v33  ;;  %v6520_v37 = vld [vmem:[#allocation2 + $0x1a] sm:$0xff]  ;;  %s5802_s17 = sshll.u32 %s13769_s19, 3 }
  0x20   : > { %v6474_v23 = vld [vmem:[#allocation2 + $0x39] sm:$0xff]  ;;  %v6484_v26 = vld [vmem:[#allocation2 + $0x41] sm:$0xff]  ;;  %v444_v35 = vld [vmem:[#allocation2 + $0xa] sm:$0xff]  ;;  %s10382_s10 = scalar_lea.vmem %s12412_s1, %s5802_s17 }
  0x21   : > { %543 = vrot.lane.b32.xlu1 %v6461_v19, %s6368_s23  ;;  %v6482_v25 = vld [vmem:[#allocation2 + $0x49] sm:$0xff]  ;;  %v6492_v28 = vld [vmem:[#allocation2 + $0x51] sm:$0xff]  ;;  %v6533_v41 = vld [vmem:[#allocation2 + $0x3a] sm:$0xff] }
  0x22   : > { %539 = vrot.lane.b32.xlu0 %v428_v20, %s6368_s23  ;;  %v6490_v27 = vld [vmem:[#allocation2 + $0x59] sm:$0xff]  ;;  %v6500_v30 = vld [vmem:[#allocation2 + $0x61] sm:$0xff]  ;;  %v6525_v39 = vld [vmem:[#allocation2 + $0x2a] sm:$0xff] }
  0x23   : > { %v6498_v29 = vld [vmem:[#allocation2 + $0x69] sm:$0xff]  ;;  %12531 = vst [vmem:[#allocation3_spill] sm:$0xff] %v6500_v30  ;;  %v6508_v32 = vld [vmem:[#allocation2 + $0x71] sm:$0xff]  ;;  %v6549_v45 = vld [vmem:[#allocation2 + $0x5a] sm:$0xff] }
  0x24   : > { %v6506_v31 = vld [vmem:[#allocation2 + $0x79] sm:$0xff]  ;;  %12532 = vst [vmem:[#allocation4_spill] sm:$0xff] %v6508_v32  ;;  %v443_v36 = vld [vmem:[#allocation2 + $0x2] sm:$0xff]  ;;  %v6541_v43 = vld [vmem:[#allocation2 + $0x4a] sm:$0xff] }
  0x25   : > { %547 = vrot.lane.b32.xlu1 %v6466_v21, %s6368_s23  ;;  %v445_v38 = vld [vmem:[#allocation2 + $0x12] sm:$0xff]  ;;  %v6527_v40 = vld [vmem:[#allocation2 + $0x22] sm:$0xff]  ;;  %v6558_v48 = vld [vmem:[#allocation2 + $0x6a] sm:$0xff] }
  0x26   : > { %545 = vrot.lane.b32.xlu0 %v6468_v22, %s6368_s23  ;;  %v6535_v42 = vld [vmem:[#allocation2 + $0x32] sm:$0xff]  ;;  %v6543_v44 = vld [vmem:[#allocation2 + $0x42] sm:$0xff]  ;;  %v6567_v50 = vld [vmem:[#allocation2 + $0x7a] sm:$0xff] }
  0x27   : > { %v6551_v46 = vld [vmem:[#allocation2 + $0x52] sm:$0xff]  ;;  %v6561_v49 = vld [vmem:[#allocation2 + $0x62] sm:$0xff] }
  0x28   : > { %v276_v47 = vld [vmem:[%s6423_s22 + $0x98] sm:$0xff]  ;;  %v460_v52 = vld [vmem:[#allocation2 + $0xb] sm:$0xff]  ;;  %v459_v53 = vld [vmem:[#allocation2 + $0x3] sm:$0xff] }
  0x29   : > { %551 = vrot.lane.b32.xlu1 %v6474_v23, %s6368_s23  ;;  %341 = vst.msk [vmem:[#allocation2 + $0x98] sm:$0xff] %vm321_vm0, %v276_v47  ;;  %v6569_v51 = vld [vmem:[#allocation2 + $0x72] sm:$0xff]  ;;  %v6577_v54 = vld [vmem:[#allocation2 + $0x1b] sm:$0xff]  ;;  %v6584_v57 = vld [vmem:[#allocation2 + $0x23] sm:$0xff] }
  0x2a   : > { %549 = vrot.lane.b32.xlu0 %v6476_v24, %s6368_s23  ;;  %v461_v55 = vld [vmem:[#allocation2 + $0x13] sm:$0xff]  ;;  %v6582_v56 = vld [vmem:[#allocation2 + $0x2b] sm:$0xff]  ;;  %v6590_v58 = vld [vmem:[#allocation2 + $0x3b] sm:$0xff] }
  0x2b   : > { %v6592_v59 = vld [vmem:[#allocation2 + $0x33] sm:$0xff]  ;;  %v6598_v60 = vld [vmem:[#allocation2 + $0x4b] sm:$0xff]  ;;  %v6600_v61 = vld [vmem:[#allocation2 + $0x43] sm:$0xff] }
  0x2c   : > { %v6606_v62 = vld [vmem:[#allocation2 + $0x5b] sm:$0xff]  ;;  %v6608_v63 = vld [vmem:[#allocation2 + $0x53] sm:$0xff]  ;;  %v6614_v0 = vld [vmem:[#allocation2 + $0x6b] sm:$0xff] }
  0x2d   : > { %555 = vrot.lane.b32.xlu1 %v6482_v25, %s6368_s23  ;;  %v6616_v1 = vld [vmem:[#allocation2 + $0x63] sm:$0xff]  ;;  %v6622_v2 = vld [vmem:[#allocation2 + $0x7b] sm:$0xff]  ;;  %v6624_v3 = vld [vmem:[#allocation2 + $0x73] sm:$0xff] }
  0x2e   : > { %553 = vrot.lane.b32.xlu0 %v6484_v26, %s6368_s23  ;;  %v476_v4 = vld [vmem:[#allocation2 + $0xc] sm:$0xff]  ;;  %v475_v5 = vld [vmem:[#allocation2 + $0x4] sm:$0xff]  ;;  %v6632_v6 = vld [vmem:[#allocation2 + $0x1c] sm:$0xff] }
  0x2f   : > { %v477_v7 = vld [vmem:[#allocation2 + $0x14] sm:$0xff]  ;;  %v6637_v8 = vld [vmem:[#allocation2 + $0x2c] sm:$0xff]  ;;  %v6639_v9 = vld [vmem:[#allocation2 + $0x24] sm:$0xff] }
  0x30   : > { %v6645_v10 = vld [vmem:[#allocation2 + $0x3c] sm:$0xff]  ;;  %v6647_v11 = vld [vmem:[#allocation2 + $0x34] sm:$0xff]  ;;  %v6653_v12 = vld [vmem:[#allocation2 + $0x4c] sm:$0xff] }
  0x31   : > { %559 = vrot.lane.b32.xlu1 %v6490_v27, %s6368_s23  ;;  %v6655_v13 = vld [vmem:[#allocation2 + $0x44] sm:$0xff]  ;;  %v6661_v14 = vld [vmem:[#allocation2 + $0x5c] sm:$0xff]  ;;  %v6665_v16 = vld [vmem:[#allocation2 + $0x54] sm:$0xff] }
  0x32   : > { %557 = vrot.lane.b32.xlu0 %v6492_v28, %s6368_s23  ;;  %v6673_v18 = vld [vmem:[#allocation2 + $0x6c] sm:$0xff]  ;;  %v6677_v33 = vld [vmem:[#allocation2 + $0x64] sm:$0xff] }
  0x35   : > { %563 = vrot.lane.b32.xlu1 %v6498_v29, %s6368_s23 }
  0x36   : > { %561 = vrot.lane.b32.xlu0 %v6500_v30, %s6368_s23 }
  0x39   : > { %567 = vrot.lane.b32.xlu1 %v6506_v31, %s6368_s23 }
  0x3a   : > { %565 = vrot.lane.b32.xlu0 %v6508_v32, %s6368_s23 }
  0x3d   : > { %603 = vrot.lane.b32.xlu1 %v444_v35, %s6369_s24  ;;  %v6685_v35 = vld [vmem:[#allocation2 + $0x7c] sm:$0xff] }
  0x3e   : > { %601 = vrot.lane.b32.xlu0 %v443_v36, %s6369_s24 }
  0x41   : > { %607 = vrot.lane.b32.xlu1 %v6520_v37, %s6369_s24 }
  0x42   : > { %605 = vrot.lane.b32.xlu0 %v445_v38, %s6369_s24  ;;  %v6689_v38 = vld [vmem:[#allocation2 + $0x74] sm:$0xff] }
  0x45   : > { %611 = vrot.lane.b32.xlu1 %v6525_v39, %s6369_s24 }
  0x46   : > { %609 = vrot.lane.b32.xlu0 %v6527_v40, %s6369_s24 }
  0x49   : > { %615 = vrot.lane.b32.xlu1 %v6533_v41, %s6369_s24 }
  0x4a   : > { %613 = vrot.lane.b32.xlu0 %v6535_v42, %s6369_s24 }
  0x4d   : > { %619 = vrot.lane.b32.xlu1 %v6541_v43, %s6369_s24 }
  0x4e   : > { %617 = vrot.lane.b32.xlu0 %v6543_v44, %s6369_s24 }
  0x51   : > { %623 = vrot.lane.b32.xlu1 %v6549_v45, %s6369_s24 }
  0x52   : > { %621 = vrot.lane.b32.xlu0 %v6551_v46, %s6369_s24 }
  0x55   : > { %627 = vrot.lane.b32.xlu1 %v6558_v48, %s6369_s24 }
  0x56   : > { %625 = vrot.lane.b32.xlu0 %v6561_v49, %s6369_s24 }
  0x59   : > { %631 = vrot.lane.b32.xlu1 %v6567_v50, %s6369_s24 }
  0x5a   : > { %629 = vrot.lane.b32.xlu0 %v6569_v51, %s6369_s24 }
  0x5d   : > { %667 = vrot.lane.b32.xlu1 %v460_v52, %s6370_s25 }
  0x5e   : > { %665 = vrot.lane.b32.xlu0 %v459_v53, %s6370_s25  ;;  %v415_v53 = vld [vmem:[#allocation2 + $0x20] sm:$0xff] }
  0x61   : > { %671 = vrot.lane.b32.xlu1 %v6577_v54, %s6370_s25 }
  0x62   : > { %669 = vrot.lane.b32.xlu0 %v461_v55, %s6370_s25 }
  0x65   : > { %675 = vrot.lane.b32.xlu1 %v6582_v56, %s6370_s25 }
  0x66   : > { %673 = vrot.lane.b32.xlu0 %v6584_v57, %s6370_s25 }
  0x69   : > { %679 = vrot.lane.b32.xlu1 %v6590_v58, %s6370_s25 }
  0x6a   : > { %677 = vrot.lane.b32.xlu0 %v6592_v59, %s6370_s25 }
  0x6d   : > { %683 = vrot.lane.b32.xlu1 %v6598_v60, %s6370_s25 }
  0x6e   : > { %681 = vrot.lane.b32.xlu0 %v6600_v61, %s6370_s25 }
  0x71   : > { %687 = vrot.lane.b32.xlu1 %v6606_v62, %s6370_s25 }
  0x72   : > { %685 = vrot.lane.b32.xlu0 %v6608_v63, %s6370_s25 }
  0x75   : > { %691 = vrot.lane.b32.xlu1 %v6614_v0, %s6370_s25 }
  0x76   : > { %689 = vrot.lane.b32.xlu0 %v6616_v1, %s6370_s25 }
  0x79   : > { %695 = vrot.lane.b32.xlu1 %v6622_v2, %s6370_s25 }
  0x7a   : > { %693 = vrot.lane.b32.xlu0 %v6624_v3, %s6370_s25 }
  0x7d   : > { %731 = vrot.lane.b32.xlu1 %v476_v4, %s6371_s26  ;;  %v6701_v4 = vld [vmem:[#allocation2 + $0x18] sm:$0xff] }
  0x7e   : > { %729 = vrot.lane.b32.xlu0 %v475_v5, %s6371_s26  ;;  %12541 = vst [vmem:[#allocation13_spill] sm:$0xff] %v6701_v4 }
  0x81   : > { %735 = vrot.lane.b32.xlu1 %v6632_v6, %s6371_s26 }
  0x82   : > { %733 = vrot.lane.b32.xlu0 %v477_v7, %s6371_s26  ;;  %v6708_v7 = vld [vmem:[#allocation2 + $0x30] sm:$0xff] }
  0x83   : > { %12543 = vst [vmem:[#allocation15_spill] sm:$0xff] %v6708_v7 }
  0x85   : > { %739 = vrot.lane.b32.xlu1 %v6637_v8, %s6371_s26 }
  0x86   : > { %737 = vrot.lane.b32.xlu0 %v6639_v9, %s6371_s26 }
  0x89   : > { %743 = vrot.lane.b32.xlu1 %v6645_v10, %s6371_s26 }
  0x8a   : > { %741 = vrot.lane.b32.xlu0 %v6647_v11, %s6371_s26 }
  0x8d   : > { %747 = vrot.lane.b32.xlu1 %v6653_v12, %s6371_s26 }
  0x8e   : > { %745 = vrot.lane.b32.xlu0 %v6655_v13, %s6371_s26 }
  0x8f   : > { %v6663_v15 = vpop.permute.xlu1 %541 }
  0x90   : > { %12533 = vst [vmem:[#allocation5_spill] sm:$0xff] %v6663_v15  ;;  %v6667_v17 = vpop.permute.xlu0 %537 }
  0x91   : > { %12534 = vst [vmem:[#allocation6_spill] sm:$0xff] %v6667_v17  ;;  %751 = vrot.lane.b32.xlu1 %v6661_v14, %s6371_s26  ;;  %v6748_v17 = vld [vmem:[#allocation2 + $0x58] sm:$0xff] }
  0x92   : > { %749 = vrot.lane.b32.xlu0 %v6665_v16, %s6371_s26  ;;  %12556 = vst [vmem:[#allocation28_spill] sm:$0xff] %v6748_v17 }
  0x93   : > { %v6675_v20 = vpop.permute.xlu1 %543 }
  0x94   : > { %12535 = vst [vmem:[#allocation7_spill] sm:$0xff] %v6675_v20  ;;  %v6679_v34 = vpop.permute.xlu0 %539 }
  0x95   : > { %12536 = vst [vmem:[#allocation8_spill] sm:$0xff] %v6679_v34  ;;  %755 = vrot.lane.b32.xlu1 %v6673_v18, %s6371_s26  ;;  %v6724_v34 = vld [vmem:[#allocation2 + $0x38] sm:$0xff] }
  0x96   : > { %753 = vrot.lane.b32.xlu0 %v6677_v33, %s6371_s26 }
  0x97   : > { %v6687_v36 = vpop.permute.xlu1 %547 }
  0x98   : > { %12537 = vst [vmem:[#allocation9_spill] sm:$0xff] %v6687_v36  ;;  %v6691_v47 = vpop.permute.xlu0 %545  ;;  %v6712_v36 = vld [vmem:[#allocation2 + $0x28] sm:$0xff] }
  0x99   : > { %12538 = vst [vmem:[#allocation10_spill] sm:$0xff] %v6691_v47  ;;  %759 = vrot.lane.b32.xlu1 %v6685_v35, %s6371_s26  ;;  %12545 = vst [vmem:[#allocation17_spill] sm:$0xff] %v6712_v36 }
  0x9a   : > { %757 = vrot.lane.b32.xlu0 %v6689_v38, %s6371_s26 }
  0x9b   : > { %v6697_v52 = vpop.permute.xlu1 %551 }
  0x9c   : > { %12539 = vst [vmem:[#allocation11_spill] sm:$0xff] %v6697_v52  ;;  %v6699_v55 = vpop.permute.xlu0 %549 }
  0x9d   : > { %12540 = vst [vmem:[#allocation12_spill] sm:$0xff] %v6699_v55  ;;  %795 = vrot.lane.b32.xlu1 %v415_v53, %s6372_s27  ;;  %v6720_v53 = vld [vmem:[#allocation2 + $0x40] sm:$0xff] }
  0x9e   : > { %793 = vrot.lane.b32.xlu0 %v6701_v4, %s6372_s27  ;;  %12547 = vst [vmem:[#allocation19_spill] sm:$0xff] %v6720_v53 }
  0x9f   : > { %v6706_v5 = vpop.permute.xlu1 %555 }
  0xa0   : > { %12542 = vst [vmem:[#allocation14_spill] sm:$0xff] %v6706_v5  ;;  %v6710_v47 = vpop.permute.xlu0 %553  ;;  %v6732_v5 = vld [vmem:[#allocation2 + $0x50] sm:$0xff] }
  0xa1   : > { %12544 = vst [vmem:[#allocation16_spill] sm:$0xff] %v6710_v47  ;;  %799 = vrot.lane.b32.xlu1 %v6708_v7, %s6372_s27  ;;  %12550 = vst [vmem:[#allocation22_spill] sm:$0xff] %v6732_v5 }
  0xa2   : > { %797 = vrot.lane.b32.xlu0 %v6712_v36, %s6372_s27  ;;  %v6736_v36 = vld [vmem:[#allocation2 + $0x48] sm:$0xff] }
  0xa3   : > { %v6718_v55 = vpop.permute.xlu1 %559  ;;  %12552 = vst [vmem:[#allocation24_spill] sm:$0xff] %v6736_v36 }
  0xa4   : > { %12546 = vst [vmem:[#allocation18_spill] sm:$0xff] %v6718_v55  ;;  %v6722_v52 = vpop.permute.xlu0 %557  ;;  %v6744_v55 = vld [vmem:[#allocation2 + $0x60] sm:$0xff] }
  0xa5   : > { %12548 = vst [vmem:[#allocation20_spill] sm:$0xff] %v6722_v52  ;;  %803 = vrot.lane.b32.xlu1 %v6720_v53, %s6372_s27  ;;  %12554 = vst [vmem:[#allocation26_spill] sm:$0xff] %v6744_v55 }
  0xa6   : > { %801 = vrot.lane.b32.xlu0 %v6724_v34, %s6372_s27 }
  0xa7   : > { %v6730_v47 = vpop.permute.xlu1 %563 }
  0xa8   : > { %12549 = vst [vmem:[#allocation21_spill] sm:$0xff] %v6730_v47  ;;  %v6734_v4 = vpop.permute.xlu0 %561  ;;  %v6756_v47 = vld [vmem:[#allocation2 + $0x70] sm:$0xff] }
  0xa9   : > { %12551 = vst [vmem:[#allocation23_spill] sm:$0xff] %v6734_v4  ;;  %807 = vrot.lane.b32.xlu1 %v6732_v5, %s6372_s27  ;;  %12558 = vst [vmem:[#allocation30_spill] sm:$0xff] %v6756_v47  ;;  %v6760_v5 = vld [vmem:[#allocation2 + $0x68] sm:$0xff] }
  0xaa   : > { %805 = vrot.lane.b32.xlu0 %v6736_v36, %s6372_s27  ;;  %12560 = vst [vmem:[#allocation32_spill] sm:$0xff] %v6760_v5 }
  0xab   : > { %v6742_v52 = vpop.permute.xlu1 %567 }
  0xac   : > { %12553 = vst [vmem:[#allocation25_spill] sm:$0xff] %v6742_v52  ;;  %v6746_v20 = vpop.permute.xlu0 %565 }
  0xad   : > { %12555 = vst [vmem:[#allocation27_spill] sm:$0xff] %v6746_v20  ;;  %811 = vrot.lane.b32.xlu1 %v6744_v55, %s6372_s27  ;;  %v6766_v20 = vld [vmem:[#allocation2 + $0x80] sm:$0xff] }
  0xae   : > { %809 = vrot.lane.b32.xlu0 %v6748_v17, %s6372_s27  ;;  %v6772_v17 = vld [vmem:[#allocation2 + $0x78] sm:$0xff] }
  0xaf   : > { %v6754_v4 = vpop.permute.xlu1 %603 }
  0xb0   : > { %12557 = vst [vmem:[#allocation29_spill] sm:$0xff] %v6754_v4  ;;  %v6758_v15 = vpop.permute.xlu0 %601 }
  0xb1   : > { %12559 = vst [vmem:[#allocation31_spill] sm:$0xff] %v6758_v15  ;;  %815 = vrot.lane.b32.xlu1 %v6756_v47, %s6372_s27  ;;  %v6778_v15 = vld [vmem:[#allocation2 + $0x90] sm:$0xff]  ;;  %v6782_v47 = vld [vmem:[#allocation2 + $0x88] sm:$0xff] }
  0xb2   : > { %813 = vrot.lane.b32.xlu0 %v6760_v5, %s6372_s27 }
  0xb3   : > { %v6768_v52 = vpop.permute.xlu1 %607 }
  0xb4   : > { %12561 = vst [vmem:[#allocation33_spill] sm:$0xff] %v6768_v52  ;;  %v6770_v55 = vpop.permute.xlu0 %605 }
  0xb5   : > { %12562 = vst [vmem:[#allocation34_spill] sm:$0xff] %v6770_v55  ;;  %819 = vrot.lane.b32.xlu1 %v6766_v20, %s6372_s27 }
  0xb6   : > { %817 = vrot.lane.b32.xlu0 %v6772_v17, %s6372_s27 }
  0xb7   : > { %v6780_v4 = vpop.permute.xlu1 %611 }
  0xb8   : > { %12563 = vst [vmem:[#allocation35_spill] sm:$0xff] %v6780_v4  ;;  %v6784_v5 = vpop.permute.xlu0 %609 }
  0xb9   : > { %12564 = vst [vmem:[#allocation36_spill] sm:$0xff] %v6784_v5  ;;  %823 = vrot.lane.b32.xlu1 %v6778_v15, %s6372_s27 }
  0xba   : > { %821 = vrot.lane.b32.xlu0 %v6782_v47, %s6372_s27 }
  0xbb   : > { %v6790_v55 = vpop.permute.xlu1 %615 }
  0xbc   : > { %12565 = vst [vmem:[#allocation37_spill] sm:$0xff] %v6790_v55  ;;  %v6792_v52 = vpop.permute.xlu0 %613 }
  0xbd   : > { %12566 = vst [vmem:[#allocation38_spill] sm:$0xff] %v6792_v52  ;;  %846 = vrot.lane.b32.xlu1 %v6468_v22, %s6373_s28 }
  0xbe   : > { %844 = vrot.lane.b32.xlu0 %v6461_v19, %s6373_s28 }
  0xbf   : > { %v6798_v4 = vpop.permute.xlu1 %619 }
  0xc0   : > { %12567 = vst [vmem:[#allocation39_spill] sm:$0xff] %v6798_v4  ;;  %v6800_v5 = vpop.permute.xlu0 %617 }
  0xc1   : > { %12568 = vst [vmem:[#allocation40_spill] sm:$0xff] %v6800_v5  ;;  %850 = vrot.lane.b32.xlu1 %v6476_v24, %s6373_s28  ;;  %v277_v5 = vld [vmem:[%s6423_s22 + $0xa0] sm:$0xff] }
  0xc2   : > { %848 = vrot.lane.b32.xlu0 %v6466_v21, %s6373_s28  ;;  %342 = vst.msk [vmem:[#allocation2 + $0xa0] sm:$0xff] %vm321_vm0, %v277_v5 }
  0xc3   : > { %v6806_v55 = vpop.permute.xlu1 %623 }
  0xc4   : > { %12569 = vst [vmem:[#allocation41_spill] sm:$0xff] %v6806_v55  ;;  %v6808_v52 = vpop.permute.xlu0 %621 }
  0xc5   : > { %12570 = vst [vmem:[#allocation42_spill] sm:$0xff] %v6808_v52  ;;  %854 = vrot.lane.b32.xlu1 %v6484_v26, %s6373_s28 }
  0xc6   : > { %852 = vrot.lane.b32.xlu0 %v6474_v23, %s6373_s28 }
  0xc7   : > { %v6814_v19 = vpop.permute.xlu1 %627 }
  0xc8   : > { %12571 = vst [vmem:[#allocation43_spill] sm:$0xff] %v6814_v19  ;;  %v6816_v22 = vpop.permute.xlu0 %625 }
  0xc9   : > { %12572 = vst [vmem:[#allocation44_spill] sm:$0xff] %v6816_v22  ;;  %858 = vrot.lane.b32.xlu1 %v6492_v28, %s6373_s28  ;;  %v278_v22 = vld [vmem:[%s6423_s22 + $0xa8] sm:$0xff] }
  0xca   : > { %856 = vrot.lane.b32.xlu0 %v6482_v25, %s6373_s28  ;;  %343 = vst.msk [vmem:[#allocation2 + $0xa8] sm:$0xff] %vm321_vm0, %v278_v22 }
  0xcb   : > { %v6822_v21 = vpop.permute.xlu1 %631 }
  0xcc   : > { %12573 = vst [vmem:[#allocation45_spill] sm:$0xff] %v6822_v21  ;;  %v6824_v55 = vpop.permute.xlu0 %629  ;;  %v6840_v21 = vld [vmem:[#allocation2 + $0x81] sm:$0xff] }
  0xcd   : > { %12574 = vst [vmem:[#allocation46_spill] sm:$0xff] %v6824_v55  ;;  %862 = vrot.lane.b32.xlu1 %v6500_v30, %s6373_s28 }
  0xce   : > { %860 = vrot.lane.b32.xlu0 %v6490_v27, %s6373_s28 }
  0xcf   : > { %v6830_v52 = vpop.permute.xlu1 %667 }
  0xd0   : > { %12575 = vst [vmem:[#allocation47_spill] sm:$0xff] %v6830_v52  ;;  %v6832_v19 = vpop.permute.xlu0 %665 }
  0xd1   : > { %12576 = vst [vmem:[#allocation48_spill] sm:$0xff] %v6832_v19  ;;  %866 = vrot.lane.b32.xlu1 %v6508_v32, %s6373_s28  ;;  %v6852_v19 = vld [vmem:[#allocation2 + $0x91] sm:$0xff]  ;;  %v6856_v32 = vld [vmem:[#allocation2 + $0x89] sm:$0xff] }
  0xd2   : > { %864 = vrot.lane.b32.xlu0 %v6498_v29, %s6373_s28 }
  0xd3   : > { %v6844_v55 = vpop.permute.xlu1 %671 }
  0xd4   : > { %12577 = vst [vmem:[#allocation49_spill] sm:$0xff] %v6844_v55  ;;  %v6846_v4 = vpop.permute.xlu0 %669  ;;  %v12636_v55 = vld [vmem:[#allocation22_spill] sm:$0xff] }
  0xd5   : > { %12578 = vst [vmem:[#allocation50_spill] sm:$0xff] %v6846_v4  ;;  %870 = vrot.lane.b32.xlu1 %v6840_v21, %s6373_s28 }
  0xd6   : > { %868 = vrot.lane.b32.xlu0 %v6506_v31, %s6373_s28 }
  0xd7   : > { %v6854_v52 = vpop.permute.xlu1 %675 }
  0xd8   : > { %12579 = vst [vmem:[#allocation51_spill] sm:$0xff] %v6854_v52  ;;  %v6858_v30 = vpop.permute.xlu0 %673 }
  0xd9   : > { %12580 = vst [vmem:[#allocation52_spill] sm:$0xff] %v6858_v30  ;;  %874 = vrot.lane.b32.xlu1 %v6852_v19, %s6373_s28 }
  0xda   : > { %872 = vrot.lane.b32.xlu0 %v6856_v32, %s6373_s28 }
  0xdb   : > { %v6864_v5 = vpop.permute.xlu1 %679 }
  0xdc   : > { %12581 = vst [vmem:[#allocation53_spill] sm:$0xff] %v6864_v5  ;;  %v6866_v22 = vpop.permute.xlu0 %677 }
  0xdd   : > { %12582 = vst [vmem:[#allocation54_spill] sm:$0xff] %v6866_v22  ;;  %897 = vrot.lane.b32.xlu1 %v6527_v40, %s6374_s29 }
  0xde   : > { %895 = vrot.lane.b32.xlu0 %v6520_v37, %s6374_s29 }
  0xdf   : > { %v6872_v52 = vpop.permute.xlu1 %683 }
  0xe0   : > { %12583 = vst [vmem:[#allocation55_spill] sm:$0xff] %v6872_v52  ;;  %v6874_v30 = vpop.permute.xlu0 %681  ;;  %v6928_v52 = vld [vmem:[#allocation2 + $0x8a] sm:$0xff] }
  0xe1   : > { %12584 = vst [vmem:[#allocation56_spill] sm:$0xff] %v6874_v30  ;;  %901 = vrot.lane.b32.xlu1 %v6535_v42, %s6374_s29 }
  0xe2   : > { %899 = vrot.lane.b32.xlu0 %v6525_v39, %s6374_s29 }
  0xe3   : > { %v6880_v5 = vpop.permute.xlu1 %687 }
  0xe4   : > { %12585 = vst [vmem:[#allocation57_spill] sm:$0xff] %v6880_v5  ;;  %v6882_v22 = vpop.permute.xlu0 %685 }
  0xe5   : > { %12586 = vst [vmem:[#allocation58_spill] sm:$0xff] %v6882_v22  ;;  %905 = vrot.lane.b32.xlu1 %v6543_v44, %s6374_s29 }
  0xe6   : > { %903 = vrot.lane.b32.xlu0 %v6533_v41, %s6374_s29 }
  0xe7   : > { %v6888_v37 = vpop.permute.xlu1 %691 }
  0xe8   : > { %12587 = vst [vmem:[#allocation59_spill] sm:$0xff] %v6888_v37  ;;  %v6890_v40 = vpop.permute.xlu0 %689 }
  0xe9   : > { %12588 = vst [vmem:[#allocation60_spill] sm:$0xff] %v6890_v40  ;;  %909 = vrot.lane.b32.xlu1 %v6551_v46, %s6374_s29  ;;  %v279_v40 = vld [vmem:[%s6423_s22 + $0xb0] sm:$0xff] }
  0xea   : > { %907 = vrot.lane.b32.xlu0 %v6541_v43, %s6374_s29  ;;  %344 = vst.msk [vmem:[#allocation2 + $0xb0] sm:$0xff] %vm321_vm0, %v279_v40 }
  0xeb   : > { %v6896_v39 = vpop.permute.xlu1 %695 }
  0xec   : > { %12589 = vst [vmem:[#allocation61_spill] sm:$0xff] %v6896_v39  ;;  %v6898_v5 = vpop.permute.xlu0 %693  ;;  %v6913_v39 = vld [vmem:[#allocation2 + $0x82] sm:$0xff] }
  0xed   : > { %12590 = vst [vmem:[#allocation62_spill] sm:$0xff] %v6898_v5  ;;  %913 = vrot.lane.b32.xlu1 %v6561_v49, %s6374_s29 }
  0xee   : > { %911 = vrot.lane.b32.xlu0 %v6549_v45, %s6374_s29 }
  0xef   : > { %v6904_v22 = vpop.permute.xlu1 %731 }
  0xf0   : > { %12591 = vst [vmem:[#allocation63_spill] sm:$0xff] %v6904_v22  ;;  %v6906_v37 = vpop.permute.xlu0 %729 }
  0xf1   : > { %12592 = vst [vmem:[#allocation64_spill] sm:$0xff] %v6906_v37  ;;  %917 = vrot.lane.b32.xlu1 %v6569_v51, %s6374_s29  ;;  %v6924_v37 = vld [vmem:[#allocation2 + $0x92] sm:$0xff] }
  0xf2   : > { %915 = vrot.lane.b32.xlu0 %v6558_v48, %s6374_s29 }
  0xf3   : > { %v6916_v5 = vpop.permute.xlu1 %735 }
  0xf4   : > { %12593 = vst [vmem:[#allocation65_spill] sm:$0xff] %v6916_v5  ;;  %v6918_v30 = vpop.permute.xlu0 %733  ;;  %v12635_v5 = vld [vmem:[#allocation28_spill] sm:$0xff] }
  0xf5   : > { %12594 = vst [vmem:[#allocation66_spill] sm:$0xff] %v6918_v30  ;;  %921 = vrot.lane.b32.xlu1 %v6913_v39, %s6374_s29 }
  0xf6   : > { %919 = vrot.lane.b32.xlu0 %v6567_v50, %s6374_s29 }
  0xf7   : > { %v6926_v22 = vpop.permute.xlu1 %739 }
  0xf8   : > { %12595 = vst [vmem:[#allocation67_spill] sm:$0xff] %v6926_v22  ;;  %v6930_v4 = vpop.permute.xlu0 %737 }
  0xf9   : > { %12596 = vst [vmem:[#allocation68_spill] sm:$0xff] %v6930_v4  ;;  %925 = vrot.lane.b32.xlu1 %v6924_v37, %s6374_s29 }
  0xfa   : > { %923 = vrot.lane.b32.xlu0 %v6928_v52, %s6374_s29 }
  0xfb   : > { %v6936_v40 = vpop.permute.xlu1 %743 }
  0xfc   : > { %12597 = vst [vmem:[#allocation69_spill] sm:$0xff] %v6936_v40  ;;  %v6938_v30 = vpop.permute.xlu0 %741 }
  0xfd   : > { %12598 = vst [vmem:[#allocation70_spill] sm:$0xff] %v6938_v30  ;;  %948 = vrot.lane.b32.xlu1 %v6584_v57, %s6375_s30 }
  0xfe   : > { %946 = vrot.lane.b32.xlu0 %v6577_v54, %s6375_s30 }
  0xff   : > { %v6944_v22 = vpop.permute.xlu1 %747 }
 0x100   : > { %12599 = vst [vmem:[#allocation71_spill] sm:$0xff] %v6944_v22  ;;  %v6946_v4 = vpop.permute.xlu0 %745 }
 0x101   : > { %12600 = vst [vmem:[#allocation72_spill] sm:$0xff] %v6946_v4  ;;  %952 = vrot.lane.b32.xlu1 %v6592_v59, %s6375_s30  ;;  %v6998_v4 = vld [vmem:[#allocation2 + $0x8b] sm:$0xff] }
 0x102   : > { %950 = vrot.lane.b32.xlu0 %v6582_v56, %s6375_s30 }
 0x103   : > { %v6952_v40 = vpop.permute.xlu1 %751 }
 0x104   : > { %12601 = vst [vmem:[#allocation73_spill] sm:$0xff] %v6952_v40  ;;  %v6954_v30 = vpop.permute.xlu0 %749 }
 0x105   : > { %12602 = vst [vmem:[#allocation74_spill] sm:$0xff] %v6954_v30  ;;  %956 = vrot.lane.b32.xlu1 %v6600_v61, %s6375_s30 }
 0x106   : > { %954 = vrot.lane.b32.xlu0 %v6590_v58, %s6375_s30 }
 0x107   : > { %v6960_v54 = vpop.permute.xlu1 %755 }
 0x108   : > { %12603 = vst [vmem:[#allocation75_spill] sm:$0xff] %v6960_v54  ;;  %v6962_v57 = vpop.permute.xlu0 %753 }
 0x109   : > { %12604 = vst [vmem:[#allocation76_spill] sm:$0xff] %v6962_v57  ;;  %960 = vrot.lane.b32.xlu1 %v6608_v63, %s6375_s30  ;;  %v6984_v57 = vld [vmem:[#allocation2 + $0x83] sm:$0xff] }
 0x10a   : > { %958 = vrot.lane.b32.xlu0 %v6598_v60, %s6375_s30 }
 0x10b   : > { %v6968_v56 = vpop.permute.xlu1 %759 }
 0x10c   : > { %12605 = vst [vmem:[#allocation77_spill] sm:$0xff] %v6968_v56  ;;  %v6970_v40 = vpop.permute.xlu0 %757 }
 0x10d   : > { %12606 = vst [vmem:[#allocation78_spill] sm:$0xff] %v6970_v40  ;;  %964 = vrot.lane.b32.xlu1 %v6616_v1, %s6375_s30 }
 0x10e   : > { %962 = vrot.lane.b32.xlu0 %v6606_v62, %s6375_s30 }
 0x10f   : > { %v6976_v30 = vpop.permute.xlu1 %795 }
 0x110   : > { %12607 = vst [vmem:[#allocation79_spill] sm:$0xff] %v6976_v30  ;;  %v6978_v54 = vpop.permute.xlu0 %793  ;;  %v6994_v30 = vld [vmem:[#allocation2 + $0x93] sm:$0xff] }
 0x111   : > { %12608 = vst [vmem:[#allocation80_spill] sm:$0xff] %v6978_v54  ;;  %968 = vrot.lane.b32.xlu1 %v6624_v3, %s6375_s30 }
 0x112   : > { %966 = vrot.lane.b32.xlu0 %v6614_v0, %s6375_s30 }
 0x113   : > { %v6986_v56 = vpop.permute.xlu1 %799 }
 0x114   : > { %12609 = vst [vmem:[#allocation81_spill] sm:$0xff] %v6986_v56  ;;  %v6988_v40 = vpop.permute.xlu0 %797 }
 0x115   : > { %12610 = vst [vmem:[#allocation82_spill] sm:$0xff] %v6988_v40  ;;  %972 = vrot.lane.b32.xlu1 %v6984_v57, %s6375_s30 }
 0x116   : > { %970 = vrot.lane.b32.xlu0 %v6622_v2, %s6375_s30 }
 0x117   : > { %v6996_v54 = vpop.permute.xlu1 %803 }
 0x118   : > { %12611 = vst [vmem:[#allocation83_spill] sm:$0xff] %v6996_v54  ;;  %v7000_v22 = vpop.permute.xlu0 %801 }
 0x119   : > { %12612 = vst [vmem:[#allocation84_spill] sm:$0xff] %v7000_v22  ;;  %976 = vrot.lane.b32.xlu1 %v6994_v30, %s6375_s30 }
 0x11a   : > { %974 = vrot.lane.b32.xlu0 %v6998_v4, %s6375_s30 }
 0x11b   : > { %v7006_v40 = vpop.permute.xlu1 %807 }
 0x11c   : > { %12613 = vst [vmem:[#allocation85_spill] sm:$0xff] %v7006_v40  ;;  %v7008_v56 = vpop.permute.xlu0 %805 }
 0x11d   : > { %12614 = vst [vmem:[#allocation86_spill] sm:$0xff] %v7008_v56  ;;  %999 = vrot.lane.b32.xlu1 %v6639_v9, %s6376_s5 }
 0x11e   : > { %997 = vrot.lane.b32.xlu0 %v6632_v6, %s6376_s5 }
 0x11f   : > { %v7014_v54 = vpop.permute.xlu1 %811 }
 0x120   : > { %12615 = vst [vmem:[#allocation87_spill] sm:$0xff] %v7014_v54  ;;  %v7016_v22 = vpop.permute.xlu0 %809 }
 0x121   : > { %12616 = vst [vmem:[#allocation88_spill] sm:$0xff] %v7016_v22  ;;  %1003 = vrot.lane.b32.xlu1 %v6647_v11, %s6376_s5  ;;  %v7068_v22 = vld [vmem:[#allocation2 + $0x8c] sm:$0xff] }
 0x122   : > { %1001 = vrot.lane.b32.xlu0 %v6637_v8, %s6376_s5 }
 0x123   : > { %v7022_v40 = vpop.permute.xlu1 %815 }
 0x124   : > { %12617 = vst [vmem:[#allocation89_spill] sm:$0xff] %v7022_v40  ;;  %v7024_v56 = vpop.permute.xlu0 %813 }
 0x125   : > { %12618 = vst [vmem:[#allocation90_spill] sm:$0xff] %v7024_v56  ;;  %1007 = vrot.lane.b32.xlu1 %v6655_v13, %s6376_s5 }
 0x126   : > { %1005 = vrot.lane.b32.xlu0 %v6645_v10, %s6376_s5 }
 0x127   : > { %v7030_v6 = vpop.permute.xlu1 %819 }
 0x128   : > { %12619 = vst [vmem:[#allocation91_spill] sm:$0xff] %v7030_v6  ;;  %v7032_v9 = vpop.permute.xlu0 %817 }
 0x129   : > { %12620 = vst [vmem:[#allocation92_spill] sm:$0xff] %v7032_v9  ;;  %1011 = vrot.lane.b32.xlu1 %v6665_v16, %s6376_s5  ;;  %v7054_v9 = vld [vmem:[#allocation2 + $0x84] sm:$0xff] }
 0x12a   : > { %1009 = vrot.lane.b32.xlu0 %v6653_v12, %s6376_s5 }
 0x12b   : > { %v7038_v8 = vpop.permute.xlu1 %823 }
 0x12c   : > { %12621 = vst [vmem:[#allocation93_spill] sm:$0xff] %v7038_v8  ;;  %v7040_v40 = vpop.permute.xlu0 %821 }
 0x12d   : > { %12622 = vst [vmem:[#allocation94_spill] sm:$0xff] %v7040_v40  ;;  %1015 = vrot.lane.b32.xlu1 %v6677_v33, %s6376_s5 }
 0x12e   : > { %1013 = vrot.lane.b32.xlu0 %v6661_v14, %s6376_s5 }
 0x12f   : > { %v7046_v56 = vpop.permute.xlu1 %846 }
 0x130   : > { %12623 = vst [vmem:[#allocation95_spill] sm:$0xff] %v7046_v56  ;;  %v7048_v6 = vpop.permute.xlu0 %844  ;;  %v7064_v56 = vld [vmem:[#allocation2 + $0x94] sm:$0xff] }
 0x131   : > { %12624 = vst [vmem:[#allocation96_spill] sm:$0xff] %v7048_v6  ;;  %1019 = vrot.lane.b32.xlu1 %v6689_v38, %s6376_s5 }
 0x132   : > { %1017 = vrot.lane.b32.xlu0 %v6673_v18, %s6376_s5 }
 0x133   : > { %v7056_v8 = vpop.permute.xlu1 %850 }
 0x134   : > { %12625 = vst [vmem:[#allocation97_spill] sm:$0xff] %v7056_v8  ;;  %v7058_v40 = vpop.permute.xlu0 %848 }
 0x135   : > { %12626 = vst [vmem:[#allocation98_spill] sm:$0xff] %v7058_v40  ;;  %1023 = vrot.lane.b32.xlu1 %v7054_v9, %s6376_s5 }
 0x136   : > { %1021 = vrot.lane.b32.xlu0 %v6685_v35, %s6376_s5 }
 0x137   : > { %v7066_v6 = vpop.permute.xlu1 %854 }
 0x138   : > { %12627 = vst [vmem:[#allocation99_spill] sm:$0xff] %v7066_v6  ;;  %v7070_v54 = vpop.permute.xlu0 %852 }
 0x139   : > { %12628 = vst [vmem:[#allocation100_spill] sm:$0xff] %v7070_v54  ;;  %1027 = vrot.lane.b32.xlu1 %v7064_v56, %s6376_s5 }
 0x13a   : > { %1025 = vrot.lane.b32.xlu0 %v7068_v22, %s6376_s5 }
 0x13b   : > { %v7076_v40 = vpop.permute.xlu1 %858 }
 0x13c   : > { %12629 = vst [vmem:[#allocation101_spill] sm:$0xff] %v7076_v40  ;;  %v7078_v8 = vpop.permute.xlu0 %856 }
 0x13d   : > { %12630 = vst [vmem:[#allocation102_spill] sm:$0xff] %v7078_v8  ;;  %1050 = vrot.lane.b32.xlu1 %v6724_v34, %s6377_s6 }
 0x13e   : > { %1048 = vrot.lane.b32.xlu0 %v6708_v7, %s6377_s6 }
 0x13f   : > { %v7084_v6 = vpop.permute.xlu1 %862 }
 0x140   : > { %12631 = vst [vmem:[#allocation103_spill] sm:$0xff] %v7084_v6  ;;  %v7086_v54 = vpop.permute.xlu0 %860 }
 0x141   : > { %12632 = vst [vmem:[#allocation104_spill] sm:$0xff] %v7086_v54  ;;  %1054 = vrot.lane.b32.xlu1 %v6736_v36, %s6377_s6  ;;  %v12639_v54 = vld [vmem:[#allocation32_spill] sm:$0xff]  ;;  %v12640_v36 = vld [vmem:[#allocation26_spill] sm:$0xff] }
 0x142   : > { %1052 = vrot.lane.b32.xlu0 %v6720_v53, %s6377_s6 }
 0x143   : > { %v7092_v40 = vpop.permute.xlu1 %866 }
 0x144   : > { %12633 = vst [vmem:[#allocation105_spill] sm:$0xff] %v7092_v40  ;;  %v7094_v8 = vpop.permute.xlu0 %864 }
 0x145   : > { %12634 = vst [vmem:[#allocation106_spill] sm:$0xff] %v7094_v8  ;;  %1058 = vrot.lane.b32.xlu1 %v12635_v5, %s6377_s6  ;;  %v12643_v8 = vld [vmem:[#allocation30_spill] sm:$0xff] }
 0x146   : > { %1056 = vrot.lane.b32.xlu0 %v12636_v55, %s6377_s6 }
 0x147   : > { %v7100_v7 = vpop.permute.xlu1 %870 }
 0x148   : > { %12637 = vst [vmem:[#allocation28_spill] sm:$0xff] %v7100_v7  ;;  %v7102_v6 = vpop.permute.xlu0 %868 }
 0x149   : > { %12638 = vst [vmem:[#allocation107_spill] sm:$0xff] %v7102_v6  ;;  %1062 = vrot.lane.b32.xlu1 %v12639_v54, %s6377_s6  ;;  %v506_v6 = vld [vmem:[#allocation2 + $0x98] sm:$0xff] }
 0x14a   : > { %1060 = vrot.lane.b32.xlu0 %v12640_v36, %s6377_s6 }
 0x14b   : > { %v7108_v53 = vpop.permute.xlu1 %874 }
 0x14c   : > { %12641 = vst [vmem:[#allocation32_spill] sm:$0xff] %v7108_v53  ;;  %v7110_v40 = vpop.permute.xlu0 %872 }
 0x14d   : > { %12642 = vst [vmem:[#allocation26_spill] sm:$0xff] %v7110_v40  ;;  %1066 = vrot.lane.b32.xlu1 %v6772_v17, %s6377_s6 }
 0x14e   : > { %1064 = vrot.lane.b32.xlu0 %v12643_v8, %s6377_s6  ;;  %v507_v8 = vld [vmem:[#allocation2 + $0xa0] sm:$0xff] }
 0x14f   : > { %v7116_v55 = vpop.permute.xlu1 %897 }
 0x150   : > { %12644 = vst [vmem:[#allocation108_spill] sm:$0xff] %v7116_v55  ;;  %v7118_v7 = vpop.permute.xlu0 %895  ;;  %v508_v55 = vld [vmem:[#allocation2 + $0xa8] sm:$0xff] }
 0x151   : > { %12645 = vst [vmem:[#allocation109_spill] sm:$0xff] %v7118_v7  ;;  %1070 = vrot.lane.b32.xlu1 %v6782_v47, %s6377_s6 }
 0x152   : > { %1068 = vrot.lane.b32.xlu0 %v6766_v20, %s6377_s6 }
 0x153   : > { %v7124_v53 = vpop.permute.xlu1 %901 }
 0x154   : > { %v7126_v40 = vpop.permute.xlu0 %899 }
 0x155   : > { %12646 = vst [vmem:[#allocation110_spill] sm:$0xff] %v7126_v40  ;;  %1074 = vrot.lane.b32.xlu1 %v506_v6, %s6377_s6 }
 0x156   : > { %1072 = vrot.lane.b32.xlu0 %v6778_v15, %s6377_s6 }
 0x157   : > { %v7131_v7 = vpop.permute.xlu1 %905 }
 0x158   : > { %v7133_v47 = vpop.permute.xlu0 %903 }
 0x159   : > { %1078 = vrot.lane.b32.xlu1 %v508_v55, %s6377_s6  ;;  %v280_v55 = vld [vmem:[%s6423_s22 + $0xb8] sm:$0xff] }
 0x15a   : > { %1076 = vrot.lane.b32.xlu0 %v507_v8, %s6377_s6  ;;  %v281_v8 = vld [vmem:[%s6423_s22 + $0xc0] sm:$0xff]  ;;  %345 = vst.msk [vmem:[#allocation2 + $0xb8] sm:$0xff] %vm321_vm0, %v280_v55 }
 0x15b   : > { %v7137_v20 = vpop.permute.xlu1 %909  ;;  %346 = vst.msk [vmem:[#allocation2 + $0xc0] sm:$0xff] %vm321_vm0, %v281_v8  ;;  %v284_v8 = vld [vmem:[%s6423_s22 + $0xd8] sm:$0xff] }
 0x15c   : > { %v7139_v40 = vpop.permute.xlu0 %907  ;;  %349 = vst.msk [vmem:[#allocation2 + $0xd8] sm:$0xff] %vm321_vm0, %v284_v8 }
 0x15d   : > { %1101 = vrot.lane.b32.xlu1 %v6474_v23, %s6378_s7 }
 0x15e   : > { %1099 = vrot.lane.b32.xlu0 %v6476_v24, %s6378_s7 }
 0x15f   : > { %v7145_v15 = vpop.permute.xlu1 %913 }
 0x160   : > { %v7147_v6 = vpop.permute.xlu0 %911 }
 0x161   : > { %12647 = vst [vmem:[#allocation111_spill] sm:$0xff] %v7147_v6  ;;  %1105 = vrot.lane.b32.xlu1 %v6482_v25, %s6378_s7  ;;  %v282_v6 = vld [vmem:[%s6423_s22 + $0xc8] sm:$0xff]  ;;  %v283_v25 = vld [vmem:[%s6423_s22 + $0xd0] sm:$0xff] }
 0x162   : > { %1103 = vrot.lane.b32.xlu0 %v6484_v26, %s6378_s7  ;;  %347 = vst.msk [vmem:[#allocation2 + $0xc8] sm:$0xff] %vm321_vm0, %v282_v6  ;;  %348 = vst.msk [vmem:[#allocation2 + $0xd0] sm:$0xff] %vm321_vm0, %v283_v25  ;;  %v286_v25 = vld [vmem:[%s6423_s22 + $0xe8] sm:$0xff] }
 0x163   : > { %v7157_v23 = vpop.permute.xlu1 %917  ;;  %351 = vst.msk [vmem:[#allocation2 + $0xe8] sm:$0xff] %vm321_vm0, %v286_v25 }
 0x164   : > { %v7159_v24 = vpop.permute.xlu0 %915 }
 0x165   : > { %12648 = vst [vmem:[#allocation112_spill] sm:$0xff] %v7159_v24  ;;  %1109 = vrot.lane.b32.xlu1 %v6490_v27, %s6378_s7  ;;  %v12651_v27 = vld [vmem:[#allocation3_spill] sm:$0xff] }
 0x166   : > { %1107 = vrot.lane.b32.xlu0 %v6492_v28, %s6378_s7  ;;  %v285_v24 = vld [vmem:[%s6423_s22 + $0xe0] sm:$0xff] }
 0x167   : > { %v7169_v26 = vpop.permute.xlu1 %921  ;;  %350 = vst.msk [vmem:[#allocation2 + $0xe0] sm:$0xff] %vm321_vm0, %v285_v24  ;;  %v288_v24 = vld [vmem:[%s6423_s22 + $0xf8] sm:$0xff] }
 0x168   : > { %12649 = vst [vmem:[#allocation113_spill] sm:$0xff] %v7169_v26  ;;  %v7171_v55 = vpop.permute.xlu0 %919  ;;  %353 = vst.msk [vmem:[#allocation2 + $0xf8] sm:$0xff] %vm321_vm0, %v288_v24  ;;  %v7219_v26 = vld [vmem:[#allocation2 + $0xa1] sm:$0xff] }
 0x169   : > { %12650 = vst [vmem:[#allocation114_spill] sm:$0xff] %v7171_v55  ;;  %1113 = vrot.lane.b32.xlu1 %v6498_v29, %s6378_s7  ;;  %v12654_v29 = vld [vmem:[#allocation4_spill] sm:$0xff]  ;;  %v287_v55 = vld [vmem:[%s6423_s22 + $0xf0] sm:$0xff] }
 0x16a   : > { %1111 = vrot.lane.b32.xlu0 %v12651_v27, %s6378_s7  ;;  %352 = vst.msk [vmem:[#allocation2 + $0xf0] sm:$0xff] %vm321_vm0, %v287_v55  ;;  %v7215_v55 = vld [vmem:[#allocation2 + $0xa9] sm:$0xff] }
 0x16b   : > { %v7180_v28 = vpop.permute.xlu1 %925 }
 0x16c   : > { %12652 = vst [vmem:[#allocation3_spill] sm:$0xff] %v7180_v28  ;;  %v7183_v6 = vpop.permute.xlu0 %923 }
 0x16d   : > { %12653 = vst [vmem:[#allocation115_spill] sm:$0xff] %v7183_v6  ;;  %1117 = vrot.lane.b32.xlu1 %v6506_v31, %s6378_s7  ;;  %v289_v6 = vld [vmem:[%s6423_s22 + $0x100] sm:$0xff] }
 0x16e   : > { %1115 = vrot.lane.b32.xlu0 %v12654_v29, %s6378_s7  ;;  %v7203_v31 = vld [vmem:[#allocation2 + $0x99] sm:$0xff]  ;;  %354 = vst.msk [vmem:[#allocation2 + $0x100] sm:$0xff] %vm321_vm0, %v289_v6 }
 0x16f   : > { %v7192_v27 = vpop.permute.xlu1 %948 }
 0x170   : > { %v7195_v8 = vpop.permute.xlu0 %946 }
 0x171   : > { %12655 = vst [vmem:[#allocation4_spill] sm:$0xff] %v7195_v8  ;;  %1121 = vrot.lane.b32.xlu1 %v6856_v32, %s6378_s7 }
 0x172   : > { %1119 = vrot.lane.b32.xlu0 %v6840_v21, %s6378_s7 }
 0x173   : > { %v7207_v25 = vpop.permute.xlu1 %952 }
 0x174   : > { %v7209_v29 = vpop.permute.xlu0 %950 }
 0x175   : > { %1125 = vrot.lane.b32.xlu1 %v7203_v31, %s6378_s7 }
 0x176   : > { %1123 = vrot.lane.b32.xlu0 %v6852_v19, %s6378_s7 }
 0x177   : > { %v7217_v28 = vpop.permute.xlu1 %956 }
 0x178   : > { %12656 = vst [vmem:[#allocation116_spill] sm:$0xff] %v7217_v28  ;;  %v7221_v8 = vpop.permute.xlu0 %954 }
 0x179   : > { %12657 = vst [vmem:[#allocation117_spill] sm:$0xff] %v7221_v8  ;;  %1129 = vrot.lane.b32.xlu1 %v7215_v55, %s6378_s7 }
 0x17a   : > { %1127 = vrot.lane.b32.xlu0 %v7219_v26, %s6378_s7 }
 0x17b   : > { %v7227_v6 = vpop.permute.xlu1 %960 }
 0x17c   : > { %12658 = vst [vmem:[#allocation118_spill] sm:$0xff] %v7227_v6  ;;  %v7229_v24 = vpop.permute.xlu0 %958 }
 0x17d   : > { %12659 = vst [vmem:[#allocation119_spill] sm:$0xff] %v7229_v24  ;;  %1152 = vrot.lane.b32.xlu1 %v6533_v41, %s6379_s8 }
 0x17e   : > { %1150 = vrot.lane.b32.xlu0 %v6535_v42, %s6379_s8 }
 0x17f   : > { %v7235_v28 = vpop.permute.xlu1 %964 }
 0x180   : > { %12660 = vst [vmem:[#allocation120_spill] sm:$0xff] %v7235_v28  ;;  %v7237_v8 = vpop.permute.xlu0 %962  ;;  %v402_v28 = vld [vmem:[%s12413_s2] sm:$0xff] }
 0x181   : > { %12661 = vst [vmem:[#allocation121_spill] sm:$0xff] %v7237_v8  ;;  %1156 = vrot.lane.b32.xlu1 %v6541_v43, %s6379_s8 }
 0x182   : > { %1154 = vrot.lane.b32.xlu0 %v6543_v44, %s6379_s8 }
 0x183   : > { %v7243_v6 = vpop.permute.xlu1 %968 }
 0x184   : > { %12662 = vst [vmem:[#allocation122_spill] sm:$0xff] %v7243_v6  ;;  %v7245_v24 = vpop.permute.xlu0 %966 }
 0x185   : > { %12663 = vst [vmem:[#allocation123_spill] sm:$0xff] %v7245_v24  ;;  %1160 = vrot.lane.b32.xlu1 %v6549_v45, %s6379_s8 }
 0x186   : > { %1158 = vrot.lane.b32.xlu0 %v6551_v46, %s6379_s8 }
 0x187   : > { %v7251_v41 = vpop.permute.xlu1 %972 }
 0x188   : > { %12664 = vst [vmem:[#allocation124_spill] sm:$0xff] %v7251_v41  ;;  %v7253_v42 = vpop.permute.xlu0 %970 }
 0x189   : > { %12665 = vst [vmem:[#allocation125_spill] sm:$0xff] %v7253_v42  ;;  %1164 = vrot.lane.b32.xlu1 %v6558_v48, %s6379_s8  ;;  %v7275_v48 = vld [vmem:[#allocation2 + $0x9a] sm:$0xff] }
 0x18a   : > { %1162 = vrot.lane.b32.xlu0 %v6561_v49, %s6379_s8 }
 0x18b   : > { %v7259_v43 = vpop.permute.xlu1 %976 }
 0x18c   : > { %12666 = vst [vmem:[#allocation126_spill] sm:$0xff] %v7259_v43  ;;  %v7261_v44 = vpop.permute.xlu0 %974  ;;  %v7289_v43 = vld [vmem:[#allocation2 + $0xa2] sm:$0xff] }
 0x18d   : > { %12667 = vst [vmem:[#allocation127_spill] sm:$0xff] %v7261_v44  ;;  %1168 = vrot.lane.b32.xlu1 %v6567_v50, %s6379_s8  ;;  %v7285_v50 = vld [vmem:[#allocation2 + $0xaa] sm:$0xff] }
 0x18e   : > { %1166 = vrot.lane.b32.xlu0 %v6569_v51, %s6379_s8 }
 0x18f   : > { %v7267_v45 = vpop.permute.xlu1 %999 }
 0x190   : > { %v7269_v46 = vpop.permute.xlu0 %997 }
 0x191   : > { %1172 = vrot.lane.b32.xlu1 %v6928_v52, %s6379_s8 }
 0x192   : > { %1170 = vrot.lane.b32.xlu0 %v6913_v39, %s6379_s8 }
 0x193   : > { %v7277_v49 = vpop.permute.xlu1 %1003 }
 0x194   : > { %v7279_v44 = vpop.permute.xlu0 %1001 }
 0x195   : > { %1176 = vrot.lane.b32.xlu1 %v7275_v48, %s6379_s8 }
 0x196   : > { %1174 = vrot.lane.b32.xlu0 %v6924_v37, %s6379_s8 }
 0x197   : > { %v7287_v51 = vpop.permute.xlu1 %1007 }
 0x198   : > { %12668 = vst [vmem:[#allocation128_spill] sm:$0xff] %v7287_v51  ;;  %v7291_v42 = vpop.permute.xlu0 %1005 }
 0x199   : > { %12669 = vst [vmem:[#allocation129_spill] sm:$0xff] %v7291_v42  ;;  %1180 = vrot.lane.b32.xlu1 %v7285_v50, %s6379_s8 }
 0x19a   : > { %1178 = vrot.lane.b32.xlu0 %v7289_v43, %s6379_s8 }
 0x19b   : > { %v7297_v41 = vpop.permute.xlu1 %1011 }
 0x19c   : > { %12670 = vst [vmem:[#allocation130_spill] sm:$0xff] %v7297_v41  ;;  %v7299_v24 = vpop.permute.xlu0 %1009  ;;  %v403_v41 = vld [vmem:[%s12413_s2 + $0x8] sm:$0xff] }
 0x19d   : > { %12671 = vst [vmem:[#allocation131_spill] sm:$0xff] %v7299_v24  ;;  %1203 = vrot.lane.b32.xlu1 %v6590_v58, %s6380_s9  ;;  %v7317_v24 = vpack.c.bf16 %v403_v41, %v402_v28 }
 0x19e   : > { %1201 = vrot.lane.b32.xlu0 %v6592_v59, %s6380_s9 }
 0x19f   : > { %v7305_v6 = vpop.permute.xlu1 %1015  ;;  %12674 = vst [vmem:[#allocation134_spill] sm:$0xff] %v7317_v24  ;;  %6142 = vmatprep.subr.bf16.mxu0 %v7317_v24  ;;  %6160 = vmatprep.subr.bf16.mxu1 %v7317_v24 }
 0x1a0   : > { %12672 = vst [vmem:[#allocation132_spill] sm:$0xff] %v7305_v6  ;;  %v7307_v8 = vpop.permute.xlu0 %1013  ;;  %6144 = vmatpush3.bf16.msra.mxu0 %v7317_v24  ;;  %6162 = vmatpush3.bf16.msra.mxu1 %v7317_v24 }
 0x1a1   : > { %12673 = vst [vmem:[#allocation133_spill] sm:$0xff] %v7307_v8  ;;  %1207 = vrot.lane.b32.xlu1 %v6598_v60, %s6380_s9  ;;  %v404_v8 = vld [vmem:[%s12413_s2 + $0x10] sm:$0xff]  ;;  %v405_v60 = vld [vmem:[%s12413_s2 + $0x18] sm:$0xff] }
 0x1a2   : > { %1205 = vrot.lane.b32.xlu0 %v6600_v61, %s6380_s9  ;;  %v7337_v61 = vpack.c.bf16 %v405_v60, %v404_v8 }
 0x1a3   : > { %v7321_v58 = vpop.permute.xlu1 %1019 }
 0x1a4   : > { %12675 = vst [vmem:[#allocation135_spill] sm:$0xff] %v7321_v58  ;;  %v7325_v59 = vpop.permute.xlu0 %1017  ;;  %12677 = vst [vmem:[#allocation137_spill] sm:$0xff] %v7337_v61  ;;  %6146 = vmatprep.subr.bf16.mxu0 %v7337_v61  ;;  %6164 = vmatprep.subr.bf16.mxu1 %v7337_v61 }
 0x1a5   : > { %12676 = vst [vmem:[#allocation136_spill] sm:$0xff] %v7325_v59  ;;  %1211 = vrot.lane.b32.xlu1 %v6606_v62, %s6380_s9  ;;  %6148 = vmatpush3.bf16.msra.mxu0 %v7337_v61  ;;  %v406_v59 = vld [vmem:[%s12413_s2 + $0x20] sm:$0xff]  ;;  %v407_v62 = vld [vmem:[%s12413_s2 + $0x28] sm:$0xff] }
 0x1a6   : > { %1209 = vrot.lane.b32.xlu0 %v6608_v63, %s6380_s9  ;;  %6166 = vmatpush3.bf16.msra.mxu1 %v7337_v61  ;;  %v7357_v63 = vpack.c.bf16 %v407_v62, %v406_v59  ;;  %v12684_v59 = vmov 0  ;;  %v12752_v61 = vld [vmem:[#allocation11_spill] sm:$0xff] }
 0x1a7   : > { %v7341_v28 = vpop.permute.xlu1 %1023  ;;  %v12685_v59 = vsel %vm7381_vm3, 4294967295, %v12684_v59 }
 0x1a8   : > { %12678 = vst [vmem:[#allocation138_spill] sm:$0xff] %v7341_v28  ;;  %v7345_v41 = vpop.permute.xlu0 %1021  ;;  %12680 = vst [vmem:[#allocation140_spill] sm:$0xff] %v7357_v63  ;;  %6150 = vmatprep.subr.bf16.mxu0 %v7357_v63  ;;  %6168 = vmatprep.subr.bf16.mxu1 %v7357_v63  ;;  %v7421_v28 = vld [vmem:[#allocation2 + $0xa3] sm:$0xff] }
 0x1a9   : > { %12679 = vst [vmem:[#allocation139_spill] sm:$0xff] %v7345_v41  ;;  %1215 = vrot.lane.b32.xlu1 %v6614_v0, %s6380_s9  ;;  %6152 = vmatpush3.bf16.msra.mxu0 %v7357_v63  ;;  %v408_v41 = vld [vmem:[%s12413_s2 + $0x30] sm:$0xff]  ;;  %v409_v0 = vld [vmem:[%s12413_s2 + $0x38] sm:$0xf]  ;;  %12686 = vst [vmem:[#allocation144_spill] sm:$0xff] %v12685_v59 }
 0x1aa   : > { %1213 = vrot.lane.b32.xlu0 %v6616_v1, %s6380_s9  ;;  %6170 = vmatpush3.bf16.msra.mxu1 %v7357_v63  ;;  %v7377_v1 = vpack.c.bf16 %v409_v0, %v408_v41 }
 0x1ab   : > { %v7361_v8 = vpop.permute.xlu1 %1027 }
 0x1ac   : > { %12681 = vst [vmem:[#allocation141_spill] sm:$0xff] %v7361_v8  ;;  %v7365_v60 = vpop.permute.xlu0 %1025  ;;  %12683 = vst [vmem:[#allocation143_spill] sm:$0xff] %v7377_v1  ;;  %6155 = vmatprep.subr.msk.bf16.mxu0 %vm7381_vm3, %v7377_v1  ;;  %6173 = vmatprep.subr.msk.bf16.mxu1 %vm7381_vm3, %v7377_v1 }
 0x1ad   : > { %12682 = vst [vmem:[#allocation142_spill] sm:$0xff] %v7365_v60  ;;  %1219 = vrot.lane.b32.xlu1 %v6622_v2, %s6380_s9  ;;  %6158 = vmatpush3.bf16.msk.msra.mxu0 %vm7381_vm3, %v7377_v1  ;;  %v7417_v60 = vld [vmem:[#allocation2 + $0xab] sm:$0xff] }
 0x1ae   : > { %1217 = vrot.lane.b32.xlu0 %v6624_v3, %s6380_s9  ;;  %6176 = vmatpush3.bf16.msk.msra.mxu1 %vm7381_vm3, %v7377_v1  ;;  %v7406_v3 = vld [vmem:[#allocation2 + $0x9b] sm:$0xff] }
 0x1af   : > { %v7385_v62 = vpop.permute.xlu1 %1050  ;;  %6178 = vmatprep.subr.bf16.mxu0 %v7317_v24  ;;  %6196 = vmatprep.subr.bf16.mxu1 %v7317_v24  ;;  %v12761_v24 = vld [vmem:[#allocation22_spill] sm:$0xff] }
 0x1b0   : > { %v7393_v2 = vpop.permute.xlu0 %1048 }
 0x1b1   : > { %1223 = vrot.lane.b32.xlu1 %v6998_v4, %s6380_s9 }
 0x1b2   : > { %1221 = vrot.lane.b32.xlu0 %v6984_v57, %s6380_s9 }
 0x1b3   : > { %v7409_v41 = vpop.permute.xlu1 %1054 }
 0x1b4   : > { %v7411_v0 = vpop.permute.xlu0 %1052 }
 0x1b5   : > { %1227 = vrot.lane.b32.xlu1 %v7406_v3, %s6380_s9 }
 0x1b6   : > { %1225 = vrot.lane.b32.xlu0 %v6994_v30, %s6380_s9 }
 0x1b7   : > { %v7419_v8 = vpop.permute.xlu1 %1058 }
 0x1b8   : > { %12687 = vst [vmem:[#allocation145_spill] sm:$0xff] %v7419_v8  ;;  %v7423_v58 = vpop.permute.xlu0 %1056  ;;  %v7699_v8 = vld [vmem:[#allocation2 + $0xe2] sm:$0xff] }
 0x1b9   : > { %12688 = vst [vmem:[#allocation146_spill] sm:$0xff] %v7423_v58  ;;  %1231 = vrot.lane.b32.xlu1 %v7417_v60, %s6380_s9  ;;  %v12758_v58 = vld [vmem:[#allocation19_spill] sm:$0xff] }
 0x1ba   : > { %1229 = vrot.lane.b32.xlu0 %v7421_v28, %s6380_s9 }
 0x1bb   : > { %v7429_v59 = vpop.permute.xlu1 %1062 }
 0x1bc   : > { %12689 = vst [vmem:[#allocation147_spill] sm:$0xff] %v7429_v59  ;;  %v7431_v1 = vpop.permute.xlu0 %1060 }
 0x1bd   : > { %12690 = vst [vmem:[#allocation148_spill] sm:$0xff] %v7431_v1  ;;  %1254 = vrot.lane.b32.xlu1 %v6645_v10, %s6382_s18 }
 0x1be   : > { %1252 = vrot.lane.b32.xlu0 %v6647_v11, %s6382_s18 }
 0x1bf   : > { %v7437_v6 = vpop.permute.xlu1 %1066 }
 0x1c0   : > { %12691 = vst [vmem:[#allocation149_spill] sm:$0xff] %v7437_v6  ;;  %v7439_v63 = vpop.permute.xlu0 %1064  ;;  %v12746_v6 = vld [vmem:[#allocation7_spill] sm:$0xff] }
 0x1c1   : > { %12692 = vst [vmem:[#allocation150_spill] sm:$0xff] %v7439_v63  ;;  %1258 = vrot.lane.b32.xlu1 %v6653_v12, %s6382_s18 }
 0x1c2   : > { %1256 = vrot.lane.b32.xlu0 %v6655_v13, %s6382_s18 }
 0x1c3   : > { %v7445_v59 = vpop.permute.xlu1 %1070 }
 0x1c4   : > { %12693 = vst [vmem:[#allocation151_spill] sm:$0xff] %v7445_v59  ;;  %v7447_v1 = vpop.permute.xlu0 %1068  ;;  %v7579_v59 = vld [vmem:[#allocation2 + $0xf1] sm:$0xff] }
 0x1c5   : > { %12694 = vst [vmem:[#allocation152_spill] sm:$0xff] %v7447_v1  ;;  %1262 = vrot.lane.b32.xlu1 %v6661_v14, %s6382_s18  ;;  %12726 = vst [vmem:[#allocation184_spill] sm:$0xff] %v7579_v59 }
 0x1c6   : > { %1260 = vrot.lane.b32.xlu0 %v6665_v16, %s6382_s18 }
 0x1c7   : > { %v7453_v10 = vpop.permute.xlu1 %1074 }
 0x1c8   : > { %12695 = vst [vmem:[#allocation153_spill] sm:$0xff] %v7453_v10  ;;  %v7455_v11 = vpop.permute.xlu0 %1072 }
 0x1c9   : > { %12696 = vst [vmem:[#allocation154_spill] sm:$0xff] %v7455_v11  ;;  %1266 = vrot.lane.b32.xlu1 %v6673_v18, %s6382_s18  ;;  %v7477_v18 = vld [vmem:[#allocation2 + $0x9c] sm:$0xff] }
 0x1ca   : > { %1264 = vrot.lane.b32.xlu0 %v6677_v33, %s6382_s18  ;;  %12699 = vst [vmem:[#allocation157_spill] sm:$0xff] %v7477_v18 }
 0x1cb   : > { %v7461_v12 = vpop.permute.xlu1 %1078 }
 0x1cc   : > { %12697 = vst [vmem:[#allocation155_spill] sm:$0xff] %v7461_v12  ;;  %v7463_v13 = vpop.permute.xlu0 %1076 }
 0x1cd   : > { %12698 = vst [vmem:[#allocation156_spill] sm:$0xff] %v7463_v13  ;;  %1270 = vrot.lane.b32.xlu1 %v6685_v35, %s6382_s18  ;;  %v7487_v35 = vld [vmem:[#allocation2 + $0xac] sm:$0xff] }
 0x1ce   : > { %1268 = vrot.lane.b32.xlu0 %v6689_v38, %s6382_s18  ;;  %12700 = vst [vmem:[#allocation158_spill] sm:$0xff] %v7487_v35 }
 0x1cf   : > { %v7469_v14 = vpop.permute.xlu1 %1101 }
 0x1d0   : > { %v7471_v16 = vpop.permute.xlu0 %1099 }
 0x1d1   : > { %1274 = vrot.lane.b32.xlu1 %v7068_v22, %s6382_s18  ;;  %v7491_v22 = vld [vmem:[#allocation2 + $0xa4] sm:$0xff] }
 0x1d2   : > { %1272 = vrot.lane.b32.xlu0 %v7054_v9, %s6382_s18  ;;  %12702 = vst [vmem:[#allocation160_spill] sm:$0xff] %v7491_v22 }
 0x1d3   : > { %v7479_v33 = vpop.permute.xlu1 %1105 }
 0x1d4   : > { %v7481_v13 = vpop.permute.xlu0 %1103 }
 0x1d5   : > { %1278 = vrot.lane.b32.xlu1 %v7477_v18, %s6382_s18  ;;  %v7527_v18 = vld [vmem:[#allocation2 + $0xb1] sm:$0xff] }
 0x1d6   : > { %1276 = vrot.lane.b32.xlu0 %v7064_v56, %s6382_s18  ;;  %12712 = vst [vmem:[#allocation170_spill] sm:$0xff] %v7527_v18 }
 0x1d7   : > { %v7489_v38 = vpop.permute.xlu1 %1109 }
 0x1d8   : > { %12701 = vst [vmem:[#allocation159_spill] sm:$0xff] %v7489_v38  ;;  %v7493_v12 = vpop.permute.xlu0 %1107 }
 0x1d9   : > { %12703 = vst [vmem:[#allocation161_spill] sm:$0xff] %v7493_v12  ;;  %1282 = vrot.lane.b32.xlu1 %v7487_v35, %s6382_s18 }
 0x1da   : > { %1280 = vrot.lane.b32.xlu0 %v7491_v22, %s6382_s18 }
 0x1db   : > { %v7499_v9 = vpop.permute.xlu1 %1113 }
 0x1dc   : > { %12704 = vst [vmem:[#allocation162_spill] sm:$0xff] %v7499_v9  ;;  %v7501_v11 = vpop.permute.xlu0 %1111  ;;  %v12750_v9 = vld [vmem:[#allocation17_spill] sm:$0xff] }
 0x1dd   : > { %12705 = vst [vmem:[#allocation163_spill] sm:$0xff] %v7501_v11  ;;  %1885 = vrot.lane.b32.xlu1 %v6856_v32, %s6368_s23  ;;  %v7523_v32 = vld [vmem:[#allocation2 + $0xb9] sm:$0xff]  ;;  %v12749_v11 = vld [vmem:[#allocation9_spill] sm:$0xff] }
 0x1de   : > { %1883 = vrot.lane.b32.xlu0 %v6840_v21, %s6368_s23  ;;  %12710 = vst [vmem:[#allocation168_spill] sm:$0xff] %v7523_v32 }
 0x1df   : > { %v7507_v56 = vpop.permute.xlu1 %1117 }
 0x1e0   : > { %12706 = vst [vmem:[#allocation164_spill] sm:$0xff] %v7507_v56  ;;  %v7509_v10 = vpop.permute.xlu0 %1115  ;;  %v7641_v56 = vld [vmem:[#allocation2 + $0xd2] sm:$0xff] }
 0x1e1   : > { %12707 = vst [vmem:[#allocation165_spill] sm:$0xff] %v7509_v10  ;;  %1889 = vrot.lane.b32.xlu1 %v7203_v31, %s6368_s23 }
 0x1e2   : > { %1887 = vrot.lane.b32.xlu0 %v6852_v19, %s6368_s23  ;;  %v7535_v19 = vld [vmem:[#allocation2 + $0xc9] sm:$0xff] }
 0x1e3   : > { %v7515_v22 = vpop.permute.xlu1 %1121  ;;  %12714 = vst [vmem:[#allocation172_spill] sm:$0xff] %v7535_v19 }
 0x1e4   : > { %12708 = vst [vmem:[#allocation166_spill] sm:$0xff] %v7515_v22  ;;  %v7517_v35 = vpop.permute.xlu0 %1119  ;;  %v290_v22 = vld [vmem:[%s6423_s22 + $0x108] sm:$0xff] }
 0x1e5   : > { %12709 = vst [vmem:[#allocation167_spill] sm:$0xff] %v7517_v35  ;;  %1893 = vrot.lane.b32.xlu1 %v7215_v55, %s6368_s23  ;;  %355 = vst.msk [vmem:[#allocation2 + $0x108] sm:$0xff] %vm321_vm0, %v290_v22 }
 0x1e6   : > { %1891 = vrot.lane.b32.xlu0 %v7219_v26, %s6368_s23  ;;  %v7539_v26 = vld [vmem:[#allocation2 + $0xc1] sm:$0xff] }
 0x1e7   : > { %v7525_v21 = vpop.permute.xlu1 %1125  ;;  %12716 = vst [vmem:[#allocation174_spill] sm:$0xff] %v7539_v26 }
 0x1e8   : > { %12711 = vst [vmem:[#allocation169_spill] sm:$0xff] %v7525_v21  ;;  %v7529_v31 = vpop.permute.xlu0 %1123  ;;  %v7551_v21 = vld [vmem:[#allocation2 + $0xd1] sm:$0xff] }
 0x1e9   : > { %12713 = vst [vmem:[#allocation171_spill] sm:$0xff] %v7529_v31  ;;  %1897 = vrot.lane.b32.xlu1 %v7523_v32, %s6368_s23  ;;  %v7547_v31 = vld [vmem:[#allocation2 + $0xd9] sm:$0xff]  ;;  %12719 = vst [vmem:[#allocation177_spill] sm:$0xff] %v7551_v21 }
 0x1ea   : > { %1895 = vrot.lane.b32.xlu0 %v7527_v18, %s6368_s23  ;;  %12718 = vst [vmem:[#allocation176_spill] sm:$0xff] %v7547_v31 }
 0x1eb   : > { %v7537_v55 = vpop.permute.xlu1 %1129 }
 0x1ec   : > { %12715 = vst [vmem:[#allocation173_spill] sm:$0xff] %v7537_v55  ;;  %v7541_v35 = vpop.permute.xlu0 %1127  ;;  %v291_v55 = vld [vmem:[%s6423_s22 + $0x110] sm:$0xff] }
 0x1ed   : > { %12717 = vst [vmem:[#allocation175_spill] sm:$0xff] %v7541_v35  ;;  %1901 = vrot.lane.b32.xlu1 %v7535_v19, %s6368_s23  ;;  %v7561_v19 = vld [vmem:[#allocation2 + $0xe9] sm:$0xff]  ;;  %356 = vst.msk [vmem:[#allocation2 + $0x110] sm:$0xff] %vm321_vm0, %v291_v55  ;;  %v7567_v35 = vld [vmem:[#allocation2 + $0xe1] sm:$0xff] }
 0x1ee   : > { %1899 = vrot.lane.b32.xlu0 %v7539_v26, %s6368_s23  ;;  %12720 = vst [vmem:[#allocation178_spill] sm:$0xff] %v7561_v19  ;;  %12722 = vst [vmem:[#allocation180_spill] sm:$0xff] %v7567_v35 }
 0x1ef   : > { %v7549_v32 = vpop.permute.xlu1 %1152 }
 0x1f0   : > { %v7553_v18 = vpop.permute.xlu0 %1150 }
 0x1f1   : > { %1905 = vrot.lane.b32.xlu1 %v7547_v31, %s6368_s23  ;;  %v7575_v31 = vld [vmem:[#allocation2 + $0xf9] sm:$0xff] }
 0x1f2   : > { %1903 = vrot.lane.b32.xlu0 %v7551_v21, %s6368_s23  ;;  %12724 = vst [vmem:[#allocation182_spill] sm:$0xff] %v7575_v31 }
 0x1f3   : > { %v7565_v26 = vpop.permute.xlu1 %1156 }
 0x1f4   : > { %12721 = vst [vmem:[#allocation179_spill] sm:$0xff] %v7565_v26  ;;  %v7569_v1 = vpop.permute.xlu0 %1154  ;;  %v12778_v26 = vld [vmem:[#allocation38_spill] sm:$0xff] }
 0x1f5   : > { %12723 = vst [vmem:[#allocation181_spill] sm:$0xff] %v7569_v1  ;;  %1909 = vrot.lane.b32.xlu1 %v7561_v19, %s6368_s23  ;;  %v12772_v1 = vld [vmem:[#allocation33_spill] sm:$0xff] }
 0x1f6   : > { %1907 = vrot.lane.b32.xlu0 %v7567_v35, %s6368_s23 }
 0x1f7   : > { %v7577_v21 = vpop.permute.xlu1 %1160 }
 0x1f8   : > { %12725 = vst [vmem:[#allocation183_spill] sm:$0xff] %v7577_v21  ;;  %v7581_v55 = vpop.permute.xlu0 %1158  ;;  %v12751_v21 = vld [vmem:[#allocation10_spill] sm:$0xff] }
 0x1f9   : > { %12727 = vst [vmem:[#allocation185_spill] sm:$0xff] %v7581_v55  ;;  %1913 = vrot.lane.b32.xlu1 %v7575_v31, %s6368_s23  ;;  %v6236_v55 = vld [vmem:[#allocation2 + $0x20] sm:$0xff] }
 0x1fa   : > { %1911 = vrot.lane.b32.xlu0 %v7579_v59, %s6368_s23  ;;  %v1304_v12 = vsel %vm321_vm0, %v6236_v55, %v12751_v21  ;;  %v12759_v55 = vld [vmem:[#allocation18_spill] sm:$0xff] }
 0x1fb   : > { %v7587_v22 = vpop.permute.xlu1 %1164 }
 0x1fc   : > { %12728 = vst [vmem:[#allocation186_spill] sm:$0xff] %v7587_v22  ;;  %v7589_v19 = vpop.permute.xlu0 %1162 }
 0x1fd   : > { %12729 = vst [vmem:[#allocation187_spill] sm:$0xff] %v7589_v19  ;;  %1949 = vrot.lane.b32.xlu1 %v6928_v52, %s6369_s24  ;;  %v7611_v52 = vld [vmem:[#allocation2 + $0xba] sm:$0xff] }
 0x1fe   : > { %1947 = vrot.lane.b32.xlu0 %v6913_v39, %s6369_s24  ;;  %12734 = vst [vmem:[#allocation192_spill] sm:$0xff] %v7611_v52 }
 0x1ff   : > { %v7595_v35 = vpop.permute.xlu1 %1168 }
 0x200   : > { %12730 = vst [vmem:[#allocation188_spill] sm:$0xff] %v7595_v35  ;;  %v7597_v10 = vpop.permute.xlu0 %1166  ;;  %v412_v35 = vld [vmem:[#allocation2 + $0x8] sm:$0xff] }
 0x201   : > { %12731 = vst [vmem:[#allocation189_spill] sm:$0xff] %v7597_v10  ;;  %1953 = vrot.lane.b32.xlu1 %v7275_v48, %s6369_s24  ;;  %v7615_v10 = vld [vmem:[#allocation2 + $0xb2] sm:$0xff] }
 0x202   : > { %1951 = vrot.lane.b32.xlu0 %v6924_v37, %s6369_s24  ;;  %12736 = vst [vmem:[#allocation194_spill] sm:$0xff] %v7615_v10  ;;  %v7623_v37 = vld [vmem:[#allocation2 + $0xca] sm:$0xff] }
 0x203   : > { %v7603_v31 = vpop.permute.xlu1 %1172  ;;  %12738 = vst [vmem:[#allocation196_spill] sm:$0xff] %v7623_v37 }
 0x204   : > { %12732 = vst [vmem:[#allocation190_spill] sm:$0xff] %v7603_v31  ;;  %v7605_v59 = vpop.permute.xlu0 %1170 }
 0x205   : > { %12733 = vst [vmem:[#allocation191_spill] sm:$0xff] %v7605_v59  ;;  %1957 = vrot.lane.b32.xlu1 %v7285_v50, %s6369_s24  ;;  %v7627_v59 = vld [vmem:[#allocation2 + $0xc2] sm:$0xff] }
 0x206   : > { %1955 = vrot.lane.b32.xlu0 %v7289_v43, %s6369_s24  ;;  %12740 = vst [vmem:[#allocation198_spill] sm:$0xff] %v7627_v59  ;;  %v413_v43 = vld [vmem:[#allocation2 + $0x10] sm:$0xff] }
 0x207   : > { %v7613_v39 = vpop.permute.xlu1 %1176 }
 0x208   : > { %12735 = vst [vmem:[#allocation193_spill] sm:$0xff] %v7613_v39  ;;  %v7617_v48 = vpop.permute.xlu0 %1174  ;;  %v411_v39 = vld [vmem:[#allocation2] sm:$0xff] }
 0x209   : > { %12737 = vst [vmem:[#allocation195_spill] sm:$0xff] %v7617_v48  ;;  %1961 = vrot.lane.b32.xlu1 %v7611_v52, %s6369_s24  ;;  %v7635_v52 = vld [vmem:[#allocation2 + $0xda] sm:$0xff] }
 0x20a   : > { %1959 = vrot.lane.b32.xlu0 %v7615_v10, %s6369_s24  ;;  %12742 = vst [vmem:[#allocation200_spill] sm:$0xff] %v7635_v52  ;;  %v12743_v10 = vld [vmem:[#allocation5_spill] sm:$0xff] }
 0x20b   : > { %v7625_v50 = vpop.permute.xlu1 %1180  ;;  %v1302_v48 = vsel %vm321_vm0, %v413_v43, %v12743_v10  ;;  %12744 = vst [vmem:[#allocation5_spill] sm:$0xff] %v7641_v56  ;;  %v1305_v10 = vsel %vm321_vm0, %v12750_v9, %v12749_v11  ;;  %v292_v11 = vld [vmem:[%s6423_s22 + $0x118] sm:$0xff]  ;;  %v12757_v9 = vld [vmem:[#allocation16_spill] sm:$0xff] }
 0x20c   : > { %12739 = vst [vmem:[#allocation197_spill] sm:$0xff] %v7625_v50  ;;  %v7629_v31 = vpop.permute.xlu0 %1178  ;;  %v1308_v21 = vsel %vm321_vm0, %v12758_v58, %v12757_v9  ;;  %357 = vst.msk [vmem:[#allocation2 + $0x118] sm:$0xff] %vm321_vm0, %v292_v11  ;;  %v12764_v58 = vld [vmem:[#allocation23_spill] sm:$0xff] }
 0x20d   : > { %12741 = vst [vmem:[#allocation199_spill] sm:$0xff] %v7629_v31  ;;  %1965 = vrot.lane.b32.xlu1 %v7623_v37, %s6369_s24  ;;  %v12745_v31 = vld [vmem:[#allocation6_spill] sm:$0xff]  ;;  %v12747_v37 = vld [vmem:[#allocation13_spill] sm:$0xff]  ;;  %v1312_v9 = vsel %vm321_vm0, %v12640_v36, %v12764_v58  ;;  %v12771_v11 = vld [vmem:[#allocation31_spill] sm:$0xff] }
 0x20e   : > { %1963 = vrot.lane.b32.xlu0 %v7627_v59, %s6369_s24  ;;  %v1300_v63 = vsel %vm321_vm0, %v411_v39, %v12745_v31  ;;  %v1303_v19 = vsel %vm321_vm0, %v12747_v37, %v12746_v6  ;;  %v12748_v59 = vld [vmem:[#allocation8_spill] sm:$0xff]  ;;  %v1307_v31 = vsel %vm321_vm0, %v6724_v34, %v12752_v61  ;;  %v12754_v6 = vld [vmem:[#allocation15_spill] sm:$0xff]  ;;  %v1311_v34 = vsel %vm321_vm0, %v12635_v5, %v12759_v55  ;;  %v12765_v5 = vld [vmem:[#allocation25_spill] sm:$0xff] }
 0x20f   : > { %v7639_v50 = vpop.permute.xlu1 %1203  ;;  %v1301_v22 = vsel %vm321_vm0, %v412_v35, %v12748_v59  ;;  %v12753_v39 = vld [vmem:[#allocation12_spill] sm:$0xff]  ;;  %v12755_v59 = vld [vmem:[#allocation14_spill] sm:$0xff]  ;;  %v1315_v55 = vsel %vm321_vm0, %v6772_v17, %v12765_v5  ;;  %12770 = vst [vmem:[#allocation13_spill] sm:$0xff] %v7699_v8  ;;  %v1317_v42 = vsel %vm1316_vm4, %v1300_v63, %v12771_v11  ;;  %v1320_v36 = vsel %vm1316_vm4, %v1303_v19, %v12772_v1  ;;  %v12774_v5 = vld [vmem:[#allocation35_spill] sm:$0xff] }
 0x210   : > { %v7653_v43 = vpop.permute.xlu0 %1201  ;;  %v1306_v37 = vsel %vm321_vm0, %v12754_v6, %v12753_v39  ;;  %v12756_v35 = vld [vmem:[#allocation24_spill] sm:$0xff]  ;;  %v12762_v6 = vld [vmem:[#allocation21_spill] sm:$0xff]  ;;  %v12773_v58 = vld [vmem:[#allocation34_spill] sm:$0xff]  ;;  %v1322_v51 = vsel %vm1316_vm4, %v1305_v10, %v12774_v5 }
 0x211   : > { %v1309_v38 = vsel %vm321_vm0, %v12756_v35, %v12755_v59  ;;  %1969 = vrot.lane.b32.xlu1 %v7635_v52, %s6369_s24  ;;  %v12760_v61 = vld [vmem:[#allocation20_spill] sm:$0xff]  ;;  %v1313_v59 = vsel %vm321_vm0, %v12639_v54, %v12762_v6  ;;  %v12768_v54 = vld [vmem:[#allocation29_spill] sm:$0xff]  ;;  %v1319_v17 = vsel %vm1316_vm4, %v1302_v48, %v12773_v58  ;;  %v1323_v63 = vsel %vm1316_vm4, %v1306_v37, %v12778_v26  ;;  %v12779_v11 = vld [vmem:[#allocation39_spill] sm:$0xff] }
 0x212   : > { %v1310_v39 = vsel %vm321_vm0, %v12761_v24, %v12760_v61  ;;  %1967 = vrot.lane.b32.xlu0 %v7641_v56, %s6369_s24  ;;  %v7683_v35 = vld [vmem:[#allocation2 + $0xea] sm:$0xff]  ;;  %v12766_v24 = vld [vmem:[#allocation27_spill] sm:$0xff]  ;;  %v12767_v61 = vld [vmem:[#allocation30_spill] sm:$0xff]  ;;  %v1318_v6 = vsel %vm1316_vm4, %v1301_v22, %v12768_v54  ;;  %v1326_v1 = vsel %vm1316_vm4, %v1309_v38, %v12779_v11 }
 0x213   : > { %12763 = vst [vmem:[#allocation6_spill] sm:$0xff] %v7683_v35  ;;  %v1314_v52 = vsel %vm321_vm0, %v12767_v61, %v12766_v24  ;;  %v7697_v56 = vpop.permute.xlu1 %1207  ;;  %v12776_v22 = vld [vmem:[#allocation36_spill] sm:$0xff]  ;;  %v12777_v54 = vld [vmem:[#allocation37_spill] sm:$0xff]  ;;  %v12782_v5 = vld [vmem:[#allocation42_spill] sm:$0xff] }
 0x214   : > { %12769 = vst [vmem:[#allocation7_spill] sm:$0xff] %v7697_v56  ;;  %v7709_v24 = vpop.permute.xlu0 %1205  ;;  %v1321_v61 = vsel %vm1316_vm4, %v1304_v12, %v12776_v22  ;;  %v1324_v56 = vsel %vm1316_vm4, %v1307_v31, %v12777_v54  ;;  %v12780_v19 = vld [vmem:[#allocation40_spill] sm:$0xff]  ;;  %v12781_v10 = vld [vmem:[#allocation41_spill] sm:$0xff]  ;;  %v1327_v12 = vsel %vm1316_vm4, %v1310_v39, %v12782_v5  ;;  %v12783_v22 = vld [vmem:[#allocation43_spill] sm:$0xff] }
 0x215   : > { %12775 = vst [vmem:[#allocation8_spill] sm:$0xff] %v7709_v24  ;;  %1973 = vrot.lane.b32.xlu1 %v7683_v35, %s6369_s24  ;;  %v1325_v48 = vsel %vm1316_vm4, %v1308_v21, %v12780_v19  ;;  %v1328_v58 = vsel %vm1316_vm4, %v1311_v34, %v12781_v10  ;;  %v1330_v31 = vsel %vm1316_vm4, %v1313_v59, %v12783_v22  ;;  %v7731_v26 = vld [vmem:[#allocation2 + $0xfa] sm:$0xff]  ;;  %v12785_v38 = vld [vmem:[#allocation44_spill] sm:$0xff]  ;;  %v12786_v54 = vld [vmem:[#allocation45_spill] sm:$0xff] }
 0x216   : > { %1971 = vrot.lane.b32.xlu0 %v7699_v8, %s6369_s24  ;;  %12784 = vst [vmem:[#allocation9_spill] sm:$0xff] %v7731_v26  ;;  %v1329_v37 = vsel %vm1316_vm4, %v1312_v9, %v12785_v38  ;;  %v1332_v21 = vsel %vm1316_vm4, %v1315_v55, %v12786_v54  ;;  %v12787_v11 = vld [vmem:[#allocation46_spill] sm:$0xff]  ;;  %v12788_v19 = vld [vmem:[#allocation47_spill] sm:$0xff]  ;;  %v12791_v5 = vld [vmem:[#allocation48_spill] sm:$0xff] }
 0x217   : > { %v1331_v34 = vsel %vm1316_vm4, %v1314_v52, %v12787_v11  ;;  %v1335_v39 = vsel %vm1333_vm5, %v1318_v6, %v12788_v19  ;;  %v7741_v10 = vpop.permute.xlu1 %1211  ;;  %v7743_v59 = vld [vmem:[#allocation2 + $0xf2] sm:$0xff]  ;;  %v1334_v22 = vsel %vm1333_vm5, %v1317_v42, %v12791_v5  ;;  %v12794_v55 = vld [vmem:[#allocation51_spill] sm:$0xff]  ;;  %v12795_v11 = vld [vmem:[#allocation52_spill] sm:$0xff] }
 0x218   : > { %12789 = vst [vmem:[#allocation17_spill] sm:$0xff] %v7741_v10  ;;  %12790 = vst [vmem:[#allocation10_spill] sm:$0xff] %v7743_v59  ;;  %v12792_v35 = vld [vmem:[#allocation49_spill] sm:$0xff]  ;;  %v12793_v9 = vld [vmem:[#allocation50_spill] sm:$0xff]  ;;  %v1339_v54 = vsel %vm1333_vm5, %v1322_v51, %v12794_v55  ;;  %v7753_v52 = vpop.permute.xlu0 %1209  ;;  %v1338_v6 = vsel %vm1333_vm5, %v1321_v61, %v12795_v11 }
 0x219   : > { %v1337_v8 = vsel %vm1333_vm5, %v1320_v36, %v12792_v35  ;;  %v1336_v38 = vsel %vm1333_vm5, %v1319_v17, %v12793_v9  ;;  %v12796_v19 = vld [vmem:[#allocation53_spill] sm:$0xff]  ;;  %v12797_v24 = vld [vmem:[#allocation54_spill] sm:$0xff]  ;;  %v12798_v5 = vld [vmem:[#allocation55_spill] sm:$0xff]  ;;  %1977 = vrot.lane.b32.xlu1 %v7731_v26, %s6369_s24 }
 0x21a   : > { %v1341_v10 = vsel %vm1333_vm5, %v1324_v56, %v12796_v19  ;;  %v1340_v42 = vsel %vm1333_vm5, %v1323_v63, %v12797_v24  ;;  %v1343_v35 = vsel %vm1333_vm5, %v1326_v1, %v12798_v5  ;;  %v12799_v36 = vld [vmem:[#allocation56_spill] sm:$0xff]  ;;  %v12800_v17 = vld [vmem:[#allocation57_spill] sm:$0xff]  ;;  %v12801_v61 = vld [vmem:[#allocation58_spill] sm:$0xff]  ;;  %1975 = vrot.lane.b32.xlu0 %v7743_v59, %s6369_s24 }
 0x21b   : > { %v1342_v51 = vsel %vm1333_vm5, %v1325_v48, %v12799_v36  ;;  %v1345_v9 = vsel %vm1333_vm5, %v1328_v58, %v12800_v17  ;;  %v1344_v55 = vsel %vm1333_vm5, %v1327_v12, %v12801_v61  ;;  %v12802_v56 = vld [vmem:[#allocation59_spill] sm:$0xff]  ;;  %v12803_v24 = vld [vmem:[#allocation60_spill] sm:$0xff]  ;;  %v12804_v1 = vld [vmem:[#allocation61_spill] sm:$0xff]  ;;  %v7783_v17 = vpop.permute.xlu1 %1215 }
 0x21c   : > { %v1347_v11 = vsel %vm1333_vm5, %v1330_v31, %v12802_v56  ;;  %v1346_v63 = vsel %vm1333_vm5, %v1329_v37, %v12803_v24  ;;  %v1349_v19 = vsel %vm1333_vm5, %v1332_v21, %v12804_v1  ;;  %v12805_v5 = vld [vmem:[#allocation62_spill] sm:$0xff]  ;;  %v12806_v36 = vld [vmem:[#allocation63_spill] sm:$0xff]  ;;  %v12807_v12 = vld [vmem:[#allocation64_spill] sm:$0xff]  ;;  %v7793_v1 = vpop.permute.xlu0 %1213 }
 0x21d   : > { %v1348_v48 = vsel %vm1333_vm5, %v1331_v34, %v12805_v5  ;;  %v1352_v58 = vsel %vm1350_vm6, %v1335_v39, %v12806_v36  ;;  %v1351_v31 = vsel %vm1350_vm6, %v1334_v22, %v12807_v12  ;;  %v12808_v61 = vld [vmem:[#allocation65_spill] sm:$0xff]  ;;  %v12809_v26 = vld [vmem:[#allocation66_spill] sm:$0xff]  ;;  %v12810_v24 = vld [vmem:[#allocation67_spill] sm:$0xff]  ;;  %2013 = vrot.lane.b32.xlu1 %v6998_v4, %s6370_s25 }
 0x21e   : > { %v1354_v56 = vsel %vm1350_vm6, %v1337_v8, %v12808_v61  ;;  %v1353_v37 = vsel %vm1350_vm6, %v1336_v38, %v12809_v26  ;;  %v1356_v21 = vsel %vm1350_vm6, %v1339_v54, %v12810_v24  ;;  %v12811_v34 = vld [vmem:[#allocation68_spill] sm:$0xff]  ;;  %v12812_v39 = vld [vmem:[#allocation69_spill] sm:$0xff]  ;;  %v12813_v59 = vld [vmem:[#allocation70_spill] sm:$0xff]  ;;  %2011 = vrot.lane.b32.xlu0 %v6984_v57, %s6370_s25 }
 0x21f   : > { %v1355_v5 = vsel %vm1350_vm6, %v1338_v6, %v12811_v34  ;;  %v1358_v36 = vsel %vm1350_vm6, %v1341_v10, %v12812_v39  ;;  %v1357_v22 = vsel %vm1350_vm6, %v1340_v42, %v12813_v59  ;;  %v12814_v12 = vld [vmem:[#allocation71_spill] sm:$0xff]  ;;  %v12815_v26 = vld [vmem:[#allocation72_spill] sm:$0xff]  ;;  %v12816_v54 = vld [vmem:[#allocation73_spill] sm:$0xff] }
 0x220   : > { %v1360_v8 = vsel %vm1350_vm6, %v1343_v35, %v12814_v12  ;;  %v1359_v38 = vsel %vm1350_vm6, %v1342_v51, %v12815_v26  ;;  %v1362_v61 = vsel %vm1350_vm6, %v1345_v9, %v12816_v54  ;;  %v12817_v6 = vld [vmem:[#allocation74_spill] sm:$0xff]  ;;  %v12818_v10 = vld [vmem:[#allocation75_spill] sm:$0xff]  ;;  %v12819_v59 = vld [vmem:[#allocation76_spill] sm:$0xff] }
 0x221   : > { %v1361_v24 = vsel %vm1350_vm6, %v1344_v55, %v12817_v6  ;;  %v1364_v34 = vsel %vm1350_vm6, %v1347_v11, %v12818_v10  ;;  %v1363_v42 = vsel %vm1350_vm6, %v1346_v63, %v12819_v59  ;;  %v12820_v35 = vld [vmem:[#allocation77_spill] sm:$0xff]  ;;  %v12821_v39 = vld [vmem:[#allocation78_spill] sm:$0xff]  ;;  %v12822_v12 = vld [vmem:[#allocation79_spill] sm:$0xff]  ;;  %v7823_v55 = vpop.permute.xlu1 %1219  ;;  %2017 = vrot.lane.b32.xlu1 %v7406_v3, %s6370_s25 }
 0x222   : > { %v1366_v4 = vsel %vm1350_vm6, %v1349_v19, %v12820_v35  ;;  %v1365_v51 = vsel %vm1350_vm6, %v1348_v48, %v12821_v39  ;;  %v1369_v9 = vsel %vm1367_vm7, %v1352_v58, %v12822_v12  ;;  %v12823_v26 = vld [vmem:[#allocation80_spill] sm:$0xff]  ;;  %v12824_v54 = vld [vmem:[#allocation81_spill] sm:$0xff]  ;;  %v12825_v6 = vld [vmem:[#allocation82_spill] sm:$0xff]  ;;  %v7833_v48 = vpop.permute.xlu0 %1217  ;;  %2015 = vrot.lane.b32.xlu0 %v6994_v30, %s6370_s25 }
 0x223   : > { %v1368_v11 = vsel %vm1367_vm7, %v1351_v31, %v12823_v26  ;;  %v1371_v57 = vsel %vm1367_vm7, %v1354_v56, %v12824_v54  ;;  %v1370_v63 = vsel %vm1367_vm7, %v1353_v37, %v12825_v6  ;;  %v12826_v10 = vld [vmem:[#allocation83_spill] sm:$0xff]  ;;  %v12827_v59 = vld [vmem:[#allocation84_spill] sm:$0xff]  ;;  %v12828_v35 = vld [vmem:[#allocation85_spill] sm:$0xff] }
 0x224   : > { %v1373_v19 = vsel %vm1367_vm7, %v1356_v21, %v12826_v10  ;;  %v1372_v58 = vsel %vm1367_vm7, %v1355_v5, %v12827_v59  ;;  %v1375_v39 = vsel %vm1367_vm7, %v1358_v36, %v12828_v35  ;;  %v12829_v12 = vld [vmem:[#allocation86_spill] sm:$0xff]  ;;  %v12830_v26 = vld [vmem:[#allocation87_spill] sm:$0xff]  ;;  %v12831_v37 = vld [vmem:[#allocation88_spill] sm:$0xff] }
 0x225   : > { %v1374_v31 = vsel %vm1367_vm7, %v1357_v22, %v12829_v12  ;;  %v1377_v56 = vsel %vm1367_vm7, %v1360_v8, %v12830_v26  ;;  %v1376_v21 = vsel %vm1367_vm7, %v1359_v38, %v12831_v37  ;;  %v12832_v54 = vld [vmem:[#allocation89_spill] sm:$0xff]  ;;  %v12833_v10 = vld [vmem:[#allocation90_spill] sm:$0xff]  ;;  %v12834_v59 = vld [vmem:[#allocation91_spill] sm:$0xff]  ;;  %2021 = vrot.lane.b32.xlu1 %v7417_v60, %s6370_s25 }
 0x226   : > { %v1379_v6 = vsel %vm1367_vm7, %v1362_v61, %v12832_v54  ;;  %v1378_v5 = vsel %vm1367_vm7, %v1361_v24, %v12833_v10  ;;  %v1381_v36 = vsel %vm1367_vm7, %v1364_v34, %v12834_v59  ;;  %v12835_v22 = vld [vmem:[#allocation92_spill] sm:$0xff]  ;;  %v12836_v35 = vld [vmem:[#allocation93_spill] sm:$0xff]  ;;  %v12837_v12 = vld [vmem:[#allocation94_spill] sm:$0xff]  ;;  %v7861_v61 = vpop.permute.xlu1 %1223  ;;  %v7871_v59 = vpop.permute.xlu0 %1221  ;;  %2019 = vrot.lane.b32.xlu0 %v7421_v28, %s6370_s25 }
 0x227   : > { %v1380_v8 = vsel %vm1367_vm7, %v1363_v42, %v12835_v22  ;;  %v1383_v3 = vsel %vm1367_vm7, %v1366_v4, %v12836_v35  ;;  %v1382_v38 = vsel %vm1367_vm7, %v1365_v51, %v12837_v12  ;;  %v12838_v26 = vld [vmem:[#allocation95_spill] sm:$0xff]  ;;  %v12839_v37 = vld [vmem:[#allocation96_spill] sm:$0xff]  ;;  %v12840_v54 = vld [vmem:[#allocation97_spill] sm:$0xff] }
 0x228   : > { %v1386_v24 = vsel %vm1384_vm8, %v1369_v9, %v12838_v26  ;;  %v1385_v34 = vsel %vm1384_vm8, %v1368_v11, %v12839_v37  ;;  %v1388_v30 = vsel %vm1384_vm8, %v1371_v57, %v12840_v54  ;;  %v12841_v10 = vld [vmem:[#allocation98_spill] sm:$0xff]  ;;  %v12842_v4 = vld [vmem:[#allocation99_spill] sm:$0xff]  ;;  %v12843_v22 = vld [vmem:[#allocation100_spill] sm:$0xff] }
 0x229   : > { %v1387_v42 = vsel %vm1384_vm8, %v1370_v63, %v12841_v10  ;;  %v1390_v51 = vsel %vm1384_vm8, %v1373_v19, %v12842_v4  ;;  %v1389_v35 = vsel %vm1384_vm8, %v1372_v58, %v12843_v22  ;;  %v12844_v12 = vld [vmem:[#allocation101_spill] sm:$0xff]  ;;  %v12845_v26 = vld [vmem:[#allocation102_spill] sm:$0xff]  ;;  %v12846_v57 = vld [vmem:[#allocation103_spill] sm:$0xff] }
 0x22a   : > { %v1392_v9 = vsel %vm1384_vm8, %v1375_v39, %v12844_v12  ;;  %v1391_v11 = vsel %vm1384_vm8, %v1374_v31, %v12845_v26  ;;  %v1394_v63 = vsel %vm1384_vm8, %v1377_v56, %v12846_v57  ;;  %v12847_v37 = vld [vmem:[#allocation104_spill] sm:$0xff]  ;;  %v12848_v10 = vld [vmem:[#allocation105_spill] sm:$0xff]  ;;  %v12849_v4 = vld [vmem:[#allocation106_spill] sm:$0xff] }
 0x22b   : > { %v1393_v54 = vsel %vm1384_vm8, %v1376_v21, %v12847_v37  ;;  %v1396_v19 = vsel %vm1384_vm8, %v1379_v6, %v12848_v10  ;;  %v1395_v58 = vsel %vm1384_vm8, %v1378_v5, %v12849_v4  ;;  %v7893_v39 = vld [vmem:[#allocation2 + $0xbb] sm:$0xff]  ;;  %v12850_v31 = vld [vmem:[#allocation28_spill] sm:$0xff]  ;;  %v7907_v5 = vpop.permute.xlu1 %1227  ;;  %v7909_v57 = vld [vmem:[#allocation2 + $0xb3] sm:$0xff] }
 0x22c   : > { %v1398_v60 = vsel %vm1384_vm8, %v1381_v36, %v12850_v31  ;;  %v12851_v22 = vld [vmem:[#allocation107_spill] sm:$0xff]  ;;  %v12852_v12 = vld [vmem:[#allocation32_spill] sm:$0xff]  ;;  %v12853_v26 = vld [vmem:[#allocation26_spill] sm:$0xff]  ;;  %v1407_v31 = vsel %vm1401_vm9, %v1390_v51, %v7131_v7  ;;  %2025 = vrot.lane.b32.xlu1 %v7893_v39, %s6370_s25  ;;  %2023 = vrot.lane.b32.xlu0 %v7909_v57, %s6370_s25 }
 0x22d   : > { %v1397_v56 = vsel %vm1384_vm8, %v1380_v8, %v12851_v22  ;;  %v7901_v21 = vsel %vm1384_vm8, %v1383_v3, %v12852_v12  ;;  %v7905_v6 = vsel %vm1384_vm8, %v1382_v38, %v12853_v26  ;;  %v12854_v28 = vld [vmem:[#allocation108_spill] sm:$0xff]  ;;  %v12855_v10 = vld [vmem:[#allocation109_spill] sm:$0xff]  ;;  %v1405_v8 = vsel %vm1401_vm9, %v1388_v30, %v7124_v53  ;;  %v7917_v3 = vpop.permute.xlu0 %1225  ;;  %v12856_v4 = vld [vmem:[#allocation110_spill] sm:$0xff] }
 0x22e   : > { %v1403_v37 = vsel %vm1401_vm9, %v1386_v24, %v12854_v28  ;;  %v1402_v36 = vsel %vm1401_vm9, %v1385_v34, %v12855_v10  ;;  %v1404_v38 = vsel %vm1401_vm9, %v1387_v42, %v12856_v4  ;;  %v1406_v22 = vsel %vm1401_vm9, %v1389_v35, %v7133_v47  ;;  %v12857_v30 = vld [vmem:[#allocation111_spill] sm:$0xff]  ;;  %v12858_v42 = vld [vmem:[#allocation4_spill] sm:$0xff] }
 0x22f   : > { %v7927_v24 = vsel %vm1401_vm9, %v1392_v9, %v7137_v20  ;;  %v7933_v53 = vsel %vm1401_vm9, %v1391_v11, %v7139_v40  ;;  %v7937_v34 = vsel %vm1401_vm9, %v1394_v63, %v7145_v15  ;;  %v7941_v7 = vsel %vm1401_vm9, %v1393_v54, %v12857_v30  ;;  %v7947_v20 = vld [vmem:[#allocation2 + $0xcb] sm:$0xff]  ;;  %v7957_v35 = vpop.permute.xlu1 %1231  ;;  %v7959_v9 = vld [vmem:[#allocation2 + $0xc3] sm:$0xff] }
 0x230   : > { %v1420_v47 = vsel %vm1418_vm10, %v1403_v37, %v7192_v27  ;;  %v7951_v40 = vsel %vm1401_vm9, %v1396_v19, %v7157_v23  ;;  %v1419_v15 = vsel %vm1418_vm10, %v1402_v36, %v12858_v42  ;;  %v12859_v27 = vld [vmem:[#allocation112_spill] sm:$0xff]  ;;  %v12860_v19 = vld [vmem:[#allocation113_spill] sm:$0xff]  ;;  %2029 = vrot.lane.b32.xlu1 %v7947_v20, %s6370_s25  ;;  %2027 = vrot.lane.b32.xlu0 %v7959_v9, %s6370_s25  ;;  %v12863_v30 = vld [vmem:[#allocation179_spill] sm:$0xff] }
 0x231   : > { %v1437_v51 = vsel %vm1435_vm11, %v1420_v47, %v7267_v45  ;;  %v7963_v11 = vsel %vm1401_vm9, %v1395_v58, %v12859_v27  ;;  %v1436_v63 = vsel %vm1435_vm11, %v1419_v15, %v7269_v46  ;;  %v7969_v54 = vpop.permute.xlu0 %1229  ;;  %v7973_v45 = vsel %vm1401_vm9, %v1398_v60, %v12860_v19  ;;  %v7999_v37 = vld [vmem:[#allocation2 + $0xd3] sm:$0xff]  ;;  %v12865_v42 = vld [vmem:[#allocation128_spill] sm:$0xff] }
 0x232   : > { %v1454_v23 = vsel %vm1452_vm12, %v1437_v51, %v7385_v62  ;;  %v1453_v12 = vsel %vm1452_vm12, %v1436_v63, %v7393_v2  ;;  %v1422_v46 = vsel %vm1418_vm10, %v1405_v8, %v7207_v25  ;;  %v1421_v62 = vsel %vm1418_vm10, %v1404_v38, %v7209_v29  ;;  %v7991_v2 = vld [vmem:[#allocation2 + $0xdb] sm:$0xff]  ;;  %v12868_v19 = vld [vmem:[#allocation129_spill] sm:$0xff] }
 0x233   : > { %v1471_v58 = vsel %vm1469_vm13, %v1454_v23, %v7469_v14  ;;  %v1470_v60 = vsel %vm1469_vm13, %v1453_v12, %v7471_v16  ;;  %v1439_v14 = vsel %vm1435_vm11, %v1422_v46, %v7277_v49  ;;  %v1255_v28 = vpop.permute.xlu1 %1254  ;;  %v1438_v16 = vsel %vm1435_vm11, %v1421_v62, %v7279_v44  ;;  %v8039_v23 = vld [vmem:[#allocation2 + $0xe3] sm:$0xff] }
 0x234   : > { %v1488_v26 = vsel %vm1486_vm14, %v1471_v58, %v7549_v32  ;;  %v1487_v25 = vsel %vm1486_vm14, %v1470_v60, %v7553_v18  ;;  %v1456_v32 = vsel %vm1452_vm12, %v1439_v14, %v7409_v41  ;;  %v12861_v18 = vld [vmem:[#allocation114_spill] sm:$0xff]  ;;  %2033 = vrot.lane.b32.xlu1 %v7991_v2, %s6370_s25  ;;  %v12862_v41 = vld [vmem:[#allocation116_spill] sm:$0xff]  ;;  %2031 = vrot.lane.b32.xlu0 %v7999_v37, %s6370_s25  ;;  %v12869_v58 = vld [vmem:[#allocation145_spill] sm:$0xff] }
 0x235   : > { %v1505_v29 = vsel %vm1503_vm15, %v1488_v26, %v7639_v50  ;;  %v1504_v10 = vsel %vm1503_vm15, %v1487_v25, %v7653_v43  ;;  %v1253_v36 = vpop.permute.xlu0 %1252  ;;  %v8010_v8 = vsel %vm1401_vm9, %v1397_v56, %v12861_v18  ;;  %v1455_v50 = vsel %vm1452_vm12, %v1438_v16, %v7411_v0  ;;  %v8028_v0 = vld [vmem:[#allocation2 + $0xeb] sm:$0xff]  ;;  %v12871_v14 = vld [vmem:[#allocation134_spill] sm:$0xff] }
 0x236   : > { %v1522_v49 = vsel %vm1520_vm1, %v1505_v29, %v1255_v28  ;;  %v1473_v4 = vsel %vm1469_vm13, %v1456_v32, %v7479_v33  ;;  %v1521_v44 = vsel %vm1520_vm1, %v1504_v10, %v1253_v36  ;;  %v1424_v43 = vsel %vm1418_vm10, %v1407_v31, %v12862_v41  ;;  %v12864_v33 = vld [vmem:[#allocation117_spill] sm:$0xff]  ;;  %v12870_v46 = vld [vmem:[#allocation8_spill] sm:$0xff]  ;;  %v12872_v25 = vld [vmem:[#allocation146_spill] sm:$0xff] }
 0x237   : > { %v1472_v38 = vsel %vm1469_vm13, %v1455_v50, %v7481_v13  ;;  %v1490_v56 = vsel %vm1486_vm14, %v1473_v4, %v12863_v30  ;;  %5997 = vmatprep.mubr.msk.f32.mxu0 %vm1543_vm2, %v1521_v44  ;;  %v1423_v47 = vsel %vm1418_vm10, %v1406_v22, %v12864_v33  ;;  %v1441_v15 = vsel %vm1435_vm11, %v1424_v43, %v12865_v42  ;;  %v12866_v31 = vld [vmem:[#allocation181_spill] sm:$0xff]  ;;  %v12867_v13 = vld [vmem:[#allocation7_spill] sm:$0xff]  ;;  %v1259_v63 = vpop.permute.xlu1 %1258  ;;  %v12879_v30 = vld [vmem:[#allocation130_spill] sm:$0xff] }
 0x238   : > { %v1489_v51 = vsel %vm1486_vm14, %v1472_v38, %v12866_v31  ;;  %v1507_v27 = vsel %vm1503_vm15, %v1490_v56, %v12867_v13  ;;  %5998 = vmatmul.mubr.msk.f32.vlgmr.msra.gmra.mrb[0].mxu0 %vm1543_vm2, %v1522_v49  ;;  %v1440_v12 = vsel %vm1435_vm11, %v1423_v47, %v12868_v19  ;;  %v1458_v22 = vsel %vm1452_vm12, %v1441_v15, %v12869_v58  ;;  %v12873_v28 = vld [vmem:[#allocation159_spill] sm:$0xff]  ;;  %v12874_v10 = vld [vmem:[#allocation137_spill] sm:$0xff]  ;;  %v12875_v49 = vld [vmem:[#allocation118_spill] sm:$0xff] }
 0x239   : > { %v1506_v62 = vsel %vm1503_vm15, %v1489_v51, %v12870_v46  ;;  %v1524_v60 = vsel %vm1520_vm1, %v1507_v27, %v1259_v63  ;;  %v1257_v26 = vpop.permute.xlu0 %1256  ;;  %6180 = vmatpush3.bf16.msra.mxu0 %v12871_v14  ;;  %v1457_v29 = vsel %vm1452_vm12, %v1440_v12, %v12872_v25  ;;  %v1475_v16 = vsel %vm1469_vm13, %v1458_v22, %v12873_v28  ;;  %v12876_v18 = vld [vmem:[#allocation161_spill] sm:$0xff]  ;;  %v12877_v4 = vld [vmem:[#allocation183_spill] sm:$0xff]  ;;  %v12884_v58 = vld [vmem:[#allocation148_spill] sm:$0xff] }
 0x23a   : > { %v1523_v32 = vsel %vm1520_vm1, %v1506_v62, %v1257_v26  ;;  %2037 = vrot.lane.b32.xlu1 %v8028_v0, %s6370_s25  ;;  %6182 = vmatprep.subr.bf16.mxu0 %v12874_v10  ;;  %v1426_v36 = vsel %vm1418_vm10, %v7927_v24, %v12875_v49  ;;  %v1474_v50 = vsel %vm1469_vm13, %v1457_v29, %v12876_v18  ;;  %v8067_v41 = vld [vmem:[#allocation2 + $0xfb] sm:$0xff]  ;;  %v12880_v56 = vld [vmem:[#allocation185_spill] sm:$0xff]  ;;  %v12886_v26 = vld [vmem:[#allocation140_spill] sm:$0xff] }
 0x23b   : > { %v1492_v44 = vsel %vm1486_vm14, %v1475_v16, %v12877_v4  ;;  %2035 = vrot.lane.b32.xlu0 %v8039_v23, %s6370_s25  ;;  %6000 = vmatprep.mubr.msk.f32.mxu0 %vm1543_vm2, %v1523_v32  ;;  %v12878_v43 = vld [vmem:[#allocation119_spill] sm:$0xff]  ;;  %v1443_v24 = vsel %vm1435_vm11, %v1426_v36, %v12879_v30  ;;  %v1491_v33 = vsel %vm1486_vm14, %v1474_v50, %v12880_v56  ;;  %v12881_v47 = vld [vmem:[#allocation17_spill] sm:$0xff]  ;;  %v1263_v15 = vpop.permute.xlu1 %1262  ;;  %v12885_v46 = vld [vmem:[#allocation162_spill] sm:$0xff] }
 0x23c   : > { %v1425_v38 = vsel %vm1418_vm10, %v7933_v53, %v12878_v43  ;;  %v1509_v42 = vsel %vm1503_vm15, %v1492_v44, %v12881_v47  ;;  %6001 = vmatmul.mubr.msk.f32.gmra.mrb[2].mxu0 %vm1543_vm2, %v1524_v60  ;;  %v8079_v31 = vld [vmem:[#allocation2 + $0xf3] sm:$0xff]  ;;  %v12882_v51 = vld [vmem:[#allocation131_spill] sm:$0xff]  ;;  %v1508_v63 = vsel %vm1503_vm15, %v1491_v33, %v7753_v52  ;;  %v12887_v25 = vld [vmem:[#allocation120_spill] sm:$0xff] }
 0x23d   : > { %v1442_v13 = vsel %vm1435_vm11, %v1425_v38, %v12882_v51  ;;  %v12883_v27 = vld [vmem:[#allocation147_spill] sm:$0xff]  ;;  %v1526_v19 = vsel %vm1520_vm1, %v1509_v42, %v1263_v15  ;;  %v1261_v12 = vpop.permute.xlu0 %1260  ;;  %6184 = vmatpush3.bf16.msra.mxu0 %v12874_v10  ;;  %v1428_v52 = vsel %vm1418_vm10, %v7937_v34, %v12887_v25  ;;  %v12889_v16 = vld [vmem:[#allocation186_spill] sm:$0xff]  ;;  %v1822_v49 = vld [vmem:[#allocation2 + $0x8c] sm:$0xff] }
 0x23e   : > { %v1460_v53 = vsel %vm1452_vm12, %v1443_v24, %v12883_v27  ;;  %v1459_v22 = vsel %vm1452_vm12, %v1442_v13, %v12884_v58  ;;  %v1525_v60 = vsel %vm1520_vm1, %v1508_v63, %v1261_v12  ;;  %2041 = vrot.lane.b32.xlu1 %v8067_v41, %s6370_s25  ;;  %6186 = vmatprep.subr.bf16.mxu0 %v12886_v26  ;;  %v12888_v29 = vld [vmem:[#allocation163_spill] sm:$0xff]  ;;  %v12890_v36 = vld [vmem:[#allocation121_spill] sm:$0xff]  ;;  %v12891_v50 = vld [vmem:[#allocation132_spill] sm:$0xff] }
 0x23f   : > { %v1477_v62 = vsel %vm1469_vm13, %v1460_v53, %v12885_v46  ;;  %v1476_v28 = vsel %vm1469_vm13, %v1459_v22, %v12888_v29  ;;  %2039 = vrot.lane.b32.xlu0 %v8079_v31, %s6370_s25  ;;  %6003 = vmatprep.mubr.msk.f32.mxu0 %vm1543_vm2, %v1525_v60  ;;  %v1427_v18 = vsel %vm1418_vm10, %v7941_v7, %v12890_v36  ;;  %v12892_v34 = vld [vmem:[#allocation187_spill] sm:$0xff]  ;;  %v1267_v38 = vpop.permute.xlu1 %1266  ;;  %v12893_v24 = vld [vmem:[#allocation133_spill] sm:$0xff]  ;;  %v12895_v51 = vld [vmem:[#allocation150_spill] sm:$0xff] }
 0x240   : > { %v1494_v32 = vsel %vm1486_vm14, %v1477_v62, %v12889_v16  ;;  %v1445_v4 = vsel %vm1435_vm11, %v1428_v52, %v12891_v50  ;;  %v1493_v44 = vsel %vm1486_vm14, %v1476_v28, %v12892_v34  ;;  %6004 = vmatmul.mubr.msk.f32.gmra.mrb[4].mxu0 %vm1543_vm2, %v1526_v19  ;;  %v1821_v30 = vld [vmem:[#allocation2 + $0x84] sm:$0xff]  ;;  %v1444_v56 = vsel %vm1435_vm11, %v1427_v18, %v12893_v24  ;;  %v12894_v33 = vld [vmem:[#allocation149_spill] sm:$0xff]  ;;  %v12909_v24 = vld [vmem:[#allocation166_spill] sm:$0xff] }
 0x241   : > { %v1511_v43 = vsel %vm1503_vm15, %v1494_v32, %v7783_v17  ;;  %v1462_v47 = vsel %vm1452_vm12, %v1445_v4, %v12894_v33  ;;  %v1510_v7 = vsel %vm1503_vm15, %v1493_v44, %v7793_v1  ;;  %v1265_v15 = vpop.permute.xlu0 %1264  ;;  %6188 = vmatpush3.bf16.msra.mxu0 %v12886_v26  ;;  %v1461_v17 = vsel %vm1452_vm12, %v1444_v56, %v12895_v51  ;;  %v12896_v13 = vld [vmem:[#allocation164_spill] sm:$0xff]  ;;  %v12897_v63 = vld [vmem:[#allocation143_spill] sm:$0xff]  ;;  %v12899_v1 = vld [vmem:[#allocation122_spill] sm:$0xff] }
 0x242   : > { %v1528_v42 = vsel %vm1520_vm1, %v1511_v43, %v1267_v38  ;;  %v1479_v27 = vsel %vm1469_vm13, %v1462_v47, %v12896_v13  ;;  %v1527_v53 = vsel %vm1520_vm1, %v1510_v7, %v1265_v15  ;;  %2077 = vrot.lane.b32.xlu1 %v1822_v49, %s6371_s26  ;;  %6191 = vmatprep.subr.msk.bf16.mxu0 %vm7381_vm3, %v12897_v63  ;;  %v12900_v58 = vld [vmem:[#allocation165_spill] sm:$0xff]  ;;  %v12901_v46 = vld [vmem:[#allocation188_spill] sm:$0xff]  ;;  %v12902_v60 = vld [vmem:[#allocation123_spill] sm:$0xff] }
 0x243   : > { %v1430_v12 = vsel %vm1418_vm10, %v7951_v40, %v12899_v1  ;;  %v1478_v22 = vsel %vm1469_vm13, %v1461_v17, %v12900_v58  ;;  %v1496_v62 = vsel %vm1486_vm14, %v1479_v27, %v12901_v46  ;;  %2075 = vrot.lane.b32.xlu0 %v1821_v30, %s6371_s26  ;;  %6006 = vmatprep.mubr.msk.f32.mxu0 %vm1543_vm2, %v1527_v53  ;;  %v12903_v52 = vld [vmem:[#allocation135_spill] sm:$0xff]  ;;  %v12904_v28 = vld [vmem:[#allocation189_spill] sm:$0xff]  ;;  %v1271_v32 = vpop.permute.xlu1 %1270  ;;  %v12905_v36 = vld [vmem:[#allocation136_spill] sm:$0xff] }
 0x244   : > { %v1429_v25 = vsel %vm1418_vm10, %v7963_v11, %v12902_v60  ;;  %v1447_v29 = vsel %vm1435_vm11, %v1430_v12, %v12903_v52  ;;  %v1495_v40 = vsel %vm1486_vm14, %v1478_v22, %v12904_v28  ;;  %v1513_v16 = vsel %vm1503_vm15, %v1496_v62, %v7823_v55  ;;  %6007 = vmatmul.mubr.msk.f32.gmra.mrb[6].mxu0 %vm1543_vm2, %v1528_v42  ;;  %v1823_v49 = vld [vmem:[#allocation2 + $0x94] sm:$0xff]  ;;  %v12906_v50 = vld [vmem:[#allocation151_spill] sm:$0xff]  ;;  %v12908_v38 = vld [vmem:[#allocation152_spill] sm:$0xff] }
 0x245   : > { %v1446_v18 = vsel %vm1435_vm11, %v1429_v25, %v12905_v36  ;;  %v1464_v4 = vsel %vm1452_vm12, %v1447_v29, %v12906_v50  ;;  %v1512_v11 = vsel %vm1503_vm15, %v1495_v40, %v7833_v48  ;;  %v1530_v34 = vsel %vm1520_vm1, %v1513_v16, %v1271_v32  ;;  %v1269_v44 = vpop.permute.xlu0 %1268  ;;  %6194 = vmatpush3.bf16.msk.msra.mxu0 %vm7381_vm3, %v12897_v63  ;;  %v12907_v55 = vld [vmem:[#allocation3_spill] sm:$0xff]  ;;  %v12910_v48 = vld [vmem:[#allocation157_spill] sm:$0xff]  ;;  %v12911_v47 = vld [vmem:[#allocation124_spill] sm:$0xff] }
 0x246   : > { %v1417_v43 = vsel %vm1401_vm9, %v7901_v21, %v12907_v55  ;;  %v1463_v30 = vsel %vm1452_vm12, %v1446_v18, %v12908_v38  ;;  %v1481_v56 = vsel %vm1469_vm13, %v1464_v4, %v12909_v24  ;;  %v1529_v33 = vsel %vm1520_vm1, %v1512_v11, %v1269_v44  ;;  %2081 = vrot.lane.b32.xlu1 %v12910_v48, %s6371_s26  ;;  %v12912_v42 = vld [vmem:[#allocation167_spill] sm:$0xff]  ;;  %v12913_v51 = vld [vmem:[#allocation190_spill] sm:$0xff]  ;;  %v12914_v17 = vld [vmem:[#allocation125_spill] sm:$0xff] }
 0x247   : > { %v1432_v7 = vsel %vm1418_vm10, %v7973_v45, %v12911_v47  ;;  %v1480_v15 = vsel %vm1469_vm13, %v1463_v30, %v12912_v42  ;;  %v1498_v21 = vsel %vm1486_vm14, %v1481_v56, %v12913_v51  ;;  %2079 = vrot.lane.b32.xlu0 %v1823_v49, %s6371_s26  ;;  %6009 = vmatprep.mubr.msk.f32.mxu0 %vm1543_vm2, %v1529_v33  ;;  %v12915_v27 = vld [vmem:[#allocation138_spill] sm:$0xff]  ;;  %v12916_v1 = vld [vmem:[#allocation191_spill] sm:$0xff]  ;;  %v1275_v58 = vpop.permute.xlu1 %1274  ;;  %v12918_v62 = vld [vmem:[#allocation153_spill] sm:$0xff] }
 0x248   : > { %v1431_v13 = vsel %vm1418_vm10, %v8010_v8, %v12914_v17  ;;  %v1449_v53 = vsel %vm1435_vm11, %v1432_v7, %v12915_v27  ;;  %v1497_v45 = vsel %vm1486_vm14, %v1480_v15, %v12916_v1  ;;  %v1515_v12 = vsel %vm1503_vm15, %v1498_v21, %v7861_v61  ;;  %6010 = vmatmul.mubr.msk.f32.gmra.mrb[8].mxu0 %vm1543_vm2, %v1530_v34  ;;  %v12917_v22 = vld [vmem:[#allocation139_spill] sm:$0xff]  ;;  %v12920_v61 = vld [vmem:[#allocation154_spill] sm:$0xff]  ;;  %v12921_v16 = vld [vmem:[#allocation169_spill] sm:$0xff] }
 0x249   : > { %v1448_v46 = vsel %vm1435_vm11, %v1431_v13, %v12917_v22  ;;  %v1466_v60 = vsel %vm1452_vm12, %v1449_v53, %v12918_v62  ;;  %v1514_v8 = vsel %vm1503_vm15, %v1497_v45, %v7871_v59  ;;  %v1532_v25 = vsel %vm1520_vm1, %v1515_v12, %v1275_v58  ;;  %v1273_v52 = vpop.permute.xlu0 %1272  ;;  %v12919_v29 = vld [vmem:[#allocation115_spill] sm:$0xff]  ;;  %v12922_v36 = vld [vmem:[#allocation158_spill] sm:$0xff]  ;;  %v12925_v11 = vld [vmem:[#allocation193_spill] sm:$0xff] }
 0x24a   : > { %v1416_v28 = vsel %vm1401_vm9, %v7905_v6, %v12919_v29  ;;  %v1465_v40 = vsel %vm1452_vm12, %v1448_v46, %v12920_v61  ;;  %v1483_v32 = vsel %vm1469_vm13, %v1466_v60, %v12921_v16  ;;  %v1531_v49 = vsel %vm1520_vm1, %v1514_v8, %v1273_v52  ;;  %2085 = vrot.lane.b32.xlu1 %v12922_v36, %s6371_s26  ;;  %v12923_v18 = vld [vmem:[#allocation126_spill] sm:$0xff]  ;;  %v12924_v50 = vld [vmem:[#allocation171_spill] sm:$0xff]  ;;  %v12926_v34 = vld [vmem:[#allocation160_spill] sm:$0xff] }
 0x24b   : > { %v1434_v59 = vsel %vm1418_vm10, %v1417_v43, %v12923_v18  ;;  %v1482_v4 = vsel %vm1469_vm13, %v1465_v40, %v12924_v50  ;;  %v1500_v6 = vsel %vm1486_vm14, %v1483_v32, %v12925_v11  ;;  %2083 = vrot.lane.b32.xlu0 %v12926_v34, %s6371_s26  ;;  %6012 = vmatprep.mubr.msk.f32.mxu0 %vm1543_vm2, %v1531_v49  ;;  %v8218_v44 = vld [vmem:[#allocation2 + $0xbc] sm:$0xff]  ;;  %v12928_v30 = vld [vmem:[#allocation141_spill] sm:$0xff]  ;;  %v1279_v48 = vpop.permute.xlu1 %1278  ;;  %v12932_v27 = vld [vmem:[#allocation156_spill] sm:$0xff] }
 0x24c   : > { %v12927_v55 = vld [vmem:[#allocation127_spill] sm:$0xff]  ;;  %v1451_v24 = vsel %vm1435_vm11, %v1434_v59, %v12928_v30  ;;  %v1517_v33 = vsel %vm1503_vm15, %v1500_v6, %v7907_v5  ;;  %6013 = vmatmul.mubr.msk.f32.gmra.mrb[10].mxu0 %vm1543_vm2, %v1532_v25  ;;  %v8229_v47 = vld [vmem:[#allocation2 + $0xb4] sm:$0xff]  ;;  %v8252_v46 = vld [vmem:[#allocation2 + $0xcc] sm:$0xff] }
 0x24d   : > { %v1433_v38 = vsel %vm1418_vm10, %v1416_v28, %v12927_v55  ;;  %v12929_v43 = vld [vmem:[#allocation195_spill] sm:$0xff]  ;;  %v12930_v7 = vld [vmem:[#allocation142_spill] sm:$0xff]  ;;  %v1534_v17 = vsel %vm1520_vm1, %v1517_v33, %v1279_v48  ;;  %v1277_v13 = vpop.permute.xlu0 %1276  ;;  %v12933_v53 = vld [vmem:[#allocation173_spill] sm:$0xff] }
 0x24e   : > { %v1499_v56 = vsel %vm1486_vm14, %v1482_v4, %v12929_v43  ;;  %v1450_v42 = vsel %vm1435_vm11, %v1433_v38, %v12930_v7  ;;  %v12931_v15 = vld [vmem:[#allocation155_spill] sm:$0xff]  ;;  %2089 = vrot.lane.b32.xlu1 %v8218_v44, %s6371_s26  ;;  %v12935_v22 = vld [vmem:[#allocation197_spill] sm:$0xff]  ;;  %v1760_v30 = vld [vmem:[#allocation2 + $0x98] sm:$0xff] }
 0x24f   : > { %v1468_v51 = vsel %vm1452_vm12, %v1451_v24, %v12931_v15  ;;  %v1516_v21 = vsel %vm1503_vm15, %v1499_v56, %v7917_v3  ;;  %v1467_v5 = vsel %vm1452_vm12, %v1450_v42, %v12932_v27  ;;  %v12934_v12 = vld [vmem:[#allocation175_spill] sm:$0xff]  ;;  %2087 = vrot.lane.b32.xlu0 %v8229_v47, %s6371_s26  ;;  %v1283_v25 = vpop.permute.xlu1 %1282  ;;  %v8283_v49 = vld [vmem:[#allocation2 + $0xec] sm:$0xff]  ;;  %v8299_v11 = vld [vmem:[#allocation2 + $0xf4] sm:$0xff] }
 0x250   : > { %v1485_v1 = vsel %vm1469_vm13, %v1468_v51, %v12933_v53  ;;  %v1533_v45 = vsel %vm1520_vm1, %v1516_v21, %v1277_v13  ;;  %v1484_v58 = vsel %vm1469_vm13, %v1467_v5, %v12934_v12  ;;  %v12936_v62 = vld [vmem:[#allocation199_spill] sm:$0xff]  ;;  %v8315_v43 = vld [vmem:[#allocation2 + $0xb0] sm:$0xff]  ;;  %v1762_v33 = vld [vmem:[#allocation2 + $0xa8] sm:$0xff] }
 0x251   : > { %v1502_v3 = vsel %vm1486_vm14, %v1485_v1, %v12935_v22  ;;  %6015 = vmatprep.mubr.msk.f32.mxu0 %vm1543_vm2, %v1533_v45  ;;  %v1501_v60 = vsel %vm1486_vm14, %v1484_v58, %v12936_v62  ;;  %v8259_v52 = vld [vmem:[#allocation2 + $0xc4] sm:$0xff]  ;;  %v1281_v61 = vpop.permute.xlu0 %1280  ;;  %v8295_v50 = vld [vmem:[#allocation2 + $0xfc] sm:$0xff]  ;;  %v8336_v21 = vld [vmem:[#allocation2 + $0xd0] sm:$0xff] }
 0x252   : > { %v1519_v8 = vsel %vm1503_vm15, %v1502_v3, %v7957_v35  ;;  %6016 = vmatmul.mubr.msk.f32.gmra.mrb[12].mxu0 %vm1543_vm2, %v1534_v17  ;;  %v1518_v29 = vsel %vm1503_vm15, %v1501_v60, %v7969_v54  ;;  %2093 = vrot.lane.b32.xlu1 %v8252_v46, %s6371_s26  ;;  %v8270_v35 = vld [vmem:[#allocation2 + $0xdc] sm:$0xff]  ;;  %v8275_v54 = vld [vmem:[#allocation2 + $0xd4] sm:$0xff]  ;;  %v8287_v18 = vld [vmem:[#allocation2 + $0xe4] sm:$0xff] }
 0x253   : > { %v1536_v28 = vsel %vm1520_vm1, %v1519_v8, %v1283_v25  ;;  %v1535_v40 = vsel %vm1520_vm1, %v1518_v29, %v1281_v61  ;;  %2091 = vrot.lane.b32.xlu0 %v8259_v52, %s6371_s26  ;;  %v8273_v16 = vpop.permute.xlu1 %1885  ;;  %v1761_v55 = vld [vmem:[#allocation2 + $0xa0] sm:$0xff]  ;;  %v8328_v15 = vld [vmem:[#allocation2 + $0xb8] sm:$0xff]  ;;  %v8340_v13 = vld [vmem:[#allocation2 + $0xc8] sm:$0xff] }
 0x254   : > { %6018 = vmatprep.mubr.msk.f32.mxu0 %vm1543_vm2, %v1535_v40  ;;  %v8324_v7 = vld [vmem:[#allocation2 + $0xc0] sm:$0xff]  ;;  %v8352_v1 = vld [vmem:[#allocation2 + $0xd8] sm:$0xff]  ;;  %v8360_v12 = vld [vmem:[#allocation2 + $0xf0] sm:$0xff] }
 0x255   : > { %v8277_v32 = vpop.permute.xlu0 %1883  ;;  %v8348_v5 = vld [vmem:[#allocation2 + $0xe0] sm:$0xff]  ;;  %v8364_v22 = vld [vmem:[#allocation2 + $0xe8] sm:$0xff]  ;;  %v8376_v8 = vld [vmem:[#allocation2 + $0xf8] sm:$0xff] }
 0x256   : > { %6019 = vmatmul.mubr.msk.f32.gmra.mrb[14].mxu0 %vm1543_vm2, %v1536_v28  ;;  %2097 = vrot.lane.b32.xlu1 %v8270_v35, %s6371_s26  ;;  %v8370_v3 = vld [vmem:[#allocation2 + $0x100] sm:$0xff]  ;;  %v8382_v25 = vld [vmem:[#allocation2 + $0x110] sm:$0xff]  ;;  %v8386_v28 = vld [vmem:[#allocation2 + $0x108] sm:$0xff] }
 0x257   : > { %2095 = vrot.lane.b32.xlu0 %v8275_v54, %s6371_s26  ;;  %v8285_v36 = vpop.permute.xlu1 %1889  ;;  %v12946_v26 = vld [vmem:[#allocation170_spill] sm:$0xff]  ;;  %v6239_v10 = vld [vmem:[#allocation2 + $0xa9] sm:$0xff] }
 0x259   : > { %v8289_v59 = vpop.permute.xlu0 %1887 }
 0x25a   : > { %2101 = vrot.lane.b32.xlu1 %v8283_v49, %s6371_s26 }
 0x25b   : > { %2099 = vrot.lane.b32.xlu0 %v8287_v18, %s6371_s26  ;;  %v8297_v4 = vpop.permute.xlu1 %1893 }
 0x25d   : > { %v8301_v6 = vpop.permute.xlu0 %1891 }
 0x25e   : > { %2105 = vrot.lane.b32.xlu1 %v8295_v50, %s6371_s26 }
 0x25f   : > { %2103 = vrot.lane.b32.xlu0 %v8299_v11, %s6371_s26  ;;  %v8307_v34 = vpop.permute.xlu1 %1897 }
 0x261   : > { %v8309_v38 = vpop.permute.xlu0 %1895 }
 0x262   : > { %2141 = vrot.lane.b32.xlu1 %v1761_v55, %s6372_s27 }
 0x263   : > { %2139 = vrot.lane.b32.xlu0 %v1760_v30, %s6372_s27  ;;  %v8313_v24 = vpop.permute.xlu1 %1901  ;;  %v6237_v30 = vld [vmem:[#allocation2 + $0xa1] sm:$0xff] }
 0x265   : > { %v8317_v56 = vpop.permute.xlu0 %1899 }
 0x266   : > { %2145 = vrot.lane.b32.xlu1 %v8315_v43, %s6372_s27 }
 0x267   : > { %2143 = vrot.lane.b32.xlu0 %v1762_v33, %s6372_s27  ;;  %v8322_v48 = vpop.permute.xlu1 %1905  ;;  %v6238_v33 = vld [vmem:[#allocation2 + $0x99] sm:$0xff] }
 0x269   : > { %v8326_v42 = vpop.permute.xlu0 %1903 }
 0x26a   : > { %2149 = vrot.lane.b32.xlu1 %v8324_v7, %s6372_s27 }
 0x26b   : > { %2147 = vrot.lane.b32.xlu0 %v8328_v15, %s6372_s27  ;;  %v8334_v51 = vpop.permute.xlu1 %1909 }
 0x26d   : > { %v8338_v17 = vpop.permute.xlu0 %1907 }
 0x26e   : > { %2153 = vrot.lane.b32.xlu1 %v8336_v21, %s6372_s27 }
 0x26f   : > { %2151 = vrot.lane.b32.xlu0 %v8340_v13, %s6372_s27  ;;  %v8346_v27 = vpop.permute.xlu1 %1913 }
 0x271   : > { %v8350_v53 = vpop.permute.xlu0 %1911 }
 0x272   : > { %2157 = vrot.lane.b32.xlu1 %v8348_v5, %s6372_s27 }
 0x273   : > { %2155 = vrot.lane.b32.xlu0 %v8352_v1, %s6372_s27  ;;  %v8358_v45 = vpop.permute.xlu1 %1949 }
 0x275   : > { %v8362_v58 = vpop.permute.xlu0 %1947 }
 0x276   : > { %12937 = vst [vmem:[#allocation11_spill] sm:$0xff] %v8362_v58  ;;  %2161 = vrot.lane.b32.xlu1 %v8360_v12, %s6372_s27 }
 0x277   : > { %2159 = vrot.lane.b32.xlu0 %v8364_v22, %s6372_s27  ;;  %v8372_v62 = vpop.permute.xlu1 %1953 }
 0x278   : > { %12938 = vst [vmem:[#allocation12_spill] sm:$0xff] %v8372_v62 }
 0x279   : > { %v8374_v60 = vpop.permute.xlu0 %1951 }
 0x27a   : > { %12939 = vst [vmem:[#allocation15_spill] sm:$0xff] %v8374_v60  ;;  %2165 = vrot.lane.b32.xlu1 %v8370_v3, %s6372_s27 }
 0x27b   : > { %2163 = vrot.lane.b32.xlu0 %v8376_v8, %s6372_s27  ;;  %v8384_v29 = vpop.permute.xlu1 %1957 }
 0x27c   : > { %12940 = vst [vmem:[#allocation14_spill] sm:$0xff] %v8384_v29  ;;  %v6242_v29 = vld [vmem:[#allocation2 + $0xaa] sm:$0xff] }
 0x27d   : > { %v8388_v61 = vpop.permute.xlu0 %1955 }
 0x27e   : > { %12941 = vst [vmem:[#allocation24_spill] sm:$0xff] %v8388_v61  ;;  %2169 = vrot.lane.b32.xlu1 %v8382_v25, %s6372_s27  ;;  %v293_v61 = vld [vmem:[%s6423_s22 + $0x120] sm:$0xff] }
 0x27f   : > { %2167 = vrot.lane.b32.xlu0 %v8386_v28, %s6372_s27  ;;  %v8394_v40 = vpop.permute.xlu1 %1961  ;;  %358 = vst.msk [vmem:[#allocation2 + $0x120] sm:$0xff] %vm321_vm0, %v293_v61 }
 0x280   : > { %12942 = vst [vmem:[#allocation16_spill] sm:$0xff] %v8394_v40 }
 0x281   : > { %v8396_v55 = vpop.permute.xlu0 %1959 }
 0x282   : > { %12943 = vst [vmem:[#allocation19_spill] sm:$0xff] %v8396_v55  ;;  %2192 = vrot.lane.b32.xlu1 %v6237_v30, %s6373_s28  ;;  %v12949_v30 = vld [vmem:[#allocation174_spill] sm:$0xff] }
 0x283   : > { %2190 = vrot.lane.b32.xlu0 %v6238_v33, %s6373_s28  ;;  %v8400_v19 = vpop.permute.xlu1 %1965  ;;  %v12950_v33 = vld [vmem:[#allocation168_spill] sm:$0xff] }
 0x284   : > { %12944 = vst [vmem:[#allocation18_spill] sm:$0xff] %v8400_v19 }
 0x285   : > { %v8402_v63 = vpop.permute.xlu0 %1963 }
 0x286   : > { %12945 = vst [vmem:[#allocation20_spill] sm:$0xff] %v8402_v63  ;;  %2196 = vrot.lane.b32.xlu1 %v12946_v26, %s6373_s28  ;;  %v12953_v26 = vld [vmem:[#allocation177_spill] sm:$0xff] }
 0x287   : > { %2194 = vrot.lane.b32.xlu0 %v6239_v10, %s6373_s28  ;;  %v8407_v14 = vpop.permute.xlu1 %1969  ;;  %v12954_v10 = vld [vmem:[#allocation172_spill] sm:$0xff] }
 0x288   : > { %12947 = vst [vmem:[#allocation22_spill] sm:$0xff] %v8407_v14 }
 0x289   : > { %v8409_v55 = vpop.permute.xlu0 %1967 }
 0x28a   : > { %12948 = vst [vmem:[#allocation21_spill] sm:$0xff] %v8409_v55  ;;  %2200 = vrot.lane.b32.xlu1 %v12949_v30, %s6373_s28  ;;  %v12957_v55 = vld [vmem:[#allocation180_spill] sm:$0xff] }
 0x28b   : > { %2198 = vrot.lane.b32.xlu0 %v12950_v33, %s6373_s28  ;;  %v8415_v19 = vpop.permute.xlu1 %1973  ;;  %v12958_v30 = vld [vmem:[#allocation176_spill] sm:$0xff] }
 0x28c   : > { %12951 = vst [vmem:[#allocation23_spill] sm:$0xff] %v8415_v19 }
 0x28d   : > { %v8417_v63 = vpop.permute.xlu0 %1971 }
 0x28e   : > { %12952 = vst [vmem:[#allocation25_spill] sm:$0xff] %v8417_v63  ;;  %2204 = vrot.lane.b32.xlu1 %v12953_v26, %s6373_s28  ;;  %v12961_v63 = vld [vmem:[#allocation184_spill] sm:$0xff] }
 0x28f   : > { %2202 = vrot.lane.b32.xlu0 %v12954_v10, %s6373_s28  ;;  %v8423_v14 = vpop.permute.xlu1 %1977  ;;  %v294_v26 = vld [vmem:[%s6423_s22 + $0x128] sm:$0xff]  ;;  %v12962_v10 = vld [vmem:[#allocation178_spill] sm:$0xff] }
 0x290   : > { %12955 = vst [vmem:[#allocation27_spill] sm:$0xff] %v8423_v14  ;;  %v8441_v14 = vld [vmem:[#allocation2 + $0x101] sm:$0xff]  ;;  %359 = vst.msk [vmem:[#allocation2 + $0x128] sm:$0xff] %vm321_vm0, %v294_v26 }
 0x291   : > { %v8425_v40 = vpop.permute.xlu0 %1975 }
 0x292   : > { %12956 = vst [vmem:[#allocation30_spill] sm:$0xff] %v8425_v40  ;;  %2208 = vrot.lane.b32.xlu1 %v12957_v55, %s6373_s28 }
 0x293   : > { %2206 = vrot.lane.b32.xlu0 %v12958_v30, %s6373_s28  ;;  %v8431_v33 = vpop.permute.xlu1 %2013 }
 0x294   : > { %12959 = vst [vmem:[#allocation29_spill] sm:$0xff] %v8431_v33 }
 0x295   : > { %v8433_v19 = vpop.permute.xlu0 %2011 }
 0x296   : > { %12960 = vst [vmem:[#allocation31_spill] sm:$0xff] %v8433_v19  ;;  %2212 = vrot.lane.b32.xlu1 %v12961_v63, %s6373_s28  ;;  %v12965_v63 = vld [vmem:[#allocation182_spill] sm:$0xff] }
 0x297   : > { %2210 = vrot.lane.b32.xlu0 %v12962_v10, %s6373_s28  ;;  %v8445_v55 = vpop.permute.xlu1 %2017  ;;  %v8453_v19 = vld [vmem:[#allocation2 + $0x111] sm:$0xff]  ;;  %v8457_v10 = vld [vmem:[#allocation2 + $0x109] sm:$0xff] }
 0x298   : > { %12963 = vst [vmem:[#allocation33_spill] sm:$0xff] %v8445_v55 }
 0x299   : > { %v8447_v30 = vpop.permute.xlu0 %2015 }
 0x29a   : > { %12964 = vst [vmem:[#allocation34_spill] sm:$0xff] %v8447_v30  ;;  %2216 = vrot.lane.b32.xlu1 %v8441_v14, %s6373_s28  ;;  %v6240_v30 = vld [vmem:[#allocation2 + $0xa2] sm:$0xff] }
 0x29b   : > { %2214 = vrot.lane.b32.xlu0 %v12965_v63, %s6373_s28  ;;  %v8455_v33 = vpop.permute.xlu1 %2021  ;;  %v6241_v63 = vld [vmem:[#allocation2 + $0x9a] sm:$0xff] }
 0x29c   : > { %12966 = vst [vmem:[#allocation35_spill] sm:$0xff] %v8455_v33 }
 0x29d   : > { %v8459_v40 = vpop.permute.xlu0 %2019 }
 0x29e   : > { %12967 = vst [vmem:[#allocation36_spill] sm:$0xff] %v8459_v40  ;;  %2220 = vrot.lane.b32.xlu1 %v8453_v19, %s6373_s28  ;;  %v12972_v40 = vld [vmem:[#allocation194_spill] sm:$0xff] }
 0x29f   : > { %2218 = vrot.lane.b32.xlu0 %v8457_v10, %s6373_s28  ;;  %v8465_v61 = vpop.permute.xlu1 %2025 }
 0x2a0   : > { %12968 = vst [vmem:[#allocation37_spill] sm:$0xff] %v8465_v61 }
 0x2a1   : > { %v8467_v26 = vpop.permute.xlu0 %2023 }
 0x2a2   : > { %12969 = vst [vmem:[#allocation38_spill] sm:$0xff] %v8467_v26  ;;  %2243 = vrot.lane.b32.xlu1 %v6240_v30, %s6374_s29  ;;  %v12975_v30 = vld [vmem:[#allocation198_spill] sm:$0xff] }
 0x2a3   : > { %2241 = vrot.lane.b32.xlu0 %v6241_v63, %s6374_s29  ;;  %v8471_v33 = vpop.permute.xlu1 %2029  ;;  %v12976_v63 = vld [vmem:[#allocation192_spill] sm:$0xff] }
 0x2a4   : > { %12970 = vst [vmem:[#allocation39_spill] sm:$0xff] %v8471_v33 }
 0x2a5   : > { %v8473_v55 = vpop.permute.xlu0 %2027 }
 0x2a6   : > { %12971 = vst [vmem:[#allocation40_spill] sm:$0xff] %v8473_v55  ;;  %2247 = vrot.lane.b32.xlu1 %v12972_v40, %s6374_s29  ;;  %v12979_v40 = vld [vmem:[#allocation5_spill] sm:$0xff] }
 0x2a7   : > { %2245 = vrot.lane.b32.xlu0 %v6242_v29, %s6374_s29  ;;  %v8478_v61 = vpop.permute.xlu1 %2033  ;;  %v12980_v29 = vld [vmem:[#allocation196_spill] sm:$0xff] }
 0x2a8   : > { %12973 = vst [vmem:[#allocation41_spill] sm:$0xff] %v8478_v61 }
 0x2a9   : > { %v8480_v26 = vpop.permute.xlu0 %2031 }
 0x2aa   : > { %12974 = vst [vmem:[#allocation42_spill] sm:$0xff] %v8480_v26  ;;  %2251 = vrot.lane.b32.xlu1 %v12975_v30, %s6374_s29  ;;  %v12983_v26 = vld [vmem:[#allocation13_spill] sm:$0xff]  ;;  %v12984_v30 = vld [vmem:[#allocation200_spill] sm:$0xff] }
 0x2ab   : > { %2249 = vrot.lane.b32.xlu0 %v12976_v63, %s6374_s29 }
 0x2ac   : > { %v8486_v33 = vpop.permute.xlu1 %2037 }
 0x2ad   : > { %12977 = vst [vmem:[#allocation43_spill] sm:$0xff] %v8486_v33  ;;  %v8488_v55 = vpop.permute.xlu0 %2035 }
 0x2ae   : > { %12978 = vst [vmem:[#allocation44_spill] sm:$0xff] %v8488_v55  ;;  %2255 = vrot.lane.b32.xlu1 %v12979_v40, %s6374_s29  ;;  %v12987_v55 = vld [vmem:[#allocation10_spill] sm:$0xff]  ;;  %v295_v40 = vld [vmem:[%s6423_s22 + $0x130] sm:$0xff] }
 0x2af   : > { %2253 = vrot.lane.b32.xlu0 %v12980_v29, %s6374_s29  ;;  %v12988_v29 = vld [vmem:[#allocation6_spill] sm:$0xff]  ;;  %360 = vst.msk [vmem:[#allocation2 + $0x130] sm:$0xff] %vm321_vm0, %v295_v40 }
 0x2b0   : > { %v8494_v60 = vpop.permute.xlu1 %2041 }
 0x2b1   : > { %12981 = vst [vmem:[#allocation45_spill] sm:$0xff] %v8494_v60  ;;  %v8496_v61 = vpop.permute.xlu0 %2039  ;;  %v8511_v60 = vld [vmem:[#allocation2 + $0x102] sm:$0xff] }
 0x2b2   : > { %12982 = vst [vmem:[#allocation46_spill] sm:$0xff] %v8496_v61  ;;  %2259 = vrot.lane.b32.xlu1 %v12983_v26, %s6374_s29 }
 0x2b3   : > { %2257 = vrot.lane.b32.xlu0 %v12984_v30, %s6374_s29  ;;  %v12991_v30 = vld [vmem:[#allocation9_spill] sm:$0xff] }
 0x2b4   : > { %v8502_v63 = vpop.permute.xlu1 %2077 }
 0x2b5   : > { %12985 = vst [vmem:[#allocation47_spill] sm:$0xff] %v8502_v63  ;;  %v8504_v33 = vpop.permute.xlu0 %2075  ;;  %v8526_v63 = vld [vmem:[#allocation2 + $0x10a] sm:$0xff] }
 0x2b6   : > { %12986 = vst [vmem:[#allocation48_spill] sm:$0xff] %v8504_v33  ;;  %2263 = vrot.lane.b32.xlu1 %v12987_v55, %s6374_s29  ;;  %v8522_v33 = vld [vmem:[#allocation2 + $0x112] sm:$0xff] }
 0x2b7   : > { %2261 = vrot.lane.b32.xlu0 %v12988_v29, %s6374_s29 }
 0x2b8   : > { %v8514_v61 = vpop.permute.xlu1 %2081 }
 0x2b9   : > { %12989 = vst [vmem:[#allocation49_spill] sm:$0xff] %v8514_v61  ;;  %v8516_v26 = vpop.permute.xlu0 %2079  ;;  %v6243_v61 = vld [vmem:[#allocation2 + $0xa3] sm:$0xff] }
 0x2ba   : > { %12990 = vst [vmem:[#allocation50_spill] sm:$0xff] %v8516_v26  ;;  %2267 = vrot.lane.b32.xlu1 %v8511_v60, %s6374_s29 }
 0x2bb   : > { %2265 = vrot.lane.b32.xlu0 %v12991_v30, %s6374_s29  ;;  %v6244_v30 = vld [vmem:[#allocation2 + $0x9b] sm:$0xff] }
 0x2bc   : > { %v8524_v55 = vpop.permute.xlu1 %2085 }
 0x2bd   : > { %12992 = vst [vmem:[#allocation51_spill] sm:$0xff] %v8524_v55  ;;  %v8528_v29 = vpop.permute.xlu0 %2083 }
 0x2be   : > { %12993 = vst [vmem:[#allocation52_spill] sm:$0xff] %v8528_v29  ;;  %2271 = vrot.lane.b32.xlu1 %v8522_v33, %s6374_s29  ;;  %v6245_v29 = vld [vmem:[#allocation2 + $0xab] sm:$0xff] }
 0x2bf   : > { %2269 = vrot.lane.b32.xlu0 %v8526_v63, %s6374_s29 }
 0x2c0   : > { %v8534_v40 = vpop.permute.xlu1 %2089 }
 0x2c1   : > { %12994 = vst [vmem:[#allocation53_spill] sm:$0xff] %v8534_v40  ;;  %v8536_v26 = vpop.permute.xlu0 %2087 }
 0x2c2   : > { %2294 = vrot.lane.b32.xlu1 %v6243_v61, %s6375_s30 }
 0x2c3   : > { %2292 = vrot.lane.b32.xlu0 %v6244_v30, %s6375_s30 }
 0x2c4   : > { %v8540_v55 = vpop.permute.xlu1 %2093 }
 0x2c5   : > { %v8542_v62 = vpop.permute.xlu0 %2091 }
 0x2c6   : > { %2298 = vrot.lane.b32.xlu1 %v7909_v57, %s6375_s30 }
 0x2c7   : > { %2296 = vrot.lane.b32.xlu0 %v6245_v29, %s6375_s30 }
 0x2c8   : > { %v8547_v58 = vpop.permute.xlu1 %2097 }
 0x2c9   : > { %v8549_v40 = vpop.permute.xlu0 %2095 }
 0x2ca   : > { %2302 = vrot.lane.b32.xlu1 %v7959_v9, %s6375_s30 }
 0x2cb   : > { %2300 = vrot.lane.b32.xlu0 %v7893_v39, %s6375_s30 }
 0x2cc   : > { %v8555_v61 = vpop.permute.xlu1 %2101 }
 0x2cd   : > { %v8557_v30 = vpop.permute.xlu0 %2099 }
 0x2ce   : > { %2306 = vrot.lane.b32.xlu1 %v7999_v37, %s6375_s30 }
 0x2cf   : > { %2304 = vrot.lane.b32.xlu0 %v7947_v20, %s6375_s30  ;;  %v8579_v20 = vld [vmem:[#allocation2 + $0x103] sm:$0xff] }
 0x2d0   : > { %v8563_v57 = vpop.permute.xlu1 %2105 }
 0x2d1   : > { %12995 = vst [vmem:[#allocation54_spill] sm:$0xff] %v8563_v57  ;;  %v8565_v29 = vpop.permute.xlu0 %2103 }
 0x2d2   : > { %12996 = vst [vmem:[#allocation55_spill] sm:$0xff] %v8565_v29  ;;  %2310 = vrot.lane.b32.xlu1 %v8039_v23, %s6375_s30 }
 0x2d3   : > { %2308 = vrot.lane.b32.xlu0 %v7991_v2, %s6375_s30  ;;  %v8589_v2 = vld [vmem:[#allocation2 + $0x113] sm:$0xff] }
 0x2d4   : > { %v8571_v39 = vpop.permute.xlu1 %2141 }
 0x2d5   : > { %12997 = vst [vmem:[#allocation56_spill] sm:$0xff] %v8571_v39  ;;  %v8573_v9 = vpop.permute.xlu0 %2139 }
 0x2d6   : > { %12998 = vst [vmem:[#allocation57_spill] sm:$0xff] %v8573_v9  ;;  %2314 = vrot.lane.b32.xlu1 %v8079_v31, %s6375_s30  ;;  %v8593_v31 = vld [vmem:[#allocation2 + $0x10b] sm:$0xff] }
 0x2d7   : > { %2312 = vrot.lane.b32.xlu0 %v8028_v0, %s6375_s30 }
 0x2d8   : > { %v8581_v37 = vpop.permute.xlu1 %2145 }
 0x2d9   : > { %12999 = vst [vmem:[#allocation58_spill] sm:$0xff] %v8581_v37  ;;  %v8583_v29 = vpop.permute.xlu0 %2143  ;;  %v6246_v37 = vld [vmem:[#allocation2 + $0xa4] sm:$0xff] }
 0x2da   : > { %13000 = vst [vmem:[#allocation59_spill] sm:$0xff] %v8583_v29  ;;  %2318 = vrot.lane.b32.xlu1 %v8579_v20, %s6375_s30 }
 0x2db   : > { %2316 = vrot.lane.b32.xlu0 %v8067_v41, %s6375_s30  ;;  %v6247_v41 = vld [vmem:[#allocation2 + $0x9c] sm:$0xff] }
 0x2dc   : > { %v8591_v23 = vpop.permute.xlu1 %2149 }
 0x2dd   : > { %13001 = vst [vmem:[#allocation60_spill] sm:$0xff] %v8591_v23  ;;  %v8595_v9 = vpop.permute.xlu0 %2147 }
 0x2de   : > { %13002 = vst [vmem:[#allocation61_spill] sm:$0xff] %v8595_v9  ;;  %2322 = vrot.lane.b32.xlu1 %v8589_v2, %s6375_s30  ;;  %v6248_v9 = vld [vmem:[#allocation2 + $0xac] sm:$0xff] }
 0x2df   : > { %2320 = vrot.lane.b32.xlu0 %v8593_v31, %s6375_s30 }
 0x2e0   : > { %v8601_v0 = vpop.permute.xlu1 %2153 }
 0x2e1   : > { %13003 = vst [vmem:[#allocation62_spill] sm:$0xff] %v8601_v0  ;;  %v8603_v29 = vpop.permute.xlu0 %2151 }
 0x2e2   : > { %2345 = vrot.lane.b32.xlu1 %v6246_v37, %s6376_s5 }
 0x2e3   : > { %2343 = vrot.lane.b32.xlu0 %v6247_v41, %s6376_s5 }
 0x2e4   : > { %v8607_v23 = vpop.permute.xlu1 %2157 }
 0x2e5   : > { %13004 = vst [vmem:[#allocation63_spill] sm:$0xff] %v8607_v23  ;;  %v8609_v39 = vpop.permute.xlu0 %2155 }
 0x2e6   : > { %13005 = vst [vmem:[#allocation64_spill] sm:$0xff] %v8609_v39  ;;  %2349 = vrot.lane.b32.xlu1 %v8229_v47, %s6376_s5  ;;  %v8660_v39 = vld [vmem:[#allocation2 + $0x10c] sm:$0xff] }
 0x2e7   : > { %2347 = vrot.lane.b32.xlu0 %v6248_v9, %s6376_s5 }
 0x2e8   : > { %v8614_v57 = vpop.permute.xlu1 %2161 }
 0x2e9   : > { %13006 = vst [vmem:[#allocation65_spill] sm:$0xff] %v8614_v57  ;;  %v8616_v0 = vpop.permute.xlu0 %2159 }
 0x2ea   : > { %13007 = vst [vmem:[#allocation66_spill] sm:$0xff] %v8616_v0  ;;  %2353 = vrot.lane.b32.xlu1 %v8259_v52, %s6376_s5 }
 0x2eb   : > { %2351 = vrot.lane.b32.xlu0 %v8218_v44, %s6376_s5 }
 0x2ec   : > { %v8622_v37 = vpop.permute.xlu1 %2165 }
 0x2ed   : > { %13008 = vst [vmem:[#allocation67_spill] sm:$0xff] %v8622_v37  ;;  %v8624_v41 = vpop.permute.xlu0 %2163 }
 0x2ee   : > { %13009 = vst [vmem:[#allocation68_spill] sm:$0xff] %v8624_v41  ;;  %2357 = vrot.lane.b32.xlu1 %v8275_v54, %s6376_s5 }
 0x2ef   : > { %2355 = vrot.lane.b32.xlu0 %v8252_v46, %s6376_s5 }
 0x2f0   : > { %v8630_v9 = vpop.permute.xlu1 %2169 }
 0x2f1   : > { %13010 = vst [vmem:[#allocation69_spill] sm:$0xff] %v8630_v9  ;;  %v8632_v57 = vpop.permute.xlu0 %2167  ;;  %v8646_v9 = vld [vmem:[#allocation2 + $0x104] sm:$0xff] }
 0x2f2   : > { %13011 = vst [vmem:[#allocation70_spill] sm:$0xff] %v8632_v57  ;;  %2361 = vrot.lane.b32.xlu1 %v8287_v18, %s6376_s5 }
 0x2f3   : > { %2359 = vrot.lane.b32.xlu0 %v8270_v35, %s6376_s5 }
 0x2f4   : > { %v8638_v0 = vpop.permute.xlu1 %2192 }
 0x2f5   : > { %13012 = vst [vmem:[#allocation71_spill] sm:$0xff] %v8638_v0  ;;  %v8640_v41 = vpop.permute.xlu0 %2190 }
 0x2f6   : > { %13013 = vst [vmem:[#allocation72_spill] sm:$0xff] %v8640_v41  ;;  %2365 = vrot.lane.b32.xlu1 %v8299_v11, %s6376_s5  ;;  %v8656_v41 = vld [vmem:[#allocation2 + $0x114] sm:$0xff] }
 0x2f7   : > { %2363 = vrot.lane.b32.xlu0 %v8283_v49, %s6376_s5 }
 0x2f8   : > { %v8648_v57 = vpop.permute.xlu1 %2196 }
 0x2f9   : > { %13014 = vst [vmem:[#allocation73_spill] sm:$0xff] %v8648_v57  ;;  %v8650_v37 = vpop.permute.xlu0 %2194 }
 0x2fa   : > { %13015 = vst [vmem:[#allocation74_spill] sm:$0xff] %v8650_v37  ;;  %2369 = vrot.lane.b32.xlu1 %v8646_v9, %s6376_s5 }
 0x2fb   : > { %2367 = vrot.lane.b32.xlu0 %v8295_v50, %s6376_s5 }
 0x2fc   : > { %v8658_v0 = vpop.permute.xlu1 %2200 }
 0x2fd   : > { %13016 = vst [vmem:[#allocation75_spill] sm:$0xff] %v8658_v0  ;;  %v8662_v23 = vpop.permute.xlu0 %2198 }
 0x2fe   : > { %13017 = vst [vmem:[#allocation76_spill] sm:$0xff] %v8662_v23  ;;  %2373 = vrot.lane.b32.xlu1 %v8656_v41, %s6376_s5 }
 0x2ff   : > { %2371 = vrot.lane.b32.xlu0 %v8660_v39, %s6376_s5 }
 0x300   : > { %v8668_v37 = vpop.permute.xlu1 %2204 }
 0x301   : > { %13018 = vst [vmem:[#allocation77_spill] sm:$0xff] %v8668_v37  ;;  %v8671_v57 = vpop.permute.xlu0 %2202 }
 0x302   : > { %13019 = vst [vmem:[#allocation78_spill] sm:$0xff] %v8671_v57  ;;  %2396 = vrot.lane.b32.xlu1 %v8328_v15, %s6377_s6 }
 0x303   : > { %2394 = vrot.lane.b32.xlu0 %v8315_v43, %s6377_s6  ;;  %v8693_v43 = vld [vmem:[%s12414_s3] ss:$0 sm:$0xff] }
 0x304   : > { %v8677_v0 = vpop.permute.xlu1 %2208 }
 0x305   : > { %13020 = vst [vmem:[#allocation79_spill] sm:$0xff] %v8677_v0  ;;  %v8680_v23 = vpop.permute.xlu0 %2206 }
 0x306   : > { %13021 = vst [vmem:[#allocation80_spill] sm:$0xff] %v8680_v23  ;;  %2400 = vrot.lane.b32.xlu1 %v8340_v13, %s6377_s6 }
 0x307   : > { %2398 = vrot.lane.b32.xlu0 %v8324_v7, %s6377_s6 }
 0x308   : > { %v8686_v37 = vpop.permute.xlu1 %2212 }
 0x309   : > { %13022 = vst [vmem:[#allocation81_spill] sm:$0xff] %v8686_v37  ;;  %v8688_v57 = vpop.permute.xlu0 %2210 }
 0x30a   : > { %13023 = vst [vmem:[#allocation82_spill] sm:$0xff] %v8688_v57  ;;  %2404 = vrot.lane.b32.xlu1 %v8352_v1, %s6377_s6 }
 0x30b   : > { %2402 = vrot.lane.b32.xlu0 %v8336_v21, %s6377_s6  ;;  %v5999_v7 = vpop.f32.mrb[0].mxu0 }
 0x30c   : > { %v1668_v15 = vadd.f32 %v5999_v7, %v8693_v43  ;;  %v1662_v13 = vpop.f32.mrb[1].mxu0  ;;  %v8705_v57 = vpop.permute.xlu1 %2216 }
 0x30d   : > { %13024 = vst [vmem:[#allocation83_spill] sm:$0xff] %v8705_v57  ;;  %v1663_v37 = vadd.f32 %v8693_v43, %v1662_v13  ;;  %v8708_v23 = vpop.permute.xlu0 %2214 }
 0x30e   : > { %13025 = vst [vmem:[#allocation84_spill] sm:$0xff] %v8708_v23  ;;  %1742 = vst.msk [vmem:[%s8702_s13 + $0x8] sm:$0xff] %vm1316_vm4, %v1668_v15  ;;  %2408 = vrot.lane.b32.xlu1 %v8364_v22, %s6377_s6 }
 0x30f   : > { %1741 = vst.msk [vmem:[%s8702_s13] sm:$0xff] %vm1316_vm4, %v1663_v37  ;;  %2406 = vrot.lane.b32.xlu0 %v8348_v5, %s6377_s6  ;;  %v6002_v21 = vpop.f32.mrb[2].mxu0 }
 0x310   : > { %v1678_v7 = vadd.f32 %v6002_v21, %v8693_v43  ;;  %v1672_v0 = vpop.f32.mrb[3].mxu0  ;;  %v8719_v57 = vpop.permute.xlu1 %2220 }
 0x311   : > { %v1673_v13 = vadd.f32 %v8693_v43, %v1672_v0  ;;  %v8722_v23 = vpop.permute.xlu0 %2218 }
 0x312   : > { %13026 = vst [vmem:[#allocation85_spill] sm:$0xff] %v8722_v23  ;;  %1744 = vst.msk [vmem:[%s8702_s13 + $0x18] sm:$0xff] %vm1316_vm4, %v1678_v7  ;;  %2412 = vrot.lane.b32.xlu1 %v8376_v8, %s6377_s6  ;;  %v1852_v7 = vld [vmem:[#allocation2 + $0x118] sm:$0xff] }
 0x313   : > { %1743 = vst.msk [vmem:[%s8702_s13 + $0x10] sm:$0xff] %vm1316_vm4, %v1673_v13  ;;  %2410 = vrot.lane.b32.xlu0 %v8360_v12, %s6377_s6  ;;  %v6005_v5 = vpop.f32.mrb[4].mxu0 }
 0x314   : > { %v1688_v37 = vadd.f32 %v6005_v5, %v8693_v43  ;;  %v1682_v15 = vpop.f32.mrb[5].mxu0  ;;  %v8733_v21 = vpop.permute.xlu1 %2243 }
 0x315   : > { %13027 = vst [vmem:[#allocation86_spill] sm:$0xff] %v8733_v21  ;;  %v1683_v0 = vadd.f32 %v8693_v43, %v1682_v15  ;;  %v8736_v23 = vpop.permute.xlu0 %2241 }
 0x316   : > { %13028 = vst [vmem:[#allocation87_spill] sm:$0xff] %v8736_v23  ;;  %1746 = vst.msk [vmem:[%s8702_s13 + $0x28] sm:$0xff] %vm1316_vm4, %v1688_v37  ;;  %2416 = vrot.lane.b32.xlu1 %v8386_v28, %s6377_s6  ;;  %v1854_v28 = vld [vmem:[#allocation2 + $0x128] sm:$0xff] }
 0x317   : > { %1745 = vst.msk [vmem:[%s8702_s13 + $0x20] sm:$0xff] %vm1316_vm4, %v1683_v0  ;;  %2414 = vrot.lane.b32.xlu0 %v8370_v3, %s6377_s6  ;;  %v6008_v12 = vpop.f32.mrb[6].mxu0 }
 0x318   : > { %v1698_v13 = vadd.f32 %v6008_v12, %v8693_v43  ;;  %v1692_v5 = vpop.f32.mrb[7].mxu0  ;;  %v8747_v21 = vpop.permute.xlu1 %2247 }
 0x319   : > { %13029 = vst [vmem:[#allocation88_spill] sm:$0xff] %v8747_v21  ;;  %v1693_v15 = vadd.f32 %v8693_v43, %v1692_v5  ;;  %v8750_v37 = vpop.permute.xlu0 %2245  ;;  %v1853_v5 = vld [vmem:[#allocation2 + $0x120] sm:$0xff] }
 0x31a   : > { %13030 = vst [vmem:[#allocation89_spill] sm:$0xff] %v8750_v37  ;;  %1748 = vst.msk [vmem:[%s8702_s13 + $0x38] sm:$0xff] %vm1316_vm4, %v1698_v13  ;;  %2420 = vrot.lane.b32.xlu1 %v1852_v7, %s6377_s6 }
 0x31b   : > { %1747 = vst.msk [vmem:[%s8702_s13 + $0x30] sm:$0xff] %vm1316_vm4, %v1693_v15  ;;  %2418 = vrot.lane.b32.xlu0 %v8382_v25, %s6377_s6  ;;  %v6011_v3 = vpop.f32.mrb[8].mxu0 }
 0x31c   : > { %v1708_v0 = vadd.f32 %v6011_v3, %v8693_v43  ;;  %v1702_v12 = vpop.f32.mrb[9].mxu0  ;;  %v8760_v21 = vpop.permute.xlu1 %2251 }
 0x31d   : > { %13031 = vst [vmem:[#allocation90_spill] sm:$0xff] %v8760_v21  ;;  %v1703_v37 = vadd.f32 %v8693_v43, %v1702_v12  ;;  %v8763_v13 = vpop.permute.xlu0 %2249 }
 0x31e   : > { %13032 = vst [vmem:[#allocation91_spill] sm:$0xff] %v8763_v13  ;;  %1750 = vst.msk [vmem:[%s8702_s13 + $0x48] sm:$0xff] %vm1316_vm4, %v1708_v0  ;;  %2424 = vrot.lane.b32.xlu1 %v1854_v28, %s6377_s6  ;;  %v6249_v28 = vld [vmem:[#allocation2 + $0xb9] sm:$0xff] }
 0x31f   : > { %1749 = vst.msk [vmem:[%s8702_s13 + $0x40] sm:$0xff] %vm1316_vm4, %v1703_v37  ;;  %2422 = vrot.lane.b32.xlu0 %v1853_v5, %s6377_s6  ;;  %v6014_v25 = vpop.f32.mrb[10].mxu0  ;;  %v6250_v37 = vld [vmem:[#allocation2 + $0xb1] sm:$0xff] }
 0x320   : > { %v1718_v7 = vadd.f32 %v6014_v25, %v8693_v43  ;;  %v1712_v15 = vpop.f32.mrb[11].mxu0  ;;  %v8772_v3 = vpop.permute.xlu1 %2255 }
 0x321   : > { %13033 = vst [vmem:[#allocation92_spill] sm:$0xff] %v8772_v3  ;;  %v1713_v21 = vadd.f32 %v8693_v43, %v1712_v15  ;;  %v8775_v12 = vpop.permute.xlu0 %2253 }
 0x322   : > { %13034 = vst [vmem:[#allocation93_spill] sm:$0xff] %v8775_v12  ;;  %1752 = vst.msk [vmem:[%s8702_s13 + $0x58] sm:$0xff] %vm1316_vm4, %v1718_v7  ;;  %2447 = vrot.lane.b32.xlu1 %v6249_v28, %s6378_s7  ;;  %v6251_v7 = vld [vmem:[#allocation2 + $0xc9] sm:$0xff]  ;;  %v297_v28 = vld [vmem:[%s6423_s22 + $0x140] sm:$0xff] }
 0x323   : > { %1751 = vst.msk [vmem:[%s8702_s13 + $0x50] sm:$0xff] %vm1316_vm4, %v1713_v21  ;;  %2445 = vrot.lane.b32.xlu0 %v6250_v37, %s6378_s7  ;;  %v296_v21 = vld [vmem:[%s6423_s22 + $0x138] sm:$0xff]  ;;  %v6252_v37 = vld [vmem:[#allocation2 + $0xc1] sm:$0xff] }
 0x324   : > { %v8784_v15 = vpop.permute.xlu1 %2259  ;;  %361 = vst.msk [vmem:[#allocation2 + $0x138] sm:$0xff] %vm321_vm0, %v296_v21  ;;  %362 = vst.msk [vmem:[#allocation2 + $0x140] sm:$0xff] %vm321_vm0, %v297_v28  ;;  %v299_v21 = vld [vmem:[%s6423_s22 + $0x150] sm:$0xff] }
 0x325   : > { %v6017_v0 = vpop.f32.mrb[12].mxu0  ;;  %13035 = vst [vmem:[#allocation94_spill] sm:$0xff] %v8784_v15  ;;  %v8787_v3 = vpop.permute.xlu0 %2257  ;;  %v6254_v28 = vld [vmem:[#allocation2 + $0xd1] sm:$0xff]  ;;  %364 = vst.msk [vmem:[#allocation2 + $0x150] sm:$0xff] %vm321_vm0, %v299_v21 }
 0x326   : > { %v1728_v5 = vadd.f32 %v6017_v0, %v8693_v43  ;;  %v1722_v25 = vpop.f32.mrb[13].mxu0  ;;  %13036 = vst [vmem:[#allocation95_spill] sm:$0xff] %v8787_v3  ;;  %2451 = vrot.lane.b32.xlu1 %v6251_v7, %s6378_s7 }
 0x327   : > { %v1723_v12 = vadd.f32 %v8693_v43, %v1722_v25  ;;  %2449 = vrot.lane.b32.xlu0 %v6252_v37, %s6378_s7  ;;  %v298_v37 = vld [vmem:[%s6423_s22 + $0x148] sm:$0xff] }
 0x328   : > { %1754 = vst.msk [vmem:[%s8702_s13 + $0x68] sm:$0xff] %vm1316_vm4, %v1728_v5  ;;  %v8800_v3 = vpop.permute.xlu1 %2263 }
 0x329   : > { %1753 = vst.msk [vmem:[%s8702_s13 + $0x60] sm:$0xff] %vm1316_vm4, %v1723_v12  ;;  %v6020_v0 = vpop.f32.mrb[14].mxu0  ;;  %13037 = vst [vmem:[#allocation96_spill] sm:$0xff] %v8800_v3  ;;  %v8803_v15 = vpop.permute.xlu0 %2261  ;;  %v6253_v12 = vld [vmem:[#allocation2 + $0xd9] sm:$0xff] }
 0x32a   : > { %v1738_v5 = vadd.f32 %v6020_v0, %v8693_v43  ;;  %v1732_v25 = vpop.f32.mrb[15].mxu0  ;;  %13038 = vst [vmem:[#allocation97_spill] sm:$0xff] %v8803_v15  ;;  %2455 = vrot.lane.b32.xlu1 %v6253_v12, %s6378_s7  ;;  %363 = vst.msk [vmem:[#allocation2 + $0x148] sm:$0xff] %vm321_vm0, %v298_v37  ;;  %v6256_v12 = vld [vmem:[#allocation2 + $0xe1] sm:$0xff] }
 0x32b   : > { %v1733_v7 = vadd.f32 %v8693_v43, %v1732_v25  ;;  %2453 = vrot.lane.b32.xlu0 %v6254_v28, %s6378_s7  ;;  %v300_v25 = vld [vmem:[%s6423_s22 + $0x158] sm:$0xff]  ;;  %v8861_v15 = vld [vmem:[#allocation2 + $0x121] sm:$0xff] }
 0x32c   : > { %1756 = vst.msk [vmem:[%s8702_s13 + $0x78] sm:$0xff] %vm1316_vm4, %v1738_v5  ;;  %v8815_v43 = vpop.permute.xlu1 %2267  ;;  %v6255_v5 = vld [vmem:[#allocation2 + $0xe9] sm:$0xff]  ;;  %v6257_v28 = vld [vmem:[#allocation2 + $0xf9] sm:$0xff] }
 0x32d   : > { %1755 = vst.msk [vmem:[%s8702_s13 + $0x70] sm:$0xff] %vm1316_vm4, %v1733_v7  ;;  %13039 = vst [vmem:[#allocation98_spill] sm:$0xff] %v8815_v43  ;;  %v8817_v0 = vpop.permute.xlu0 %2265  ;;  %v301_v7 = vld [vmem:[%s6423_s22 + $0x160] sm:$0xff]  ;;  %v303_v43 = vld [vmem:[%s6423_s22 + $0x170] sm:$0xff] }
 0x32e   : > { %13040 = vst [vmem:[#allocation99_spill] sm:$0xff] %v8817_v0  ;;  %2459 = vrot.lane.b32.xlu1 %v6255_v5, %s6378_s7  ;;  %365 = vst.msk [vmem:[#allocation2 + $0x158] sm:$0xff] %vm321_vm0, %v300_v25  ;;  %v302_v0 = vld [vmem:[%s6423_s22 + $0x168] sm:$0xff]  ;;  %v6258_v5 = vld [vmem:[#allocation2 + $0xf1] sm:$0xff] }
 0x32f   : > { %2457 = vrot.lane.b32.xlu0 %v6256_v12, %s6378_s7  ;;  %366 = vst.msk [vmem:[#allocation2 + $0x160] sm:$0xff] %vm321_vm0, %v301_v7  ;;  %367 = vst.msk [vmem:[#allocation2 + $0x168] sm:$0xff] %vm321_vm0, %v302_v0  ;;  %v304_v7 = vld [vmem:[%s6423_s22 + $0x178] sm:$0xff] }
 0x330   : > { %v8824_v37 = vpop.permute.xlu1 %2271  ;;  %368 = vst.msk [vmem:[#allocation2 + $0x170] sm:$0xff] %vm321_vm0, %v303_v43  ;;  %369 = vst.msk [vmem:[#allocation2 + $0x178] sm:$0xff] %vm321_vm0, %v304_v7  ;;  %v8857_v43 = vld [vmem:[#allocation2 + $0x129] sm:$0xff] }
 0x331   : > { %13041 = vst [vmem:[#allocation100_spill] sm:$0xff] %v8824_v37  ;;  %v8827_v21 = vpop.permute.xlu0 %2269 }
 0x332   : > { %13042 = vst [vmem:[#allocation101_spill] sm:$0xff] %v8827_v21  ;;  %2463 = vrot.lane.b32.xlu1 %v6257_v28, %s6378_s7  ;;  %v305_v21 = vld [vmem:[%s6423_s22 + $0x180] sm:$0xff] }
 0x333   : > { %2461 = vrot.lane.b32.xlu0 %v6258_v5, %s6378_s7  ;;  %v8845_v28 = vld [vmem:[#allocation2 + $0x119] sm:$0xff]  ;;  %370 = vst.msk [vmem:[#allocation2 + $0x180] sm:$0xff] %vm321_vm0, %v305_v21 }
 0x334   : > { %v8834_v12 = vpop.permute.xlu1 %2294 }
 0x335   : > { %13043 = vst [vmem:[#allocation102_spill] sm:$0xff] %v8834_v12  ;;  %v8837_v25 = vpop.permute.xlu0 %2292  ;;  %v6262_v12 = vld [vmem:[#allocation2 + $0xc2] sm:$0xff] }
 0x336   : > { %13044 = vst [vmem:[#allocation103_spill] sm:$0xff] %v8837_v25  ;;  %2467 = vrot.lane.b32.xlu1 %v8457_v10, %s6378_s7 }
 0x337   : > { %2465 = vrot.lane.b32.xlu0 %v8441_v14, %s6378_s7 }
 0x338   : > { %v8849_v0 = vpop.permute.xlu1 %2298 }
 0x339   : > { %13045 = vst [vmem:[#allocation104_spill] sm:$0xff] %v8849_v0  ;;  %v8851_v5 = vpop.permute.xlu0 %2296  ;;  %v6260_v0 = vld [vmem:[#allocation2 + $0xb2] sm:$0xff] }
 0x33a   : > { %13046 = vst [vmem:[#allocation105_spill] sm:$0xff] %v8851_v5  ;;  %2471 = vrot.lane.b32.xlu1 %v8845_v28, %s6378_s7  ;;  %v6259_v5 = vld [vmem:[#allocation2 + $0xba] sm:$0xff] }
 0x33b   : > { %2469 = vrot.lane.b32.xlu0 %v8453_v19, %s6378_s7 }
 0x33c   : > { %v8859_v37 = vpop.permute.xlu1 %2302 }
 0x33d   : > { %13047 = vst [vmem:[#allocation106_spill] sm:$0xff] %v8859_v37  ;;  %v8863_v3 = vpop.permute.xlu0 %2300 }
 0x33e   : > { %13048 = vst [vmem:[#allocation28_spill] sm:$0xff] %v8863_v3  ;;  %2475 = vrot.lane.b32.xlu1 %v8857_v43, %s6378_s7  ;;  %v6261_v3 = vld [vmem:[#allocation2 + $0xca] sm:$0xff] }
 0x33f   : > { %2473 = vrot.lane.b32.xlu0 %v8861_v15, %s6378_s7 }
 0x340   : > { %v8869_v21 = vpop.permute.xlu1 %2306 }
 0x341   : > { %13049 = vst [vmem:[#allocation107_spill] sm:$0xff] %v8869_v21  ;;  %v8871_v7 = vpop.permute.xlu0 %2304 }
 0x342   : > { %13050 = vst [vmem:[#allocation32_spill] sm:$0xff] %v8871_v7  ;;  %2498 = vrot.lane.b32.xlu1 %v6259_v5, %s6379_s8  ;;  %v6263_v7 = vld [vmem:[#allocation2 + $0xda] sm:$0xff]  ;;  %v6264_v5 = vld [vmem:[#allocation2 + $0xd2] sm:$0xff] }
 0x343   : > { %2496 = vrot.lane.b32.xlu0 %v6260_v0, %s6379_s8 }
 0x344   : > { %v8875_v37 = vpop.permute.xlu1 %2310 }
 0x345   : > { %13051 = vst [vmem:[#allocation26_spill] sm:$0xff] %v8875_v37  ;;  %v8877_v25 = vpop.permute.xlu0 %2308 }
 0x346   : > { %13052 = vst [vmem:[#allocation108_spill] sm:$0xff] %v8877_v25  ;;  %2502 = vrot.lane.b32.xlu1 %v6261_v3, %s6379_s8  ;;  %v6265_v25 = vld [vmem:[#allocation2 + $0xea] sm:$0xff]  ;;  %v6266_v3 = vld [vmem:[#allocation2 + $0xe2] sm:$0xff] }
 0x347   : > { %2500 = vrot.lane.b32.xlu0 %v6262_v12, %s6379_s8 }
 0x348   : > { %v8881_v13 = vpop.permute.xlu1 %2314 }
 0x349   : > { %13053 = vst [vmem:[#allocation109_spill] sm:$0xff] %v8881_v13  ;;  %v8883_v21 = vpop.permute.xlu0 %2312 }
 0x34a   : > { %13054 = vst [vmem:[#allocation110_spill] sm:$0xff] %v8883_v21  ;;  %2506 = vrot.lane.b32.xlu1 %v6263_v7, %s6379_s8  ;;  %v6267_v21 = vld [vmem:[#allocation2 + $0xfa] sm:$0xff]  ;;  %v6268_v7 = vld [vmem:[#allocation2 + $0xf2] sm:$0xff] }
 0x34b   : > { %2504 = vrot.lane.b32.xlu0 %v6264_v5, %s6379_s8 }
 0x34c   : > { %v8887_v0 = vpop.permute.xlu1 %2318 }
 0x34d   : > { %13055 = vst [vmem:[#allocation111_spill] sm:$0xff] %v8887_v0  ;;  %v8889_v37 = vpop.permute.xlu0 %2316 }
 0x34e   : > { %13056 = vst [vmem:[#allocation4_spill] sm:$0xff] %v8889_v37  ;;  %2510 = vrot.lane.b32.xlu1 %v6265_v25, %s6379_s8  ;;  %v8907_v25 = vld [vmem:[#allocation2 + $0x11a] sm:$0xff] }
 0x34f   : > { %2508 = vrot.lane.b32.xlu0 %v6266_v3, %s6379_s8 }
 0x350   : > { %v8893_v12 = vpop.permute.xlu1 %2322 }
 0x351   : > { %13057 = vst [vmem:[#allocation112_spill] sm:$0xff] %v8893_v12  ;;  %v8895_v13 = vpop.permute.xlu0 %2320  ;;  %v8921_v12 = vld [vmem:[#allocation2 + $0x122] sm:$0xff] }
 0x352   : > { %13058 = vst [vmem:[#allocation113_spill] sm:$0xff] %v8895_v13  ;;  %2514 = vrot.lane.b32.xlu1 %v6267_v21, %s6379_s8  ;;  %v8917_v21 = vld [vmem:[#allocation2 + $0x12a] sm:$0xff] }
 0x353   : > { %2512 = vrot.lane.b32.xlu0 %v6268_v7, %s6379_s8 }
 0x354   : > { %v8899_v5 = vpop.permute.xlu1 %2345 }
 0x355   : > { %13059 = vst [vmem:[#allocation114_spill] sm:$0xff] %v8899_v5  ;;  %v8901_v0 = vpop.permute.xlu0 %2343  ;;  %v6272_v5 = vld [vmem:[#allocation2 + $0xc3] sm:$0xff] }
 0x356   : > { %13060 = vst [vmem:[#allocation116_spill] sm:$0xff] %v8901_v0  ;;  %2518 = vrot.lane.b32.xlu1 %v8526_v63, %s6379_s8 }
 0x357   : > { %2516 = vrot.lane.b32.xlu0 %v8511_v60, %s6379_s8 }
 0x358   : > { %v8909_v3 = vpop.permute.xlu1 %2349 }
 0x359   : > { %13061 = vst [vmem:[#allocation179_spill] sm:$0xff] %v8909_v3  ;;  %v8911_v13 = vpop.permute.xlu0 %2347  ;;  %v6269_v3 = vld [vmem:[#allocation2 + $0xbb] sm:$0xff] }
 0x35a   : > { %13062 = vst [vmem:[#allocation117_spill] sm:$0xff] %v8911_v13  ;;  %2522 = vrot.lane.b32.xlu1 %v8907_v25, %s6379_s8 }
 0x35b   : > { %2520 = vrot.lane.b32.xlu0 %v8522_v33, %s6379_s8  ;;  %v6270_v33 = vld [vmem:[#allocation2 + $0xb3] sm:$0xff] }
 0x35c   : > { %v8919_v7 = vpop.permute.xlu1 %2353 }
 0x35d   : > { %13063 = vst [vmem:[#allocation128_spill] sm:$0xff] %v8919_v7  ;;  %v8923_v37 = vpop.permute.xlu0 %2351 }
 0x35e   : > { %13064 = vst [vmem:[#allocation181_spill] sm:$0xff] %v8923_v37  ;;  %2526 = vrot.lane.b32.xlu1 %v8917_v21, %s6379_s8  ;;  %v6271_v37 = vld [vmem:[#allocation2 + $0xcb] sm:$0xff] }
 0x35f   : > { %2524 = vrot.lane.b32.xlu0 %v8921_v12, %s6379_s8 }
 0x360   : > { %v8929_v60 = vpop.permute.xlu1 %2357 }
 0x361   : > { %13065 = vst [vmem:[#allocation7_spill] sm:$0xff] %v8929_v60  ;;  %v8931_v13 = vpop.permute.xlu0 %2355 }
 0x362   : > { %13066 = vst [vmem:[#allocation129_spill] sm:$0xff] %v8931_v13  ;;  %2549 = vrot.lane.b32.xlu1 %v6269_v3, %s6380_s9  ;;  %v6273_v13 = vld [vmem:[#allocation2 + $0xdb] sm:$0xff]  ;;  %v6274_v3 = vld [vmem:[#allocation2 + $0xd3] sm:$0xff] }
 0x363   : > { %2547 = vrot.lane.b32.xlu0 %v6270_v33, %s6380_s9 }
 0x364   : > { %v8935_v7 = vpop.permute.xlu1 %2361 }
 0x365   : > { %13067 = vst [vmem:[#allocation145_spill] sm:$0xff] %v8935_v7  ;;  %v8937_v0 = vpop.permute.xlu0 %2359 }
 0x366   : > { %13068 = vst [vmem:[#allocation8_spill] sm:$0xff] %v8937_v0  ;;  %2553 = vrot.lane.b32.xlu1 %v6271_v37, %s6380_s9  ;;  %v6275_v0 = vld [vmem:[#allocation2 + $0xeb] sm:$0xff]  ;;  %v6276_v37 = vld [vmem:[#allocation2 + $0xe3] sm:$0xff] }
 0x367   : > { %2551 = vrot.lane.b32.xlu0 %v6272_v5, %s6380_s9 }
 0x368   : > { %v8941_v23 = vpop.permute.xlu1 %2365 }
 0x369   : > { %13069 = vst [vmem:[#allocation146_spill] sm:$0xff] %v8941_v23  ;;  %v8943_v60 = vpop.permute.xlu0 %2363 }
 0x36a   : > { %13070 = vst [vmem:[#allocation159_spill] sm:$0xff] %v8943_v60  ;;  %2557 = vrot.lane.b32.xlu1 %v6273_v13, %s6380_s9  ;;  %v6277_v60 = vld [vmem:[#allocation2 + $0xfb] sm:$0xff]  ;;  %v6278_v13 = vld [vmem:[#allocation2 + $0xf3] sm:$0xff] }
 0x36b   : > { %2555 = vrot.lane.b32.xlu0 %v6274_v3, %s6380_s9 }
 0x36c   : > { %v8947_v33 = vpop.permute.xlu1 %2369 }
 0x36d   : > { %13071 = vst [vmem:[#allocation118_spill] sm:$0xff] %v8947_v33  ;;  %v8949_v7 = vpop.permute.xlu0 %2367 }
 0x36e   : > { %13072 = vst [vmem:[#allocation161_spill] sm:$0xff] %v8949_v7  ;;  %2561 = vrot.lane.b32.xlu1 %v6275_v0, %s6380_s9  ;;  %v8967_v0 = vld [vmem:[#allocation2 + $0x11b] sm:$0xff] }
 0x36f   : > { %2559 = vrot.lane.b32.xlu0 %v6276_v37, %s6380_s9 }
 0x370   : > { %v8953_v5 = vpop.permute.xlu1 %2373 }
 0x371   : > { %13073 = vst [vmem:[#allocation183_spill] sm:$0xff] %v8953_v5  ;;  %v8955_v23 = vpop.permute.xlu0 %2371 }
 0x372   : > { %13074 = vst [vmem:[#allocation119_spill] sm:$0xff] %v8955_v23  ;;  %2565 = vrot.lane.b32.xlu1 %v6277_v60, %s6380_s9  ;;  %v8977_v60 = vld [vmem:[#allocation2 + $0x12b] sm:$0xff] }
 0x373   : > { %2563 = vrot.lane.b32.xlu0 %v6278_v13, %s6380_s9 }
 0x374   : > { %v8959_v3 = vpop.permute.xlu1 %2396 }
 0x375   : > { %v8961_v33 = vpop.permute.xlu0 %2394 }
 0x376   : > { %2569 = vrot.lane.b32.xlu1 %v8593_v31, %s6380_s9  ;;  %v8981_v31 = vld [vmem:[#allocation2 + $0x123] sm:$0xff] }
 0x377   : > { %2567 = vrot.lane.b32.xlu0 %v8579_v20, %s6380_s9 }
 0x378   : > { %v8969_v37 = vpop.permute.xlu1 %2400 }
 0x379   : > { %v8971_v23 = vpop.permute.xlu0 %2398 }
 0x37a   : > { %2573 = vrot.lane.b32.xlu1 %v8967_v0, %s6380_s9 }
 0x37b   : > { %2571 = vrot.lane.b32.xlu0 %v8589_v2, %s6380_s9 }
 0x37c   : > { %v8979_v13 = vpop.permute.xlu1 %2404 }
 0x37d   : > { %13075 = vst [vmem:[#allocation130_spill] sm:$0xff] %v8979_v13  ;;  %v8983_v5 = vpop.permute.xlu0 %2402 }
 0x37e   : > { %13076 = vst [vmem:[#allocation185_spill] sm:$0xff] %v8983_v5  ;;  %2577 = vrot.lane.b32.xlu1 %v8977_v60, %s6380_s9 }
 0x37f   : > { %2575 = vrot.lane.b32.xlu0 %v8981_v31, %s6380_s9 }
 0x380   : > { %v8989_v20 = vpop.permute.xlu1 %2408 }
 0x381   : > { %13077 = vst [vmem:[#allocation17_spill] sm:$0xff] %v8989_v20  ;;  %v8991_v7 = vpop.permute.xlu0 %2406 }
 0x382   : > { %13078 = vst [vmem:[#allocation131_spill] sm:$0xff] %v8991_v7  ;;  %2600 = vrot.lane.b32.xlu1 %v8218_v44, %s6382_s18  ;;  %v6281_v7 = vld [vmem:[#allocation2 + $0xa0] sm:$0xff] }
 0x383   : > { %2598 = vrot.lane.b32.xlu0 %v8229_v47, %s6382_s18 }
 0x384   : > { %v8997_v2 = vpop.permute.xlu1 %2412 }
 0x385   : > { %13079 = vst [vmem:[#allocation147_spill] sm:$0xff] %v8997_v2  ;;  %v8999_v13 = vpop.permute.xlu0 %2410  ;;  %v6279_v2 = vld [vmem:[#allocation2 + $0x98] sm:$0xff] }
 0x386   : > { %13080 = vst [vmem:[#allocation148_spill] sm:$0xff] %v8999_v13  ;;  %2604 = vrot.lane.b32.xlu1 %v8252_v46, %s6382_s18 }
 0x387   : > { %2602 = vrot.lane.b32.xlu0 %v8259_v52, %s6382_s18 }
 0x388   : > { %v9005_v5 = vpop.permute.xlu1 %2416 }
 0x389   : > { %13081 = vst [vmem:[#allocation162_spill] sm:$0xff] %v9005_v5  ;;  %v9007_v20 = vpop.permute.xlu0 %2414  ;;  %v9139_v5 = vld [vmem:[#allocation2 + $0x171] sm:$0xff] }
 0x38a   : > { %13082 = vst [vmem:[#allocation120_spill] sm:$0xff] %v9007_v20  ;;  %2608 = vrot.lane.b32.xlu1 %v8270_v35, %s6382_s18  ;;  %13109 = vst [vmem:[#allocation191_spill] sm:$0xff] %v9139_v5 }
 0x38b   : > { %2606 = vrot.lane.b32.xlu0 %v8275_v54, %s6382_s18 }
 0x38c   : > { %v9013_v44 = vpop.permute.xlu1 %2420 }
 0x38d   : > { %13083 = vst [vmem:[#allocation163_spill] sm:$0xff] %v9013_v44  ;;  %v9015_v47 = vpop.permute.xlu0 %2418 }
 0x38e   : > { %13084 = vst [vmem:[#allocation186_spill] sm:$0xff] %v9015_v47  ;;  %2612 = vrot.lane.b32.xlu1 %v8283_v49, %s6382_s18  ;;  %v9037_v49 = vld [vmem:[#allocation2 + $0x11c] sm:$0xff] }
 0x38f   : > { %2610 = vrot.lane.b32.xlu0 %v8287_v18, %s6382_s18  ;;  %13087 = vst [vmem:[#allocation187_spill] sm:$0xff] %v9037_v49 }
 0x390   : > { %v9021_v46 = vpop.permute.xlu1 %2424 }
 0x391   : > { %13085 = vst [vmem:[#allocation121_spill] sm:$0xff] %v9021_v46  ;;  %v9023_v52 = vpop.permute.xlu0 %2422 }
 0x392   : > { %13086 = vst [vmem:[#allocation132_spill] sm:$0xff] %v9023_v52  ;;  %2616 = vrot.lane.b32.xlu1 %v8295_v50, %s6382_s18  ;;  %v9047_v50 = vld [vmem:[#allocation2 + $0x12c] sm:$0xff] }
 0x393   : > { %2614 = vrot.lane.b32.xlu0 %v8299_v11, %s6382_s18  ;;  %13088 = vst [vmem:[#allocation133_spill] sm:$0xff] %v9047_v50 }
 0x394   : > { %v9029_v35 = vpop.permute.xlu1 %2447 }
 0x395   : > { %v9031_v54 = vpop.permute.xlu0 %2445 }
 0x396   : > { %2620 = vrot.lane.b32.xlu1 %v8660_v39, %s6382_s18  ;;  %v9051_v39 = vld [vmem:[#allocation2 + $0x124] sm:$0xff] }
 0x397   : > { %2618 = vrot.lane.b32.xlu0 %v8646_v9, %s6382_s18  ;;  %13089 = vst [vmem:[#allocation149_spill] sm:$0xff] %v9051_v39 }
 0x398   : > { %v9039_v18 = vpop.permute.xlu1 %2451 }
 0x399   : > { %v9041_v52 = vpop.permute.xlu0 %2449 }
 0x39a   : > { %2624 = vrot.lane.b32.xlu1 %v9037_v49, %s6382_s18  ;;  %v9087_v49 = vld [vmem:[#allocation2 + $0x131] sm:$0xff] }
 0x39b   : > { %2622 = vrot.lane.b32.xlu0 %v8656_v41, %s6382_s18  ;;  %13098 = vst [vmem:[#allocation136_spill] sm:$0xff] %v9087_v49 }
 0x39c   : > { %v9049_v11 = vpop.permute.xlu1 %2455 }
 0x39d   : > { %v9053_v46 = vpop.permute.xlu0 %2453 }
 0x39e   : > { %2628 = vrot.lane.b32.xlu1 %v9047_v50, %s6382_s18 }
 0x39f   : > { %2626 = vrot.lane.b32.xlu0 %v9051_v39, %s6382_s18 }
 0x3a0   : > { %v9059_v9 = vpop.permute.xlu1 %2459 }
 0x3a1   : > { %13090 = vst [vmem:[#allocation150_spill] sm:$0xff] %v9059_v9  ;;  %v9061_v47 = vpop.permute.xlu0 %2457 }
 0x3a2   : > { %13091 = vst [vmem:[#allocation164_spill] sm:$0xff] %v9061_v47  ;;  %3207 = vrot.lane.b32.xlu1 %v8457_v10, %s6368_s23  ;;  %v6280_v47 = vld [vmem:[#allocation2 + $0xa8] sm:$0xff] }
 0x3a3   : > { %3205 = vrot.lane.b32.xlu0 %v8441_v14, %s6368_s23  ;;  %v9083_v14 = vld [vmem:[#allocation2 + $0x139] sm:$0xff]  ;;  %v2651_v9 = vsel %vm321_vm0, %v6280_v47, %v8297_v4  ;;  %v6284_v4 = vld [vmem:[#allocation2 + $0xc8] sm:$0xff] }
 0x3a4   : > { %v9067_v41 = vpop.permute.xlu1 %2463  ;;  %13096 = vst [vmem:[#allocation135_spill] sm:$0xff] %v9083_v14 }
 0x3a5   : > { %13092 = vst [vmem:[#allocation122_spill] sm:$0xff] %v9067_v41  ;;  %v9069_v44 = vpop.permute.xlu0 %2461  ;;  %v3113_v41 = vld [vmem:[#allocation2 + $0x112] sm:$0xff] }
 0x3a6   : > { %13093 = vst [vmem:[#allocation165_spill] sm:$0xff] %v9069_v44  ;;  %3211 = vrot.lane.b32.xlu1 %v8845_v28, %s6368_s23 }
 0x3a7   : > { %3209 = vrot.lane.b32.xlu0 %v8453_v19, %s6368_s23  ;;  %v9095_v19 = vld [vmem:[#allocation2 + $0x149] sm:$0xff] }
 0x3a8   : > { %v9075_v39 = vpop.permute.xlu1 %2467  ;;  %13100 = vst [vmem:[#allocation3_spill] sm:$0xff] %v9095_v19 }
 0x3a9   : > { %13094 = vst [vmem:[#allocation188_spill] sm:$0xff] %v9075_v39  ;;  %v9077_v50 = vpop.permute.xlu0 %2465  ;;  %v306_v39 = vld [vmem:[%s6423_s22 + $0x188] sm:$0xff] }
 0x3aa   : > { %13095 = vst [vmem:[#allocation123_spill] sm:$0xff] %v9077_v50  ;;  %3215 = vrot.lane.b32.xlu1 %v8857_v43, %s6368_s23  ;;  %371 = vst.msk [vmem:[#allocation2 + $0x188] sm:$0xff] %vm321_vm0, %v306_v39 }
 0x3ab   : > { %3213 = vrot.lane.b32.xlu0 %v8861_v15, %s6368_s23  ;;  %v9099_v15 = vld [vmem:[#allocation2 + $0x141] sm:$0xff] }
 0x3ac   : > { %v9085_v10 = vpop.permute.xlu1 %2471  ;;  %13102 = vst [vmem:[#allocation166_spill] sm:$0xff] %v9099_v15 }
 0x3ad   : > { %13097 = vst [vmem:[#allocation189_spill] sm:$0xff] %v9085_v10  ;;  %v9089_v28 = vpop.permute.xlu0 %2469  ;;  %v9111_v10 = vld [vmem:[#allocation2 + $0x151] sm:$0xff] }
 0x3ae   : > { %13099 = vst [vmem:[#allocation151_spill] sm:$0xff] %v9089_v28  ;;  %3219 = vrot.lane.b32.xlu1 %v9083_v14, %s6368_s23  ;;  %v9107_v28 = vld [vmem:[#allocation2 + $0x159] sm:$0xff]  ;;  %13105 = vst [vmem:[#allocation167_spill] sm:$0xff] %v9111_v10 }
 0x3af   : > { %3217 = vrot.lane.b32.xlu0 %v9087_v49, %s6368_s23  ;;  %13104 = vst [vmem:[#allocation124_spill] sm:$0xff] %v9107_v28 }
 0x3b0   : > { %v9097_v43 = vpop.permute.xlu1 %2475 }
 0x3b1   : > { %13101 = vst [vmem:[#allocation152_spill] sm:$0xff] %v9097_v43  ;;  %v9101_v50 = vpop.permute.xlu0 %2473  ;;  %v307_v43 = vld [vmem:[%s6423_s22 + $0x190] sm:$0xff] }
 0x3b2   : > { %13103 = vst [vmem:[#allocation157_spill] sm:$0xff] %v9101_v50  ;;  %3223 = vrot.lane.b32.xlu1 %v9095_v19, %s6368_s23  ;;  %v9121_v19 = vld [vmem:[#allocation2 + $0x169] sm:$0xff]  ;;  %372 = vst.msk [vmem:[#allocation2 + $0x190] sm:$0xff] %vm321_vm0, %v307_v43  ;;  %v9127_v50 = vld [vmem:[#allocation2 + $0x161] sm:$0xff] }
 0x3b3   : > { %3221 = vrot.lane.b32.xlu0 %v9099_v15, %s6368_s23  ;;  %13106 = vst [vmem:[#allocation190_spill] sm:$0xff] %v9121_v19  ;;  %13107 = vst [vmem:[#allocation125_spill] sm:$0xff] %v9127_v50 }
 0x3b4   : > { %v9109_v14 = vpop.permute.xlu1 %2498 }
 0x3b5   : > { %v9113_v49 = vpop.permute.xlu0 %2496 }
 0x3b6   : > { %3227 = vrot.lane.b32.xlu1 %v9107_v28, %s6368_s23  ;;  %v9135_v28 = vld [vmem:[#allocation2 + $0x179] sm:$0xff] }
 0x3b7   : > { %3225 = vrot.lane.b32.xlu0 %v9111_v10, %s6368_s23  ;;  %13108 = vst [vmem:[#allocation138_spill] sm:$0xff] %v9135_v28 }
 0x3b8   : > { %v9125_v15 = vpop.permute.xlu1 %2502 }
 0x3b9   : > { %v9129_v20 = vpop.permute.xlu0 %2500 }
 0x3ba   : > { %3231 = vrot.lane.b32.xlu1 %v9121_v19, %s6368_s23  ;;  %v3111_v19 = vld [vmem:[#allocation2 + $0x102] sm:$0xff] }
 0x3bb   : > { %3229 = vrot.lane.b32.xlu0 %v9127_v50, %s6368_s23 }
 0x3bc   : > { %v9137_v10 = vpop.permute.xlu1 %2506 }
 0x3bd   : > { %v9141_v43 = vpop.permute.xlu0 %2504 }
 0x3be   : > { %3235 = vrot.lane.b32.xlu1 %v9135_v28, %s6368_s23 }
 0x3bf   : > { %3233 = vrot.lane.b32.xlu0 %v9139_v5, %s6368_s23 }
 0x3c0   : > { %v9147_v39 = vpop.permute.xlu1 %2510 }
 0x3c1   : > { %13110 = vst [vmem:[#allocation139_spill] sm:$0xff] %v9147_v39  ;;  %v9149_v44 = vpop.permute.xlu0 %2508 }
 0x3c2   : > { %13111 = vst [vmem:[#allocation153_spill] sm:$0xff] %v9149_v44  ;;  %3271 = vrot.lane.b32.xlu1 %v8526_v63, %s6369_s24  ;;  %v9169_v63 = vld [vmem:[#allocation2 + $0x13a] sm:$0xff]  ;;  %v2649_v44 = vsel %vm321_vm0, %v6279_v2, %v8285_v36  ;;  %v9220_v36 = vld [vmem:[#allocation2 + $0x16a] sm:$0xff]  ;;  %v2655_v2 = vsel %vm321_vm0, %v6284_v4, %v8313_v24  ;;  %v2659_v24 = vsel %vm321_vm0, %v8364_v22, %v8334_v51 }
 0x3c3   : > { %3269 = vrot.lane.b32.xlu0 %v3111_v19, %s6369_s24  ;;  %13116 = vst [vmem:[#allocation126_spill] sm:$0xff] %v9169_v63  ;;  %13126 = vst [vmem:[#allocation173_spill] sm:$0xff] %v9220_v36  ;;  %v13129_v22 = vld [vmem:[#allocation12_spill] sm:$0xff] }
 0x3c4   : > { %v9154_v50 = vpop.permute.xlu1 %2514 }
 0x3c5   : > { %13112 = vst [vmem:[#allocation115_spill] sm:$0xff] %v9154_v50  ;;  %v9156_v13 = vpop.permute.xlu0 %2512 }
 0x3c6   : > { %13113 = vst [vmem:[#allocation154_spill] sm:$0xff] %v9156_v13  ;;  %3275 = vrot.lane.b32.xlu1 %v8907_v25, %s6369_s24  ;;  %v9173_v13 = vld [vmem:[#allocation2 + $0x132] sm:$0xff]  ;;  %v9181_v25 = vld [vmem:[#allocation2 + $0x14a] sm:$0xff] }
 0x3c7   : > { %3273 = vrot.lane.b32.xlu0 %v3113_v41, %s6369_s24  ;;  %13118 = vst [vmem:[#allocation193_spill] sm:$0xff] %v9173_v13  ;;  %13120 = vst [vmem:[#allocation127_spill] sm:$0xff] %v9181_v25  ;;  %v9185_v41 = vld [vmem:[#allocation2 + $0x142] sm:$0xff] }
 0x3c8   : > { %v9161_v28 = vpop.permute.xlu1 %2518  ;;  %13122 = vst [vmem:[#allocation195_spill] sm:$0xff] %v9185_v41 }
 0x3c9   : > { %13114 = vst [vmem:[#allocation169_spill] sm:$0xff] %v9161_v28  ;;  %v9163_v5 = vpop.permute.xlu0 %2516  ;;  %v9197_v28 = vld [vmem:[#allocation2 + $0x152] sm:$0xff] }
 0x3ca   : > { %13115 = vst [vmem:[#allocation158_spill] sm:$0xff] %v9163_v5  ;;  %3279 = vrot.lane.b32.xlu1 %v8917_v21, %s6369_s24  ;;  %13125 = vst [vmem:[#allocation156_spill] sm:$0xff] %v9197_v28 }
 0x3cb   : > { %3277 = vrot.lane.b32.xlu0 %v8921_v12, %s6369_s24 }
 0x3cc   : > { %v9171_v19 = vpop.permute.xlu1 %2522 }
 0x3cd   : > { %13117 = vst [vmem:[#allocation171_spill] sm:$0xff] %v9171_v19  ;;  %v9175_v50 = vpop.permute.xlu0 %2520  ;;  %v1758_v19 = vld [vmem:[#allocation2 + $0x88] sm:$0xff] }
 0x3ce   : > { %13119 = vst [vmem:[#allocation160_spill] sm:$0xff] %v9175_v50  ;;  %3283 = vrot.lane.b32.xlu1 %v9169_v63, %s6369_s24  ;;  %v1757_v50 = vld [vmem:[#allocation2 + $0x80] sm:$0xff] }
 0x3cf   : > { %3281 = vrot.lane.b32.xlu0 %v9173_v13, %s6369_s24  ;;  %v9193_v63 = vld [vmem:[#allocation2 + $0x15a] sm:$0xff]  ;;  %v1759_v13 = vld [vmem:[#allocation2 + $0x90] sm:$0xff] }
 0x3d0   : > { %v9183_v21 = vpop.permute.xlu1 %2526  ;;  %13124 = vst [vmem:[#allocation155_spill] sm:$0xff] %v9193_v63  ;;  %v2648_v39 = vsel %vm321_vm0, %v1759_v13, %v8289_v59  ;;  %v6283_v59 = vld [vmem:[#allocation2 + $0xb0] sm:$0xff] }
 0x3d1   : > { %13121 = vst [vmem:[#allocation141_spill] sm:$0xff] %v9183_v21  ;;  %v9187_v12 = vpop.permute.xlu0 %2524  ;;  %v2652_v13 = vsel %vm321_vm0, %v6283_v59, %v8309_v38  ;;  %v6288_v59 = vld [vmem:[#allocation2 + $0xf0] sm:$0xff] }
 0x3d2   : > { %13123 = vst [vmem:[#allocation142_spill] sm:$0xff] %v9187_v12  ;;  %3287 = vrot.lane.b32.xlu1 %v9181_v25, %s6369_s24  ;;  %v2647_v12 = vsel %vm321_vm0, %v1758_v19, %v8273_v16  ;;  %v2646_v25 = vsel %vm321_vm0, %v1757_v50, %v8277_v32  ;;  %v2650_v16 = vsel %vm321_vm0, %v6281_v7, %v8301_v6  ;;  %v6282_v32 = vld [vmem:[#allocation2 + $0xb8] sm:$0xff]  ;;  %v6285_v6 = vld [vmem:[#allocation2 + $0xc0] sm:$0xff] }
 0x3d3   : > { %3285 = vrot.lane.b32.xlu0 %v9185_v41, %s6369_s24  ;;  %v308_v41 = vld [vmem:[%s6423_s22 + $0x198] sm:$0xff]  ;;  %v2653_v50 = vsel %vm321_vm0, %v6282_v32, %v8307_v34  ;;  %v2654_v7 = vsel %vm321_vm0, %v6285_v6, %v8317_v56  ;;  %v2657_v34 = vsel %vm321_vm0, %v8352_v1, %v8322_v48  ;;  %v9234_v19 = vld [vmem:[#allocation2 + $0x162] sm:$0xff]  ;;  %v2661_v48 = vsel %vm321_vm0, %v8376_v8, %v8346_v27 }
 0x3d4   : > { %v9195_v5 = vpop.permute.xlu1 %2549  ;;  %373 = vst.msk [vmem:[#allocation2 + $0x198] sm:$0xff] %vm321_vm0, %v308_v41  ;;  %13127 = vst [vmem:[#allocation175_spill] sm:$0xff] %v9234_v19  ;;  %v6286_v41 = vld [vmem:[#allocation2 + $0xd0] sm:$0xff]  ;;  %v6287_v32 = vld [vmem:[#allocation2 + $0xe0] sm:$0xff]  ;;  %v2660_v4 = vsel %vm321_vm0, %v6288_v59, %v8350_v53 }
 0x3d5   : > { %v9199_v21 = vpop.permute.xlu0 %2547  ;;  %v2656_v38 = vsel %vm321_vm0, %v6286_v41, %v8326_v42  ;;  %v2658_v56 = vsel %vm321_vm0, %v6287_v32, %v8338_v17  ;;  %v2663_v42 = vsel %vm1316_vm4, %v2647_v12, %v8358_v45  ;;  %v13128_v6 = vld [vmem:[#allocation11_spill] sm:$0xff]  ;;  %v2665_v41 = vsel %vm1316_vm4, %v2649_v44, %v13129_v22  ;;  %v13131_v8 = vld [vmem:[#allocation14_spill] sm:$0xff]  ;;  %v13133_v59 = vld [vmem:[#allocation16_spill] sm:$0xff] }
 0x3d6   : > { %3291 = vrot.lane.b32.xlu1 %v9193_v63, %s6369_s24  ;;  %v2662_v51 = vsel %vm1316_vm4, %v2646_v25, %v13128_v6  ;;  %v13130_v17 = vld [vmem:[#allocation15_spill] sm:$0xff]  ;;  %v2667_v32 = vsel %vm1316_vm4, %v2651_v9, %v13131_v8  ;;  %v13132_v63 = vld [vmem:[#allocation24_spill] sm:$0xff]  ;;  %v2669_v45 = vsel %vm1316_vm4, %v2653_v50, %v13133_v59  ;;  %v13136_v6 = vld [vmem:[#allocation18_spill] sm:$0xff] }
 0x3d7   : > { %3289 = vrot.lane.b32.xlu0 %v9197_v28, %s6369_s24  ;;  %v2664_v27 = vsel %vm1316_vm4, %v2648_v39, %v13130_v17  ;;  %v2666_v53 = vsel %vm1316_vm4, %v2650_v16, %v13132_v63  ;;  %v9268_v25 = vld [vmem:[#allocation2 + $0x17a] sm:$0xff]  ;;  %v2671_v39 = vsel %vm1316_vm4, %v2655_v2, %v13136_v6  ;;  %v13137_v22 = vld [vmem:[#allocation20_spill] sm:$0xff]  ;;  %v9280_v50 = vld [vmem:[#allocation2 + $0x172] sm:$0xff] }
 0x3d8   : > { %v9232_v47 = vpop.permute.xlu1 %2553  ;;  %13134 = vst [vmem:[#allocation197_spill] sm:$0xff] %v9268_v25  ;;  %v13135_v44 = vld [vmem:[#allocation19_spill] sm:$0xff]  ;;  %v2670_v9 = vsel %vm1316_vm4, %v2654_v7, %v13137_v22  ;;  %v13138_v17 = vld [vmem:[#allocation22_spill] sm:$0xff]  ;;  %13140 = vst [vmem:[#allocation170_spill] sm:$0xff] %v9280_v50 }
 0x3d9   : > { %v9246_v1 = vpop.permute.xlu0 %2551  ;;  %v2668_v12 = vsel %vm1316_vm4, %v2652_v13, %v13135_v44  ;;  %v2673_v63 = vsel %vm1316_vm4, %v2657_v34, %v13138_v17  ;;  %v13141_v8 = vld [vmem:[#allocation21_spill] sm:$0xff]  ;;  %v13144_v2 = vld [vmem:[#allocation27_spill] sm:$0xff]  ;;  %v13146_v22 = vld [vmem:[#allocation30_spill] sm:$0xff] }
 0x3da   : > { %3295 = vrot.lane.b32.xlu1 %v9220_v36, %s6369_s24  ;;  %v2672_v59 = vsel %vm1316_vm4, %v2656_v38, %v13141_v8  ;;  %v13142_v36 = vld [vmem:[#allocation23_spill] sm:$0xff]  ;;  %v13143_v13 = vld [vmem:[#allocation25_spill] sm:$0xff]  ;;  %v2677_v6 = vsel %vm1316_vm4, %v2661_v48, %v13144_v2  ;;  %v2676_v34 = vsel %vm1316_vm4, %v2660_v4, %v13146_v22  ;;  %v13152_v2 = vld [vmem:[#allocation36_spill] sm:$0xff] }
 0x3db   : > { %3293 = vrot.lane.b32.xlu0 %v9234_v19, %s6369_s24  ;;  %v2675_v19 = vsel %vm1316_vm4, %v2659_v24, %v13142_v36  ;;  %v2674_v44 = vsel %vm1316_vm4, %v2658_v56, %v13143_v13  ;;  %v13147_v17 = vld [vmem:[#allocation29_spill] sm:$0xff]  ;;  %v13150_v24 = vld [vmem:[#allocation34_spill] sm:$0xff]  ;;  %v13151_v48 = vld [vmem:[#allocation35_spill] sm:$0xff]  ;;  %v2682_v4 = vsel %vm1333_vm5, %v2666_v53, %v13152_v2 }
 0x3dc   : > { %v9278_v16 = vpop.permute.xlu1 %2557  ;;  %v2679_v28 = vsel %vm1333_vm5, %v2663_v42, %v13147_v17  ;;  %v13149_v8 = vld [vmem:[#allocation33_spill] sm:$0xff]  ;;  %v2680_v56 = vsel %vm1333_vm5, %v2664_v27, %v13150_v24  ;;  %v2683_v13 = vsel %vm1333_vm5, %v2667_v32, %v13151_v48  ;;  %v13155_v17 = vld [vmem:[#allocation39_spill] sm:$0xff]  ;;  %v13156_v27 = vld [vmem:[#allocation40_spill] sm:$0xff] }
 0x3dd   : > { %13139 = vst [vmem:[#allocation199_spill] sm:$0xff] %v9278_v16  ;;  %v9290_v7 = vpop.permute.xlu0 %2555  ;;  %v13148_v16 = vld [vmem:[#allocation31_spill] sm:$0xff]  ;;  %v2681_v36 = vsel %vm1333_vm5, %v2665_v41, %v13149_v8  ;;  %v13153_v22 = vld [vmem:[#allocation37_spill] sm:$0xff]  ;;  %v13154_v41 = vld [vmem:[#allocation38_spill] sm:$0xff]  ;;  %v2687_v8 = vsel %vm1333_vm5, %v2671_v39, %v13155_v17  ;;  %v2686_v24 = vsel %vm1333_vm5, %v2670_v9, %v13156_v27 }
 0x3de   : > { %13145 = vst [vmem:[#allocation174_spill] sm:$0xff] %v9290_v7  ;;  %v2678_v38 = vsel %vm1333_vm5, %v2662_v51, %v13148_v16  ;;  %3299 = vrot.lane.b32.xlu1 %v9268_v25, %s6369_s24  ;;  %v2685_v42 = vsel %vm1333_vm5, %v2669_v45, %v13153_v22  ;;  %v3128_v51 = vld [vmem:[#allocation2 + $0x10b] sm:$0xff]  ;;  %v2684_v16 = vsel %vm1333_vm5, %v2668_v12, %v13154_v41  ;;  %v3127_v2 = vld [vmem:[#allocation2 + $0x103] sm:$0xff]  ;;  %v13159_v45 = vld [vmem:[#allocation42_spill] sm:$0xff] }
 0x3df   : > { %3297 = vrot.lane.b32.xlu0 %v9280_v50, %s6369_s24  ;;  %v13157_v32 = vld [vmem:[#allocation41_spill] sm:$0xff]  ;;  %v2688_v22 = vsel %vm1333_vm5, %v2672_v59, %v13159_v45  ;;  %v13160_v25 = vld [vmem:[#allocation43_spill] sm:$0xff]  ;;  %v13161_v7 = vld [vmem:[#allocation44_spill] sm:$0xff] }
 0x3e0   : > { %v2689_v48 = vsel %vm1333_vm5, %v2673_v63, %v13157_v32  ;;  %v9320_v53 = vpop.permute.xlu1 %2561  ;;  %v2691_v50 = vsel %vm1333_vm5, %v2675_v19, %v13160_v25  ;;  %v2690_v12 = vsel %vm1333_vm5, %v2674_v44, %v13161_v7  ;;  %v13162_v41 = vld [vmem:[#allocation45_spill] sm:$0xff]  ;;  %v13163_v9 = vld [vmem:[#allocation46_spill] sm:$0xff]  ;;  %v13164_v27 = vld [vmem:[#allocation47_spill] sm:$0xff] }
 0x3e1   : > { %13158 = vst [vmem:[#allocation168_spill] sm:$0xff] %v9320_v53  ;;  %v2693_v39 = vsel %vm1333_vm5, %v2677_v6, %v13162_v41  ;;  %v9330_v17 = vpop.permute.xlu0 %2559  ;;  %v2692_v63 = vsel %vm1333_vm5, %v2676_v34, %v13163_v9  ;;  %v2695_v32 = vsel %vm1350_vm6, %v2679_v28, %v13164_v27  ;;  %v13165_v53 = vld [vmem:[#allocation48_spill] sm:$0xff]  ;;  %v13166_v45 = vld [vmem:[#allocation49_spill] sm:$0xff]  ;;  %v13167_v25 = vld [vmem:[#allocation50_spill] sm:$0xff] }
 0x3e2   : > { %v2694_v59 = vsel %vm1350_vm6, %v2678_v38, %v13165_v53  ;;  %v2697_v19 = vsel %vm1350_vm6, %v2681_v36, %v13166_v45  ;;  %3335 = vrot.lane.b32.xlu1 %v3128_v51, %s6370_s25  ;;  %v2696_v44 = vsel %vm1350_vm6, %v2680_v56, %v13167_v25  ;;  %v13168_v6 = vld [vmem:[#allocation51_spill] sm:$0xff]  ;;  %v13169_v41 = vld [vmem:[#allocation52_spill] sm:$0xff]  ;;  %v13170_v9 = vld [vmem:[#allocation53_spill] sm:$0xff]  ;;  %v2700_v38 = vsel %vm1350_vm6, %v2684_v16, %v8536_v26 }
 0x3e3   : > { %v2699_v7 = vsel %vm1350_vm6, %v2683_v13, %v13168_v6  ;;  %v2698_v34 = vsel %vm1350_vm6, %v2682_v4, %v13169_v41  ;;  %v2701_v28 = vsel %vm1350_vm6, %v2685_v42, %v13170_v9  ;;  %3333 = vrot.lane.b32.xlu0 %v3127_v2, %s6370_s25  ;;  %v2703_v36 = vsel %vm1350_vm6, %v2687_v8, %v8540_v55  ;;  %v3129_v4 = vld [vmem:[#allocation2 + $0x113] sm:$0xff]  ;;  %v13181_v25 = vld [vmem:[#allocation64_spill] sm:$0xff] }
 0x3e4   : > { %v2702_v56 = vsel %vm1350_vm6, %v2686_v24, %v8542_v62  ;;  %v2705_v13 = vsel %vm1350_vm6, %v2689_v48, %v8547_v58  ;;  %v9358_v51 = vpop.permute.xlu1 %2565  ;;  %v2704_v42 = vsel %vm1350_vm6, %v2688_v22, %v8549_v40  ;;  %v2707_v53 = vsel %vm1350_vm6, %v2691_v50, %v8555_v61  ;;  %v13171_v16 = vld [vmem:[#allocation54_spill] sm:$0xff]  ;;  %v13172_v62 = vld [vmem:[#allocation55_spill] sm:$0xff]  ;;  %v13173_v24 = vld [vmem:[#allocation56_spill] sm:$0xff] }
 0x3e5   : > { %v2706_v26 = vsel %vm1350_vm6, %v2690_v12, %v8557_v30  ;;  %v2709_v55 = vsel %vm1350_vm6, %v2693_v39, %v13171_v16  ;;  %v9368_v8 = vpop.permute.xlu0 %2563  ;;  %v2708_v58 = vsel %vm1350_vm6, %v2692_v63, %v13172_v62  ;;  %v2711_v48 = vsel %vm1367_vm7, %v2695_v32, %v13173_v24  ;;  %v13174_v2 = vld [vmem:[#allocation57_spill] sm:$0xff]  ;;  %v13175_v22 = vld [vmem:[#allocation58_spill] sm:$0xff]  ;;  %v13176_v30 = vld [vmem:[#allocation59_spill] sm:$0xff] }
 0x3e6   : > { %v2710_v40 = vsel %vm1367_vm7, %v2694_v59, %v13174_v2  ;;  %v2713_v61 = vsel %vm1367_vm7, %v2697_v19, %v13175_v22  ;;  %3339 = vrot.lane.b32.xlu1 %v8967_v0, %s6370_s25  ;;  %v2712_v50 = vsel %vm1367_vm7, %v2696_v44, %v13176_v30  ;;  %v13177_v12 = vld [vmem:[#allocation60_spill] sm:$0xff]  ;;  %v13178_v27 = vld [vmem:[#allocation61_spill] sm:$0xff]  ;;  %v13179_v45 = vld [vmem:[#allocation62_spill] sm:$0xff]  ;;  %v2716_v59 = vsel %vm1367_vm7, %v2700_v38, %v8603_v29 }
 0x3e7   : > { %v2715_v39 = vsel %vm1367_vm7, %v2699_v7, %v13177_v12  ;;  %v2714_v63 = vsel %vm1367_vm7, %v2698_v34, %v13178_v27  ;;  %v2717_v32 = vsel %vm1367_vm7, %v2701_v28, %v13179_v45  ;;  %3337 = vrot.lane.b32.xlu0 %v3129_v4, %s6370_s25  ;;  %v13180_v19 = vld [vmem:[#allocation63_spill] sm:$0xff]  ;;  %v2718_v44 = vsel %vm1367_vm7, %v2702_v56, %v13181_v25  ;;  %v13182_v6 = vld [vmem:[#allocation65_spill] sm:$0xff]  ;;  %v13183_v34 = vld [vmem:[#allocation66_spill] sm:$0xff] }
 0x3e8   : > { %v2719_v0 = vsel %vm1367_vm7, %v2703_v36, %v13180_v19  ;;  %v2721_v7 = vsel %vm1367_vm7, %v2705_v13, %v13182_v6  ;;  %v9397_v41 = vpop.permute.xlu1 %2569  ;;  %v2720_v9 = vsel %vm1367_vm7, %v2704_v42, %v13183_v34  ;;  %v13184_v28 = vld [vmem:[#allocation67_spill] sm:$0xff]  ;;  %v13185_v16 = vld [vmem:[#allocation68_spill] sm:$0xff]  ;;  %v13186_v38 = vld [vmem:[#allocation69_spill] sm:$0xff] }
 0x3e9   : > { %v2723_v4 = vsel %vm1367_vm7, %v2707_v53, %v13184_v28  ;;  %v2722_v29 = vsel %vm1367_vm7, %v2706_v26, %v13185_v16  ;;  %v2725_v36 = vsel %vm1367_vm7, %v2709_v55, %v13186_v38  ;;  %v9407_v62 = vpop.permute.xlu0 %2567  ;;  %v13187_v56 = vld [vmem:[#allocation70_spill] sm:$0xff]  ;;  %v13188_v13 = vld [vmem:[#allocation71_spill] sm:$0xff]  ;;  %v13189_v22 = vld [vmem:[#allocation72_spill] sm:$0xff] }
 0x3ea   : > { %v2724_v24 = vsel %vm1367_vm7, %v2708_v58, %v13187_v56  ;;  %v2727_v2 = vsel %vm1384_vm8, %v2711_v48, %v13188_v13  ;;  %v2726_v42 = vsel %vm1384_vm8, %v2710_v40, %v13189_v22  ;;  %v13190_v30 = vld [vmem:[#allocation73_spill] sm:$0xff]  ;;  %3343 = vrot.lane.b32.xlu1 %v8977_v60, %s6370_s25  ;;  %v13191_v26 = vld [vmem:[#allocation74_spill] sm:$0xff]  ;;  %v13192_v12 = vld [vmem:[#allocation75_spill] sm:$0xff] }
 0x3eb   : > { %v2729_v53 = vsel %vm1384_vm8, %v2713_v61, %v13190_v30  ;;  %v2728_v55 = vsel %vm1384_vm8, %v2712_v50, %v13191_v26  ;;  %v2731_v27 = vsel %vm1384_vm8, %v2715_v39, %v13192_v12  ;;  %v13193_v45 = vld [vmem:[#allocation76_spill] sm:$0xff]  ;;  %v13194_v19 = vld [vmem:[#allocation77_spill] sm:$0xff]  ;;  %3341 = vrot.lane.b32.xlu0 %v8981_v31, %s6370_s25  ;;  %v9429_v40 = vld [vmem:[#allocation2 + $0x13b] sm:$0xff] }
 0x3ec   : > { %v2730_v58 = vsel %vm1384_vm8, %v2714_v63, %v13193_v45  ;;  %v2733_v48 = vsel %vm1384_vm8, %v2717_v32, %v13194_v19  ;;  %v13195_v61 = vld [vmem:[#allocation78_spill] sm:$0xff]  ;;  %v13196_v25 = vld [vmem:[#allocation79_spill] sm:$0xff]  ;;  %v13197_v6 = vld [vmem:[#allocation80_spill] sm:$0xff]  ;;  %v9439_v28 = vpop.permute.xlu1 %2573 }
 0x3ed   : > { %v2732_v60 = vsel %vm1384_vm8, %v2716_v59, %v13195_v61  ;;  %v2735_v50 = vsel %vm1384_vm8, %v2719_v0, %v13196_v25  ;;  %v2734_v39 = vsel %vm1384_vm8, %v2718_v44, %v13197_v6  ;;  %v13198_v34 = vld [vmem:[#allocation81_spill] sm:$0xff]  ;;  %v13199_v16 = vld [vmem:[#allocation82_spill] sm:$0xff]  ;;  %v13200_v38 = vld [vmem:[#allocation83_spill] sm:$0xff]  ;;  %v9451_v0 = vsel %vm1384_vm8, %v2725_v36, %v8719_v57  ;;  %v9453_v44 = vpop.permute.xlu0 %2571 }
 0x3ee   : > { %v2737_v63 = vsel %vm1384_vm8, %v2721_v7, %v13198_v34  ;;  %v9441_v32 = vld [vmem:[#allocation2 + $0x133] sm:$0xff]  ;;  %v2736_v31 = vsel %vm1384_vm8, %v2720_v9, %v13199_v16  ;;  %v2739_v56 = vsel %vm1384_vm8, %v2723_v4, %v13200_v38  ;;  %v13201_v59 = vld [vmem:[#allocation84_spill] sm:$0xff]  ;;  %v13204_v9 = vld [vmem:[#allocation87_spill] sm:$0xff]  ;;  %3347 = vrot.lane.b32.xlu1 %v9429_v40, %s6370_s25 }
 0x3ef   : > { %v2738_v13 = vsel %vm1384_vm8, %v2722_v29, %v13201_v59  ;;  %v13202_v7 = vld [vmem:[#allocation85_spill] sm:$0xff]  ;;  %v13203_v30 = vld [vmem:[#allocation86_spill] sm:$0xff]  ;;  %v2742_v12 = vsel %vm1401_vm9, %v2726_v42, %v13204_v9  ;;  %v13205_v4 = vld [vmem:[#allocation88_spill] sm:$0xff]  ;;  %3345 = vrot.lane.b32.xlu0 %v9441_v32, %s6370_s25 }
 0x3f0   : > { %v9457_v22 = vsel %vm1384_vm8, %v2724_v24, %v13202_v7  ;;  %v2743_v26 = vsel %vm1401_vm9, %v2727_v2, %v13203_v30  ;;  %v2745_v45 = vsel %vm1401_vm9, %v2729_v53, %v13205_v4  ;;  %v13206_v57 = vld [vmem:[#allocation89_spill] sm:$0xff]  ;;  %v13207_v36 = vld [vmem:[#allocation90_spill] sm:$0xff]  ;;  %v13208_v24 = vld [vmem:[#allocation91_spill] sm:$0xff]  ;;  %v9491_v59 = vpop.permute.xlu1 %2577 }
 0x3f1   : > { %v2744_v29 = vsel %vm1401_vm9, %v2728_v55, %v13206_v57  ;;  %v2747_v19 = vsel %vm1401_vm9, %v2731_v27, %v13207_v36  ;;  %v2746_v61 = vsel %vm1401_vm9, %v2730_v58, %v13208_v24  ;;  %v13209_v25 = vld [vmem:[#allocation102_spill] sm:$0xff]  ;;  %v9477_v42 = vld [vmem:[#allocation2 + $0x14b] sm:$0xff]  ;;  %v13212_v27 = vld [vmem:[#allocation103_spill] sm:$0xff]  ;;  %v9507_v57 = vpop.permute.xlu0 %2575 }
 0x3f2   : > { %v2759_v2 = vsel %vm1418_vm10, %v2743_v26, %v13209_v25  ;;  %v13210_v53 = vld [vmem:[#allocation92_spill] sm:$0xff]  ;;  %v13211_v34 = vld [vmem:[#allocation93_spill] sm:$0xff]  ;;  %v2758_v16 = vsel %vm1418_vm10, %v2742_v12, %v13212_v27  ;;  %v13213_v58 = vld [vmem:[#allocation114_spill] sm:$0xff]  ;;  %3351 = vrot.lane.b32.xlu1 %v9477_v42, %s6370_s25 }
 0x3f3   : > { %v9481_v6 = vsel %vm1401_vm9, %v2733_v48, %v13210_v53  ;;  %v9485_v55 = vsel %vm1401_vm9, %v2732_v60, %v13211_v34  ;;  %v2775_v38 = vsel %vm1435_vm11, %v2759_v2, %v13213_v58  ;;  %v9493_v7 = vld [vmem:[#allocation2 + $0x143] sm:$0xff]  ;;  %v13214_v30 = vld [vmem:[#allocation94_spill] sm:$0xff]  ;;  %v13218_v25 = vld [vmem:[#allocation97_spill] sm:$0xff] }
 0x3f4   : > { %v9497_v26 = vsel %vm1401_vm9, %v2735_v50, %v13214_v30  ;;  %v13215_v48 = vld [vmem:[#allocation95_spill] sm:$0xff]  ;;  %v13216_v60 = vld [vmem:[#allocation116_spill] sm:$0xff]  ;;  %v2791_v12 = vsel %vm1452_vm12, %v2775_v38, %v8959_v3  ;;  %v9515_v50 = vsel %vm1401_vm9, %v2736_v31, %v13218_v25  ;;  %v13219_v3 = vld [vmem:[#allocation98_spill] sm:$0xff]  ;;  %3349 = vrot.lane.b32.xlu0 %v9493_v7, %s6370_s25  ;;  %v2601_v38 = vpop.permute.xlu1 %2600 }
 0x3f5   : > { %v9501_v9 = vsel %vm1401_vm9, %v2734_v39, %v13215_v48  ;;  %v2774_v4 = vsel %vm1435_vm11, %v2758_v16, %v13216_v60  ;;  %v13217_v36 = vld [vmem:[#allocation96_spill] sm:$0xff]  ;;  %v2807_v2 = vsel %vm1469_vm13, %v2791_v12, %v9029_v35  ;;  %v9525_v53 = vsel %vm1401_vm9, %v2739_v56, %v13219_v3  ;;  %v13221_v35 = vld [vmem:[#allocation105_spill] sm:$0xff]  ;;  %v13222_v58 = vld [vmem:[#allocation179_spill] sm:$0xff]  ;;  %v2599_v12 = vpop.permute.xlu0 %2598 }
 0x3f6   : > { %v9511_v24 = vsel %vm1401_vm9, %v2737_v63, %v13217_v36  ;;  %v2790_v39 = vsel %vm1452_vm12, %v2774_v4, %v8961_v33  ;;  %v13220_v34 = vld [vmem:[#allocation104_spill] sm:$0xff]  ;;  %v2823_v27 = vsel %vm1486_vm14, %v2807_v2, %v9109_v14  ;;  %v9535_v33 = vld [vmem:[#allocation2 + $0x15b] sm:$0xff]  ;;  %v2760_v16 = vsel %vm1418_vm10, %v2744_v29, %v13221_v35  ;;  %v9545_v30 = vld [vmem:[#allocation2 + $0x153] sm:$0xff] }
 0x3f7   : > { %v2761_v63 = vsel %vm1418_vm10, %v2745_v45, %v13220_v34  ;;  %v2806_v31 = vsel %vm1469_vm13, %v2790_v39, %v9031_v54  ;;  %v2839_v54 = vsel %vm1503_vm15, %v2823_v27, %v9195_v5  ;;  %v13223_v14 = vld [vmem:[#allocation117_spill] sm:$0xff]  ;;  %v13224_v36 = vld [vmem:[#allocation99_spill] sm:$0xff]  ;;  %3355 = vrot.lane.b32.xlu1 %v9535_v33, %s6370_s25  ;;  %v13225_v39 = vld [vmem:[#allocation106_spill] sm:$0xff] }
 0x3f8   : > { %v2777_v56 = vsel %vm1435_vm11, %v2761_v63, %v13222_v58  ;;  %v2822_v45 = vsel %vm1486_vm14, %v2806_v31, %v9113_v49  ;;  %v2776_v48 = vsel %vm1435_vm11, %v2760_v16, %v13223_v14  ;;  %v2855_v4 = vsel %vm1520_vm1, %v2839_v54, %v2601_v38  ;;  %3353 = vrot.lane.b32.xlu0 %v9545_v30, %s6370_s25  ;;  %v13227_v34 = vld [vmem:[#allocation128_spill] sm:$0xff]  ;;  %v13228_v27 = vld [vmem:[#allocation181_spill] sm:$0xff]  ;;  %v13229_v16 = vld [vmem:[#allocation130_spill] sm:$0xff] }
 0x3f9   : > { %v2793_v60 = vsel %vm1452_vm12, %v2777_v56, %v8969_v37  ;;  %v2838_v29 = vsel %vm1503_vm15, %v2822_v45, %v9199_v21  ;;  %v9556_v49 = vsel %vm1401_vm9, %v2738_v13, %v13224_v36  ;;  %v2792_v5 = vsel %vm1452_vm12, %v2776_v48, %v8971_v23  ;;  %v9574_v23 = vld [vmem:[#allocation2 + $0x16b] sm:$0xff]  ;;  %v9585_v31 = vld [vmem:[#allocation2 + $0x163] sm:$0xff]  ;;  %v13230_v45 = vld [vmem:[#allocation134_spill] sm:$0xff] }
 0x3fa   : > { %v2809_v25 = vsel %vm1469_vm13, %v2793_v60, %v9039_v18  ;;  %v2854_v37 = vsel %vm1520_vm1, %v2838_v29, %v2599_v12  ;;  %v2763_v21 = vsel %vm1418_vm10, %v2747_v19, %v13225_v39  ;;  %v2808_v2 = vsel %vm1469_vm13, %v2792_v5, %v9041_v52  ;;  %v13226_v18 = vld [vmem:[#allocation28_spill] sm:$0xff]  ;;  %v13232_v48 = vld [vmem:[#allocation137_spill] sm:$0xff]  ;;  %v13233_v60 = vld [vmem:[#allocation107_spill] sm:$0xff] }
 0x3fb   : > { %v2825_v13 = vsel %vm1486_vm14, %v2809_v25, %v9125_v15  ;;  %6037 = vmatprep.mubr.msk.f32.mxu1 %vm1543_vm2, %v2854_v37  ;;  %v2762_v3 = vsel %vm1418_vm10, %v2746_v61, %v13226_v18  ;;  %v2779_v63 = vsel %vm1435_vm11, %v2763_v21, %v13227_v34  ;;  %v2824_v19 = vsel %vm1486_vm14, %v2808_v2, %v9129_v20  ;;  %v2605_v15 = vpop.permute.xlu1 %2604  ;;  %v2603_v20 = vpop.permute.xlu0 %2602  ;;  %v13234_v12 = vld [vmem:[#allocation32_spill] sm:$0xff]  ;;  %v13235_v5 = vld [vmem:[#allocation7_spill] sm:$0xff]  ;;  %v9625_v39 = vld [vmem:[#allocation2 + $0x173] sm:$0xff] }
 0x3fc   : > { %v2841_v52 = vsel %vm1503_vm15, %v2825_v13, %v9232_v47  ;;  %6038 = vmatmul.mubr.msk.f32.vlgmr.msra.gmra.mrb[0].mxu1 %vm1543_vm2, %v2855_v4  ;;  %v2778_v35 = vsel %vm1435_vm11, %v2762_v3, %v13228_v27  ;;  %v2795_v61 = vsel %vm1452_vm12, %v2779_v63, %v13229_v16  ;;  %v2840_v58 = vsel %vm1503_vm15, %v2824_v19, %v9246_v1  ;;  %v13231_v47 = vld [vmem:[#allocation185_spill] sm:$0xff]  ;;  %v13236_v25 = vld [vmem:[#allocation199_spill] sm:$0xff]  ;;  %v13239_v18 = vld [vmem:[#allocation174_spill] sm:$0xff] }
 0x3fd   : > { %v2857_v56 = vsel %vm1520_vm1, %v2841_v52, %v2605_v15  ;;  %6198 = vmatpush3.bf16.msra.mxu1 %v13230_v45  ;;  %v2794_v54 = vsel %vm1452_vm12, %v2778_v35, %v13231_v47  ;;  %v2811_v38 = vsel %vm1469_vm13, %v2795_v61, %v9049_v11  ;;  %v2856_v14 = vsel %vm1520_vm1, %v2840_v58, %v2603_v20  ;;  %v9613_v11 = vld [vmem:[#allocation2 + $0x17b] sm:$0xff]  ;;  %v13237_v21 = vld [vmem:[#allocation129_spill] sm:$0xff]  ;;  %v13242_v35 = vld [vmem:[#allocation140_spill] sm:$0xff] }
 0x3fe   : > { %3359 = vrot.lane.b32.xlu1 %v9574_v23, %s6370_s25  ;;  %6200 = vmatprep.subr.bf16.mxu1 %v13232_v48  ;;  %v2765_v1 = vsel %vm1418_vm10, %v9481_v6, %v13233_v60  ;;  %v2810_v29 = vsel %vm1469_vm13, %v2794_v54, %v9053_v46  ;;  %v2827_v4 = vsel %vm1486_vm14, %v2811_v38, %v9137_v10  ;;  %v13238_v13 = vld [vmem:[#allocation17_spill] sm:$0xff]  ;;  %v13240_v63 = vld [vmem:[#allocation131_spill] sm:$0xff]  ;;  %v13241_v52 = vld [vmem:[#allocation150_spill] sm:$0xff] }
 0x3ff   : > { %3357 = vrot.lane.b32.xlu0 %v9585_v31, %s6370_s25  ;;  %6040 = vmatprep.mubr.msk.f32.mxu1 %vm1543_vm2, %v2856_v14  ;;  %v2764_v36 = vsel %vm1418_vm10, %v9485_v55, %v13234_v12  ;;  %v2781_v6 = vsel %vm1435_vm11, %v2765_v1, %v13235_v5  ;;  %v2826_v46 = vsel %vm1486_vm14, %v2810_v29, %v9141_v43  ;;  %v2609_v37 = vpop.permute.xlu1 %2608  ;;  %v2607_v43 = vpop.permute.xlu0 %2606  ;;  %v13243_v16 = vld [vmem:[#allocation26_spill] sm:$0xff]  ;;  %v13244_v58 = vld [vmem:[#allocation164_spill] sm:$0xff]  ;;  %v13245_v20 = vld [vmem:[#allocation139_spill] sm:$0xff] }
 0x400   : > { %v2843_v10 = vsel %vm1503_vm15, %v2827_v4, %v13236_v25  ;;  %6041 = vmatmul.mubr.msk.f32.gmra.mrb[2].mxu1 %vm1543_vm2, %v2857_v56  ;;  %v2780_v2 = vsel %vm1435_vm11, %v2764_v36, %v13237_v21  ;;  %v2797_v55 = vsel %vm1452_vm12, %v2781_v6, %v13238_v13  ;;  %v2842_v3 = vsel %vm1503_vm15, %v2826_v46, %v13239_v18  ;;  %v3144_v47 = vld [vmem:[#allocation2 + $0x10c] sm:$0xff]  ;;  %v3143_v12 = vld [vmem:[#allocation2 + $0x104] sm:$0xff] }
 0x401   : > { %v2859_v34 = vsel %vm1520_vm1, %v2843_v10, %v2609_v37  ;;  %6202 = vmatpush3.bf16.msra.mxu1 %v13232_v48  ;;  %v2796_v19 = vsel %vm1452_vm12, %v2780_v2, %v13240_v63  ;;  %v2813_v15 = vsel %vm1469_vm13, %v2797_v55, %v13241_v52  ;;  %v2858_v27 = vsel %vm1520_vm1, %v2842_v3, %v2607_v43  ;;  %v13246_v54 = vld [vmem:[#allocation108_spill] sm:$0xff]  ;;  %v13247_v14 = vld [vmem:[#allocation145_spill] sm:$0xff]  ;;  %v13251_v6 = vld [vmem:[#allocation147_spill] sm:$0xff] }
 0x402   : > { %3363 = vrot.lane.b32.xlu1 %v9613_v11, %s6370_s25  ;;  %6204 = vmatprep.subr.bf16.mxu1 %v13242_v35  ;;  %v2767_v61 = vsel %vm1418_vm10, %v9497_v26, %v13243_v16  ;;  %v2812_v56 = vsel %vm1469_vm13, %v2796_v19, %v13244_v58  ;;  %v2829_v45 = vsel %vm1486_vm14, %v2813_v15, %v13245_v20  ;;  %v13248_v26 = vld [vmem:[#allocation153_spill] sm:$0xff]  ;;  %v13249_v1 = vld [vmem:[#allocation168_spill] sm:$0xff]  ;;  %v13253_v2 = vld [vmem:[#allocation122_spill] sm:$0xff] }
 0x403   : > { %3361 = vrot.lane.b32.xlu0 %v9625_v39, %s6370_s25  ;;  %6043 = vmatprep.mubr.msk.f32.mxu1 %vm1543_vm2, %v2858_v27  ;;  %v2766_v38 = vsel %vm1418_vm10, %v9501_v9, %v13246_v54  ;;  %v2783_v48 = vsel %vm1435_vm11, %v2767_v61, %v13247_v14  ;;  %v2828_v60 = vsel %vm1486_vm14, %v2812_v56, %v13248_v26  ;;  %v2613_v4 = vpop.permute.xlu1 %2612  ;;  %v13250_v36 = vld [vmem:[#allocation8_spill] sm:$0xff]  ;;  %v2611_v10 = vpop.permute.xlu0 %2610  ;;  %v13254_v18 = vld [vmem:[#allocation143_spill] sm:$0xff]  ;;  %v13257_v43 = vld [vmem:[#allocation165_spill] sm:$0xff] }
 0x404   : > { %v2845_v29 = vsel %vm1503_vm15, %v2829_v45, %v13249_v1  ;;  %6044 = vmatmul.mubr.msk.f32.gmra.mrb[4].mxu1 %vm1543_vm2, %v2859_v34  ;;  %v2782_v5 = vsel %vm1435_vm11, %v2766_v38, %v13250_v36  ;;  %v2799_v46 = vsel %vm1452_vm12, %v2783_v48, %v13251_v6  ;;  %v2844_v9 = vsel %vm1503_vm15, %v2828_v60, %v9330_v17  ;;  %v13252_v37 = vld [vmem:[#allocation148_spill] sm:$0xff]  ;;  %v13256_v17 = vld [vmem:[#allocation109_spill] sm:$0xff]  ;;  %v13258_v19 = vld [vmem:[#allocation115_spill] sm:$0xff] }
 0x405   : > { %v2861_v25 = vsel %vm1520_vm1, %v2845_v29, %v2613_v4  ;;  %6206 = vmatpush3.bf16.msra.mxu1 %v13242_v35  ;;  %v2798_v21 = vsel %vm1452_vm12, %v2782_v5, %v13252_v37  ;;  %v2815_v13 = vsel %vm1469_vm13, %v2799_v46, %v13253_v2  ;;  %v2860_v55 = vsel %vm1520_vm1, %v2844_v9, %v2611_v10  ;;  %v13259_v15 = vld [vmem:[#allocation110_spill] sm:$0xff]  ;;  %v13262_v45 = vld [vmem:[#allocation159_spill] sm:$0xff]  ;;  %v13265_v60 = vld [vmem:[#allocation120_spill] sm:$0xff] }
 0x406   : > { %3399 = vrot.lane.b32.xlu1 %v3144_v47, %s6371_s26  ;;  %6209 = vmatprep.subr.msk.bf16.mxu1 %vm7381_vm3, %v13254_v18  ;;  %v2769_v34 = vsel %vm1418_vm10, %v9511_v24, %v13256_v17  ;;  %v2814_v63 = vsel %vm1469_vm13, %v2798_v21, %v13257_v43  ;;  %v2831_v52 = vsel %vm1486_vm14, %v2815_v13, %v13258_v19  ;;  %v13260_v35 = vld [vmem:[#allocation146_spill] sm:$0xff]  ;;  %v13266_v29 = vld [vmem:[#allocation188_spill] sm:$0xff]  ;;  %v13268_v36 = vld [vmem:[#allocation111_spill] sm:$0xff] }
 0x407   : > { %3397 = vrot.lane.b32.xlu0 %v3143_v12, %s6371_s26  ;;  %6046 = vmatprep.mubr.msk.f32.mxu1 %vm1543_vm2, %v2860_v55  ;;  %v2768_v27 = vsel %vm1418_vm10, %v9515_v50, %v13259_v15  ;;  %v2785_v16 = vsel %vm1435_vm11, %v2769_v34, %v13260_v35  ;;  %v13261_v61 = vld [vmem:[#allocation154_spill] sm:$0xff]  ;;  %v2847_v58 = vsel %vm1503_vm15, %v2831_v52, %v9358_v51  ;;  %v2617_v56 = vpop.permute.xlu1 %2616  ;;  %v2615_v48 = vpop.permute.xlu0 %2614  ;;  %v13264_v51 = vld [vmem:[#allocation100_spill] sm:$0xff]  ;;  %v13269_v6 = vld [vmem:[#allocation123_spill] sm:$0xff] }
 0x408   : > { %v2830_v24 = vsel %vm1486_vm14, %v2814_v63, %v13261_v61  ;;  %6047 = vmatmul.mubr.msk.f32.gmra.mrb[6].mxu1 %vm1543_vm2, %v2861_v25  ;;  %v3145_v20 = vld [vmem:[#allocation2 + $0x114] sm:$0xff]  ;;  %v2784_v47 = vsel %vm1435_vm11, %v2768_v27, %v13262_v45  ;;  %v2863_v14 = vsel %vm1520_vm1, %v2847_v58, %v2617_v56  ;;  %v2757_v26 = vsel %vm1401_vm9, %v9451_v0, %v13264_v51  ;;  %v13271_v25 = vld [vmem:[#allocation4_spill] sm:$0xff]  ;;  %v13275_v17 = vld [vmem:[#allocation163_spill] sm:$0xff] }
 0x409   : > { %v13263_v54 = vld [vmem:[#allocation162_spill] sm:$0xff]  ;;  %v2846_v50 = vsel %vm1503_vm15, %v2830_v24, %v9368_v8  ;;  %6212 = vmatpush3.bf16.msk.msra.mxu1 %vm7381_vm3, %v13254_v18  ;;  %v2800_v1 = vsel %vm1452_vm12, %v2784_v47, %v13265_v60  ;;  %v13267_v8 = vld [vmem:[#allocation187_spill] sm:$0xff]  ;;  %v2771_v5 = vsel %vm1418_vm10, %v9525_v53, %v13268_v36  ;;  %v13270_v9 = vld [vmem:[#allocation169_spill] sm:$0xff]  ;;  %v2770_v10 = vsel %vm1418_vm10, %v9556_v49, %v13271_v25 }
 0x40a   : > { %v2801_v38 = vsel %vm1452_vm12, %v2785_v16, %v13263_v54  ;;  %v2862_v12 = vsel %vm1520_vm1, %v2846_v50, %v2615_v48  ;;  %3403 = vrot.lane.b32.xlu1 %v13267_v8, %s6371_s26  ;;  %v2816_v46 = vsel %vm1469_vm13, %v2800_v1, %v13269_v6  ;;  %v13272_v37 = vld [vmem:[#allocation118_spill] sm:$0xff]  ;;  %v13274_v18 = vld [vmem:[#allocation161_spill] sm:$0xff]  ;;  %v13280_v24 = vld [vmem:[#allocation112_spill] sm:$0xff] }
 0x40b   : > { %v2817_v4 = vsel %vm1469_vm13, %v2801_v38, %v13266_v29  ;;  %3401 = vrot.lane.b32.xlu0 %v3145_v20, %s6371_s26  ;;  %6049 = vmatprep.mubr.msk.f32.mxu1 %vm1543_vm2, %v2862_v12  ;;  %v2787_v21 = vsel %vm1435_vm11, %v2771_v5, %v13272_v37  ;;  %v13273_v2 = vld [vmem:[#allocation158_spill] sm:$0xff]  ;;  %v2621_v55 = vpop.permute.xlu1 %2620  ;;  %v2786_v3 = vsel %vm1435_vm11, %v2770_v10, %v13274_v18  ;;  %v2619_v63 = vpop.permute.xlu0 %2618  ;;  %v13276_v19 = vld [vmem:[#allocation101_spill] sm:$0xff]  ;;  %v13281_v58 = vld [vmem:[#allocation151_spill] sm:$0xff] }
 0x40c   : > { %v2833_v0 = vsel %vm1486_vm14, %v2817_v4, %v13270_v9  ;;  %v2832_v53 = vsel %vm1486_vm14, %v2816_v46, %v13273_v2  ;;  %6050 = vmatmul.mubr.msk.f32.gmra.mrb[8].mxu1 %vm1543_vm2, %v2863_v14  ;;  %v2803_v34 = vsel %vm1452_vm12, %v2787_v21, %v13275_v17  ;;  %v2756_v52 = vsel %vm1401_vm9, %v9457_v22, %v13276_v19  ;;  %v13278_v27 = vld [vmem:[#allocation189_spill] sm:$0xff]  ;;  %v13282_v20 = vld [vmem:[#allocation171_spill] sm:$0xff]  ;;  %v13286_v48 = vld [vmem:[#allocation160_spill] sm:$0xff] }
 0x40d   : > { %v2849_v13 = vsel %vm1503_vm15, %v2833_v0, %v9397_v41  ;;  %v2848_v49 = vsel %vm1503_vm15, %v2832_v53, %v9407_v62  ;;  %v13277_v41 = vld [vmem:[#allocation186_spill] sm:$0xff]  ;;  %v2819_v35 = vsel %vm1469_vm13, %v2803_v34, %v13278_v27  ;;  %v13279_v61 = vld [vmem:[#allocation133_spill] sm:$0xff]  ;;  %v2773_v62 = vsel %vm1418_vm10, %v2757_v26, %v13280_v24  ;;  %v13285_v50 = vld [vmem:[#allocation183_spill] sm:$0xff] }
 0x40e   : > { %v2865_v43 = vsel %vm1520_vm1, %v2849_v13, %v2621_v55  ;;  %v2802_v15 = vsel %vm1452_vm12, %v2786_v3, %v13277_v41  ;;  %v2864_v16 = vsel %vm1520_vm1, %v2848_v49, %v2619_v63  ;;  %3407 = vrot.lane.b32.xlu1 %v13279_v61, %s6371_s26  ;;  %v2835_v22 = vsel %vm1486_vm14, %v2819_v35, %v13282_v20  ;;  %v13283_v45 = vld [vmem:[#allocation149_spill] sm:$0xff]  ;;  %v9764_v47 = vld [vmem:[#allocation2 + $0x13c] sm:$0xff]  ;;  %v13289_v46 = vld [vmem:[#allocation132_spill] sm:$0xff] }
 0x40f   : > { %v2818_v56 = vsel %vm1469_vm13, %v2802_v15, %v13281_v58  ;;  %3405 = vrot.lane.b32.xlu0 %v13283_v45, %s6371_s26  ;;  %6052 = vmatprep.mubr.msk.f32.mxu1 %vm1543_vm2, %v2864_v16  ;;  %v13284_v54 = vld [vmem:[#allocation113_spill] sm:$0xff]  ;;  %v2789_v14 = vsel %vm1435_vm11, %v2773_v62, %v13285_v50  ;;  %v2851_v26 = vsel %vm1503_vm15, %v2835_v22, %v9439_v28  ;;  %v2625_v60 = vpop.permute.xlu1 %2624  ;;  %v13287_v29 = vld [vmem:[#allocation119_spill] sm:$0xff]  ;;  %v2623_v6 = vpop.permute.xlu0 %2622  ;;  %v13290_v9 = vld [vmem:[#allocation152_spill] sm:$0xff] }
 0x410   : > { %v2772_v38 = vsel %vm1418_vm10, %v2756_v52, %v13284_v54  ;;  %v2834_v51 = vsel %vm1486_vm14, %v2818_v56, %v13286_v48  ;;  %6053 = vmatmul.mubr.msk.f32.gmra.mrb[10].mxu1 %vm1543_vm2, %v2865_v43  ;;  %v9775_v1 = vld [vmem:[#allocation2 + $0x134] sm:$0xff]  ;;  %v2867_v5 = vsel %vm1520_vm1, %v2851_v26, %v2625_v60  ;;  %v9798_v2 = vld [vmem:[#allocation2 + $0x14c] sm:$0xff]  ;;  %v9805_v3 = vld [vmem:[#allocation2 + $0x144] sm:$0xff] }
 0x411   : > { %v2788_v4 = vsel %vm1435_vm11, %v2772_v38, %v13287_v29  ;;  %v13288_v12 = vld [vmem:[#allocation121_spill] sm:$0xff]  ;;  %v2850_v36 = vsel %vm1503_vm15, %v2834_v51, %v9453_v44  ;;  %v13293_v53 = vld [vmem:[#allocation142_spill] sm:$0xff]  ;;  %v9833_v15 = vld [vmem:[#allocation2 + $0x164] sm:$0xff] }
 0x412   : > { %v2805_v8 = vsel %vm1452_vm12, %v2789_v14, %v13288_v12  ;;  %v2804_v28 = vsel %vm1452_vm12, %v2788_v4, %v13289_v46  ;;  %v2866_v25 = vsel %vm1520_vm1, %v2850_v36, %v2623_v6  ;;  %3411 = vrot.lane.b32.xlu1 %v9764_v47, %s6371_s26  ;;  %v13291_v10 = vld [vmem:[#allocation157_spill] sm:$0xff]  ;;  %v9841_v35 = vld [vmem:[#allocation2 + $0x17c] sm:$0xff]  ;;  %v3084_v38 = vld [vmem:[#allocation2 + $0x128] sm:$0xff] }
 0x413   : > { %v2821_v0 = vsel %vm1469_vm13, %v2805_v8, %v13290_v9  ;;  %v2820_v37 = vsel %vm1469_vm13, %v2804_v28, %v13291_v10  ;;  %v13292_v21 = vld [vmem:[#allocation141_spill] sm:$0xff]  ;;  %3409 = vrot.lane.b32.xlu0 %v9775_v1, %s6371_s26  ;;  %6055 = vmatprep.mubr.msk.f32.mxu1 %vm1543_vm2, %v2866_v25  ;;  %v2629_v18 = vpop.permute.xlu1 %2628  ;;  %v2627_v49 = vpop.permute.xlu0 %2626  ;;  %v3083_v58 = vld [vmem:[#allocation2 + $0x120] sm:$0xff]  ;;  %v3082_v20 = vld [vmem:[#allocation2 + $0x118] sm:$0xff] }
 0x414   : > { %v2837_v44 = vsel %vm1486_vm14, %v2821_v0, %v13292_v21  ;;  %v2836_v13 = vsel %vm1486_vm14, %v2820_v37, %v13293_v53  ;;  %6056 = vmatmul.mubr.msk.f32.gmra.mrb[12].mxu1 %vm1543_vm2, %v2867_v5  ;;  %v9829_v52 = vld [vmem:[#allocation2 + $0x16c] sm:$0xff]  ;;  %v9845_v61 = vld [vmem:[#allocation2 + $0x174] sm:$0xff]  ;;  %v9870_v14 = vld [vmem:[#allocation2 + $0x140] sm:$0xff] }
 0x415   : > { %v2853_v55 = vsel %vm1503_vm15, %v2837_v44, %v9491_v59  ;;  %v2852_v17 = vsel %vm1503_vm15, %v2836_v13, %v9507_v57  ;;  %v9816_v59 = vld [vmem:[#allocation2 + $0x15c] sm:$0xff]  ;;  %v9821_v57 = vld [vmem:[#allocation2 + $0x154] sm:$0xff]  ;;  %v9886_v4 = vld [vmem:[#allocation2 + $0x148] sm:$0xff] }
 0x416   : > { %v2869_v34 = vsel %vm1520_vm1, %v2853_v55, %v2629_v18  ;;  %v2868_v43 = vsel %vm1520_vm1, %v2852_v17, %v2627_v49  ;;  %3415 = vrot.lane.b32.xlu1 %v9798_v2, %s6371_s26  ;;  %v9861_v45 = vld [vmem:[#allocation2 + $0x130] sm:$0xff]  ;;  %v9874_v51 = vld [vmem:[#allocation2 + $0x138] sm:$0xff]  ;;  %v9894_v8 = vld [vmem:[#allocation2 + $0x160] sm:$0xff] }
 0x417   : > { %3413 = vrot.lane.b32.xlu0 %v9805_v3, %s6371_s26  ;;  %6058 = vmatprep.mubr.msk.f32.mxu1 %vm1543_vm2, %v2868_v43  ;;  %v9819_v63 = vpop.permute.xlu1 %3207  ;;  %v9823_v19 = vpop.permute.xlu0 %3205  ;;  %v9882_v60 = vld [vmem:[#allocation2 + $0x150] sm:$0xff]  ;;  %v9898_v5 = vld [vmem:[#allocation2 + $0x158] sm:$0xff]  ;;  %v9910_v9 = vld [vmem:[#allocation2 + $0x168] sm:$0xff] }
 0x418   : > { %6059 = vmatmul.mubr.msk.f32.gmra.mrb[14].mxu1 %vm1543_vm2, %v2869_v34  ;;  %v9906_v46 = vld [vmem:[#allocation2 + $0x170] sm:$0xff]  ;;  %v9916_v0 = vld [vmem:[#allocation2 + $0x180] sm:$0xff]  ;;  %v9922_v37 = vld [vmem:[#allocation2 + $0x178] sm:$0xff] }
 0x419   : > { %v9928_v21 = vld [vmem:[#allocation2 + $0x190] sm:$0xff]  ;;  %v9932_v53 = vld [vmem:[#allocation2 + $0x188] sm:$0xff]  ;;  %v6290_v34 = vld [vmem:[#allocation2 + $0x119] sm:$0xff] }
 0x41a   : > { %3419 = vrot.lane.b32.xlu1 %v9816_v59, %s6371_s26  ;;  %v6289_v17 = vld [vmem:[#allocation2 + $0x121] sm:$0xff] }
 0x41b   : > { %3417 = vrot.lane.b32.xlu0 %v9821_v57, %s6371_s26  ;;  %v9831_v41 = vpop.permute.xlu1 %3211  ;;  %v9835_v27 = vpop.permute.xlu0 %3209 }
 0x41e   : > { %3423 = vrot.lane.b32.xlu1 %v9829_v52, %s6371_s26 }
 0x41f   : > { %3421 = vrot.lane.b32.xlu0 %v9833_v15, %s6371_s26  ;;  %v9843_v16 = vpop.permute.xlu1 %3215  ;;  %v9847_v24 = vpop.permute.xlu0 %3213 }
 0x422   : > { %3427 = vrot.lane.b32.xlu1 %v9841_v35, %s6371_s26 }
 0x423   : > { %3425 = vrot.lane.b32.xlu0 %v9845_v61, %s6371_s26  ;;  %v9853_v62 = vpop.permute.xlu1 %3219  ;;  %v9855_v56 = vpop.permute.xlu0 %3217 }
 0x426   : > { %3463 = vrot.lane.b32.xlu1 %v3083_v58, %s6372_s27  ;;  %v13303_v58 = vld [vmem:[#allocation136_spill] sm:$0xff] }
 0x427   : > { %3461 = vrot.lane.b32.xlu0 %v3082_v20, %s6372_s27  ;;  %v9859_v22 = vpop.permute.xlu1 %3223  ;;  %v9863_v54 = vpop.permute.xlu0 %3221  ;;  %v6291_v20 = vld [vmem:[#allocation2 + $0x129] sm:$0xff] }
 0x42a   : > { %3467 = vrot.lane.b32.xlu1 %v9861_v45, %s6372_s27 }
 0x42b   : > { %3465 = vrot.lane.b32.xlu0 %v3084_v38, %s6372_s27  ;;  %v9868_v50 = vpop.permute.xlu1 %3227  ;;  %v9872_v48 = vpop.permute.xlu0 %3225 }
 0x42e   : > { %3471 = vrot.lane.b32.xlu1 %v9870_v14, %s6372_s27 }
 0x42f   : > { %3469 = vrot.lane.b32.xlu0 %v9874_v51, %s6372_s27  ;;  %v9880_v26 = vpop.permute.xlu1 %3231  ;;  %v9884_v29 = vpop.permute.xlu0 %3229 }
 0x432   : > { %3475 = vrot.lane.b32.xlu1 %v9882_v60, %s6372_s27 }
 0x433   : > { %3473 = vrot.lane.b32.xlu0 %v9886_v4, %s6372_s27  ;;  %v9892_v12 = vpop.permute.xlu1 %3235  ;;  %v9896_v36 = vpop.permute.xlu0 %3233 }
 0x436   : > { %3479 = vrot.lane.b32.xlu1 %v9894_v8, %s6372_s27 }
 0x437   : > { %3477 = vrot.lane.b32.xlu0 %v9898_v5, %s6372_s27  ;;  %v9904_v6 = vpop.permute.xlu1 %3271  ;;  %v9908_v28 = vpop.permute.xlu0 %3269 }
 0x438   : > { %13294 = vst [vmem:[#allocation177_spill] sm:$0xff] %v9908_v28 }
 0x43a   : > { %3483 = vrot.lane.b32.xlu1 %v9906_v46, %s6372_s27 }
 0x43b   : > { %3481 = vrot.lane.b32.xlu0 %v9910_v9, %s6372_s27  ;;  %v9918_v25 = vpop.permute.xlu1 %3275  ;;  %v9920_v10 = vpop.permute.xlu0 %3273 }
 0x43c   : > { %13295 = vst [vmem:[#allocation172_spill] sm:$0xff] %v9918_v25  ;;  %13296 = vst [vmem:[#allocation180_spill] sm:$0xff] %v9920_v10 }
 0x43e   : > { %3487 = vrot.lane.b32.xlu1 %v9916_v0, %s6372_s27 }
 0x43f   : > { %3485 = vrot.lane.b32.xlu0 %v9922_v37, %s6372_s27  ;;  %v9930_v44 = vpop.permute.xlu1 %3279  ;;  %v9934_v13 = vpop.permute.xlu0 %3277 }
 0x440   : > { %13297 = vst [vmem:[#allocation176_spill] sm:$0xff] %v9930_v44  ;;  %13298 = vst [vmem:[#allocation184_spill] sm:$0xff] %v9934_v13  ;;  %v309_v13 = vld [vmem:[%s6423_s22 + $0x1a0] sm:$0xff]  ;;  %v6294_v44 = vld [vmem:[#allocation2 + $0x12a] sm:$0xff] }
 0x441   : > { %374 = vst.msk [vmem:[#allocation2 + $0x1a0] sm:$0xff] %vm321_vm0, %v309_v13 }
 0x442   : > { %3491 = vrot.lane.b32.xlu1 %v9928_v21, %s6372_s27 }
 0x443   : > { %3489 = vrot.lane.b32.xlu0 %v9932_v53, %s6372_s27  ;;  %v9940_v55 = vpop.permute.xlu1 %3283  ;;  %v9942_v18 = vpop.permute.xlu0 %3281 }
 0x444   : > { %13299 = vst [vmem:[#allocation178_spill] sm:$0xff] %v9940_v55  ;;  %13300 = vst [vmem:[#allocation182_spill] sm:$0xff] %v9942_v18 }
 0x446   : > { %3514 = vrot.lane.b32.xlu1 %v6289_v17, %s6373_s28  ;;  %v13306_v17 = vld [vmem:[#allocation166_spill] sm:$0xff] }
 0x447   : > { %3512 = vrot.lane.b32.xlu0 %v6290_v34, %s6373_s28  ;;  %v9946_v49 = vpop.permute.xlu1 %3287  ;;  %v9948_v43 = vpop.permute.xlu0 %3285  ;;  %v13307_v34 = vld [vmem:[#allocation135_spill] sm:$0xff] }
 0x448   : > { %13301 = vst [vmem:[#allocation194_spill] sm:$0xff] %v9946_v49  ;;  %13302 = vst [vmem:[#allocation198_spill] sm:$0xff] %v9948_v43 }
 0x44a   : > { %3518 = vrot.lane.b32.xlu1 %v13303_v58, %s6373_s28  ;;  %v13310_v58 = vld [vmem:[#allocation167_spill] sm:$0xff] }
 0x44b   : > { %3516 = vrot.lane.b32.xlu0 %v6291_v20, %s6373_s28  ;;  %v9953_v38 = vpop.permute.xlu1 %3291  ;;  %v9955_v18 = vpop.permute.xlu0 %3289  ;;  %v13311_v20 = vld [vmem:[#allocation3_spill] sm:$0xff] }
 0x44c   : > { %13304 = vst [vmem:[#allocation192_spill] sm:$0xff] %v9953_v38  ;;  %13305 = vst [vmem:[#allocation5_spill] sm:$0xff] %v9955_v18  ;;  %v13314_v18 = vld [vmem:[#allocation125_spill] sm:$0xff] }
 0x44e   : > { %3522 = vrot.lane.b32.xlu1 %v13306_v17, %s6373_s28  ;;  %v13315_v17 = vld [vmem:[#allocation124_spill] sm:$0xff] }
 0x44f   : > { %3520 = vrot.lane.b32.xlu0 %v13307_v34, %s6373_s28  ;;  %v9961_v49 = vpop.permute.xlu1 %3295  ;;  %v9963_v43 = vpop.permute.xlu0 %3293 }
 0x450   : > { %13308 = vst [vmem:[#allocation196_spill] sm:$0xff] %v9961_v49  ;;  %13309 = vst [vmem:[#allocation13_spill] sm:$0xff] %v9963_v43  ;;  %v13318_v43 = vld [vmem:[#allocation191_spill] sm:$0xff] }
 0x452   : > { %3526 = vrot.lane.b32.xlu1 %v13310_v58, %s6373_s28  ;;  %v310_v58 = vld [vmem:[%s6423_s22 + $0x1a8] sm:$0xff] }
 0x453   : > { %3524 = vrot.lane.b32.xlu0 %v13311_v20, %s6373_s28  ;;  %v9969_v38 = vpop.permute.xlu1 %3299  ;;  %v9971_v55 = vpop.permute.xlu0 %3297  ;;  %v13319_v20 = vld [vmem:[#allocation190_spill] sm:$0xff]  ;;  %375 = vst.msk [vmem:[#allocation2 + $0x1a8] sm:$0xff] %vm321_vm0, %v310_v58 }
 0x454   : > { %13312 = vst [vmem:[#allocation200_spill] sm:$0xff] %v9969_v38  ;;  %13313 = vst [vmem:[#allocation10_spill] sm:$0xff] %v9971_v55  ;;  %v9987_v38 = vld [vmem:[#allocation2 + $0x181] sm:$0xff] }
 0x456   : > { %3530 = vrot.lane.b32.xlu1 %v13314_v18, %s6373_s28 }
 0x457   : > { %3528 = vrot.lane.b32.xlu0 %v13315_v17, %s6373_s28  ;;  %v9977_v34 = vpop.permute.xlu1 %3335  ;;  %v9979_v49 = vpop.permute.xlu0 %3333 }
 0x458   : > { %13316 = vst [vmem:[#allocation6_spill] sm:$0xff] %v9977_v34  ;;  %13317 = vst [vmem:[#allocation9_spill] sm:$0xff] %v9979_v49  ;;  %v9999_v49 = vld [vmem:[#allocation2 + $0x191] sm:$0xff] }
 0x45a   : > { %3534 = vrot.lane.b32.xlu1 %v13318_v43, %s6373_s28  ;;  %v13322_v43 = vld [vmem:[#allocation138_spill] sm:$0xff] }
 0x45b   : > { %3532 = vrot.lane.b32.xlu0 %v13319_v20, %s6373_s28  ;;  %v9991_v18 = vpop.permute.xlu1 %3339  ;;  %v9993_v17 = vpop.permute.xlu0 %3337  ;;  %v10003_v20 = vld [vmem:[#allocation2 + $0x189] sm:$0xff] }
 0x45c   : > { %13320 = vst [vmem:[#allocation11_spill] sm:$0xff] %v9991_v18  ;;  %13321 = vst [vmem:[#allocation12_spill] sm:$0xff] %v9993_v17  ;;  %v6292_v17 = vld [vmem:[#allocation2 + $0x122] sm:$0xff] }
 0x45e   : > { %3538 = vrot.lane.b32.xlu1 %v9987_v38, %s6373_s28 }
 0x45f   : > { %3536 = vrot.lane.b32.xlu0 %v13322_v43, %s6373_s28  ;;  %v10001_v34 = vpop.permute.xlu1 %3343  ;;  %v10005_v55 = vpop.permute.xlu0 %3341  ;;  %v6293_v43 = vld [vmem:[#allocation2 + $0x11a] sm:$0xff] }
 0x460   : > { %13323 = vst [vmem:[#allocation15_spill] sm:$0xff] %v10001_v34  ;;  %13324 = vst [vmem:[#allocation14_spill] sm:$0xff] %v10005_v55  ;;  %v13329_v55 = vld [vmem:[#allocation193_spill] sm:$0xff] }
 0x462   : > { %3542 = vrot.lane.b32.xlu1 %v9999_v49, %s6373_s28 }
 0x463   : > { %3540 = vrot.lane.b32.xlu0 %v10003_v20, %s6373_s28  ;;  %v10011_v13 = vpop.permute.xlu1 %3347  ;;  %v10013_v58 = vpop.permute.xlu0 %3345 }
 0x464   : > { %13325 = vst [vmem:[#allocation24_spill] sm:$0xff] %v10011_v13  ;;  %13326 = vst [vmem:[#allocation16_spill] sm:$0xff] %v10013_v58 }
 0x466   : > { %3565 = vrot.lane.b32.xlu1 %v6292_v17, %s6374_s29  ;;  %v13332_v17 = vld [vmem:[#allocation195_spill] sm:$0xff] }
 0x467   : > { %3563 = vrot.lane.b32.xlu0 %v6293_v43, %s6374_s29  ;;  %v10017_v34 = vpop.permute.xlu1 %3351  ;;  %v10019_v18 = vpop.permute.xlu0 %3349  ;;  %v13333_v43 = vld [vmem:[#allocation126_spill] sm:$0xff] }
 0x468   : > { %13327 = vst [vmem:[#allocation19_spill] sm:$0xff] %v10017_v34  ;;  %13328 = vst [vmem:[#allocation18_spill] sm:$0xff] %v10019_v18 }
 0x46a   : > { %3569 = vrot.lane.b32.xlu1 %v13329_v55, %s6374_s29  ;;  %v13336_v55 = vld [vmem:[#allocation156_spill] sm:$0xff] }
 0x46b   : > { %3567 = vrot.lane.b32.xlu0 %v6294_v44, %s6374_s29  ;;  %v10024_v13 = vpop.permute.xlu1 %3355  ;;  %v10026_v58 = vpop.permute.xlu0 %3353  ;;  %v13337_v44 = vld [vmem:[#allocation127_spill] sm:$0xff] }
 0x46c   : > { %13330 = vst [vmem:[#allocation20_spill] sm:$0xff] %v10024_v13  ;;  %13331 = vst [vmem:[#allocation22_spill] sm:$0xff] %v10026_v58  ;;  %v13340_v58 = vld [vmem:[#allocation175_spill] sm:$0xff] }
 0x46e   : > { %3573 = vrot.lane.b32.xlu1 %v13332_v17, %s6374_s29  ;;  %v13341_v17 = vld [vmem:[#allocation155_spill] sm:$0xff] }
 0x46f   : > { %3571 = vrot.lane.b32.xlu0 %v13333_v43, %s6374_s29 }
 0x470   : > { %v10032_v34 = vpop.permute.xlu1 %3359 }
 0x471   : > { %13334 = vst [vmem:[#allocation21_spill] sm:$0xff] %v10032_v34  ;;  %v10034_v18 = vpop.permute.xlu0 %3357 }
 0x472   : > { %13335 = vst [vmem:[#allocation23_spill] sm:$0xff] %v10034_v18  ;;  %3577 = vrot.lane.b32.xlu1 %v13336_v55, %s6374_s29  ;;  %v13344_v18 = vld [vmem:[#allocation170_spill] sm:$0xff]  ;;  %v311_v55 = vld [vmem:[%s6423_s22 + $0x1b0] sm:$0xff] }
 0x473   : > { %3575 = vrot.lane.b32.xlu0 %v13337_v44, %s6374_s29  ;;  %v13345_v44 = vld [vmem:[#allocation173_spill] sm:$0xff]  ;;  %376 = vst.msk [vmem:[#allocation2 + $0x1b0] sm:$0xff] %vm321_vm0, %v311_v55 }
 0x474   : > { %v10040_v10 = vpop.permute.xlu1 %3363 }
 0x475   : > { %13338 = vst [vmem:[#allocation25_spill] sm:$0xff] %v10040_v10  ;;  %v10042_v13 = vpop.permute.xlu0 %3361  ;;  %v10057_v10 = vld [vmem:[#allocation2 + $0x182] sm:$0xff] }
 0x476   : > { %13339 = vst [vmem:[#allocation27_spill] sm:$0xff] %v10042_v13  ;;  %3581 = vrot.lane.b32.xlu1 %v13340_v58, %s6374_s29 }
 0x477   : > { %3579 = vrot.lane.b32.xlu0 %v13341_v17, %s6374_s29  ;;  %v13348_v17 = vld [vmem:[#allocation197_spill] sm:$0xff] }
 0x478   : > { %v10048_v43 = vpop.permute.xlu1 %3399 }
 0x479   : > { %13342 = vst [vmem:[#allocation30_spill] sm:$0xff] %v10048_v43  ;;  %v10050_v34 = vpop.permute.xlu0 %3397  ;;  %v10072_v43 = vld [vmem:[#allocation2 + $0x18a] sm:$0xff] }
 0x47a   : > { %13343 = vst [vmem:[#allocation29_spill] sm:$0xff] %v10050_v34  ;;  %3585 = vrot.lane.b32.xlu1 %v13344_v18, %s6374_s29  ;;  %v10068_v34 = vld [vmem:[#allocation2 + $0x192] sm:$0xff] }
 0x47b   : > { %3583 = vrot.lane.b32.xlu0 %v13345_v44, %s6374_s29 }
 0x47c   : > { %v10060_v13 = vpop.permute.xlu1 %3403 }
 0x47d   : > { %13346 = vst [vmem:[#allocation31_spill] sm:$0xff] %v10060_v13  ;;  %v10062_v58 = vpop.permute.xlu0 %3401  ;;  %v6295_v13 = vld [vmem:[#allocation2 + $0x123] sm:$0xff] }
 0x47e   : > { %13347 = vst [vmem:[#allocation33_spill] sm:$0xff] %v10062_v58  ;;  %3589 = vrot.lane.b32.xlu1 %v10057_v10, %s6374_s29 }
 0x47f   : > { %3587 = vrot.lane.b32.xlu0 %v13348_v17, %s6374_s29  ;;  %v6296_v17 = vld [vmem:[#allocation2 + $0x11b] sm:$0xff] }
 0x480   : > { %v10070_v18 = vpop.permute.xlu1 %3407 }
 0x481   : > { %13349 = vst [vmem:[#allocation34_spill] sm:$0xff] %v10070_v18  ;;  %v10074_v44 = vpop.permute.xlu0 %3405 }
 0x482   : > { %13350 = vst [vmem:[#allocation35_spill] sm:$0xff] %v10074_v44  ;;  %3593 = vrot.lane.b32.xlu1 %v10068_v34, %s6374_s29  ;;  %v6297_v44 = vld [vmem:[#allocation2 + $0x12b] sm:$0xff] }
 0x483   : > { %3591 = vrot.lane.b32.xlu0 %v10072_v43, %s6374_s29 }
 0x484   : > { %v10080_v55 = vpop.permute.xlu1 %3411 }
 0x485   : > { %13351 = vst [vmem:[#allocation36_spill] sm:$0xff] %v10080_v55  ;;  %v10082_v58 = vpop.permute.xlu0 %3409 }
 0x486   : > { %3616 = vrot.lane.b32.xlu1 %v6295_v13, %s6375_s30 }
 0x487   : > { %3614 = vrot.lane.b32.xlu0 %v6296_v17, %s6375_s30 }
 0x488   : > { %v10086_v18 = vpop.permute.xlu1 %3415 }
 0x489   : > { %v10088_v25 = vpop.permute.xlu0 %3413 }
 0x48a   : > { %3620 = vrot.lane.b32.xlu1 %v9441_v32, %s6375_s30 }
 0x48b   : > { %3618 = vrot.lane.b32.xlu0 %v6297_v44, %s6375_s30 }
 0x48c   : > { %v10093_v28 = vpop.permute.xlu1 %3419 }
 0x48d   : > { %v10095_v55 = vpop.permute.xlu0 %3417 }
 0x48e   : > { %3624 = vrot.lane.b32.xlu1 %v9493_v7, %s6375_s30 }
 0x48f   : > { %3622 = vrot.lane.b32.xlu0 %v9429_v40, %s6375_s30 }
 0x490   : > { %v10101_v13 = vpop.permute.xlu1 %3423 }
 0x491   : > { %v10103_v17 = vpop.permute.xlu0 %3421 }
 0x492   : > { %3628 = vrot.lane.b32.xlu1 %v9545_v30, %s6375_s30 }
 0x493   : > { %3626 = vrot.lane.b32.xlu0 %v9477_v42, %s6375_s30  ;;  %v10125_v42 = vld [vmem:[#allocation2 + $0x183] sm:$0xff] }
 0x494   : > { %v10109_v32 = vpop.permute.xlu1 %3427 }
 0x495   : > { %13352 = vst [vmem:[#allocation37_spill] sm:$0xff] %v10109_v32  ;;  %v10111_v44 = vpop.permute.xlu0 %3425 }
 0x496   : > { %13353 = vst [vmem:[#allocation38_spill] sm:$0xff] %v10111_v44  ;;  %3632 = vrot.lane.b32.xlu1 %v9585_v31, %s6375_s30 }
 0x497   : > { %3630 = vrot.lane.b32.xlu0 %v9535_v33, %s6375_s30  ;;  %v10135_v33 = vld [vmem:[#allocation2 + $0x193] sm:$0xff] }
 0x498   : > { %v10117_v40 = vpop.permute.xlu1 %3463 }
 0x499   : > { %13354 = vst [vmem:[#allocation39_spill] sm:$0xff] %v10117_v40  ;;  %v10119_v7 = vpop.permute.xlu0 %3461 }
 0x49a   : > { %13355 = vst [vmem:[#allocation40_spill] sm:$0xff] %v10119_v7  ;;  %3636 = vrot.lane.b32.xlu1 %v9625_v39, %s6375_s30  ;;  %v10139_v39 = vld [vmem:[#allocation2 + $0x18b] sm:$0xff] }
 0x49b   : > { %3634 = vrot.lane.b32.xlu0 %v9574_v23, %s6375_s30 }
 0x49c   : > { %v10127_v30 = vpop.permute.xlu1 %3467 }
 0x49d   : > { %13356 = vst [vmem:[#allocation41_spill] sm:$0xff] %v10127_v30  ;;  %v10129_v44 = vpop.permute.xlu0 %3465  ;;  %v6298_v30 = vld [vmem:[#allocation2 + $0x124] sm:$0xff] }
 0x49e   : > { %13357 = vst [vmem:[#allocation42_spill] sm:$0xff] %v10129_v44  ;;  %3640 = vrot.lane.b32.xlu1 %v10125_v42, %s6375_s30 }
 0x49f   : > { %3638 = vrot.lane.b32.xlu0 %v9613_v11, %s6375_s30  ;;  %v6299_v11 = vld [vmem:[#allocation2 + $0x11c] sm:$0xff] }
 0x4a0   : > { %v10137_v31 = vpop.permute.xlu1 %3471 }
 0x4a1   : > { %13358 = vst [vmem:[#allocation43_spill] sm:$0xff] %v10137_v31  ;;  %v10141_v7 = vpop.permute.xlu0 %3469 }
 0x4a2   : > { %13359 = vst [vmem:[#allocation44_spill] sm:$0xff] %v10141_v7  ;;  %3644 = vrot.lane.b32.xlu1 %v10135_v33, %s6375_s30  ;;  %v6300_v7 = vld [vmem:[#allocation2 + $0x12c] sm:$0xff] }
 0x4a3   : > { %3642 = vrot.lane.b32.xlu0 %v10139_v39, %s6375_s30 }
 0x4a4   : > { %v10147_v23 = vpop.permute.xlu1 %3475 }
 0x4a5   : > { %13360 = vst [vmem:[#allocation45_spill] sm:$0xff] %v10147_v23  ;;  %v10149_v44 = vpop.permute.xlu0 %3473 }
 0x4a6   : > { %13361 = vst [vmem:[#allocation46_spill] sm:$0xff] %v10149_v44  ;;  %3667 = vrot.lane.b32.xlu1 %v6298_v30, %s6376_s5 }
 0x4a7   : > { %3665 = vrot.lane.b32.xlu0 %v6299_v11, %s6376_s5 }
 0x4a8   : > { %v10153_v31 = vpop.permute.xlu1 %3479 }
 0x4a9   : > { %13362 = vst [vmem:[#allocation47_spill] sm:$0xff] %v10153_v31  ;;  %v10155_v40 = vpop.permute.xlu0 %3477 }
 0x4aa   : > { %13363 = vst [vmem:[#allocation48_spill] sm:$0xff] %v10155_v40  ;;  %3671 = vrot.lane.b32.xlu1 %v9775_v1, %s6376_s5  ;;  %v10206_v40 = vld [vmem:[#allocation2 + $0x18c] sm:$0xff] }
 0x4ab   : > { %3669 = vrot.lane.b32.xlu0 %v6300_v7, %s6376_s5 }
 0x4ac   : > { %v10160_v32 = vpop.permute.xlu1 %3483 }
 0x4ad   : > { %13364 = vst [vmem:[#allocation49_spill] sm:$0xff] %v10160_v32  ;;  %v10162_v23 = vpop.permute.xlu0 %3481 }
 0x4ae   : > { %13365 = vst [vmem:[#allocation50_spill] sm:$0xff] %v10162_v23  ;;  %3675 = vrot.lane.b32.xlu1 %v9805_v3, %s6376_s5 }
 0x4af   : > { %3673 = vrot.lane.b32.xlu0 %v9764_v47, %s6376_s5 }
 0x4b0   : > { %v10168_v30 = vpop.permute.xlu1 %3487 }
 0x4b1   : > { %13366 = vst [vmem:[#allocation51_spill] sm:$0xff] %v10168_v30  ;;  %v10170_v11 = vpop.permute.xlu0 %3485 }
 0x4b2   : > { %13367 = vst [vmem:[#allocation52_spill] sm:$0xff] %v10170_v11  ;;  %3679 = vrot.lane.b32.xlu1 %v9821_v57, %s6376_s5  ;;  %v10192_v11 = vld [vmem:[#allocation2 + $0x184] sm:$0xff] }
 0x4b3   : > { %3677 = vrot.lane.b32.xlu0 %v9798_v2, %s6376_s5 }
 0x4b4   : > { %v10176_v7 = vpop.permute.xlu1 %3491 }
 0x4b5   : > { %13368 = vst [vmem:[#allocation53_spill] sm:$0xff] %v10176_v7  ;;  %v10178_v32 = vpop.permute.xlu0 %3489 }
 0x4b6   : > { %13369 = vst [vmem:[#allocation54_spill] sm:$0xff] %v10178_v32  ;;  %3683 = vrot.lane.b32.xlu1 %v9833_v15, %s6376_s5 }
 0x4b7   : > { %3681 = vrot.lane.b32.xlu0 %v9816_v59, %s6376_s5 }
 0x4b8   : > { %v10184_v23 = vpop.permute.xlu1 %3514 }
 0x4b9   : > { %13370 = vst [vmem:[#allocation55_spill] sm:$0xff] %v10184_v23  ;;  %v10186_v30 = vpop.permute.xlu0 %3512  ;;  %v10202_v23 = vld [vmem:[#allocation2 + $0x194] sm:$0xff] }
 0x4ba   : > { %13371 = vst [vmem:[#allocation56_spill] sm:$0xff] %v10186_v30  ;;  %3687 = vrot.lane.b32.xlu1 %v9845_v61, %s6376_s5 }
 0x4bb   : > { %3685 = vrot.lane.b32.xlu0 %v9829_v52, %s6376_s5 }
 0x4bc   : > { %v10194_v7 = vpop.permute.xlu1 %3518 }
 0x4bd   : > { %13372 = vst [vmem:[#allocation57_spill] sm:$0xff] %v10194_v7  ;;  %v10196_v32 = vpop.permute.xlu0 %3516 }
 0x4be   : > { %13373 = vst [vmem:[#allocation58_spill] sm:$0xff] %v10196_v32  ;;  %3691 = vrot.lane.b32.xlu1 %v10192_v11, %s6376_s5 }
 0x4bf   : > { %3689 = vrot.lane.b32.xlu0 %v9841_v35, %s6376_s5 }
 0x4c0   : > { %v10204_v30 = vpop.permute.xlu1 %3522 }
 0x4c1   : > { %13374 = vst [vmem:[#allocation59_spill] sm:$0xff] %v10204_v30  ;;  %v10208_v31 = vpop.permute.xlu0 %3520 }
 0x4c2   : > { %13375 = vst [vmem:[#allocation60_spill] sm:$0xff] %v10208_v31  ;;  %3695 = vrot.lane.b32.xlu1 %v10202_v23, %s6376_s5 }
 0x4c3   : > { %3693 = vrot.lane.b32.xlu0 %v10206_v40, %s6376_s5 }
 0x4c4   : > { %v10214_v32 = vpop.permute.xlu1 %3526 }
 0x4c5   : > { %13376 = vst [vmem:[#allocation61_spill] sm:$0xff] %v10214_v32  ;;  %v10216_v7 = vpop.permute.xlu0 %3524 }
 0x4c6   : > { %13377 = vst [vmem:[#allocation62_spill] sm:$0xff] %v10216_v7  ;;  %3718 = vrot.lane.b32.xlu1 %v9874_v51, %s6377_s6  ;;  %v10241_v51 = vld [vmem:[%s12414_s3] ss:$0 sm:$0xff] }
 0x4c7   : > { %3716 = vrot.lane.b32.xlu0 %v9861_v45, %s6377_s6 }
 0x4c8   : > { %v10222_v30 = vpop.permute.xlu1 %3530 }
 0x4c9   : > { %13378 = vst [vmem:[#allocation63_spill] sm:$0xff] %v10222_v30  ;;  %v10224_v31 = vpop.permute.xlu0 %3528 }
 0x4ca   : > { %13379 = vst [vmem:[#allocation64_spill] sm:$0xff] %v10224_v31  ;;  %3722 = vrot.lane.b32.xlu1 %v9886_v4, %s6377_s6 }
 0x4cb   : > { %3720 = vrot.lane.b32.xlu0 %v9870_v14, %s6377_s6 }
 0x4cc   : > { %v10230_v32 = vpop.permute.xlu1 %3534 }
 0x4cd   : > { %13380 = vst [vmem:[#allocation65_spill] sm:$0xff] %v10230_v32  ;;  %v10232_v7 = vpop.permute.xlu0 %3532 }
 0x4ce   : > { %13381 = vst [vmem:[#allocation66_spill] sm:$0xff] %v10232_v7  ;;  %3726 = vrot.lane.b32.xlu1 %v9898_v5, %s6377_s6 }
 0x4cf   : > { %v6039_v45 = vpop.f32.mrb[0].mxu1  ;;  %3724 = vrot.lane.b32.xlu0 %v9882_v60, %s6377_s6 }
 0x4d0   : > { %v2990_v31 = vadd.f32 %v10241_v51, %v6039_v45  ;;  %v2984_v14 = vpop.f32.mrb[1].mxu1  ;;  %v10244_v32 = vpop.permute.xlu1 %3538 }
 0x4d1   : > { %13382 = vst [vmem:[#allocation67_spill] sm:$0xff] %v10244_v32  ;;  %v2985_v7 = vadd.f32 %v10241_v51, %v2984_v14  ;;  %v10247_v30 = vpop.permute.xlu0 %3536 }
 0x4d2   : > { %13383 = vst [vmem:[#allocation68_spill] sm:$0xff] %v10247_v30  ;;  %3064 = vst.msk [vmem:[%s8702_s13 + $0x88] sm:$0xff] %vm1316_vm4, %v2990_v31  ;;  %3730 = vrot.lane.b32.xlu1 %v9910_v9, %s6377_s6 }
 0x4d3   : > { %3063 = vst.msk [vmem:[%s8702_s13 + $0x80] sm:$0xff] %vm1316_vm4, %v2985_v7  ;;  %v6042_v60 = vpop.f32.mrb[2].mxu1  ;;  %3728 = vrot.lane.b32.xlu0 %v9894_v8, %s6377_s6 }
 0x4d4   : > { %v3000_v45 = vadd.f32 %v10241_v51, %v6042_v60  ;;  %v2994_v44 = vpop.f32.mrb[3].mxu1  ;;  %v10258_v32 = vpop.permute.xlu1 %3542 }
 0x4d5   : > { %13384 = vst [vmem:[#allocation69_spill] sm:$0xff] %v10258_v32  ;;  %v2995_v14 = vadd.f32 %v10241_v51, %v2994_v44  ;;  %v10261_v30 = vpop.permute.xlu0 %3540 }
 0x4d6   : > { %13385 = vst [vmem:[#allocation70_spill] sm:$0xff] %v10261_v30  ;;  %3066 = vst.msk [vmem:[%s8702_s13 + $0x98] sm:$0xff] %vm1316_vm4, %v3000_v45  ;;  %3734 = vrot.lane.b32.xlu1 %v9922_v37, %s6377_s6 }
 0x4d7   : > { %3065 = vst.msk [vmem:[%s8702_s13 + $0x90] sm:$0xff] %vm1316_vm4, %v2995_v14  ;;  %v6045_v31 = vpop.f32.mrb[4].mxu1  ;;  %3732 = vrot.lane.b32.xlu0 %v9906_v46, %s6377_s6  ;;  %v3174_v14 = vld [vmem:[#allocation2 + $0x198] sm:$0xff] }
 0x4d8   : > { %v3010_v8 = vadd.f32 %v10241_v51, %v6045_v31  ;;  %v3004_v7 = vpop.f32.mrb[5].mxu1  ;;  %v10272_v60 = vpop.permute.xlu1 %3565 }
 0x4d9   : > { %13386 = vst [vmem:[#allocation71_spill] sm:$0xff] %v10272_v60  ;;  %v3005_v44 = vadd.f32 %v10241_v51, %v3004_v7  ;;  %v10275_v30 = vpop.permute.xlu0 %3563 }
 0x4da   : > { %13387 = vst [vmem:[#allocation72_spill] sm:$0xff] %v10275_v30  ;;  %3068 = vst.msk [vmem:[%s8702_s13 + $0xa8] sm:$0xff] %vm1316_vm4, %v3010_v8  ;;  %3738 = vrot.lane.b32.xlu1 %v9932_v53, %s6377_s6 }
 0x4db   : > { %3067 = vst.msk [vmem:[%s8702_s13 + $0xa0] sm:$0xff] %vm1316_vm4, %v3005_v44  ;;  %v6048_v45 = vpop.f32.mrb[6].mxu1  ;;  %3736 = vrot.lane.b32.xlu0 %v9916_v0, %s6377_s6  ;;  %v3176_v0 = vld [vmem:[#allocation2 + $0x1a8] sm:$0xff] }
 0x4dc   : > { %v3020_v31 = vadd.f32 %v10241_v51, %v6048_v45  ;;  %v3014_v60 = vpop.f32.mrb[7].mxu1  ;;  %v10286_v32 = vpop.permute.xlu1 %3569 }
 0x4dd   : > { %13388 = vst [vmem:[#allocation73_spill] sm:$0xff] %v10286_v32  ;;  %v3015_v7 = vadd.f32 %v10241_v51, %v3014_v60  ;;  %v10289_v8 = vpop.permute.xlu0 %3567  ;;  %v3175_v60 = vld [vmem:[#allocation2 + $0x1a0] sm:$0xff] }
 0x4de   : > { %13389 = vst [vmem:[#allocation74_spill] sm:$0xff] %v10289_v8  ;;  %3070 = vst.msk [vmem:[%s8702_s13 + $0xb8] sm:$0xff] %vm1316_vm4, %v3020_v31  ;;  %3742 = vrot.lane.b32.xlu1 %v3174_v14, %s6377_s6 }
 0x4df   : > { %3069 = vst.msk [vmem:[%s8702_s13 + $0xb0] sm:$0xff] %vm1316_vm4, %v3015_v7  ;;  %v6051_v53 = vpop.f32.mrb[8].mxu1  ;;  %3740 = vrot.lane.b32.xlu0 %v9928_v21, %s6377_s6 }
 0x4e0   : > { %v3030_v44 = vadd.f32 %v10241_v51, %v6051_v53  ;;  %v3024_v45 = vpop.f32.mrb[9].mxu1  ;;  %v10299_v32 = vpop.permute.xlu1 %3573 }
 0x4e1   : > { %13390 = vst [vmem:[#allocation75_spill] sm:$0xff] %v10299_v32  ;;  %v3025_v8 = vadd.f32 %v10241_v51, %v3024_v45  ;;  %v10302_v31 = vpop.permute.xlu0 %3571 }
 0x4e2   : > { %13391 = vst [vmem:[#allocation76_spill] sm:$0xff] %v10302_v31  ;;  %3072 = vst.msk [vmem:[%s8702_s13 + $0xc8] sm:$0xff] %vm1316_vm4, %v3030_v44  ;;  %3746 = vrot.lane.b32.xlu1 %v3176_v0, %s6377_s6  ;;  %v6302_v0 = vld [vmem:[#allocation2 + $0x139] sm:$0xff]  ;;  %v6303_v44 = vld [vmem:[#allocation2 + $0x131] sm:$0xff] }
 0x4e3   : > { %3071 = vst.msk [vmem:[%s8702_s13 + $0xc0] sm:$0xff] %vm1316_vm4, %v3025_v8  ;;  %v6054_v21 = vpop.f32.mrb[10].mxu1  ;;  %3744 = vrot.lane.b32.xlu0 %v3175_v60, %s6377_s6 }
 0x4e4   : > { %v3040_v14 = vadd.f32 %v10241_v51, %v6054_v21  ;;  %v3034_v7 = vpop.f32.mrb[11].mxu1  ;;  %v10311_v53 = vpop.permute.xlu1 %3577 }
 0x4e5   : > { %13392 = vst [vmem:[#allocation77_spill] sm:$0xff] %v10311_v53  ;;  %v3035_v32 = vadd.f32 %v10241_v51, %v3034_v7  ;;  %v10314_v45 = vpop.permute.xlu0 %3575 }
 0x4e6   : > { %13393 = vst [vmem:[#allocation78_spill] sm:$0xff] %v10314_v45  ;;  %3074 = vst.msk [vmem:[%s8702_s13 + $0xd8] sm:$0xff] %vm1316_vm4, %v3040_v14  ;;  %3769 = vrot.lane.b32.xlu1 %v6302_v0, %s6378_s7  ;;  %v6304_v14 = vld [vmem:[#allocation2 + $0x149] sm:$0xff]  ;;  %v313_v0 = vld [vmem:[%s6423_s22 + $0x1c0] sm:$0xff] }
 0x4e7   : > { %3073 = vst.msk [vmem:[%s8702_s13 + $0xd0] sm:$0xff] %vm1316_vm4, %v3035_v32  ;;  %v6057_v8 = vpop.f32.mrb[12].mxu1  ;;  %3767 = vrot.lane.b32.xlu0 %v6303_v44, %s6378_s7  ;;  %v312_v32 = vld [vmem:[%s6423_s22 + $0x1b8] sm:$0xff]  ;;  %v6305_v44 = vld [vmem:[#allocation2 + $0x141] sm:$0xff] }
 0x4e8   : > { %v3050_v60 = vadd.f32 %v10241_v51, %v6057_v8  ;;  %v3044_v21 = vpop.f32.mrb[13].mxu1  ;;  %v10323_v7 = vpop.permute.xlu1 %3581  ;;  %377 = vst.msk [vmem:[#allocation2 + $0x1b8] sm:$0xff] %vm321_vm0, %v312_v32  ;;  %378 = vst.msk [vmem:[#allocation2 + $0x1c0] sm:$0xff] %vm321_vm0, %v313_v0  ;;  %v315_v32 = vld [vmem:[%s6423_s22 + $0x1d0] sm:$0xff] }
 0x4e9   : > { %13394 = vst [vmem:[#allocation79_spill] sm:$0xff] %v10323_v7  ;;  %v3045_v45 = vadd.f32 %v10241_v51, %v3044_v21  ;;  %v10326_v53 = vpop.permute.xlu0 %3579  ;;  %v6307_v0 = vld [vmem:[#allocation2 + $0x151] sm:$0xff]  ;;  %380 = vst.msk [vmem:[#allocation2 + $0x1d0] sm:$0xff] %vm321_vm0, %v315_v32 }
 0x4ea   : > { %13395 = vst [vmem:[#allocation80_spill] sm:$0xff] %v10326_v53  ;;  %3076 = vst.msk [vmem:[%s8702_s13 + $0xe8] sm:$0xff] %vm1316_vm4, %v3050_v60  ;;  %3773 = vrot.lane.b32.xlu1 %v6304_v14, %s6378_s7 }
 0x4eb   : > { %3075 = vst.msk [vmem:[%s8702_s13 + $0xe0] sm:$0xff] %vm1316_vm4, %v3045_v45  ;;  %v6060_v8 = vpop.f32.mrb[14].mxu1  ;;  %3771 = vrot.lane.b32.xlu0 %v6305_v44, %s6378_s7  ;;  %v6306_v45 = vld [vmem:[#allocation2 + $0x159] sm:$0xff]  ;;  %v314_v44 = vld [vmem:[%s6423_s22 + $0x1c8] sm:$0xff] }
 0x4ec   : > { %v3060_v60 = vadd.f32 %v10241_v51, %v6060_v8  ;;  %v3054_v21 = vpop.f32.mrb[15].mxu1  ;;  %v10339_v53 = vpop.permute.xlu1 %3585  ;;  %379 = vst.msk [vmem:[#allocation2 + $0x1c8] sm:$0xff] %vm321_vm0, %v314_v44 }
 0x4ed   : > { %13396 = vst [vmem:[#allocation81_spill] sm:$0xff] %v10339_v53  ;;  %v3055_v14 = vadd.f32 %v10241_v51, %v3054_v21  ;;  %v10342_v7 = vpop.permute.xlu0 %3583  ;;  %v316_v21 = vld [vmem:[%s6423_s22 + $0x1d8] sm:$0xff] }
 0x4ee   : > { %13397 = vst [vmem:[#allocation82_spill] sm:$0xff] %v10342_v7  ;;  %3078 = vst.msk [vmem:[%s8702_s13 + $0xf8] sm:$0xff] %vm1316_vm4, %v3060_v60  ;;  %3777 = vrot.lane.b32.xlu1 %v6306_v45, %s6378_s7  ;;  %v6308_v60 = vld [vmem:[#allocation2 + $0x169] sm:$0xff]  ;;  %v6309_v45 = vld [vmem:[#allocation2 + $0x161] sm:$0xff] }
 0x4ef   : > { %3077 = vst.msk [vmem:[%s8702_s13 + $0xf0] sm:$0xff] %vm1316_vm4, %v3055_v14  ;;  %3775 = vrot.lane.b32.xlu0 %v6307_v0, %s6378_s7  ;;  %v317_v14 = vld [vmem:[%s6423_s22 + $0x1e0] sm:$0xff] }
 0x4f0   : > { %v10354_v51 = vpop.permute.xlu1 %3589  ;;  %381 = vst.msk [vmem:[#allocation2 + $0x1d8] sm:$0xff] %vm321_vm0, %v316_v21  ;;  %382 = vst.msk [vmem:[#allocation2 + $0x1e0] sm:$0xff] %vm321_vm0, %v317_v14  ;;  %v6310_v0 = vld [vmem:[#allocation2 + $0x179] sm:$0xff]  ;;  %v10406_v7 = vld [vmem:[#allocation2 + $0x1a1] sm:$0xff] }
 0x4f1   : > { %13398 = vst [vmem:[#allocation83_spill] sm:$0xff] %v10354_v51  ;;  %v10356_v8 = vpop.permute.xlu0 %3587 }
 0x4f2   : > { %13399 = vst [vmem:[#allocation84_spill] sm:$0xff] %v10356_v8  ;;  %3781 = vrot.lane.b32.xlu1 %v6308_v60, %s6378_s7  ;;  %v318_v60 = vld [vmem:[%s6423_s22 + $0x1e8] sm:$0xff]  ;;  %v6311_v8 = vld [vmem:[#allocation2 + $0x171] sm:$0xff] }
 0x4f3   : > { %3779 = vrot.lane.b32.xlu0 %v6309_v45, %s6378_s7  ;;  %v319_v45 = vld [vmem:[%s6423_s22 + $0x1f0] sm:$0xff]  ;;  %383 = vst.msk [vmem:[#allocation2 + $0x1e8] sm:$0xff] %vm321_vm0, %v318_v60  ;;  %v10390_v60 = vld [vmem:[#allocation2 + $0x199] sm:$0xff] }
 0x4f4   : > { %v10364_v44 = vpop.permute.xlu1 %3593  ;;  %384 = vst.msk [vmem:[#allocation2 + $0x1f0] sm:$0xff] %vm321_vm0, %v319_v45 }
 0x4f5   : > { %13400 = vst [vmem:[#allocation85_spill] sm:$0xff] %v10364_v44  ;;  %v10367_v32 = vpop.permute.xlu0 %3591  ;;  %v10402_v44 = vld [vmem:[#allocation2 + $0x1a9] sm:$0xff] }
 0x4f6   : > { %13401 = vst [vmem:[#allocation86_spill] sm:$0xff] %v10367_v32  ;;  %3785 = vrot.lane.b32.xlu1 %v6310_v0, %s6378_s7  ;;  %v386_v0 = vld [vmem:[%s10382_s10] sm:$0xff] }
 0x4f7   : > { %3783 = vrot.lane.b32.xlu0 %v6311_v8, %s6378_s7  ;;  %v320_v8 = vld [vmem:[%s6423_s22 + $0x1f8] sm:$0xff]  ;;  %394 = vst.msk [vmem:[#allocation2 + $0x200] sm:$0xff] %vm321_vm0, %v386_v0 }
 0x4f8   : > { %v10374_v21 = vpop.permute.xlu1 %3616  ;;  %385 = vst.msk [vmem:[#allocation2 + $0x1f8] sm:$0xff] %vm321_vm0, %v320_v8 }
 0x4f9   : > { %13402 = vst [vmem:[#allocation87_spill] sm:$0xff] %v10374_v21  ;;  %v10377_v14 = vpop.permute.xlu0 %3614 }
 0x4fa   : > { %13403 = vst [vmem:[#allocation88_spill] sm:$0xff] %v10377_v14  ;;  %3789 = vrot.lane.b32.xlu1 %v10003_v20, %s6378_s7  ;;  %v6315_v14 = vld [vmem:[#allocation2 + $0x142] sm:$0xff] }
 0x4fb   : > { %3787 = vrot.lane.b32.xlu0 %v9987_v38, %s6378_s7 }
 0x4fc   : > { %v10394_v45 = vpop.permute.xlu1 %3620 }
 0x4fd   : > { %13404 = vst [vmem:[#allocation89_spill] sm:$0xff] %v10394_v45  ;;  %v10396_v32 = vpop.permute.xlu0 %3618  ;;  %v6313_v45 = vld [vmem:[#allocation2 + $0x132] sm:$0xff] }
 0x4fe   : > { %13405 = vst [vmem:[#allocation90_spill] sm:$0xff] %v10396_v32  ;;  %3793 = vrot.lane.b32.xlu1 %v10390_v60, %s6378_s7  ;;  %v6312_v32 = vld [vmem:[#allocation2 + $0x13a] sm:$0xff] }
 0x4ff   : > { %3791 = vrot.lane.b32.xlu0 %v9999_v49, %s6378_s7 }
 0x500   : > { %v10404_v51 = vpop.permute.xlu1 %3624 }
 0x501   : > { %13406 = vst [vmem:[#allocation91_spill] sm:$0xff] %v10404_v51  ;;  %v10408_v53 = vpop.permute.xlu0 %3622 }
 0x502   : > { %13407 = vst [vmem:[#allocation102_spill] sm:$0xff] %v10408_v53  ;;  %3797 = vrot.lane.b32.xlu1 %v10402_v44, %s6378_s7  ;;  %v6314_v53 = vld [vmem:[#allocation2 + $0x14a] sm:$0xff] }
 0x503   : > { %3795 = vrot.lane.b32.xlu0 %v10406_v7, %s6378_s7 }
 0x504   : > { %v10414_v8 = vpop.permute.xlu1 %3628 }
 0x505   : > { %13408 = vst [vmem:[#allocation92_spill] sm:$0xff] %v10414_v8  ;;  %v10416_v0 = vpop.permute.xlu0 %3626 }
 0x506   : > { %13409 = vst [vmem:[#allocation93_spill] sm:$0xff] %v10416_v0  ;;  %3820 = vrot.lane.b32.xlu1 %v6312_v32, %s6379_s8  ;;  %v6316_v0 = vld [vmem:[#allocation2 + $0x15a] sm:$0xff]  ;;  %v6317_v32 = vld [vmem:[#allocation2 + $0x152] sm:$0xff] }
 0x507   : > { %3818 = vrot.lane.b32.xlu0 %v6313_v45, %s6379_s8 }
 0x508   : > { %v10420_v51 = vpop.permute.xlu1 %3632 }
 0x509   : > { %13410 = vst [vmem:[#allocation103_spill] sm:$0xff] %v10420_v51  ;;  %v10422_v31 = vpop.permute.xlu0 %3630 }
 0x50a   : > { %13411 = vst [vmem:[#allocation114_spill] sm:$0xff] %v10422_v31  ;;  %3824 = vrot.lane.b32.xlu1 %v6314_v53, %s6379_s8  ;;  %v6318_v31 = vld [vmem:[#allocation2 + $0x16a] sm:$0xff]  ;;  %v6319_v53 = vld [vmem:[#allocation2 + $0x162] sm:$0xff] }
 0x50b   : > { %3822 = vrot.lane.b32.xlu0 %v6315_v14, %s6379_s8 }
 0x50c   : > { %v10426_v21 = vpop.permute.xlu1 %3636 }
 0x50d   : > { %13412 = vst [vmem:[#allocation94_spill] sm:$0xff] %v10426_v21  ;;  %v10428_v8 = vpop.permute.xlu0 %3634 }
 0x50e   : > { %13413 = vst [vmem:[#allocation95_spill] sm:$0xff] %v10428_v8  ;;  %3828 = vrot.lane.b32.xlu1 %v6316_v0, %s6379_s8  ;;  %v6320_v8 = vld [vmem:[#allocation2 + $0x17a] sm:$0xff]  ;;  %v6321_v0 = vld [vmem:[#allocation2 + $0x172] sm:$0xff] }
 0x50f   : > { %3826 = vrot.lane.b32.xlu0 %v6317_v32, %s6379_s8 }
 0x510   : > { %v10432_v45 = vpop.permute.xlu1 %3640 }
 0x511   : > { %13414 = vst [vmem:[#allocation116_spill] sm:$0xff] %v10432_v45  ;;  %v10434_v51 = vpop.permute.xlu0 %3638 }
 0x512   : > { %13415 = vst [vmem:[#allocation96_spill] sm:$0xff] %v10434_v51  ;;  %3832 = vrot.lane.b32.xlu1 %v6318_v31, %s6379_s8  ;;  %v10452_v31 = vld [vmem:[#allocation2 + $0x19a] sm:$0xff] }
 0x513   : > { %3830 = vrot.lane.b32.xlu0 %v6319_v53, %s6379_s8 }
 0x514   : > { %v10438_v14 = vpop.permute.xlu1 %3644 }
 0x515   : > { %13416 = vst [vmem:[#allocation97_spill] sm:$0xff] %v10438_v14  ;;  %v10440_v21 = vpop.permute.xlu0 %3642  ;;  %v10466_v14 = vld [vmem:[#allocation2 + $0x1a2] sm:$0xff] }
 0x516   : > { %13417 = vst [vmem:[#allocation98_spill] sm:$0xff] %v10440_v21  ;;  %3836 = vrot.lane.b32.xlu1 %v6320_v8, %s6379_s8  ;;  %v10462_v8 = vld [vmem:[#allocation2 + $0x1aa] sm:$0xff] }
 0x517   : > { %3834 = vrot.lane.b32.xlu0 %v6321_v0, %s6379_s8 }
 0x518   : > { %v10444_v32 = vpop.permute.xlu1 %3667 }
 0x519   : > { %13418 = vst [vmem:[#allocation104_spill] sm:$0xff] %v10444_v32  ;;  %v10446_v45 = vpop.permute.xlu0 %3665  ;;  %v6325_v32 = vld [vmem:[#allocation2 + $0x143] sm:$0xff] }
 0x51a   : > { %13419 = vst [vmem:[#allocation105_spill] sm:$0xff] %v10446_v45  ;;  %3840 = vrot.lane.b32.xlu1 %v10072_v43, %s6379_s8 }
 0x51b   : > { %3838 = vrot.lane.b32.xlu0 %v10057_v10, %s6379_s8 }
 0x51c   : > { %v10454_v53 = vpop.permute.xlu1 %3671 }
 0x51d   : > { %13420 = vst [vmem:[#allocation179_spill] sm:$0xff] %v10454_v53  ;;  %v10456_v21 = vpop.permute.xlu0 %3669  ;;  %v6322_v53 = vld [vmem:[#allocation2 + $0x13b] sm:$0xff] }
 0x51e   : > { %13421 = vst [vmem:[#allocation117_spill] sm:$0xff] %v10456_v21  ;;  %3844 = vrot.lane.b32.xlu1 %v10452_v31, %s6379_s8 }
 0x51f   : > { %3842 = vrot.lane.b32.xlu0 %v10068_v34, %s6379_s8  ;;  %v6323_v34 = vld [vmem:[#allocation2 + $0x133] sm:$0xff] }
 0x520   : > { %v10464_v0 = vpop.permute.xlu1 %3675 }
 0x521   : > { %13422 = vst [vmem:[#allocation99_spill] sm:$0xff] %v10464_v0  ;;  %v10468_v51 = vpop.permute.xlu0 %3673 }
 0x522   : > { %13423 = vst [vmem:[#allocation106_spill] sm:$0xff] %v10468_v51  ;;  %3848 = vrot.lane.b32.xlu1 %v10462_v8, %s6379_s8  ;;  %v6324_v51 = vld [vmem:[#allocation2 + $0x14b] sm:$0xff] }
 0x523   : > { %3846 = vrot.lane.b32.xlu0 %v10466_v14, %s6379_s8 }
 0x524   : > { %v10474_v10 = vpop.permute.xlu1 %3679 }
 0x525   : > { %13424 = vst [vmem:[#allocation28_spill] sm:$0xff] %v10474_v10  ;;  %v10476_v21 = vpop.permute.xlu0 %3677 }
 0x526   : > { %13425 = vst [vmem:[#allocation128_spill] sm:$0xff] %v10476_v21  ;;  %3871 = vrot.lane.b32.xlu1 %v6322_v53, %s6380_s9  ;;  %v6326_v21 = vld [vmem:[#allocation2 + $0x15b] sm:$0xff]  ;;  %v6327_v53 = vld [vmem:[#allocation2 + $0x153] sm:$0xff] }
 0x527   : > { %3869 = vrot.lane.b32.xlu0 %v6323_v34, %s6380_s9 }
 0x528   : > { %v10480_v0 = vpop.permute.xlu1 %3683 }
 0x529   : > { %13426 = vst [vmem:[#allocation181_spill] sm:$0xff] %v10480_v0  ;;  %v10482_v45 = vpop.permute.xlu0 %3681 }
 0x52a   : > { %13427 = vst [vmem:[#allocation130_spill] sm:$0xff] %v10482_v45  ;;  %3875 = vrot.lane.b32.xlu1 %v6324_v51, %s6380_s9  ;;  %v6328_v45 = vld [vmem:[#allocation2 + $0x16b] sm:$0xff]  ;;  %v6329_v51 = vld [vmem:[#allocation2 + $0x163] sm:$0xff] }
 0x52b   : > { %3873 = vrot.lane.b32.xlu0 %v6325_v32, %s6380_s9 }
 0x52c   : > { %v10486_v30 = vpop.permute.xlu1 %3687 }
 0x52d   : > { %13428 = vst [vmem:[#allocation134_spill] sm:$0xff] %v10486_v30  ;;  %v10488_v10 = vpop.permute.xlu0 %3685 }
 0x52e   : > { %13429 = vst [vmem:[#allocation185_spill] sm:$0xff] %v10488_v10  ;;  %3879 = vrot.lane.b32.xlu1 %v6326_v21, %s6380_s9  ;;  %v6330_v10 = vld [vmem:[#allocation2 + $0x17b] sm:$0xff]  ;;  %v6331_v21 = vld [vmem:[#allocation2 + $0x173] sm:$0xff] }
 0x52f   : > { %3877 = vrot.lane.b32.xlu0 %v6327_v53, %s6380_s9 }
 0x530   : > { %v10492_v34 = vpop.permute.xlu1 %3691 }
 0x531   : > { %13430 = vst [vmem:[#allocation137_spill] sm:$0xff] %v10492_v34  ;;  %v10494_v0 = vpop.permute.xlu0 %3689 }
 0x532   : > { %13431 = vst [vmem:[#allocation107_spill] sm:$0xff] %v10494_v0  ;;  %3883 = vrot.lane.b32.xlu1 %v6328_v45, %s6380_s9  ;;  %v10512_v45 = vld [vmem:[#allocation2 + $0x19b] sm:$0xff] }
 0x533   : > { %3881 = vrot.lane.b32.xlu0 %v6329_v51, %s6380_s9 }
 0x534   : > { %v10498_v32 = vpop.permute.xlu1 %3695 }
 0x535   : > { %13432 = vst [vmem:[#allocation32_spill] sm:$0xff] %v10498_v32  ;;  %v10500_v30 = vpop.permute.xlu0 %3693 }
 0x536   : > { %13433 = vst [vmem:[#allocation7_spill] sm:$0xff] %v10500_v30  ;;  %3887 = vrot.lane.b32.xlu1 %v6330_v10, %s6380_s9  ;;  %v10522_v10 = vld [vmem:[#allocation2 + $0x1ab] sm:$0xff] }
 0x537   : > { %3885 = vrot.lane.b32.xlu0 %v6331_v21, %s6380_s9 }
 0x538   : > { %v10504_v53 = vpop.permute.xlu1 %3718 }
 0x539   : > { %v10506_v34 = vpop.permute.xlu0 %3716 }
 0x53a   : > { %3891 = vrot.lane.b32.xlu1 %v10139_v39, %s6380_s9  ;;  %v10526_v39 = vld [vmem:[#allocation2 + $0x1a3] sm:$0xff] }
 0x53b   : > { %3889 = vrot.lane.b32.xlu0 %v10125_v42, %s6380_s9 }
 0x53c   : > { %v10514_v51 = vpop.permute.xlu1 %3722 }
 0x53d   : > { %v10516_v30 = vpop.permute.xlu0 %3720 }
 0x53e   : > { %3895 = vrot.lane.b32.xlu1 %v10512_v45, %s6380_s9 }
 0x53f   : > { %3893 = vrot.lane.b32.xlu0 %v10135_v33, %s6380_s9 }
 0x540   : > { %v10524_v21 = vpop.permute.xlu1 %3726 }
 0x541   : > { %13434 = vst [vmem:[#allocation199_spill] sm:$0xff] %v10524_v21  ;;  %v10528_v32 = vpop.permute.xlu0 %3724 }
 0x542   : > { %13435 = vst [vmem:[#allocation129_spill] sm:$0xff] %v10528_v32  ;;  %3899 = vrot.lane.b32.xlu1 %v10522_v10, %s6380_s9 }
 0x543   : > { %3897 = vrot.lane.b32.xlu0 %v10526_v39, %s6380_s9 }
 0x544   : > { %v10534_v42 = vpop.permute.xlu1 %3730 }
 0x545   : > { %13436 = vst [vmem:[#allocation17_spill] sm:$0xff] %v10534_v42  ;;  %v10536_v0 = vpop.permute.xlu0 %3728 }
 0x546   : > { %13437 = vst [vmem:[#allocation174_spill] sm:$0xff] %v10536_v0  ;;  %3922 = vrot.lane.b32.xlu1 %v9764_v47, %s6382_s18  ;;  %v13507_v0 = vld [vmem:[#allocation20_spill] sm:$0xff] }
 0x547   : > { %3920 = vrot.lane.b32.xlu0 %v9775_v1, %s6382_s18 }
 0x548   : > { %v10542_v33 = vpop.permute.xlu1 %3734 }
 0x549   : > { %13438 = vst [vmem:[#allocation131_spill] sm:$0xff] %v10542_v33  ;;  %v10544_v21 = vpop.permute.xlu0 %3732 }
 0x54a   : > { %13439 = vst [vmem:[#allocation150_spill] sm:$0xff] %v10544_v21  ;;  %3926 = vrot.lane.b32.xlu1 %v9798_v2, %s6382_s18 }
 0x54b   : > { %3924 = vrot.lane.b32.xlu0 %v9805_v3, %s6382_s18 }
 0x54c   : > { %v10550_v32 = vpop.permute.xlu1 %3738 }
 0x54d   : > { %13440 = vst [vmem:[#allocation140_spill] sm:$0xff] %v10550_v32  ;;  %v10552_v42 = vpop.permute.xlu0 %3736  ;;  %v4431_v32 = vld [vmem:[#allocation2 + $0x1f1] sm:$0xff] }
 0x54e   : > { %13441 = vst [vmem:[#allocation26_spill] sm:$0xff] %v10552_v42  ;;  %3930 = vrot.lane.b32.xlu1 %v9816_v59, %s6382_s18 }
 0x54f   : > { %3928 = vrot.lane.b32.xlu0 %v9821_v57, %s6382_s18 }
 0x550   : > { %v10558_v47 = vpop.permute.xlu1 %3742 }
 0x551   : > { %13442 = vst [vmem:[#allocation164_spill] sm:$0xff] %v10558_v47  ;;  %v10560_v1 = vpop.permute.xlu0 %3740 }
 0x552   : > { %13443 = vst [vmem:[#allocation139_spill] sm:$0xff] %v10560_v1  ;;  %3934 = vrot.lane.b32.xlu1 %v9829_v52, %s6382_s18  ;;  %v10582_v52 = vld [vmem:[#allocation2 + $0x19c] sm:$0xff] }
 0x553   : > { %3932 = vrot.lane.b32.xlu0 %v9833_v15, %s6382_s18  ;;  %13446 = vst [vmem:[#allocation153_spill] sm:$0xff] %v10582_v52 }
 0x554   : > { %v10566_v2 = vpop.permute.xlu1 %3746 }
 0x555   : > { %13444 = vst [vmem:[#allocation108_spill] sm:$0xff] %v10566_v2  ;;  %v10568_v3 = vpop.permute.xlu0 %3744 }
 0x556   : > { %13445 = vst [vmem:[#allocation145_spill] sm:$0xff] %v10568_v3  ;;  %3938 = vrot.lane.b32.xlu1 %v9841_v35, %s6382_s18  ;;  %v10592_v35 = vld [vmem:[#allocation2 + $0x1ac] sm:$0xff] }
 0x557   : > { %3936 = vrot.lane.b32.xlu0 %v9845_v61, %s6382_s18  ;;  %13447 = vst [vmem:[#allocation168_spill] sm:$0xff] %v10592_v35 }
 0x558   : > { %v10574_v59 = vpop.permute.xlu1 %3769 }
 0x559   : > { %v10576_v57 = vpop.permute.xlu0 %3767 }
 0x55a   : > { %3942 = vrot.lane.b32.xlu1 %v10206_v40, %s6382_s18  ;;  %v10596_v40 = vld [vmem:[#allocation2 + $0x1a4] sm:$0xff] }
 0x55b   : > { %3940 = vrot.lane.b32.xlu0 %v10192_v11, %s6382_s18  ;;  %13448 = vst [vmem:[#allocation8_spill] sm:$0xff] %v10596_v40 }
 0x55c   : > { %v10584_v15 = vpop.permute.xlu1 %3773 }
 0x55d   : > { %v10586_v3 = vpop.permute.xlu0 %3771 }
 0x55e   : > { %3946 = vrot.lane.b32.xlu1 %v10582_v52, %s6382_s18  ;;  %v10632_v52 = vld [vmem:[#allocation2 + $0x1b1] sm:$0xff] }
 0x55f   : > { %3944 = vrot.lane.b32.xlu0 %v10202_v23, %s6382_s18  ;;  %13457 = vst [vmem:[#allocation110_spill] sm:$0xff] %v10632_v52 }
 0x560   : > { %v10594_v61 = vpop.permute.xlu1 %3777 }
 0x561   : > { %v10598_v2 = vpop.permute.xlu0 %3775 }
 0x562   : > { %3950 = vrot.lane.b32.xlu1 %v10592_v35, %s6382_s18 }
 0x563   : > { %3948 = vrot.lane.b32.xlu0 %v10596_v40, %s6382_s18 }
 0x564   : > { %v10604_v11 = vpop.permute.xlu1 %3781 }
 0x565   : > { %13449 = vst [vmem:[#allocation147_spill] sm:$0xff] %v10604_v11  ;;  %v10606_v1 = vpop.permute.xlu0 %3779  ;;  %v6334_v11 = vld [vmem:[#allocation2 + $0x120] sm:$0xff] }
 0x566   : > { %13450 = vst [vmem:[#allocation148_spill] sm:$0xff] %v10606_v1  ;;  %4529 = vrot.lane.b32.xlu1 %v10003_v20, %s6368_s23  ;;  %v6333_v1 = vld [vmem:[#allocation2 + $0x128] sm:$0xff] }
 0x567   : > { %4527 = vrot.lane.b32.xlu0 %v9987_v38, %s6368_s23  ;;  %v10628_v38 = vld [vmem:[#allocation2 + $0x1b9] sm:$0xff] }
 0x568   : > { %v10612_v23 = vpop.permute.xlu1 %3785  ;;  %13455 = vst [vmem:[#allocation165_spill] sm:$0xff] %v10628_v38 }
 0x569   : > { %13451 = vst [vmem:[#allocation122_spill] sm:$0xff] %v10612_v23  ;;  %v10614_v47 = vpop.permute.xlu0 %3783 }
 0x56a   : > { %13452 = vst [vmem:[#allocation143_spill] sm:$0xff] %v10614_v47  ;;  %4533 = vrot.lane.b32.xlu1 %v10390_v60, %s6368_s23 }
 0x56b   : > { %4531 = vrot.lane.b32.xlu0 %v9999_v49, %s6368_s23  ;;  %v10640_v49 = vld [vmem:[#allocation2 + $0x1c9] sm:$0xff] }
 0x56c   : > { %v10620_v40 = vpop.permute.xlu1 %3789  ;;  %13459 = vst [vmem:[#allocation154_spill] sm:$0xff] %v10640_v49 }
 0x56d   : > { %13453 = vst [vmem:[#allocation144_spill] sm:$0xff] %v10620_v40  ;;  %v10622_v35 = vpop.permute.xlu0 %3787  ;;  %v4429_v40 = vld [vmem:[#allocation2 + $0x1e1] sm:$0xff] }
 0x56e   : > { %13454 = vst [vmem:[#allocation109_spill] sm:$0xff] %v10622_v35  ;;  %4537 = vrot.lane.b32.xlu1 %v10402_v44, %s6368_s23  ;;  %v10644_v35 = vld [vmem:[#allocation2 + $0x1c1] sm:$0xff] }
 0x56f   : > { %4535 = vrot.lane.b32.xlu0 %v10406_v7, %s6368_s23  ;;  %13461 = vst [vmem:[#allocation162_spill] sm:$0xff] %v10644_v35 }
 0x570   : > { %v10630_v20 = vpop.permute.xlu1 %3793 }
 0x571   : > { %13456 = vst [vmem:[#allocation115_spill] sm:$0xff] %v10630_v20  ;;  %v10634_v60 = vpop.permute.xlu0 %3791 }
 0x572   : > { %13458 = vst [vmem:[#allocation146_spill] sm:$0xff] %v10634_v60  ;;  %4541 = vrot.lane.b32.xlu1 %v10628_v38, %s6368_s23  ;;  %v4428_v60 = vld [vmem:[#allocation2 + $0x1d9] sm:$0xff]  ;;  %v10654_v38 = vld [vmem:[#allocation2 + $0x1d1] sm:$0xff] }
 0x573   : > { %4539 = vrot.lane.b32.xlu0 %v10632_v52, %s6368_s23  ;;  %13463 = vst [vmem:[#allocation120_spill] sm:$0xff] %v10654_v38 }
 0x574   : > { %v10642_v44 = vpop.permute.xlu1 %3797 }
 0x575   : > { %13460 = vst [vmem:[#allocation159_spill] sm:$0xff] %v10642_v44  ;;  %v10646_v7 = vpop.permute.xlu0 %3795  ;;  %v4430_v44 = vld [vmem:[#allocation2 + $0x1e9] sm:$0xff] }
 0x576   : > { %13462 = vst [vmem:[#allocation100_spill] sm:$0xff] %v10646_v7  ;;  %4545 = vrot.lane.b32.xlu1 %v10640_v49, %s6368_s23 }
 0x577   : > { %4543 = vrot.lane.b32.xlu0 %v10644_v35, %s6368_s23  ;;  %v4432_v35 = vld [vmem:[#allocation2 + $0x1f9] sm:$0xff] }
 0x578   : > { %v10652_v20 = vpop.permute.xlu1 %3820 }
 0x579   : > { %v10656_v52 = vpop.permute.xlu0 %3818 }
 0x57a   : > { %4549 = vrot.lane.b32.xlu1 %v4428_v60, %s6368_s23 }
 0x57b   : > { %4547 = vrot.lane.b32.xlu0 %v10654_v38, %s6368_s23  ;;  %v4433_v38 = vld [vmem:[#allocation2 + $0x182] sm:$0xff] }
 0x57c   : > { %v10661_v7 = vpop.permute.xlu1 %3824 }
 0x57d   : > { %v10663_v49 = vpop.permute.xlu0 %3822 }
 0x57e   : > { %4553 = vrot.lane.b32.xlu1 %v4430_v44, %s6368_s23  ;;  %v4435_v44 = vld [vmem:[#allocation2 + $0x192] sm:$0xff] }
 0x57f   : > { %4551 = vrot.lane.b32.xlu0 %v4429_v40, %s6368_s23 }
 0x580   : > { %v10667_v42 = vpop.permute.xlu1 %3828 }
 0x581   : > { %v10669_v47 = vpop.permute.xlu0 %3826 }
 0x582   : > { %4557 = vrot.lane.b32.xlu1 %v4432_v35, %s6368_s23 }
 0x583   : > { %4555 = vrot.lane.b32.xlu0 %v4431_v32, %s6368_s23 }
 0x584   : > { %v10673_v60 = vpop.permute.xlu1 %3832 }
 0x585   : > { %13464 = vst [vmem:[#allocation188_spill] sm:$0xff] %v10673_v60  ;;  %v10675_v23 = vpop.permute.xlu0 %3830  ;;  %v4446_v60 = vld [vmem:[#allocation2 + $0x1ea] sm:$0xff] }
 0x586   : > { %13465 = vst [vmem:[#allocation187_spill] sm:$0xff] %v10675_v23  ;;  %4593 = vrot.lane.b32.xlu1 %v10072_v43, %s6369_s24  ;;  %v10695_v43 = vld [vmem:[#allocation2 + $0x1ba] sm:$0xff] }
 0x587   : > { %4591 = vrot.lane.b32.xlu0 %v4433_v38, %s6369_s24  ;;  %13470 = vst [vmem:[#allocation118_spill] sm:$0xff] %v10695_v43 }
 0x588   : > { %v10680_v40 = vpop.permute.xlu1 %3836 }
 0x589   : > { %13466 = vst [vmem:[#allocation111_spill] sm:$0xff] %v10680_v40  ;;  %v10682_v21 = vpop.permute.xlu0 %3834 }
 0x58a   : > { %13467 = vst [vmem:[#allocation123_spill] sm:$0xff] %v10682_v21  ;;  %4597 = vrot.lane.b32.xlu1 %v10452_v31, %s6369_s24  ;;  %v10699_v21 = vld [vmem:[#allocation2 + $0x1b2] sm:$0xff]  ;;  %v10707_v31 = vld [vmem:[#allocation2 + $0x1ca] sm:$0xff] }
 0x58b   : > { %4595 = vrot.lane.b32.xlu0 %v4435_v44, %s6369_s24  ;;  %13472 = vst [vmem:[#allocation161_spill] sm:$0xff] %v10699_v21  ;;  %13474 = vst [vmem:[#allocation101_spill] sm:$0xff] %v10707_v31  ;;  %v10711_v44 = vld [vmem:[#allocation2 + $0x1c2] sm:$0xff] }
 0x58c   : > { %v10687_v32 = vpop.permute.xlu1 %3840  ;;  %13476 = vst [vmem:[#allocation189_spill] sm:$0xff] %v10711_v44 }
 0x58d   : > { %13468 = vst [vmem:[#allocation169_spill] sm:$0xff] %v10687_v32  ;;  %v10689_v35 = vpop.permute.xlu0 %3838  ;;  %v10723_v32 = vld [vmem:[#allocation2 + $0x1d2] sm:$0xff] }
 0x58e   : > { %13469 = vst [vmem:[#allocation4_spill] sm:$0xff] %v10689_v35  ;;  %4601 = vrot.lane.b32.xlu1 %v10462_v8, %s6369_s24  ;;  %v3081_v35 = vld [vmem:[#allocation2 + $0x110] sm:$0xff]  ;;  %13479 = vst [vmem:[#allocation151_spill] sm:$0xff] %v10723_v32 }
 0x58f   : > { %4599 = vrot.lane.b32.xlu0 %v10466_v14, %s6369_s24  ;;  %v3970_v23 = vsel %vm321_vm0, %v3081_v35, %v9835_v27 }
 0x590   : > { %v10697_v38 = vpop.permute.xlu1 %3844 }
 0x591   : > { %13471 = vst [vmem:[#allocation158_spill] sm:$0xff] %v10697_v38  ;;  %v10701_v40 = vpop.permute.xlu0 %3842  ;;  %v3080_v38 = vld [vmem:[#allocation2 + $0x108] sm:$0xff] }
 0x592   : > { %13473 = vst [vmem:[#allocation163_spill] sm:$0xff] %v10701_v40  ;;  %4605 = vrot.lane.b32.xlu1 %v10695_v43, %s6369_s24  ;;  %v10719_v40 = vld [vmem:[#allocation2 + $0x1da] sm:$0xff] }
 0x593   : > { %4603 = vrot.lane.b32.xlu0 %v10699_v21, %s6369_s24  ;;  %13478 = vst [vmem:[#allocation112_spill] sm:$0xff] %v10719_v40  ;;  %v3079_v43 = vld [vmem:[#allocation2 + $0x100] sm:$0xff] }
 0x594   : > { %v10709_v8 = vpop.permute.xlu1 %3848 }
 0x595   : > { %13475 = vst [vmem:[#allocation186_spill] sm:$0xff] %v10709_v8  ;;  %v10713_v14 = vpop.permute.xlu0 %3846 }
 0x596   : > { %13477 = vst [vmem:[#allocation133_spill] sm:$0xff] %v10713_v14  ;;  %4609 = vrot.lane.b32.xlu1 %v10707_v31, %s6369_s24  ;;  %v3969_v31 = vsel %vm321_vm0, %v3080_v38, %v9819_v63  ;;  %v3968_v14 = vsel %vm321_vm0, %v3079_v43, %v9823_v19  ;;  %v3972_v63 = vsel %vm321_vm0, %v6334_v11, %v9847_v24  ;;  %v6335_v19 = vld [vmem:[#allocation2 + $0x138] sm:$0xff]  ;;  %v10749_v38 = vld [vmem:[#allocation2 + $0x1e2] sm:$0xff]  ;;  %v6338_v11 = vld [vmem:[#allocation2 + $0x150] sm:$0xff] }
 0x597   : > { %4607 = vrot.lane.b32.xlu0 %v10711_v44, %s6369_s24  ;;  %v6332_v44 = vld [vmem:[#allocation2 + $0x118] sm:$0xff]  ;;  %v3975_v43 = vsel %vm321_vm0, %v6335_v19, %v9853_v62  ;;  %13480 = vst [vmem:[#allocation171_spill] sm:$0xff] %v10749_v38  ;;  %v3979_v62 = vsel %vm321_vm0, %v9898_v5, %v9868_v50  ;;  %v3981_v19 = vsel %vm321_vm0, %v9910_v9, %v9880_v26  ;;  %v13482_v5 = vld [vmem:[#allocation172_spill] sm:$0xff] }
 0x598   : > { %v10721_v21 = vpop.permute.xlu1 %3871  ;;  %v3971_v33 = vsel %vm321_vm0, %v6332_v44, %v9831_v41  ;;  %v6336_v41 = vld [vmem:[#allocation2 + $0x130] sm:$0xff]  ;;  %v3982_v50 = vsel %vm321_vm0, %v9906_v46, %v9896_v36  ;;  %v13485_v46 = vld [vmem:[#allocation184_spill] sm:$0xff] }
 0x599   : > { %v10725_v8 = vpop.permute.xlu0 %3869  ;;  %v3974_v27 = vsel %vm321_vm0, %v6336_v41, %v9855_v56  ;;  %v3978_v56 = vsel %vm321_vm0, %v6338_v11, %v9872_v48  ;;  %v6339_v41 = vld [vmem:[#allocation2 + $0x160] sm:$0xff]  ;;  %v3985_v48 = vsel %vm1316_vm4, %v3969_v31, %v9904_v6  ;;  %v3987_v9 = vsel %vm1316_vm4, %v3971_v33, %v13482_v5  ;;  %v13486_v6 = vld [vmem:[#allocation178_spill] sm:$0xff] }
 0x59a   : > { %4613 = vrot.lane.b32.xlu1 %v10719_v40, %s6369_s24  ;;  %v3973_v40 = vsel %vm321_vm0, %v6333_v1, %v9843_v16  ;;  %v3977_v16 = vsel %vm321_vm0, %v9886_v4, %v9859_v22  ;;  %v6337_v1 = vld [vmem:[#allocation2 + $0x140] sm:$0xff]  ;;  %v3980_v22 = vsel %vm321_vm0, %v6339_v41, %v9884_v29  ;;  %v13481_v4 = vld [vmem:[#allocation177_spill] sm:$0xff]  ;;  %v13483_v29 = vld [vmem:[#allocation180_spill] sm:$0xff]  ;;  %v3991_v31 = vsel %vm1316_vm4, %v3975_v43, %v13486_v6 }
 0x59b   : > { %4611 = vrot.lane.b32.xlu0 %v10723_v32, %s6369_s24  ;;  %v3976_v24 = vsel %vm321_vm0, %v6337_v1, %v9863_v54  ;;  %v3983_v54 = vsel %vm321_vm0, %v9922_v37, %v9892_v12  ;;  %v3984_v26 = vsel %vm1316_vm4, %v3968_v14, %v13481_v4  ;;  %v3986_v1 = vsel %vm1316_vm4, %v3970_v23, %v13483_v29  ;;  %v4448_v12 = vld [vmem:[#allocation2 + $0x1fa] sm:$0xff]  ;;  %v13484_v37 = vld [vmem:[#allocation176_spill] sm:$0xff]  ;;  %v4447_v41 = vld [vmem:[#allocation2 + $0x1f2] sm:$0xff] }
 0x59c   : > { %v10747_v35 = vpop.permute.xlu1 %3875  ;;  %v3989_v36 = vsel %vm1316_vm4, %v3973_v40, %v13484_v37  ;;  %v13487_v14 = vld [vmem:[#allocation182_spill] sm:$0xff]  ;;  %v13491_v37 = vld [vmem:[#allocation5_spill] sm:$0xff]  ;;  %v13492_v43 = vld [vmem:[#allocation196_spill] sm:$0xff] }
 0x59d   : > { %v10761_v44 = vpop.permute.xlu0 %3873  ;;  %v3990_v11 = vsel %vm1316_vm4, %v3974_v27, %v13487_v14  ;;  %v13488_v23 = vld [vmem:[#allocation194_spill] sm:$0xff]  ;;  %v3997_v27 = vsel %vm1316_vm4, %v3981_v19, %v13492_v43  ;;  %v13493_v6 = vld [vmem:[#allocation13_spill] sm:$0xff]  ;;  %v13494_v32 = vld [vmem:[#allocation200_spill] sm:$0xff] }
 0x59e   : > { %4617 = vrot.lane.b32.xlu1 %v4446_v60, %s6369_s24  ;;  %v3988_v60 = vsel %vm1316_vm4, %v3972_v63, %v13485_v46  ;;  %v3993_v4 = vsel %vm1316_vm4, %v3977_v16, %v13488_v23  ;;  %v13489_v5 = vld [vmem:[#allocation198_spill] sm:$0xff]  ;;  %v3994_v63 = vsel %vm1316_vm4, %v3978_v56, %v13491_v37  ;;  %v3996_v14 = vsel %vm1316_vm4, %v3980_v22, %v13493_v6  ;;  %v13497_v56 = vld [vmem:[#allocation9_spill] sm:$0xff]  ;;  %v13498_v37 = vld [vmem:[#allocation11_spill] sm:$0xff] }
 0x59f   : > { %4615 = vrot.lane.b32.xlu0 %v10749_v38, %s6369_s24  ;;  %v3992_v29 = vsel %vm1316_vm4, %v3976_v24, %v13489_v5  ;;  %v13490_v38 = vld [vmem:[#allocation192_spill] sm:$0xff]  ;;  %v3999_v16 = vsel %vm1316_vm4, %v3983_v54, %v13494_v32  ;;  %v13495_v23 = vld [vmem:[#allocation10_spill] sm:$0xff]  ;;  %v4000_v5 = vsel %vm1333_vm5, %v3984_v26, %v13497_v56  ;;  %v4003_v19 = vsel %vm1333_vm5, %v3987_v9, %v13498_v37  ;;  %v13500_v54 = vld [vmem:[#allocation15_spill] sm:$0xff] }
 0x5a0   : > { %v10793_v33 = vpop.permute.xlu1 %3879  ;;  %v3995_v40 = vsel %vm1316_vm4, %v3979_v62, %v13490_v38  ;;  %v3998_v24 = vsel %vm1316_vm4, %v3982_v50, %v13495_v23  ;;  %v13496_v38 = vld [vmem:[#allocation6_spill] sm:$0xff]  ;;  %v13499_v43 = vld [vmem:[#allocation12_spill] sm:$0xff]  ;;  %v4005_v50 = vsel %vm1333_vm5, %v3989_v36, %v13500_v54  ;;  %v13505_v37 = vld [vmem:[#allocation19_spill] sm:$0xff] }
 0x5a1   : > { %v10803_v46 = vpop.permute.xlu0 %3877  ;;  %v4001_v62 = vsel %vm1333_vm5, %v3985_v48, %v13496_v38  ;;  %v4002_v22 = vsel %vm1333_vm5, %v3986_v1, %v13499_v43  ;;  %v4450_v32 = vld [vmem:[#allocation2 + $0x18b] sm:$0xff]  ;;  %v13501_v6 = vld [vmem:[#allocation14_spill] sm:$0xff]  ;;  %v4449_v9 = vld [vmem:[#allocation2 + $0x183] sm:$0xff]  ;;  %v4009_v1 = vsel %vm1333_vm5, %v3993_v4, %v13505_v37  ;;  %v4011_v36 = vsel %vm1333_vm5, %v3995_v40, %v13507_v0 }
 0x5a2   : > { %4621 = vrot.lane.b32.xlu1 %v4448_v12, %s6369_s24  ;;  %v4004_v12 = vsel %vm1333_vm5, %v3988_v60, %v13501_v6  ;;  %v13502_v23 = vld [vmem:[#allocation24_spill] sm:$0xff]  ;;  %v13508_v54 = vld [vmem:[#allocation22_spill] sm:$0xff]  ;;  %v13512_v37 = vld [vmem:[#allocation27_spill] sm:$0xff] }
 0x5a3   : > { %4619 = vrot.lane.b32.xlu0 %v4447_v41, %s6369_s24  ;;  %v4007_v48 = vsel %vm1333_vm5, %v3991_v31, %v13502_v23  ;;  %v13503_v38 = vld [vmem:[#allocation16_spill] sm:$0xff]  ;;  %v13506_v41 = vld [vmem:[#allocation18_spill] sm:$0xff]  ;;  %v4010_v60 = vsel %vm1333_vm5, %v3994_v63, %v13508_v54  ;;  %v13509_v31 = vld [vmem:[#allocation21_spill] sm:$0xff] }
 0x5a4   : > { %v4006_v26 = vsel %vm1333_vm5, %v3990_v11, %v13503_v38  ;;  %v10831_v56 = vpop.permute.xlu1 %3883  ;;  %v4008_v43 = vsel %vm1333_vm5, %v3992_v29, %v13506_v41  ;;  %v4013_v11 = vsel %vm1333_vm5, %v3997_v27, %v13509_v31  ;;  %v13510_v23 = vld [vmem:[#allocation23_spill] sm:$0xff]  ;;  %v4014_v29 = vsel %vm1333_vm5, %v3998_v24, %v13512_v37  ;;  %v13513_v0 = vld [vmem:[#allocation30_spill] sm:$0xff]  ;;  %v13514_v63 = vld [vmem:[#allocation29_spill] sm:$0xff] }
 0x5a5   : > { %13504 = vst [vmem:[#allocation149_spill] sm:$0xff] %v10831_v56  ;;  %v10841_v6 = vpop.permute.xlu0 %3881  ;;  %v4012_v38 = vsel %vm1333_vm5, %v3996_v14, %v13510_v23  ;;  %v13511_v56 = vld [vmem:[#allocation25_spill] sm:$0xff]  ;;  %v4017_v40 = vsel %vm1350_vm6, %v4001_v62, %v13513_v0  ;;  %v4016_v41 = vsel %vm1350_vm6, %v4000_v5, %v13514_v63  ;;  %v13515_v54 = vld [vmem:[#allocation31_spill] sm:$0xff]  ;;  %v13519_v23 = vld [vmem:[#allocation36_spill] sm:$0xff]  ;;  %v4022_v5 = vsel %vm1350_vm6, %v4006_v26, %v10082_v58 }
 0x5a6   : > { %v4015_v4 = vsel %vm1333_vm5, %v3999_v16, %v13511_v56  ;;  %4657 = vrot.lane.b32.xlu1 %v4450_v32, %s6370_s25  ;;  %v4019_v27 = vsel %vm1350_vm6, %v4003_v19, %v13515_v54  ;;  %v13516_v31 = vld [vmem:[#allocation33_spill] sm:$0xff]  ;;  %v13517_v16 = vld [vmem:[#allocation34_spill] sm:$0xff]  ;;  %v13518_v24 = vld [vmem:[#allocation35_spill] sm:$0xff]  ;;  %v4023_v62 = vsel %vm1350_vm6, %v4007_v48, %v13519_v23  ;;  %v4029_v58 = vsel %vm1350_vm6, %v4013_v11, %v10101_v13 }
 0x5a7   : > { %v4018_v14 = vsel %vm1350_vm6, %v4002_v22, %v13516_v31  ;;  %4655 = vrot.lane.b32.xlu0 %v4449_v9, %s6370_s25  ;;  %v4021_v56 = vsel %vm1350_vm6, %v4005_v50, %v13517_v16  ;;  %v4020_v32 = vsel %vm1350_vm6, %v4004_v12, %v13518_v24  ;;  %v4451_v19 = vld [vmem:[#allocation2 + $0x193] sm:$0xff]  ;;  %v4025_v22 = vsel %vm1350_vm6, %v4009_v1, %v10086_v18 }
 0x5a8   : > { %v10869_v37 = vpop.permute.xlu1 %3887  ;;  %v4024_v9 = vsel %vm1350_vm6, %v4008_v43, %v10088_v25  ;;  %v4027_v50 = vsel %vm1350_vm6, %v4011_v36, %v10093_v28  ;;  %v4026_v12 = vsel %vm1350_vm6, %v4010_v60, %v10095_v55  ;;  %v4028_v48 = vsel %vm1350_vm6, %v4012_v38, %v10103_v17  ;;  %v13520_v26 = vld [vmem:[#allocation37_spill] sm:$0xff]  ;;  %v13521_v1 = vld [vmem:[#allocation38_spill] sm:$0xff]  ;;  %v13522_v28 = vld [vmem:[#allocation39_spill] sm:$0xff] }
 0x5a9   : > { %v10879_v0 = vpop.permute.xlu0 %3885  ;;  %v4031_v18 = vsel %vm1350_vm6, %v4015_v4, %v13520_v26  ;;  %v4030_v25 = vsel %vm1350_vm6, %v4014_v29, %v13521_v1  ;;  %v4033_v55 = vsel %vm1367_vm7, %v4017_v40, %v13522_v28  ;;  %v13523_v43 = vld [vmem:[#allocation40_spill] sm:$0xff]  ;;  %v13524_v60 = vld [vmem:[#allocation41_spill] sm:$0xff]  ;;  %v13525_v11 = vld [vmem:[#allocation42_spill] sm:$0xff] }
 0x5aa   : > { %4661 = vrot.lane.b32.xlu1 %v10512_v45, %s6370_s25  ;;  %v4032_v36 = vsel %vm1367_vm7, %v4016_v41, %v13523_v43  ;;  %v4035_v13 = vsel %vm1367_vm7, %v4019_v27, %v13524_v60  ;;  %v4034_v17 = vsel %vm1367_vm7, %v4018_v14, %v13525_v11  ;;  %v13526_v38 = vld [vmem:[#allocation43_spill] sm:$0xff]  ;;  %v13527_v29 = vld [vmem:[#allocation44_spill] sm:$0xff]  ;;  %v13528_v54 = vld [vmem:[#allocation45_spill] sm:$0xff] }
 0x5ab   : > { %4659 = vrot.lane.b32.xlu0 %v4451_v19, %s6370_s25  ;;  %v4037_v4 = vsel %vm1367_vm7, %v4021_v56, %v13526_v38  ;;  %v4036_v63 = vsel %vm1367_vm7, %v4020_v32, %v13527_v29  ;;  %v4039_v40 = vsel %vm1367_vm7, %v4023_v62, %v13528_v54  ;;  %v13529_v31 = vld [vmem:[#allocation46_spill] sm:$0xff]  ;;  %v13530_v27 = vld [vmem:[#allocation47_spill] sm:$0xff]  ;;  %v13531_v14 = vld [vmem:[#allocation48_spill] sm:$0xff] }
 0x5ac   : > { %v4038_v41 = vsel %vm1367_vm7, %v4022_v5, %v13529_v31  ;;  %v10908_v16 = vpop.permute.xlu1 %3891  ;;  %v4041_v24 = vsel %vm1367_vm7, %v4025_v22, %v13530_v27  ;;  %v4040_v23 = vsel %vm1367_vm7, %v4024_v9, %v13531_v14  ;;  %v13532_v19 = vld [vmem:[#allocation49_spill] sm:$0xff]  ;;  %v13533_v26 = vld [vmem:[#allocation50_spill] sm:$0xff]  ;;  %v13534_v62 = vld [vmem:[#allocation51_spill] sm:$0xff] }
 0x5ad   : > { %v4043_v56 = vsel %vm1367_vm7, %v4027_v50, %v13532_v19  ;;  %v4042_v32 = vsel %vm1367_vm7, %v4026_v12, %v13533_v26  ;;  %v10918_v1 = vpop.permute.xlu0 %3889  ;;  %v4045_v28 = vsel %vm1367_vm7, %v4029_v58, %v13534_v62  ;;  %v13535_v5 = vld [vmem:[#allocation52_spill] sm:$0xff]  ;;  %v13536_v60 = vld [vmem:[#allocation53_spill] sm:$0xff]  ;;  %v13537_v11 = vld [vmem:[#allocation54_spill] sm:$0xff] }
 0x5ae   : > { %v4044_v43 = vsel %vm1367_vm7, %v4028_v48, %v13535_v5  ;;  %v4047_v22 = vsel %vm1367_vm7, %v4031_v18, %v13536_v60  ;;  %v4046_v9 = vsel %vm1367_vm7, %v4030_v25, %v13537_v11  ;;  %4665 = vrot.lane.b32.xlu1 %v10522_v10, %s6370_s25  ;;  %v13538_v50 = vld [vmem:[#allocation55_spill] sm:$0xff]  ;;  %v13539_v38 = vld [vmem:[#allocation56_spill] sm:$0xff]  ;;  %v13540_v54 = vld [vmem:[#allocation57_spill] sm:$0xff] }
 0x5af   : > { %v4049_v12 = vsel %vm1384_vm8, %v4033_v55, %v13538_v50  ;;  %v4048_v29 = vsel %vm1384_vm8, %v4032_v36, %v13539_v38  ;;  %v4051_v58 = vsel %vm1384_vm8, %v4035_v13, %v13540_v54  ;;  %v13541_v31 = vld [vmem:[#allocation58_spill] sm:$0xff]  ;;  %4663 = vrot.lane.b32.xlu0 %v10526_v39, %s6370_s25  ;;  %v13543_v25 = vld [vmem:[#allocation59_spill] sm:$0xff]  ;;  %v13544_v14 = vld [vmem:[#allocation60_spill] sm:$0xff] }
 0x5b0   : > { %v4050_v48 = vsel %vm1384_vm8, %v4034_v17, %v13541_v31  ;;  %v10940_v18 = vld [vmem:[#allocation2 + $0x1bb] sm:$0xff]  ;;  %v4053_v27 = vsel %vm1384_vm8, %v4037_v4, %v13543_v25  ;;  %v4052_v55 = vsel %vm1384_vm8, %v4036_v63, %v13544_v14  ;;  %v13545_v19 = vld [vmem:[#allocation61_spill] sm:$0xff]  ;;  %v10950_v62 = vpop.permute.xlu1 %3895  ;;  %v13548_v11 = vld [vmem:[#allocation64_spill] sm:$0xff] }
 0x5b1   : > { %13542 = vst [vmem:[#allocation113_spill] sm:$0xff] %v10940_v18  ;;  %v4055_v36 = vsel %vm1384_vm8, %v4039_v40, %v13545_v19  ;;  %v13546_v26 = vld [vmem:[#allocation62_spill] sm:$0xff]  ;;  %v13547_v5 = vld [vmem:[#allocation63_spill] sm:$0xff]  ;;  %v4056_v50 = vsel %vm1384_vm8, %v4040_v23, %v13548_v11  ;;  %v13549_v4 = vld [vmem:[#allocation65_spill] sm:$0xff]  ;;  %v10964_v40 = vpop.permute.xlu0 %3893 }
 0x5b2   : > { %v4054_v13 = vsel %vm1384_vm8, %v4038_v41, %v13546_v26  ;;  %v10952_v17 = vld [vmem:[#allocation2 + $0x1b3] sm:$0xff]  ;;  %v4057_v60 = vsel %vm1384_vm8, %v4041_v24, %v13547_v5  ;;  %v4059_v38 = vsel %vm1384_vm8, %v4043_v56, %v13549_v4  ;;  %v13551_v41 = vld [vmem:[#allocation67_spill] sm:$0xff]  ;;  %v13552_v25 = vld [vmem:[#allocation68_spill] sm:$0xff]  ;;  %4669 = vrot.lane.b32.xlu1 %v10940_v18, %s6370_s25 }
 0x5b3   : > { %v13550_v63 = vld [vmem:[#allocation66_spill] sm:$0xff]  ;;  %v10968_v31 = vsel %vm1384_vm8, %v4045_v28, %v13551_v41  ;;  %v10972_v14 = vsel %vm1384_vm8, %v4044_v43, %v13552_v25  ;;  %v13553_v24 = vld [vmem:[#allocation69_spill] sm:$0xff]  ;;  %v13554_v19 = vld [vmem:[#allocation71_spill] sm:$0xff]  ;;  %4667 = vrot.lane.b32.xlu0 %v10952_v17, %s6370_s25 }
 0x5b4   : > { %v10962_v54 = vsel %vm1384_vm8, %v4042_v32, %v13550_v63  ;;  %v10976_v23 = vsel %vm1384_vm8, %v4047_v22, %v13553_v24  ;;  %v4065_v56 = vsel %vm1401_vm9, %v4049_v12, %v13554_v19  ;;  %v13555_v32 = vld [vmem:[#allocation70_spill] sm:$0xff]  ;;  %v13556_v28 = vld [vmem:[#allocation72_spill] sm:$0xff]  ;;  %v13557_v11 = vld [vmem:[#allocation73_spill] sm:$0xff] }
 0x5b5   : > { %v10984_v26 = vsel %vm1384_vm8, %v4046_v9, %v13555_v32  ;;  %v4064_v5 = vsel %vm1401_vm9, %v4048_v29, %v13556_v28  ;;  %v4067_v43 = vsel %vm1401_vm9, %v4051_v58, %v13557_v11  ;;  %v13558_v4 = vld [vmem:[#allocation87_spill] sm:$0xff]  ;;  %v10994_v12 = vld [vmem:[#allocation2 + $0x1cb] sm:$0xff]  ;;  %v13559_v63 = vld [vmem:[#allocation74_spill] sm:$0xff]  ;;  %v11004_v32 = vpop.permute.xlu1 %3899 }
 0x5b6   : > { %v4081_v22 = vsel %vm1418_vm10, %v4065_v56, %v13558_v4  ;;  %v4066_v41 = vsel %vm1401_vm9, %v4050_v48, %v13559_v63  ;;  %v13560_v25 = vld [vmem:[#allocation75_spill] sm:$0xff]  ;;  %v13561_v24 = vld [vmem:[#allocation88_spill] sm:$0xff]  ;;  %v13564_v4 = vld [vmem:[#allocation77_spill] sm:$0xff]  ;;  %4673 = vrot.lane.b32.xlu1 %v10994_v12, %s6370_s25 }
 0x5b7   : > { %v4069_v9 = vsel %vm1401_vm9, %v4053_v27, %v13560_v25  ;;  %v4080_v29 = vsel %vm1418_vm10, %v4064_v5, %v13561_v24  ;;  %v13562_v19 = vld [vmem:[#allocation104_spill] sm:$0xff]  ;;  %v4071_v18 = vsel %vm1401_vm9, %v4055_v36, %v13564_v4  ;;  %v13565_v48 = vld [vmem:[#allocation105_spill] sm:$0xff]  ;;  %v11016_v5 = vpop.permute.xlu0 %3897  ;;  %v13566_v25 = vld [vmem:[#allocation78_spill] sm:$0xff] }
 0x5b8   : > { %v4097_v58 = vsel %vm1435_vm11, %v4081_v22, %v13562_v19  ;;  %v11006_v56 = vld [vmem:[#allocation2 + $0x1c3] sm:$0xff]  ;;  %v4096_v63 = vsel %vm1435_vm11, %v4080_v29, %v13565_v48  ;;  %v4070_v22 = vsel %vm1401_vm9, %v4054_v13, %v13566_v25 }
 0x5b9   : > { %v13563_v28 = vld [vmem:[#allocation76_spill] sm:$0xff]  ;;  %v4113_v27 = vsel %vm1452_vm12, %v4097_v58, %v10504_v53  ;;  %v13567_v24 = vld [vmem:[#allocation79_spill] sm:$0xff]  ;;  %v13569_v58 = vld [vmem:[#allocation89_spill] sm:$0xff]  ;;  %4671 = vrot.lane.b32.xlu0 %v11006_v56, %s6370_s25 }
 0x5ba   : > { %v4068_v11 = vsel %vm1401_vm9, %v4052_v55, %v13563_v28  ;;  %v11022_v19 = vsel %vm1401_vm9, %v4057_v60, %v13567_v24  ;;  %v4112_v55 = vsel %vm1452_vm12, %v4096_v63, %v10506_v34  ;;  %v4129_v36 = vsel %vm1469_vm13, %v4113_v27, %v10574_v59  ;;  %v13568_v29 = vld [vmem:[#allocation80_spill] sm:$0xff]  ;;  %v11042_v34 = vld [vmem:[#allocation2 + $0x1db] sm:$0xff]  ;;  %v3923_v63 = vpop.permute.xlu1 %3922  ;;  %v11052_v27 = vld [vmem:[#allocation2 + $0x1d3] sm:$0xff] }
 0x5bb   : > { %v11032_v53 = vsel %vm1401_vm9, %v4056_v50, %v13568_v29  ;;  %v4083_v13 = vsel %vm1418_vm10, %v4067_v43, %v13569_v58  ;;  %v4128_v60 = vsel %vm1469_vm13, %v4112_v55, %v10576_v57  ;;  %v4145_v28 = vsel %vm1486_vm14, %v4129_v36, %v10652_v20  ;;  %v13570_v59 = vld [vmem:[#allocation90_spill] sm:$0xff]  ;;  %v13571_v48 = vld [vmem:[#allocation179_spill] sm:$0xff]  ;;  %v13572_v20 = vld [vmem:[#allocation117_spill] sm:$0xff]  ;;  %v3921_v36 = vpop.permute.xlu0 %3920  ;;  %4677 = vrot.lane.b32.xlu1 %v11042_v34, %s6370_s25 }
 0x5bc   : > { %v4082_v4 = vsel %vm1418_vm10, %v4066_v41, %v13570_v59  ;;  %v4099_v50 = vsel %vm1435_vm11, %v4083_v13, %v13571_v48  ;;  %v4144_v43 = vsel %vm1486_vm14, %v4128_v60, %v10656_v52  ;;  %v4161_v57 = vsel %vm1503_vm15, %v4145_v28, %v10721_v21  ;;  %v13573_v29 = vld [vmem:[#allocation81_spill] sm:$0xff]  ;;  %v13576_v59 = vld [vmem:[#allocation99_spill] sm:$0xff] }
 0x5bd   : > { %v4098_v25 = vsel %vm1435_vm11, %v4082_v4, %v13572_v20  ;;  %v4115_v24 = vsel %vm1452_vm12, %v4099_v50, %v10514_v51  ;;  %v4160_v41 = vsel %vm1503_vm15, %v4144_v43, %v10725_v8  ;;  %v4177_v55 = vsel %vm1520_vm1, %v4161_v57, %v3923_v63  ;;  %v13574_v51 = vld [vmem:[#allocation91_spill] sm:$0xff]  ;;  %4675 = vrot.lane.b32.xlu0 %v11052_v27, %s6370_s25  ;;  %v13577_v50 = vld [vmem:[#allocation106_spill] sm:$0xff] }
 0x5be   : > { %v11063_v52 = vsel %vm1401_vm9, %v4059_v38, %v13573_v29  ;;  %v4114_v21 = vsel %vm1452_vm12, %v4098_v25, %v10516_v30  ;;  %v4131_v58 = vsel %vm1469_vm13, %v4115_v24, %v10584_v15  ;;  %v4176_v13 = vsel %vm1520_vm1, %v4160_v41, %v3921_v36  ;;  %v11081_v30 = vld [vmem:[#allocation2 + $0x1eb] sm:$0xff]  ;;  %v13575_v15 = vld [vmem:[#allocation102_spill] sm:$0xff]  ;;  %v11092_v48 = vld [vmem:[#allocation2 + $0x1e3] sm:$0xff] }
 0x5bf   : > { %v4085_v8 = vsel %vm1418_vm10, %v4069_v9, %v13574_v51  ;;  %v4130_v60 = vsel %vm1469_vm13, %v4114_v21, %v10586_v3  ;;  %v4147_v38 = vsel %vm1486_vm14, %v4131_v58, %v10661_v7  ;;  %6077 = vmatprep.mubr.msk.f32.mxu0 %vm1543_vm2, %v4176_v13  ;;  %v4084_v28 = vsel %vm1418_vm10, %v4068_v11, %v13575_v15  ;;  %v3927_v7 = vpop.permute.xlu1 %3926  ;;  %v13578_v57 = vld [vmem:[#allocation199_spill] sm:$0xff]  ;;  %v13579_v25 = vld [vmem:[#allocation82_spill] sm:$0xff]  ;;  %v13580_v24 = vld [vmem:[#allocation129_spill] sm:$0xff] }
 0x5c0   : > { %v4101_v4 = vsel %vm1435_vm11, %v4085_v8, %v13576_v59  ;;  %v4146_v9 = vsel %vm1486_vm14, %v4130_v60, %v10663_v49  ;;  %v4163_v3 = vsel %vm1503_vm15, %v4147_v38, %v10747_v35  ;;  %6078 = vmatmul.mubr.msk.f32.vlgmr.msra.gmra.mrb[16].mxu0 %vm1543_vm2, %v4177_v55  ;;  %v4100_v43 = vsel %vm1435_vm11, %v4084_v28, %v13577_v50  ;;  %v3925_v49 = vpop.permute.xlu0 %3924  ;;  %v13581_v29 = vld [vmem:[#allocation92_spill] sm:$0xff]  ;;  %v13582_v58 = vld [vmem:[#allocation93_spill] sm:$0xff]  ;;  %v13588_v50 = vld [vmem:[#allocation147_spill] sm:$0xff] }
 0x5c1   : > { %v4117_v11 = vsel %vm1452_vm12, %v4101_v4, %v13578_v57  ;;  %v4162_v63 = vsel %vm1503_vm15, %v4146_v9, %v10761_v44  ;;  %v4179_v20 = vsel %vm1520_vm1, %v4163_v3, %v3927_v7  ;;  %v4074_v35 = vsel %vm1401_vm9, %v10962_v54, %v13579_v25  ;;  %4681 = vrot.lane.b32.xlu1 %v11081_v30, %s6370_s25  ;;  %v13583_v51 = vld [vmem:[#allocation28_spill] sm:$0xff]  ;;  %v11131_v60 = vld [vmem:[#allocation2 + $0x1f3] sm:$0xff]  ;;  %v13586_v9 = vld [vmem:[#allocation83_spill] sm:$0xff] }
 0x5c2   : > { %v4116_v41 = vsel %vm1452_vm12, %v4100_v43, %v13580_v24  ;;  %v4133_v55 = vsel %vm1469_vm13, %v4117_v11, %v10594_v61  ;;  %v4178_v36 = vsel %vm1520_vm1, %v4162_v63, %v3925_v49  ;;  %v4087_v44 = vsel %vm1418_vm10, %v4071_v18, %v13581_v29  ;;  %4679 = vrot.lane.b32.xlu0 %v11092_v48, %s6370_s25  ;;  %v11120_v61 = vld [vmem:[#allocation2 + $0x1fb] sm:$0xff]  ;;  %v13584_v38 = vld [vmem:[#allocation128_spill] sm:$0xff]  ;;  %v13585_v28 = vld [vmem:[#allocation17_spill] sm:$0xff] }
 0x5c3   : > { %v4132_v21 = vsel %vm1469_vm13, %v4116_v41, %v10598_v2  ;;  %v4149_v54 = vsel %vm1486_vm14, %v4133_v55, %v10667_v42  ;;  %6080 = vmatprep.mubr.msk.f32.mxu0 %vm1543_vm2, %v4178_v36  ;;  %v4086_v13 = vsel %vm1418_vm10, %v4070_v22, %v13582_v58  ;;  %v4103_v8 = vsel %vm1435_vm11, %v4087_v44, %v13583_v51  ;;  %v3931_v42 = vpop.permute.xlu1 %3930  ;;  %v13587_v3 = vld [vmem:[#allocation174_spill] sm:$0xff]  ;;  %v13589_v11 = vld [vmem:[#allocation103_spill] sm:$0xff]  ;;  %v13590_v63 = vld [vmem:[#allocation148_spill] sm:$0xff] }
 0x5c4   : > { %v4148_v18 = vsel %vm1486_vm14, %v4132_v21, %v10669_v47  ;;  %v4165_v2 = vsel %vm1503_vm15, %v4149_v54, %v10793_v33  ;;  %6081 = vmatmul.mubr.msk.f32.gmra.mrb[18].mxu0 %vm1543_vm2, %v4179_v20  ;;  %v4102_v15 = vsel %vm1435_vm11, %v4086_v13, %v13584_v38  ;;  %v4119_v22 = vsel %vm1452_vm12, %v4103_v8, %v13585_v28  ;;  %v3929_v47 = vpop.permute.xlu0 %3928  ;;  %v13591_v49 = vld [vmem:[#allocation188_spill] sm:$0xff]  ;;  %v13592_v24 = vld [vmem:[#allocation114_spill] sm:$0xff]  ;;  %v13593_v55 = vld [vmem:[#allocation181_spill] sm:$0xff] }
 0x5c5   : > { %v4164_v59 = vsel %vm1503_vm15, %v4148_v18, %v10803_v46  ;;  %v4181_v4 = vsel %vm1520_vm1, %v4165_v2, %v3931_v42  ;;  %v4077_v33 = vsel %vm1401_vm9, %v10968_v31, %v13586_v9  ;;  %v4118_v7 = vsel %vm1452_vm12, %v4102_v15, %v13587_v3  ;;  %4685 = vrot.lane.b32.xlu1 %v11120_v61, %s6370_s25  ;;  %v4466_v25 = vld [vmem:[#allocation2 + $0x18c] sm:$0xff]  ;;  %v4465_v58 = vld [vmem:[#allocation2 + $0x184] sm:$0xff]  ;;  %v13596_v13 = vld [vmem:[#allocation130_spill] sm:$0xff] }
 0x5c6   : > { %v4135_v43 = vsel %vm1469_vm13, %v4119_v22, %v13588_v50  ;;  %v4180_v57 = vsel %vm1520_vm1, %v4164_v59, %v3929_v47  ;;  %v4089_v46 = vsel %vm1418_vm10, %v11022_v19, %v13589_v11  ;;  %v4134_v20 = vsel %vm1469_vm13, %v4118_v7, %v13590_v63  ;;  %4683 = vrot.lane.b32.xlu0 %v11131_v60, %s6370_s25  ;;  %v13594_v19 = vld [vmem:[#allocation187_spill] sm:$0xff]  ;;  %v13595_v44 = vld [vmem:[#allocation149_spill] sm:$0xff]  ;;  %v13598_v38 = vld [vmem:[#allocation84_spill] sm:$0xff] }
 0x5c7   : > { %v4151_v31 = vsel %vm1486_vm14, %v4135_v43, %v13591_v49  ;;  %6083 = vmatprep.mubr.msk.f32.mxu0 %vm1543_vm2, %v4180_v57  ;;  %v4088_v41 = vsel %vm1418_vm10, %v11032_v53, %v13592_v24  ;;  %v4105_v36 = vsel %vm1435_vm11, %v4089_v46, %v13593_v55  ;;  %v4150_v29 = vsel %vm1486_vm14, %v4134_v20, %v13594_v19  ;;  %v3935_v54 = vpop.permute.xlu1 %3934  ;;  %v13597_v8 = vld [vmem:[#allocation131_spill] sm:$0xff]  ;;  %v13599_v28 = vld [vmem:[#allocation150_spill] sm:$0xff] }
 0x5c8   : > { %v4167_v21 = vsel %vm1503_vm15, %v4151_v31, %v13595_v44  ;;  %6084 = vmatmul.mubr.msk.f32.gmra.mrb[20].mxu0 %vm1543_vm2, %v4181_v4  ;;  %v4104_v51 = vsel %vm1435_vm11, %v4088_v41, %v13596_v13  ;;  %v4121_v18 = vsel %vm1452_vm12, %v4105_v36, %v13597_v8  ;;  %v4166_v53 = vsel %vm1503_vm15, %v4150_v29, %v10841_v6  ;;  %v3933_v42 = vpop.permute.xlu0 %3932  ;;  %v13600_v59 = vld [vmem:[#allocation122_spill] sm:$0xff]  ;;  %v13602_v3 = vld [vmem:[#allocation143_spill] sm:$0xff]  ;;  %v13608_v41 = vld [vmem:[#allocation140_spill] sm:$0xff] }
 0x5c9   : > { %v4183_v2 = vsel %vm1520_vm1, %v4167_v21, %v3935_v54  ;;  %v4076_v15 = vsel %vm1401_vm9, %v10972_v14, %v13598_v38  ;;  %v4120_v22 = vsel %vm1452_vm12, %v4104_v51, %v13599_v28  ;;  %v4137_v4 = vsel %vm1469_vm13, %v4121_v18, %v13600_v59  ;;  %4721 = vrot.lane.b32.xlu1 %v4466_v25, %s6371_s26  ;;  %v13601_v9 = vld [vmem:[#allocation94_spill] sm:$0xff]  ;;  %v13603_v50 = vld [vmem:[#allocation111_spill] sm:$0xff]  ;;  %v13607_v25 = vld [vmem:[#allocation185_spill] sm:$0xff] }
 0x5ca   : > { %v4182_v47 = vsel %vm1520_vm1, %v4166_v53, %v3933_v42  ;;  %v4091_v6 = vsel %vm1418_vm10, %v11063_v52, %v13601_v9  ;;  %v4136_v7 = vsel %vm1469_vm13, %v4120_v22, %v13602_v3  ;;  %v4153_v14 = vsel %vm1486_vm14, %v4137_v4, %v13603_v50  ;;  %4719 = vrot.lane.b32.xlu0 %v4465_v58, %s6371_s26  ;;  %v13604_v43 = vld [vmem:[#allocation95_spill] sm:$0xff]  ;;  %v13605_v11 = vld [vmem:[#allocation134_spill] sm:$0xff]  ;;  %v13609_v29 = vld [vmem:[#allocation85_spill] sm:$0xff] }
 0x5cb   : > { %6086 = vmatprep.mubr.msk.f32.mxu0 %vm1543_vm2, %v4182_v47  ;;  %v4090_v57 = vsel %vm1418_vm10, %v4074_v35, %v13604_v43  ;;  %v4107_v46 = vsel %vm1435_vm11, %v4091_v6, %v13605_v11  ;;  %v13606_v63 = vld [vmem:[#allocation123_spill] sm:$0xff]  ;;  %v4169_v52 = vsel %vm1503_vm15, %v4153_v14, %v10869_v37  ;;  %v3939_v49 = vpop.permute.xlu1 %3938  ;;  %v4467_v31 = vld [vmem:[#allocation2 + $0x194] sm:$0xff]  ;;  %v4079_v37 = vsel %vm1401_vm9, %v10976_v23, %v13609_v29  ;;  %v13611_v54 = vld [vmem:[#allocation144_spill] sm:$0xff] }
 0x5cc   : > { %v4152_v20 = vsel %vm1486_vm14, %v4136_v7, %v13606_v63  ;;  %6087 = vmatmul.mubr.msk.f32.gmra.mrb[22].mxu0 %vm1543_vm2, %v4183_v2  ;;  %v4106_v24 = vsel %vm1435_vm11, %v4090_v57, %v13607_v25  ;;  %v4123_v55 = vsel %vm1452_vm12, %v4107_v46, %v13608_v41  ;;  %v4185_v36 = vsel %vm1520_vm1, %v4169_v52, %v3939_v49  ;;  %v3937_v19 = vpop.permute.xlu0 %3936  ;;  %v13610_v44 = vld [vmem:[#allocation26_spill] sm:$0xff]  ;;  %v13612_v51 = vld [vmem:[#allocation153_spill] sm:$0xff]  ;;  %v13613_v8 = vld [vmem:[#allocation116_spill] sm:$0xff] }
 0x5cd   : > { %v4168_v35 = vsel %vm1503_vm15, %v4152_v20, %v10879_v0  ;;  %v4122_v21 = vsel %vm1452_vm12, %v4106_v24, %v13610_v44  ;;  %v4139_v58 = vsel %vm1469_vm13, %v4123_v55, %v13611_v54  ;;  %4725 = vrot.lane.b32.xlu1 %v13612_v51, %s6371_s26  ;;  %v4093_v0 = vsel %vm1418_vm10, %v4077_v33, %v13613_v8  ;;  %v13614_v18 = vld [vmem:[#allocation109_spill] sm:$0xff]  ;;  %v13616_v42 = vld [vmem:[#allocation96_spill] sm:$0xff]  ;;  %v13619_v9 = vld [vmem:[#allocation107_spill] sm:$0xff] }
 0x5ce   : > { %v4184_v13 = vsel %vm1520_vm1, %v4168_v35, %v3937_v19  ;;  %v4138_v53 = vsel %vm1469_vm13, %v4122_v21, %v13614_v18  ;;  %v13615_v2 = vld [vmem:[#allocation169_spill] sm:$0xff]  ;;  %4723 = vrot.lane.b32.xlu0 %v4467_v31, %s6371_s26  ;;  %v4092_v38 = vsel %vm1418_vm10, %v4076_v15, %v13616_v42  ;;  %v13618_v59 = vld [vmem:[#allocation4_spill] sm:$0xff]  ;;  %v13621_v43 = vld [vmem:[#allocation86_spill] sm:$0xff] }
 0x5cf   : > { %v4155_v23 = vsel %vm1486_vm14, %v4139_v58, %v13615_v2  ;;  %6089 = vmatprep.mubr.msk.f32.mxu0 %vm1543_vm2, %v4184_v13  ;;  %v13617_v28 = vld [vmem:[#allocation137_spill] sm:$0xff]  ;;  %v4154_v4 = vsel %vm1486_vm14, %v4138_v53, %v13618_v59  ;;  %v3943_v47 = vpop.permute.xlu1 %3942  ;;  %v4108_v6 = vsel %vm1435_vm11, %v4092_v38, %v13619_v9  ;;  %v13620_v3 = vld [vmem:[#allocation164_spill] sm:$0xff]  ;;  %v4078_v57 = vsel %vm1401_vm9, %v10984_v26, %v13621_v43  ;;  %v13623_v46 = vld [vmem:[#allocation115_spill] sm:$0xff] }
 0x5d0   : > { %v4109_v22 = vsel %vm1435_vm11, %v4093_v0, %v13617_v28  ;;  %v4171_v33 = vsel %vm1503_vm15, %v4155_v23, %v10908_v16  ;;  %6090 = vmatmul.mubr.msk.f32.gmra.mrb[24].mxu0 %vm1543_vm2, %v4185_v36  ;;  %v4170_v15 = vsel %vm1503_vm15, %v4154_v4, %v10918_v1  ;;  %v3941_v14 = vpop.permute.xlu0 %3940  ;;  %v13622_v16 = vld [vmem:[#allocation139_spill] sm:$0xff]  ;;  %v13624_v52 = vld [vmem:[#allocation168_spill] sm:$0xff]  ;;  %v13625_v49 = vld [vmem:[#allocation97_spill] sm:$0xff] }
 0x5d1   : > { %v4125_v7 = vsel %vm1452_vm12, %v4109_v22, %v13620_v3  ;;  %v4187_v50 = vsel %vm1520_vm1, %v4171_v33, %v3943_v47  ;;  %v4124_v11 = vsel %vm1452_vm12, %v4108_v6, %v13622_v16  ;;  %v4186_v20 = vsel %vm1520_vm1, %v4170_v15, %v3941_v14  ;;  %4729 = vrot.lane.b32.xlu1 %v13624_v52, %s6371_s26  ;;  %v13626_v31 = vld [vmem:[#allocation146_spill] sm:$0xff]  ;;  %v13628_v41 = vld [vmem:[#allocation8_spill] sm:$0xff]  ;;  %v13632_v13 = vld [vmem:[#allocation7_spill] sm:$0xff] }
 0x5d2   : > { %v4141_v63 = vsel %vm1469_vm13, %v4125_v7, %v13623_v46  ;;  %v4095_v1 = vsel %vm1418_vm10, %v4079_v37, %v13625_v49  ;;  %v4140_v25 = vsel %vm1469_vm13, %v4124_v11, %v13626_v31  ;;  %v13627_v24 = vld [vmem:[#allocation158_spill] sm:$0xff]  ;;  %4727 = vrot.lane.b32.xlu0 %v13628_v41, %s6371_s26  ;;  %6092 = vmatprep.mubr.msk.f32.mxu0 %vm1543_vm2, %v4186_v20  ;;  %v13630_v19 = vld [vmem:[#allocation32_spill] sm:$0xff]  ;;  %v13631_v37 = vld [vmem:[#allocation163_spill] sm:$0xff] }
 0x5d3   : > { %v4157_v26 = vsel %vm1486_vm14, %v4141_v63, %v13627_v24  ;;  %v11264_v55 = vld [vmem:[#allocation2 + $0x1bc] sm:$0xff]  ;;  %v4111_v29 = vsel %vm1435_vm11, %v4095_v1, %v13630_v19  ;;  %v4156_v44 = vsel %vm1486_vm14, %v4140_v25, %v13631_v37  ;;  %v3947_v54 = vpop.permute.xlu1 %3946  ;;  %v11275_v58 = vld [vmem:[#allocation2 + $0x1b4] sm:$0xff]  ;;  %v13633_v0 = vld [vmem:[#allocation108_spill] sm:$0xff] }
 0x5d4   : > { %v13629_v35 = vld [vmem:[#allocation98_spill] sm:$0xff]  ;;  %v4173_v21 = vsel %vm1503_vm15, %v4157_v26, %v10950_v62  ;;  %6093 = vmatmul.mubr.msk.f32.gmra.mrb[26].mxu0 %vm1543_vm2, %v4187_v50  ;;  %v4127_v18 = vsel %vm1452_vm12, %v4111_v29, %v13633_v0  ;;  %v4172_v53 = vsel %vm1503_vm15, %v4156_v44, %v10964_v40  ;;  %v3945_v23 = vpop.permute.xlu0 %3944  ;;  %v13634_v42 = vld [vmem:[#allocation145_spill] sm:$0xff]  ;;  %v13635_v38 = vld [vmem:[#allocation159_spill] sm:$0xff] }
 0x5d5   : > { %v4094_v36 = vsel %vm1418_vm10, %v4078_v57, %v13629_v35  ;;  %v4189_v2 = vsel %vm1520_vm1, %v4173_v21, %v3947_v54  ;;  %v4143_v28 = vsel %vm1469_vm13, %v4127_v18, %v13635_v38  ;;  %v4188_v22 = vsel %vm1520_vm1, %v4172_v53, %v3945_v23  ;;  %4733 = vrot.lane.b32.xlu1 %v11264_v55, %s6371_s26  ;;  %v13636_v59 = vld [vmem:[#allocation100_spill] sm:$0xff]  ;;  %v13637_v33 = vld [vmem:[#allocation186_spill] sm:$0xff]  ;;  %v13638_v9 = vld [vmem:[#allocation133_spill] sm:$0xff] }
 0x5d6   : > { %v4110_v8 = vsel %vm1435_vm11, %v4094_v36, %v13632_v13  ;;  %v4159_v40 = vsel %vm1486_vm14, %v4143_v28, %v13637_v33  ;;  %4731 = vrot.lane.b32.xlu0 %v11275_v58, %s6371_s26  ;;  %6095 = vmatprep.mubr.msk.f32.mxu0 %vm1543_vm2, %v4188_v22  ;;  %v11298_v47 = vld [vmem:[#allocation2 + $0x1cc] sm:$0xff]  ;;  %v11305_v15 = vld [vmem:[#allocation2 + $0x1c4] sm:$0xff]  ;;  %v11341_v1 = vld [vmem:[#allocation2 + $0x1fc] sm:$0xff] }
 0x5d7   : > { %v4126_v62 = vsel %vm1452_vm12, %v4110_v8, %v13634_v42  ;;  %v4175_v3 = vsel %vm1503_vm15, %v4159_v40, %v11004_v32  ;;  %v3951_v7 = vpop.permute.xlu1 %3950  ;;  %v11316_v32 = vld [vmem:[#allocation2 + $0x1dc] sm:$0xff]  ;;  %v11329_v46 = vld [vmem:[#allocation2 + $0x1ec] sm:$0xff]  ;;  %v11333_v20 = vld [vmem:[#allocation2 + $0x1e4] sm:$0xff] }
 0x5d8   : > { %v4142_v4 = vsel %vm1469_vm13, %v4126_v62, %v13636_v59  ;;  %6096 = vmatmul.mubr.msk.f32.gmra.mrb[28].mxu0 %vm1543_vm2, %v4189_v2  ;;  %v4191_v14 = vsel %vm1520_vm1, %v4175_v3, %v3951_v7  ;;  %v3949_v43 = vpop.permute.xlu0 %3948  ;;  %v11345_v25 = vld [vmem:[#allocation2 + $0x1f4] sm:$0xff]  ;;  %v11355_v35 = vld [vmem:[#allocation2 + $0x1a0] sm:$0xff]  ;;  %v11371_v21 = vld [vmem:[#allocation2 + $0x1a8] sm:$0xff] }
 0x5d9   : > { %v4158_v6 = vsel %vm1486_vm14, %v4142_v4, %v13638_v9  ;;  %4737 = vrot.lane.b32.xlu1 %v11298_v47, %s6371_s26  ;;  %13642 = vst [vmem:[#allocation121_spill] sm:$0xff] %v11355_v35  ;;  %v11359_v19 = vld [vmem:[#allocation2 + $0x198] sm:$0xff]  ;;  %v11367_v37 = vld [vmem:[#allocation2 + $0x1b0] sm:$0xff]  ;;  %13646 = vst [vmem:[#allocation141_spill] sm:$0xff] %v11371_v21 }
 0x5da   : > { %v4174_v50 = vsel %vm1503_vm15, %v4158_v6, %v11016_v5  ;;  %4735 = vrot.lane.b32.xlu0 %v11305_v15, %s6371_s26  ;;  %v11321_v5 = vld [vmem:[#allocation2 + $0x1d4] sm:$0xff]  ;;  %13645 = vst [vmem:[#allocation157_spill] sm:$0xff] %v11367_v37  ;;  %v6342_v23 = vld [vmem:[#allocation2 + $0x1a1] sm:$0xff] }
 0x5db   : > { %v4190_v57 = vsel %vm1520_vm1, %v4174_v50, %v3949_v43  ;;  %v11319_v16 = vpop.permute.xlu1 %4529  ;;  %v11381_v8 = vld [vmem:[#allocation2 + $0x1b8] sm:$0xff]  ;;  %v6343_v38 = vld [vmem:[#allocation2 + $0x1a2] sm:$0xff]  ;;  %v13661_v7 = vld [vmem:[#allocation161_spill] sm:$0xff] }
 0x5dc   : > { %6098 = vmatprep.mubr.msk.f32.mxu0 %vm1543_vm2, %v4190_v57  ;;  %v11323_v11 = vpop.permute.xlu0 %4527  ;;  %13649 = vst [vmem:[#allocation166_spill] sm:$0xff] %v11381_v8  ;;  %v6340_v0 = vld [vmem:[#allocation2 + $0x199] sm:$0xff]  ;;  %v13664_v43 = vld [vmem:[#allocation165_spill] sm:$0xff] }
 0x5dd   : > { %6099 = vmatmul.mubr.msk.f32.gmra.mrb[30].mxu0 %vm1543_vm2, %v4191_v14  ;;  %4741 = vrot.lane.b32.xlu1 %v11316_v32, %s6371_s26  ;;  %v6341_v2 = vld [vmem:[#allocation2 + $0x19a] sm:$0xff] }
 0x5de   : > { %4739 = vrot.lane.b32.xlu0 %v11321_v5, %s6371_s26  ;;  %v13656_v9 = vld [vmem:[#allocation110_spill] sm:$0xff] }
 0x5df   : > { %v11331_v63 = vpop.permute.xlu1 %4533 }
 0x5e0   : > { %v11335_v49 = vpop.permute.xlu0 %4531 }
 0x5e1   : > { %4745 = vrot.lane.b32.xlu1 %v11329_v46, %s6371_s26 }
 0x5e2   : > { %4743 = vrot.lane.b32.xlu0 %v11333_v20, %s6371_s26 }
 0x5e3   : > { %v11343_v31 = vpop.permute.xlu1 %4537 }
 0x5e4   : > { %13639 = vst [vmem:[#allocation183_spill] sm:$0xff] %v11343_v31  ;;  %v11347_v24 = vpop.permute.xlu0 %4535 }
 0x5e5   : > { %13640 = vst [vmem:[#allocation160_spill] sm:$0xff] %v11347_v24  ;;  %4749 = vrot.lane.b32.xlu1 %v11341_v1, %s6371_s26 }
 0x5e6   : > { %4747 = vrot.lane.b32.xlu0 %v11345_v25, %s6371_s26 }
 0x5e7   : > { %v11353_v26 = vpop.permute.xlu1 %4541 }
 0x5e8   : > { %13641 = vst [vmem:[#allocation119_spill] sm:$0xff] %v11353_v26  ;;  %v11357_v36 = vpop.permute.xlu0 %4539 }
 0x5e9   : > { %13643 = vst [vmem:[#allocation132_spill] sm:$0xff] %v11357_v36  ;;  %4785 = vrot.lane.b32.xlu1 %v11355_v35, %s6372_s27  ;;  %v11635_v36 = vld [vmem:[#allocation2 + $0x1e0] sm:$0xff] }
 0x5ea   : > { %4783 = vrot.lane.b32.xlu0 %v11359_v19, %s6372_s27  ;;  %13706 = vst [vmem:[#allocation22_spill] sm:$0xff] %v11635_v36 }
 0x5eb   : > { %v11365_v29 = vpop.permute.xlu1 %4545 }
 0x5ec   : > { %13644 = vst [vmem:[#allocation152_spill] sm:$0xff] %v11365_v29  ;;  %v11369_v44 = vpop.permute.xlu0 %4543 }
 0x5ed   : > { %4789 = vrot.lane.b32.xlu1 %v11367_v37, %s6372_s27 }
 0x5ee   : > { %4787 = vrot.lane.b32.xlu0 %v11371_v21, %s6372_s27  ;;  %v13708_v21 = vld [vmem:[#allocation171_spill] sm:$0xff] }
 0x5ef   : > { %v11377_v54 = vpop.permute.xlu1 %4549 }
 0x5f0   : > { %13647 = vst [vmem:[#allocation142_spill] sm:$0xff] %v11377_v54  ;;  %v11379_v13 = vpop.permute.xlu0 %4547  ;;  %v11549_v54 = vld [vmem:[#allocation2 + $0x1d0] sm:$0xff] }
 0x5f1   : > { %13648 = vst [vmem:[#allocation136_spill] sm:$0xff] %v11379_v13  ;;  %4834 = vrot.lane.b32.xlu1 %v6340_v0, %s6373_s28  ;;  %13689 = vst [vmem:[#allocation13_spill] sm:$0xff] %v11549_v54  ;;  %v13705_v13 = vld [vmem:[#allocation112_spill] sm:$0xff] }
 0x5f2   : > { %4791 = vrot.lane.b32.xlu0 %v11381_v8, %s6372_s27 }
 0x5f3   : > { %v11386_v18 = vpop.permute.xlu1 %4553 }
 0x5f4   : > { %13650 = vst [vmem:[#allocation135_spill] sm:$0xff] %v11386_v18  ;;  %v11388_v53 = vpop.permute.xlu0 %4551 }
 0x5f5   : > { %13651 = vst [vmem:[#allocation167_spill] sm:$0xff] %v11388_v53  ;;  %4885 = vrot.lane.b32.xlu1 %v6341_v2, %s6374_s29 }
 0x5f6   : > { %4836 = vrot.lane.b32.xlu0 %v6342_v23, %s6373_s28 }
 0x5f7   : > { %v11392_v42 = vpop.permute.xlu1 %4557 }
 0x5f8   : > { %13652 = vst [vmem:[#allocation3_spill] sm:$0xff] %v11392_v42  ;;  %v11394_v62 = vpop.permute.xlu0 %4555  ;;  %v13675_v42 = vld [vmem:[#allocation162_spill] sm:$0xff] }
 0x5f9   : > { %13653 = vst [vmem:[#allocation125_spill] sm:$0xff] %v11394_v62  ;;  %4936 = vrot.lane.b32.xlu1 %v10512_v45, %s6375_s30  ;;  %v6344_v45 = vld [vmem:[#allocation2 + $0x1a9] sm:$0xff] }
 0x5fa   : > { %4887 = vrot.lane.b32.xlu0 %v6343_v38, %s6374_s29  ;;  %v13669_v38 = vld [vmem:[#allocation118_spill] sm:$0xff] }
 0x5fb   : > { %v11399_v28 = vpop.permute.xlu1 %4593 }
 0x5fc   : > { %v11401_v22 = vpop.permute.xlu0 %4591 }
 0x5fd   : > { %4987 = vrot.lane.b32.xlu1 %v13612_v51, %s6376_s5 }
 0x5fe   : > { %4938 = vrot.lane.b32.xlu0 %v10526_v39, %s6375_s30 }
 0x5ff   : > { %v11407_v59 = vpop.permute.xlu1 %4597 }
 0x600   : > { %v11409_v4 = vpop.permute.xlu0 %4595 }
 0x601   : > { %4989 = vrot.lane.b32.xlu1 %v13628_v41, %s6376_s5  ;;  %v6345_v41 = vld [vmem:[#allocation2 + $0x1aa] sm:$0xff] }
 0x602   : > { %4838 = vrot.lane.b32.xlu0 %v6344_v45, %s6373_s28  ;;  %v11463_v45 = vld [vmem:[#allocation2 + $0x1c0] sm:$0xff] }
 0x603   : > { %v11414_v33 = vpop.permute.xlu1 %4601 }
 0x604   : > { %13654 = vst [vmem:[#allocation124_spill] sm:$0xff] %v11414_v33  ;;  %v11416_v40 = vpop.permute.xlu0 %4599 }
 0x605   : > { %13655 = vst [vmem:[#allocation191_spill] sm:$0xff] %v11416_v40  ;;  %4840 = vrot.lane.b32.xlu1 %v13656_v9, %s6373_s28  ;;  %v4401_v40 = vld [vmem:[#allocation2 + $0x180] sm:$0xff] }
 0x606   : > { %5038 = vrot.lane.b32.xlu0 %v11367_v37, %s6377_s6 }
 0x607   : > { %v11422_v39 = vpop.permute.xlu1 %4605 }
 0x608   : > { %13657 = vst [vmem:[#allocation190_spill] sm:$0xff] %v11422_v39  ;;  %v11424_v51 = vpop.permute.xlu0 %4603 }
 0x609   : > { %13658 = vst [vmem:[#allocation138_spill] sm:$0xff] %v11424_v51  ;;  %5040 = vrot.lane.b32.xlu1 %v11381_v8, %s6377_s6 }
 0x60a   : > { %4889 = vrot.lane.b32.xlu0 %v6345_v41, %s6374_s29 }
 0x60b   : > { %v11429_v6 = vpop.permute.xlu1 %4609 }
 0x60c   : > { %13659 = vst [vmem:[#allocation193_spill] sm:$0xff] %v11429_v6  ;;  %v11431_v3 = vpop.permute.xlu0 %4607  ;;  %v11669_v6 = vld [vmem:[#allocation2 + $0x1e8] sm:$0xff] }
 0x60d   : > { %13660 = vst [vmem:[#allocation195_spill] sm:$0xff] %v11431_v3  ;;  %4891 = vrot.lane.b32.xlu1 %v13661_v7, %s6374_s29  ;;  %13707 = vst [vmem:[#allocation21_spill] sm:$0xff] %v11669_v6 }
 0x60e   : > { %5089 = vrot.lane.b32.xlu0 %v13656_v9, %s6378_s7 }
 0x60f   : > { %v11437_v50 = vpop.permute.xlu1 %4613 }
 0x610   : > { %13662 = vst [vmem:[#allocation126_spill] sm:$0xff] %v11437_v50  ;;  %v11439_v14 = vpop.permute.xlu0 %4611 }
 0x611   : > { %13663 = vst [vmem:[#allocation156_spill] sm:$0xff] %v11439_v14  ;;  %5091 = vrot.lane.b32.xlu1 %v13664_v43, %s6378_s7  ;;  %v11585_v14 = vld [vmem:[#allocation2 + $0x1d8] sm:$0xff] }
 0x612   : > { %4940 = vrot.lane.b32.xlu0 %v10522_v10, %s6375_s30  ;;  %13699 = vst [vmem:[#allocation24_spill] sm:$0xff] %v11585_v14 }
 0x613   : > { %v11445_v57 = vpop.permute.xlu1 %4617 }
 0x614   : > { %13665 = vst [vmem:[#allocation127_spill] sm:$0xff] %v11445_v57  ;;  %v11447_v0 = vpop.permute.xlu0 %4615  ;;  %v11497_v57 = vld [vmem:[#allocation2 + $0x1c8] sm:$0xff] }
 0x615   : > { %13666 = vst [vmem:[#allocation175_spill] sm:$0xff] %v11447_v0  ;;  %4942 = vrot.lane.b32.xlu1 %v10952_v17, %s6375_s30  ;;  %13677 = vst [vmem:[#allocation176_spill] sm:$0xff] %v11497_v57 }
 0x616   : > { %5140 = vrot.lane.b32.xlu0 %v13661_v7, %s6379_s8 }
 0x617   : > { %v11453_v2 = vpop.permute.xlu1 %4621 }
 0x618   : > { %13667 = vst [vmem:[#allocation155_spill] sm:$0xff] %v11453_v2  ;;  %v11455_v23 = vpop.permute.xlu0 %4619  ;;  %v13672_v2 = vld [vmem:[#allocation113_spill] sm:$0xff] }
 0x619   : > { %13668 = vst [vmem:[#allocation170_spill] sm:$0xff] %v11455_v23  ;;  %5142 = vrot.lane.b32.xlu1 %v13669_v38, %s6379_s8 }
 0x61a   : > { %4991 = vrot.lane.b32.xlu0 %v13624_v52, %s6376_s5 }
 0x61b   : > { %v11461_v10 = vpop.permute.xlu1 %4657 }
 0x61c   : > { %v11465_v9 = vpop.permute.xlu0 %4655 }
 0x61d   : > { %4793 = vrot.lane.b32.xlu1 %v11463_v45, %s6372_s27 }
 0x61e   : > { %5191 = vrot.lane.b32.xlu0 %v10952_v17, %s6380_s9 }
 0x61f   : > { %v11471_v41 = vpop.permute.xlu1 %4661 }
 0x620   : > { %v11473_v7 = vpop.permute.xlu0 %4659 }
 0x621   : > { %4993 = vrot.lane.b32.xlu1 %v11275_v58, %s6376_s5 }
 0x622   : > { %4842 = vrot.lane.b32.xlu0 %v13664_v43, %s6373_s28 }
 0x623   : > { %v11479_v52 = vpop.permute.xlu1 %4665 }
 0x624   : > { %13670 = vst [vmem:[#allocation173_spill] sm:$0xff] %v11479_v52  ;;  %v11481_v23 = vpop.permute.xlu0 %4663  ;;  %v390_v52 = vld [vmem:[%s10382_s10 + $0x20] sm:$0xff] }
 0x625   : > { %13671 = vst [vmem:[#allocation197_spill] sm:$0xff] %v11481_v23  ;;  %5193 = vrot.lane.b32.xlu1 %v13672_v2, %s6380_s9  ;;  %398 = vst.msk [vmem:[#allocation2 + $0x220] sm:$0xff] %vm321_vm0, %v390_v52 }
 0x626   : > { %5042 = vrot.lane.b32.xlu0 %v11463_v45, %s6377_s6 }
 0x627   : > { %v11487_v17 = vpop.permute.xlu1 %4669 }
 0x628   : > { %13673 = vst [vmem:[#allocation177_spill] sm:$0xff] %v11487_v17  ;;  %v11489_v62 = vpop.permute.xlu0 %4667 }
 0x629   : > { %13674 = vst [vmem:[#allocation172_spill] sm:$0xff] %v11489_v62  ;;  %4844 = vrot.lane.b32.xlu1 %v13675_v42, %s6373_s28  ;;  %v388_v62 = vld [vmem:[%s10382_s10 + $0x10] sm:$0xff] }
 0x62a   : > { %5242 = vrot.lane.b32.xlu0 %v11275_v58, %s6382_s18  ;;  %396 = vst.msk [vmem:[#allocation2 + $0x210] sm:$0xff] %vm321_vm0, %v388_v62 }
 0x62b   : > { %v11495_v43 = vpop.permute.xlu1 %4673 }
 0x62c   : > { %13676 = vst [vmem:[#allocation180_spill] sm:$0xff] %v11495_v43  ;;  %v11499_v18 = vpop.permute.xlu0 %4671  ;;  %v6348_v43 = vld [vmem:[#allocation2 + $0x1e1] sm:$0xff] }
 0x62d   : > { %13678 = vst [vmem:[#allocation184_spill] sm:$0xff] %v11499_v18  ;;  %5044 = vrot.lane.b32.xlu1 %v11497_v57, %s6377_s6  ;;  %v392_v18 = vld [vmem:[%s10382_s10 + $0x30] sm:$0xff] }
 0x62e   : > { %4893 = vrot.lane.b32.xlu0 %v13669_v38, %s6374_s29  ;;  %v13683_v38 = vld [vmem:[#allocation189_spill] sm:$0xff]  ;;  %400 = vst.msk [vmem:[#allocation2 + $0x230] sm:$0xff] %vm321_vm0, %v392_v18 }
 0x62f   : > { %v11505_v0 = vpop.permute.xlu1 %4677 }
 0x630   : > { %13679 = vst [vmem:[#allocation178_spill] sm:$0xff] %v11505_v0  ;;  %v11507_v53 = vpop.permute.xlu0 %4675 }
 0x631   : > { %13680 = vst [vmem:[#allocation182_spill] sm:$0xff] %v11507_v53  ;;  %5244 = vrot.lane.b32.xlu1 %v11264_v55, %s6382_s18 }
 0x632   : > { %5093 = vrot.lane.b32.xlu0 %v13675_v42, %s6378_s7  ;;  %v13686_v42 = vld [vmem:[#allocation154_spill] sm:$0xff] }
 0x633   : > { %v11513_v58 = vpop.permute.xlu1 %4681 }
 0x634   : > { %13681 = vst [vmem:[#allocation194_spill] sm:$0xff] %v11513_v58  ;;  %v11515_v17 = vpop.permute.xlu0 %4679 }
 0x635   : > { %13682 = vst [vmem:[#allocation198_spill] sm:$0xff] %v11515_v17  ;;  %4944 = vrot.lane.b32.xlu1 %v13672_v2, %s6375_s30 }
 0x636   : > { %4895 = vrot.lane.b32.xlu0 %v13683_v38, %s6374_s29 }
 0x637   : > { %v11521_v0 = vpop.permute.xlu1 %4685 }
 0x638   : > { %13684 = vst [vmem:[#allocation192_spill] sm:$0xff] %v11521_v0  ;;  %v11523_v50 = vpop.permute.xlu0 %4683 }
 0x639   : > { %13685 = vst [vmem:[#allocation5_spill] sm:$0xff] %v11523_v50  ;;  %5144 = vrot.lane.b32.xlu1 %v13683_v38, %s6379_s8  ;;  %v13687_v50 = vld [vmem:[#allocation101_spill] sm:$0xff]  ;;  %v387_v38 = vld [vmem:[%s10382_s10 + $0x8] sm:$0xff] }
 0x63a   : > { %5095 = vrot.lane.b32.xlu0 %v13686_v42, %s6378_s7  ;;  %395 = vst.msk [vmem:[#allocation2 + $0x208] sm:$0xff] %vm321_vm0, %v387_v38 }
 0x63b   : > { %v11529_v39 = vpop.permute.xlu1 %4721 }
 0x63c   : > { %v11531_v58 = vpop.permute.xlu0 %4719 }
 0x63d   : > { %4946 = vrot.lane.b32.xlu1 %v11006_v56, %s6375_s30 }
 0x63e   : > { %4795 = vrot.lane.b32.xlu0 %v11497_v57, %s6372_s27 }
 0x63f   : > { %v11537_v2 = vpop.permute.xlu1 %4725 }
 0x640   : > { %v11539_v0 = vpop.permute.xlu0 %4723 }
 0x641   : > { %5146 = vrot.lane.b32.xlu1 %v13687_v50, %s6379_s8 }
 0x642   : > { %4995 = vrot.lane.b32.xlu0 %v11264_v55, %s6376_s5 }
 0x643   : > { %v11547_v17 = vpop.permute.xlu1 %4729 }
 0x644   : > { %13688 = vst [vmem:[#allocation196_spill] sm:$0xff] %v11547_v17  ;;  %v11551_v8 = vpop.permute.xlu0 %4727 }
 0x645   : > { %13690 = vst [vmem:[#allocation200_spill] sm:$0xff] %v11551_v8  ;;  %4797 = vrot.lane.b32.xlu1 %v11549_v54, %s6372_s27  ;;  %v6351_v8 = vld [vmem:[#allocation2 + $0x1e9] sm:$0xff] }
 0x646   : > { %5195 = vrot.lane.b32.xlu0 %v11006_v56, %s6380_s9 }
 0x647   : > { %v11557_v26 = vpop.permute.xlu1 %4733 }
 0x648   : > { %13691 = vst [vmem:[#allocation10_spill] sm:$0xff] %v11557_v26  ;;  %v11559_v53 = vpop.permute.xlu0 %4731 }
 0x649   : > { %13692 = vst [vmem:[#allocation6_spill] sm:$0xff] %v11559_v53  ;;  %4997 = vrot.lane.b32.xlu1 %v11305_v15, %s6376_s5  ;;  %v13697_v53 = vld [vmem:[#allocation120_spill] sm:$0xff] }
 0x64a   : > { %4846 = vrot.lane.b32.xlu0 %v13686_v42, %s6373_s28 }
 0x64b   : > { %v11565_v55 = vpop.permute.xlu1 %4737 }
 0x64c   : > { %13693 = vst [vmem:[#allocation9_spill] sm:$0xff] %v11565_v55  ;;  %v11567_v38 = vpop.permute.xlu0 %4735 }
 0x64d   : > { %13694 = vst [vmem:[#allocation11_spill] sm:$0xff] %v11567_v38  ;;  %5197 = vrot.lane.b32.xlu1 %v10994_v12, %s6380_s9  ;;  %v11711_v38 = vld [vmem:[#allocation2 + $0x1ea] sm:$0xff] }
 0x64e   : > { %5046 = vrot.lane.b32.xlu0 %v11549_v54, %s6377_s6 }
 0x64f   : > { %v11573_v56 = vpop.permute.xlu1 %4741 }
 0x650   : > { %13695 = vst [vmem:[#allocation12_spill] sm:$0xff] %v11573_v56  ;;  %v11575_v26 = vpop.permute.xlu0 %4739 }
 0x651   : > { %13696 = vst [vmem:[#allocation15_spill] sm:$0xff] %v11575_v26  ;;  %4848 = vrot.lane.b32.xlu1 %v13697_v53, %s6373_s28 }
 0x652   : > { %5246 = vrot.lane.b32.xlu0 %v11305_v15, %s6382_s18  ;;  %v6346_v15 = vld [vmem:[#allocation2 + $0x1d1] sm:$0xff] }
 0x653   : > { %v11583_v42 = vpop.permute.xlu1 %4745 }
 0x654   : > { %13698 = vst [vmem:[#allocation14_spill] sm:$0xff] %v11583_v42  ;;  %v11587_v51 = vpop.permute.xlu0 %4743 }
 0x655   : > { %13700 = vst [vmem:[#allocation16_spill] sm:$0xff] %v11587_v51  ;;  %5048 = vrot.lane.b32.xlu1 %v11585_v14, %s6377_s6  ;;  %v6347_v51 = vld [vmem:[#allocation2 + $0x1d9] sm:$0xff] }
 0x656   : > { %4897 = vrot.lane.b32.xlu0 %v13687_v50, %s6374_s29  ;;  %v13703_v50 = vld [vmem:[#allocation151_spill] sm:$0xff] }
 0x657   : > { %v11593_v56 = vpop.permute.xlu1 %4749 }
 0x658   : > { %13701 = vst [vmem:[#allocation19_spill] sm:$0xff] %v11593_v56  ;;  %v11595_v53 = vpop.permute.xlu0 %4747 }
 0x659   : > { %13702 = vst [vmem:[#allocation18_spill] sm:$0xff] %v11595_v53  ;;  %5248 = vrot.lane.b32.xlu1 %v11298_v47, %s6382_s18 }
 0x65a   : > { %5097 = vrot.lane.b32.xlu0 %v6346_v15, %s6378_s7 }
 0x65b   : > { %v11600_v62 = vpop.permute.xlu1 %4785 }
 0x65c   : > { %v11602_v42 = vpop.permute.xlu0 %4783 }
 0x65d   : > { %4948 = vrot.lane.b32.xlu1 %v10994_v12, %s6375_s30 }
 0x65e   : > { %4899 = vrot.lane.b32.xlu0 %v13703_v50, %s6374_s29 }
 0x65f   : > { %v11608_v56 = vpop.permute.xlu1 %4789 }
 0x660   : > { %v11610_v53 = vpop.permute.xlu0 %4787 }
 0x661   : > { %5148 = vrot.lane.b32.xlu1 %v13703_v50, %s6379_s8  ;;  %v389_v50 = vld [vmem:[%s10382_s10 + $0x18] sm:$0xff] }
 0x662   : > { %5099 = vrot.lane.b32.xlu0 %v6347_v51, %s6378_s7  ;;  %397 = vst.msk [vmem:[#allocation2 + $0x218] sm:$0xff] %vm321_vm0, %v389_v50 }
 0x663   : > { %v11615_v15 = vpop.permute.xlu1 %4834 }
 0x664   : > { %v11617_v26 = vpop.permute.xlu0 %4791 }
 0x665   : > { %13704 = vst [vmem:[#allocation20_spill] sm:$0xff] %v11617_v26  ;;  %4950 = vrot.lane.b32.xlu1 %v11052_v27, %s6375_s30  ;;  %v6350_v26 = vld [vmem:[#allocation2 + $0x1e2] sm:$0xff] }
 0x666   : > { %4799 = vrot.lane.b32.xlu0 %v11585_v14, %s6372_s27 }
 0x667   : > { %v11623_v12 = vpop.permute.xlu1 %4885 }
 0x668   : > { %v11625_v54 = vpop.permute.xlu0 %4836 }
 0x669   : > { %5150 = vrot.lane.b32.xlu1 %v13705_v13, %s6379_s8 }
 0x66a   : > { %4999 = vrot.lane.b32.xlu0 %v11298_v47, %s6376_s5 }
 0x66b   : > { %v11633_v37 = vpop.permute.xlu1 %4936 }
 0x66c   : > { %v11637_v55 = vpop.permute.xlu0 %4887 }
 0x66d   : > { %4801 = vrot.lane.b32.xlu1 %v11635_v36, %s6372_s27 }
 0x66e   : > { %5199 = vrot.lane.b32.xlu0 %v11052_v27, %s6380_s9 }
 0x66f   : > { %v11643_v13 = vpop.permute.xlu1 %4987 }
 0x670   : > { %v11645_v14 = vpop.permute.xlu0 %4938 }
 0x671   : > { %5001 = vrot.lane.b32.xlu1 %v11321_v5, %s6376_s5 }
 0x672   : > { %4850 = vrot.lane.b32.xlu0 %v6347_v51, %s6373_s28 }
 0x673   : > { %v11650_v47 = vpop.permute.xlu1 %4989 }
 0x674   : > { %v11652_v50 = vpop.permute.xlu0 %4838 }
 0x675   : > { %5201 = vrot.lane.b32.xlu1 %v11042_v34, %s6380_s9 }
 0x676   : > { %5050 = vrot.lane.b32.xlu0 %v11635_v36, %s6377_s6  ;;  %v6349_v36 = vld [vmem:[#allocation2 + $0x1da] sm:$0xff] }
 0x677   : > { %v11658_v27 = vpop.permute.xlu1 %4840 }
 0x678   : > { %v11660_v17 = vpop.permute.xlu0 %5038 }
 0x679   : > { %4852 = vrot.lane.b32.xlu1 %v6348_v43, %s6373_s28 }
 0x67a   : > { %5250 = vrot.lane.b32.xlu0 %v11321_v5, %s6382_s18 }
 0x67b   : > { %v11667_v51 = vpop.permute.xlu1 %5040 }
 0x67c   : > { %v11671_v33 = vpop.permute.xlu0 %4889 }
 0x67d   : > { %5052 = vrot.lane.b32.xlu1 %v11669_v6, %s6377_s6 }
 0x67e   : > { %4901 = vrot.lane.b32.xlu0 %v6349_v36, %s6374_s29 }
 0x67f   : > { %v11676_v57 = vpop.permute.xlu1 %4891 }
 0x680   : > { %v11678_v29 = vpop.permute.xlu0 %5089 }
 0x681   : > { %5252 = vrot.lane.b32.xlu1 %v11316_v32, %s6382_s18 }
 0x682   : > { %5101 = vrot.lane.b32.xlu0 %v6348_v43, %s6378_s7 }
 0x683   : > { %v11683_v5 = vpop.permute.xlu1 %5091 }
 0x684   : > { %v11685_v52 = vpop.permute.xlu0 %4940 }
 0x685   : > { %4952 = vrot.lane.b32.xlu1 %v11042_v34, %s6375_s30  ;;  %v391_v34 = vld [vmem:[%s10382_s10 + $0x28] sm:$0xff] }
 0x686   : > { %4903 = vrot.lane.b32.xlu0 %v13708_v21, %s6374_s29  ;;  %399 = vst.msk [vmem:[#allocation2 + $0x228] sm:$0xff] %vm321_vm0, %v391_v34 }
 0x687   : > { %v11691_v36 = vpop.permute.xlu1 %4942 }
 0x688   : > { %v5141_v31 = vpop.permute.xlu0 %5140 }
 0x689   : > { %5152 = vrot.lane.b32.xlu1 %v6350_v26, %s6379_s8  ;;  %v5290_v26 = vsel %vm321_vm0, %v4401_v40, %v11323_v11 }
 0x68a   : > { %5103 = vrot.lane.b32.xlu0 %v6351_v8, %s6378_s7  ;;  %v5306_v24 = vsel %vm1316_vm4, %v5290_v26, %v11401_v22  ;;  %v11726_v22 = vld [vmem:[%s12414_s3] ss:$0 sm:$0xff] }
 0x68b   : > { %v11695_v43 = vpop.permute.xlu1 %5142 }
 0x68c   : > { %v11697_v23 = vpop.permute.xlu0 %4991 }
 0x68d   : > { %4954 = vrot.lane.b32.xlu1 %v11092_v48, %s6375_s30 }
 0x68e   : > { %4803 = vrot.lane.b32.xlu0 %v11669_v6, %s6372_s27  ;;  %v5322_v6 = vsel %vm1333_vm5, %v5306_v24, %v11465_v9  ;;  %v4402_v24 = vld [vmem:[#allocation2 + $0x188] sm:$0xff]  ;;  %v11731_v9 = vld [vmem:[#allocation2 + $0x1f0] sm:$0xff] }
 0x68f   : > { %v11705_v21 = vpop.permute.xlu1 %4793  ;;  %v5338_v11 = vsel %vm1350_vm6, %v5322_v6, %v11531_v58 }
 0x690   : > { %13709 = vst [vmem:[#allocation23_spill] sm:$0xff] %v11705_v21  ;;  %v5192_v35 = vpop.permute.xlu0 %5191 }
 0x691   : > { %5154 = vrot.lane.b32.xlu1 %v11711_v38, %s6379_s8 }
 0x692   : > { %5003 = vrot.lane.b32.xlu0 %v11316_v32, %s6376_s5  ;;  %v5354_v32 = vsel %vm1367_vm7, %v5338_v11, %v11602_v42 }
 0x693   : > { %v6079_v34 = vpop.f32.mrb[16].mxu0  ;;  %v11729_v21 = vpop.permute.xlu1 %4993  ;;  %v5370_v6 = vsel %vm1384_vm8, %v5354_v32, %v11615_v15 }
 0x694   : > { %v4312_v40 = vadd.f32 %v11726_v22, %v6079_v34  ;;  %v4306_v26 = vpop.f32.mrb[17].mxu0  ;;  %v11736_v3 = vpop.permute.xlu0 %4842  ;;  %v5386_v58 = vsel %vm1401_vm9, %v5370_v6, %v11623_v12  ;;  %v5291_v34 = vsel %vm321_vm0, %v4402_v24, %v11319_v16 }
 0x695   : > { %v4307_v18 = vadd.f32 %v11726_v22, %v4306_v26  ;;  %4805 = vrot.lane.b32.xlu1 %v11731_v9, %s6372_s27  ;;  %v5402_v15 = vsel %vm1418_vm10, %v5386_v58, %v11633_v37  ;;  %v5307_v12 = vsel %vm1316_vm4, %v5291_v34, %v11399_v28 }
 0x696   : > { %4386 = vst.msk [vmem:[%s8702_s13 + $0x108] sm:$0xff] %vm1316_vm4, %v4312_v40  ;;  %5203 = vrot.lane.b32.xlu0 %v11092_v48, %s6380_s9  ;;  %v5418_v32 = vsel %vm1435_vm11, %v5402_v15, %v11643_v13  ;;  %v5323_v16 = vsel %vm1333_vm5, %v5307_v12, %v11461_v10 }
 0x697   : > { %4385 = vst.msk [vmem:[%s8702_s13 + $0x100] sm:$0xff] %vm1316_vm4, %v4307_v18  ;;  %v6082_v42 = vpop.f32.mrb[18].mxu0  ;;  %v5194_v26 = vpop.permute.xlu1 %5193  ;;  %v5434_v37 = vsel %vm1452_vm12, %v5418_v32, %v11660_v17  ;;  %v5339_v28 = vsel %vm1350_vm6, %v5323_v16, %v11529_v39  ;;  %v6354_v16 = vld [vmem:[#allocation2 + $0x1f1] sm:$0xff] }
 0x698   : > { %v4322_v11 = vadd.f32 %v11726_v22, %v6082_v42  ;;  %v4316_v40 = vpop.f32.mrb[19].mxu0  ;;  %v11760_v18 = vpop.permute.xlu0 %5042  ;;  %v5450_v13 = vsel %vm1469_vm13, %v5434_v37, %v11678_v29  ;;  %v5355_v17 = vsel %vm1367_vm7, %v5339_v28, %v11600_v62 }
 0x699   : > { %v4317_v48 = vadd.f32 %v11726_v22, %v4316_v40  ;;  %5005 = vrot.lane.b32.xlu1 %v11333_v20, %s6376_s5  ;;  %v5466_v24 = vsel %vm1486_vm14, %v5450_v13, %v5141_v31  ;;  %v5371_v39 = vsel %vm1384_vm8, %v5355_v17, %v11625_v54 }
 0x69a   : > { %4388 = vst.msk [vmem:[%s8702_s13 + $0x118] sm:$0xff] %vm1316_vm4, %v4322_v11  ;;  %4854 = vrot.lane.b32.xlu0 %v6351_v8, %s6373_s28  ;;  %v5482_v29 = vsel %vm1503_vm15, %v5466_v24, %v5192_v35  ;;  %v5387_v15 = vsel %vm1401_vm9, %v5371_v39, %v11637_v55 }
 0x69b   : > { %4387 = vst.msk [vmem:[%s8702_s13 + $0x110] sm:$0xff] %vm1316_vm4, %v4317_v48  ;;  %v6085_v10 = vpop.f32.mrb[20].mxu0  ;;  %v11781_v42 = vpop.permute.xlu1 %4844  ;;  %v5403_v62 = vsel %vm1418_vm10, %v5387_v15, %v11645_v14 }
 0x69c   : > { %v4332_v6 = vadd.f32 %v11726_v22, %v6085_v10  ;;  %v4326_v58 = vpop.f32.mrb[21].mxu0  ;;  %v5243_v8 = vpop.permute.xlu0 %5242  ;;  %v5419_v54 = vsel %vm1435_vm11, %v5403_v62, %v11650_v47  ;;  %v11824_v10 = vld [vmem:[#allocation2 + $0x1f8] sm:$0xff] }
 0x69d   : > { %v4327_v34 = vadd.f32 %v11726_v22, %v4326_v58  ;;  %v5498_v31 = vsel %vm1520_vm1, %v5482_v29, %v5243_v8  ;;  %5205 = vrot.lane.b32.xlu1 %v11081_v30, %s6380_s9  ;;  %v5435_v14 = vsel %vm1452_vm12, %v5419_v54, %v11667_v51 }
 0x69e   : > { %4390 = vst.msk [vmem:[%s8702_s13 + $0x128] sm:$0xff] %vm1316_vm4, %v4332_v6  ;;  %5054 = vrot.lane.b32.xlu0 %v11731_v9, %s6377_s6  ;;  %6117 = vmatprep.mubr.msk.f32.mxu1 %vm1543_vm2, %v5498_v31  ;;  %v5451_v48 = vsel %vm1469_vm13, %v5435_v14, %v11683_v5 }
 0x69f   : > { %4389 = vst.msk [vmem:[%s8702_s13 + $0x120] sm:$0xff] %vm1316_vm4, %v4327_v34  ;;  %v6088_v35 = vpop.f32.mrb[22].mxu0  ;;  %v11804_v40 = vpop.permute.xlu1 %5044  ;;  %v5467_v47 = vsel %vm1486_vm14, %v5451_v48, %v11695_v43 }
 0x6a0   : > { %v4342_v55 = vadd.f32 %v11726_v22, %v6088_v35  ;;  %v4336_v11 = vpop.f32.mrb[23].mxu0  ;;  %v11809_v32 = vpop.permute.xlu0 %4893  ;;  %v5483_v37 = vsel %vm1503_vm15, %v5467_v47, %v5194_v26  ;;  %v6355_v35 = vld [vmem:[#allocation2 + $0x1f2] sm:$0xff] }
 0x6a1   : > { %v4337_v12 = vadd.f32 %v11726_v22, %v4336_v11  ;;  %4856 = vrot.lane.b32.xlu1 %v6354_v16, %s6373_s28 }
 0x6a2   : > { %4392 = vst.msk [vmem:[%s8702_s13 + $0x138] sm:$0xff] %vm1316_vm4, %v4342_v55  ;;  %5254 = vrot.lane.b32.xlu0 %v11333_v20, %s6382_s18 }
 0x6a3   : > { %4391 = vst.msk [vmem:[%s8702_s13 + $0x130] sm:$0xff] %vm1316_vm4, %v4337_v12  ;;  %v6091_v51 = vpop.f32.mrb[24].mxu0  ;;  %v5245_v13 = vpop.permute.xlu1 %5244 }
 0x6a4   : > { %v4352_v5 = vadd.f32 %v11726_v22, %v6091_v51  ;;  %v4346_v28 = vpop.f32.mrb[25].mxu0  ;;  %v5499_v43 = vsel %vm1520_vm1, %v5483_v37, %v5245_v13  ;;  %v11828_v24 = vpop.permute.xlu0 %5093  ;;  %v4403_v51 = vld [vmem:[#allocation2 + $0x190] sm:$0xff] }
 0x6a5   : > { %v4347_v17 = vadd.f32 %v11726_v22, %v4346_v28  ;;  %5056 = vrot.lane.b32.xlu1 %v11824_v10, %s6377_s6  ;;  %6118 = vmatmul.mubr.msk.f32.vlgmr.msra.gmra.mrb[16].mxu1 %vm1543_vm2, %v5499_v43 }
 0x6a6   : > { %4394 = vst.msk [vmem:[%s8702_s13 + $0x148] sm:$0xff] %vm1316_vm4, %v4352_v5  ;;  %4905 = vrot.lane.b32.xlu0 %v11711_v38, %s6374_s29  ;;  %v5292_v5 = vsel %vm321_vm0, %v4403_v51, %v11335_v49  ;;  %v5298_v51 = vsel %vm321_vm0, %v11463_v45, %v11369_v44  ;;  %v4490_v45 = vld [vmem:[#allocation2 + $0x203] sm:$0xff] }
 0x6a7   : > { %4393 = vst.msk [vmem:[%s8702_s13 + $0x140] sm:$0xff] %vm1316_vm4, %v4347_v17  ;;  %v6094_v20 = vpop.f32.mrb[26].mxu0  ;;  %v11840_v58 = vpop.permute.xlu1 %4944  ;;  %v5308_v13 = vsel %vm1316_vm4, %v5292_v5, %v11409_v4  ;;  %v6357_v17 = vld [vmem:[#allocation2 + $0x1fa] sm:$0xff] }
 0x6a8   : > { %v4362_v26 = vadd.f32 %v11726_v22, %v6094_v20  ;;  %v4356_v6 = vpop.f32.mrb[27].mxu0  ;;  %v11843_v29 = vpop.permute.xlu0 %4895  ;;  %v5324_v43 = vsel %vm1333_vm5, %v5308_v13, %v11473_v7  ;;  %v4481_v20 = vld [vmem:[#allocation2 + $0x200] sm:$0xff] }
 0x6a9   : > { %v4357_v39 = vadd.f32 %v11726_v22, %v4356_v6  ;;  %5256 = vrot.lane.b32.xlu1 %v11329_v46, %s6382_s18  ;;  %v6358_v5 = vld [vmem:[#allocation2 + $0x1fb] sm:$0xff] }
 0x6aa   : > { %4396 = vst.msk [vmem:[%s8702_s13 + $0x158] sm:$0xff] %vm1316_vm4, %v4362_v26  ;;  %5105 = vrot.lane.b32.xlu0 %v6354_v16, %s6378_s7  ;;  %v5340_v26 = vsel %vm1350_vm6, %v5324_v43, %v11539_v0 }
 0x6ab   : > { %4395 = vst.msk [vmem:[%s8702_s13 + $0x150] sm:$0xff] %vm1316_vm4, %v4357_v39  ;;  %v6097_v38 = vpop.f32.mrb[28].mxu0  ;;  %v5145_v15 = vpop.permute.xlu1 %5144  ;;  %v5356_v49 = vsel %vm1367_vm7, %v5340_v26, %v11610_v53  ;;  %v4485_v26 = vld [vmem:[#allocation2 + $0x209] sm:$0xff] }
 0x6ac   : > { %v4372_v34 = vadd.f32 %v11726_v22, %v6097_v38  ;;  %v4366_v8 = vpop.f32.mrb[29].mxu0  ;;  %v11854_v62 = vpop.permute.xlu0 %5095  ;;  %v5372_v4 = vsel %vm1384_vm8, %v5356_v49, %v11652_v50  ;;  %v13712_v49 = vld [vmem:[#allocation11_spill] sm:$0xff] }
 0x6ad   : > { %v4367_v31 = vadd.f32 %v11726_v22, %v4366_v8  ;;  %4956 = vrot.lane.b32.xlu1 %v11081_v30, %s6375_s30  ;;  %v6356_v30 = vld [vmem:[#allocation2 + $0x1f9] sm:$0xff]  ;;  %v5388_v7 = vsel %vm1401_vm9, %v5372_v4, %v11671_v33 }
 0x6ae   : > { %4398 = vst.msk [vmem:[%s8702_s13 + $0x168] sm:$0xff] %vm1316_vm4, %v4372_v34  ;;  %4907 = vrot.lane.b32.xlu0 %v6355_v35, %s6374_s29  ;;  %v5404_v0 = vsel %vm1418_vm10, %v5388_v7, %v11685_v52 }
 0x6af   : > { %4397 = vst.msk [vmem:[%s8702_s13 + $0x160] sm:$0xff] %vm1316_vm4, %v4367_v31  ;;  %v11864_v14 = vpop.permute.xlu1 %4946  ;;  %v5420_v50 = vsel %vm1435_vm11, %v5404_v0, %v11697_v23 }
 0x6b0   : > { %v6100_v54 = vpop.f32.mrb[30].mxu0  ;;  %v11867_v48 = vpop.permute.xlu0 %4795 }
 0x6b1   : > { %v4382_v55 = vadd.f32 %v11726_v22, %v6100_v54  ;;  %v4376_v11 = vpop.f32.mrb[31].mxu0  ;;  %5156 = vrot.lane.b32.xlu1 %v6355_v35, %s6379_s8  ;;  %v4482_v54 = vld [vmem:[#allocation2 + $0x208] sm:$0xff] }
 0x6b2   : > { %v4377_v12 = vadd.f32 %v11726_v22, %v4376_v11  ;;  %5107 = vrot.lane.b32.xlu0 %v6356_v30, %s6378_s7 }
 0x6b3   : > { %4400 = vst.msk [vmem:[%s8702_s13 + $0x178] sm:$0xff] %vm1316_vm4, %v4382_v55  ;;  %v5147_v16 = vpop.permute.xlu1 %5146 }
 0x6b4   : > { %4399 = vst.msk [vmem:[%s8702_s13 + $0x170] sm:$0xff] %vm1316_vm4, %v4377_v12  ;;  %v11875_v47 = vpop.permute.xlu0 %4995 }
 0x6b5   : > { %4958 = vrot.lane.b32.xlu1 %v11131_v60, %s6375_s30 }
 0x6b6   : > { %4807 = vrot.lane.b32.xlu0 %v11824_v10, %s6372_s27 }
 0x6b7   : > { %v11881_v37 = vpop.permute.xlu1 %4797 }
 0x6b8   : > { %v5196_v28 = vpop.permute.xlu0 %5195 }
 0x6b9   : > { %5158 = vrot.lane.b32.xlu1 %v6357_v17, %s6379_s8 }
 0x6ba   : > { %5007 = vrot.lane.b32.xlu0 %v11329_v46, %s6376_s5  ;;  %v5293_v46 = vsel %vm321_vm0, %v11359_v19, %v11331_v63 }
 0x6bb   : > { %v11894_v6 = vpop.permute.xlu1 %4997  ;;  %v5309_v38 = vsel %vm1316_vm4, %v5293_v46, %v11407_v59 }
 0x6bc   : > { %v11898_v39 = vpop.permute.xlu0 %4846  ;;  %v5325_v33 = vsel %vm1333_vm5, %v5309_v38, %v11471_v41 }
 0x6bd   : > { %4809 = vrot.lane.b32.xlu1 %v4481_v20, %s6372_s27  ;;  %v5341_v63 = vsel %vm1350_vm6, %v5325_v33, %v11537_v2  ;;  %v13714_v33 = vld [vmem:[#allocation121_spill] sm:$0xff] }
 0x6be   : > { %5207 = vrot.lane.b32.xlu0 %v11131_v60, %s6380_s9  ;;  %v5436_v60 = vsel %vm1452_vm12, %v5420_v50, %v11760_v18  ;;  %v5357_v59 = vsel %vm1367_vm7, %v5341_v63, %v11608_v56  ;;  %v13713_v50 = vld [vmem:[#allocation160_spill] sm:$0xff] }
 0x6bf   : > { %v5198_v53 = vpop.permute.xlu1 %5197  ;;  %v5452_v19 = vsel %vm1469_vm13, %v5436_v60, %v11828_v24  ;;  %v5373_v52 = vsel %vm1384_vm8, %v5357_v59, %v11658_v27  ;;  %v5294_v60 = vsel %vm321_vm0, %v13714_v33, %v13713_v50  ;;  %v13727_v50 = vld [vmem:[#allocation196_spill] sm:$0xff] }
 0x6c0   : > { %v11916_v34 = vpop.permute.xlu0 %5046  ;;  %v5468_v23 = vsel %vm1486_vm14, %v5452_v19, %v5145_v15  ;;  %v5389_v2 = vsel %vm1401_vm9, %v5373_v52, %v11676_v57  ;;  %v4484_v15 = vld [vmem:[#allocation2 + $0x201] sm:$0xff] }
 0x6c1   : > { %5009 = vrot.lane.b32.xlu1 %v11345_v25, %s6376_s5  ;;  %v5484_v18 = vsel %vm1503_vm15, %v5468_v23, %v5196_v28  ;;  %v5405_v56 = vsel %vm1418_vm10, %v5389_v2, %v11691_v36  ;;  %v13710_v28 = vld [vmem:[#allocation195_spill] sm:$0xff]  ;;  %v13716_v23 = vld [vmem:[#allocation197_spill] sm:$0xff] }
 0x6c2   : > { %4858 = vrot.lane.b32.xlu0 %v6356_v30, %s6373_s28  ;;  %v5421_v27 = vsel %vm1435_vm11, %v5405_v56, %v11729_v21  ;;  %v4487_v30 = vld [vmem:[#allocation2 + $0x202] sm:$0xff]  ;;  %v5314_v13 = vsel %vm1316_vm4, %v5298_v51, %v13710_v28 }
 0x6c3   : > { %v11932_v41 = vpop.permute.xlu1 %4848  ;;  %v5437_v57 = vsel %vm1452_vm12, %v5421_v27, %v11804_v40  ;;  %v13715_v19 = vld [vmem:[#allocation191_spill] sm:$0xff]  ;;  %v13718_v56 = vld [vmem:[#allocation20_spill] sm:$0xff] }
 0x6c4   : > { %v5247_v8 = vpop.permute.xlu0 %5246  ;;  %v5310_v59 = vsel %vm1316_vm4, %v5294_v60, %v13715_v19  ;;  %v13723_v28 = vld [vmem:[#allocation124_spill] sm:$0xff]  ;;  %v13728_v60 = vld [vmem:[#allocation9_spill] sm:$0xff] }
 0x6c5   : > { %v5500_v24 = vsel %vm1520_vm1, %v5484_v18, %v5247_v8  ;;  %5209 = vrot.lane.b32.xlu1 %v11120_v61, %s6380_s9  ;;  %v5453_v61 = vsel %vm1469_vm13, %v5437_v57, %v11854_v62  ;;  %v5326_v52 = vsel %vm1333_vm5, %v5310_v59, %v13716_v23  ;;  %v4483_v18 = vld [vmem:[#allocation2 + $0x210] sm:$0xff]  ;;  %v13717_v8 = vld [vmem:[#allocation200_spill] sm:$0xff]  ;;  %v13729_v23 = vld [vmem:[#allocation23_spill] sm:$0xff] }
 0x6c6   : > { %5058 = vrot.lane.b32.xlu0 %v4481_v20, %s6377_s6  ;;  %6120 = vmatprep.mubr.msk.f32.mxu1 %vm1543_vm2, %v5500_v24  ;;  %v5469_v36 = vsel %vm1486_vm14, %v5453_v61, %v5147_v16  ;;  %v5342_v2 = vsel %vm1350_vm6, %v5326_v52, %v13717_v8  ;;  %v4491_v59 = vld [vmem:[#allocation2 + $0x20b] sm:$0xff] }
 0x6c7   : > { %v11948_v31 = vpop.permute.xlu1 %5048  ;;  %v5485_v21 = vsel %vm1503_vm15, %v5469_v36, %v5198_v53  ;;  %v11998_v53 = vld [vmem:[#allocation2 + $0x20a] sm:$0xff] }
 0x6c8   : > { %v11952_v35 = vpop.permute.xlu0 %4897  ;;  %v4493_v36 = vld [vmem:[#allocation2 + $0x204] sm:$0xff] }
 0x6c9   : > { %4860 = vrot.lane.b32.xlu1 %v4484_v15, %s6373_s28 }
 0x6ca   : > { %5258 = vrot.lane.b32.xlu0 %v11345_v25, %s6382_s18 }
 0x6cb   : > { %v5249_v55 = vpop.permute.xlu1 %5248 }
 0x6cc   : > { %v5501_v11 = vsel %vm1520_vm1, %v5485_v21, %v5249_v55  ;;  %v11962_v12 = vpop.permute.xlu0 %5097  ;;  %v13720_v21 = vld [vmem:[#allocation141_spill] sm:$0xff] }
 0x6cd   : > { %5060 = vrot.lane.b32.xlu1 %v4482_v54, %s6377_s6  ;;  %6121 = vmatmul.mubr.msk.f32.gmra.mrb[18].mxu1 %vm1543_vm2, %v5501_v11  ;;  %v13721_v11 = vld [vmem:[#allocation152_spill] sm:$0xff] }
 0x6ce   : > { %4909 = vrot.lane.b32.xlu0 %v6357_v17, %s6374_s29  ;;  %v13711_v17 = vld [vmem:[#allocation184_spill] sm:$0xff] }
 0x6cf   : > { %v11967_v40 = vpop.permute.xlu1 %4948  ;;  %v5330_v43 = vsel %vm1333_vm5, %v5314_v13, %v13711_v17  ;;  %v13724_v17 = vld [vmem:[#allocation193_spill] sm:$0xff] }
 0x6d0   : > { %v11969_v62 = vpop.permute.xlu0 %4899  ;;  %v5346_v4 = vsel %vm1350_vm6, %v5330_v43, %v13712_v49 }
 0x6d1   : > { %5260 = vrot.lane.b32.xlu1 %v11341_v1, %s6382_s18 }
 0x6d2   : > { %5109 = vrot.lane.b32.xlu0 %v4484_v15, %s6378_s7  ;;  %v5358_v15 = vsel %vm1367_vm7, %v5342_v2, %v13718_v56 }
 0x6d3   : > { %v5149_v25 = vpop.permute.xlu1 %5148  ;;  %v5374_v57 = vsel %vm1384_vm8, %v5358_v15, %v11736_v3 }
 0x6d4   : > { %v11974_v16 = vpop.permute.xlu0 %5099 }
 0x6d5   : > { %4960 = vrot.lane.b32.xlu1 %v6358_v5, %s6375_s30 }
 0x6d6   : > { %4911 = vrot.lane.b32.xlu0 %v4487_v30, %s6374_s29 }
 0x6d7   : > { %v11985_v20 = vpop.permute.xlu1 %4950 }
 0x6d8   : > { %v4800_v7 = vpop.permute.xlu0 %4799 }
 0x6d9   : > { %v5362_v44 = vsel %vm1367_vm7, %v5346_v4, %v4800_v7  ;;  %5160 = vrot.lane.b32.xlu1 %v4487_v30, %s6379_s8  ;;  %v13722_v30 = vld [vmem:[#allocation176_spill] sm:$0xff]  ;;  %v13725_v4 = vld [vmem:[#allocation173_spill] sm:$0xff] }
 0x6da   : > { %5111 = vrot.lane.b32.xlu0 %v4485_v26, %s6378_s7  ;;  %v5299_v51 = vsel %vm321_vm0, %v13722_v30, %v13721_v11 }
 0x6db   : > { %v11992_v46 = vpop.permute.xlu1 %5150 }
 0x6dc   : > { %v11994_v0 = vpop.permute.xlu0 %4999 }
 0x6dd   : > { %4962 = vrot.lane.b32.xlu1 %v4490_v45, %s6375_s30 }
 0x6de   : > { %4811 = vrot.lane.b32.xlu0 %v4482_v54, %s6372_s27  ;;  %v13719_v54 = vld [vmem:[#allocation183_spill] sm:$0xff] }
 0x6df   : > { %v4802_v38 = vpop.permute.xlu1 %4801  ;;  %v5295_v55 = vsel %vm321_vm0, %v13720_v21, %v13719_v54 }
 0x6e0   : > { %v5200_v63 = vpop.permute.xlu0 %5199  ;;  %v5311_v13 = vsel %vm1316_vm4, %v5295_v55, %v13723_v28 }
 0x6e1   : > { %5162 = vrot.lane.b32.xlu1 %v11998_v53, %s6379_s8  ;;  %v5327_v7 = vsel %vm1333_vm5, %v5311_v13, %v13725_v4  ;;  %v4502_v4 = vld [vmem:[#allocation2 + $0x21a] sm:$0xff] }
 0x6e2   : > { %5011 = vrot.lane.b32.xlu0 %v11341_v1, %s6376_s5  ;;  %v5390_v1 = vsel %vm1401_vm9, %v5374_v57, %v11809_v32  ;;  %v5315_v32 = vsel %vm1316_vm4, %v5299_v51, %v13724_v17  ;;  %v5343_v33 = vsel %vm1350_vm6, %v5327_v7, %v13727_v50  ;;  %v4489_v51 = vld [vmem:[#allocation2 + $0x212] sm:$0xff]  ;;  %v13730_v7 = vld [vmem:[#allocation132_spill] sm:$0xff] }
 0x6e3   : > { %v12013_v24 = vpop.permute.xlu1 %5001  ;;  %v5406_v3 = vsel %vm1418_vm10, %v5390_v1, %v11840_v58  ;;  %v5359_v52 = vsel %vm1367_vm7, %v5343_v33, %v13729_v23  ;;  %v4492_v17 = vld [vmem:[#allocation2 + $0x213] sm:$0xff] }
 0x6e4   : > { %v4851_v27 = vpop.permute.xlu0 %4850  ;;  %v5422_v43 = vsel %vm1435_vm11, %v5406_v3, %v11875_v47  ;;  %v5375_v56 = vsel %vm1384_vm8, %v5359_v52, %v11781_v42  ;;  %v4486_v42 = vld [vmem:[#allocation2 + $0x211] sm:$0xff]  ;;  %v13736_v52 = vld [vmem:[#allocation172_spill] sm:$0xff] }
 0x6e5   : > { %v5378_v61 = vsel %vm1384_vm8, %v5362_v44, %v4851_v27  ;;  %4813 = vrot.lane.b32.xlu1 %v4483_v18, %s6372_s27  ;;  %v13726_v44 = vld [vmem:[#allocation180_spill] sm:$0xff]  ;;  %v5438_v58 = vsel %vm1452_vm12, %v5422_v43, %v11916_v34  ;;  %v13733_v50 = vld [vmem:[#allocation13_spill] sm:$0xff] }
 0x6e6   : > { %5211 = vrot.lane.b32.xlu0 %v4490_v45, %s6380_s9  ;;  %v5331_v45 = vsel %vm1333_vm5, %v5315_v32, %v13726_v44  ;;  %v5454_v47 = vsel %vm1469_vm13, %v5438_v58, %v11962_v12  ;;  %v5391_v12 = vsel %vm1401_vm9, %v5375_v56, %v11843_v29  ;;  %v13731_v44 = vld [vmem:[#allocation157_spill] sm:$0xff]  ;;  %v13732_v58 = vld [vmem:[#allocation136_spill] sm:$0xff]  ;;  %v4497_v56 = vld [vmem:[#allocation2 + $0x220] sm:$0xff] }
 0x6e7   : > { %v5202_v5 = vpop.permute.xlu1 %5201  ;;  %v5347_v19 = vsel %vm1350_vm6, %v5331_v45, %v13728_v60  ;;  %v5470_v8 = vsel %vm1486_vm14, %v5454_v47, %v5149_v25  ;;  %v5407_v25 = vsel %vm1418_vm10, %v5391_v12, %v11864_v14  ;;  %v5296_v45 = vsel %vm321_vm0, %v13731_v44, %v13730_v7  ;;  %v13746_v44 = vld [vmem:[#allocation177_spill] sm:$0xff] }
 0x6e8   : > { %v12038_v49 = vpop.permute.xlu0 %5050  ;;  %v5363_v34 = vsel %vm1367_vm7, %v5347_v19, %v4802_v38  ;;  %v5486_v15 = vsel %vm1503_vm15, %v5470_v8, %v5200_v63  ;;  %v5423_v38 = vsel %vm1435_vm11, %v5407_v25, %v11894_v6  ;;  %v4496_v6 = vld [vmem:[#allocation2 + $0x218] sm:$0xff]  ;;  %v5300_v33 = vsel %vm321_vm0, %v13733_v50, %v13732_v58 }
 0x6e9   : > { %5013 = vrot.lane.b32.xlu1 %v4493_v36, %s6376_s5  ;;  %v5439_v29 = vsel %vm1452_vm12, %v5423_v38, %v11948_v31  ;;  %v13734_v19 = vld [vmem:[#allocation138_spill] sm:$0xff] }
 0x6ea   : > { %4862 = vrot.lane.b32.xlu0 %v4485_v26, %s6373_s28  ;;  %v5455_v54 = vsel %vm1469_vm13, %v5439_v29, %v11974_v16  ;;  %v4494_v16 = vld [vmem:[#allocation2 + $0x20c] sm:$0xff]  ;;  %v5312_v47 = vsel %vm1316_vm4, %v5296_v45, %v13734_v19  ;;  %v4495_v25 = vld [vmem:[#allocation2 + $0x214] sm:$0xff] }
 0x6eb   : > { %v4853_v2 = vpop.permute.xlu1 %4852  ;;  %v5471_v14 = vsel %vm1486_vm14, %v5455_v54, %v11992_v46  ;;  %v5328_v8 = vsel %vm1333_vm5, %v5312_v47, %v13736_v52  ;;  %v13747_v58 = vld [vmem:[#allocation178_spill] sm:$0xff]  ;;  %v13749_v47 = vld [vmem:[#allocation12_spill] sm:$0xff] }
 0x6ec   : > { %v5379_v27 = vsel %vm1384_vm8, %v5363_v34, %v4853_v2  ;;  %v5251_v57 = vpop.permute.xlu0 %5250  ;;  %v13737_v34 = vld [vmem:[#allocation182_spill] sm:$0xff] }
 0x6ed   : > { %v5502_v26 = vsel %vm1520_vm1, %v5486_v15, %v5251_v57  ;;  %5213 = vrot.lane.b32.xlu1 %v4491_v59, %s6380_s9  ;;  %v13738_v15 = vld [vmem:[#allocation6_spill] sm:$0xff]  ;;  %v13739_v57 = vld [vmem:[#allocation15_spill] sm:$0xff] }
 0x6ee   : > { %5062 = vrot.lane.b32.xlu0 %v4483_v18, %s6377_s6  ;;  %6123 = vmatprep.mubr.msk.f32.mxu1 %vm1543_vm2, %v5502_v26  ;;  %v5487_v18 = vsel %vm1503_vm15, %v5471_v14, %v5202_v5  ;;  %v4499_v5 = vld [vmem:[#allocation2 + $0x219] sm:$0xff] }
 0x6ef   : > { %v12072_v63 = vpop.permute.xlu1 %5052 }
 0x6f0   : > { %v4902_v1 = vpop.permute.xlu0 %4901 }
 0x6f1   : > { %v12079_v21 = vsel %vm1401_vm9, %v5378_v61, %v4902_v1  ;;  %4864 = vrot.lane.b32.xlu1 %v4486_v42, %s6373_s28 }
 0x6f2   : > { %5262 = vrot.lane.b32.xlu0 %v4493_v36, %s6382_s18 }
 0x6f3   : > { %v5253_v55 = vpop.permute.xlu1 %5252 }
 0x6f4   : > { %v5503_v31 = vsel %vm1520_vm1, %v5487_v18, %v5253_v55  ;;  %v12087_v11 = vpop.permute.xlu0 %5101  ;;  %v13741_v18 = vld [vmem:[#allocation166_spill] sm:$0xff] }
 0x6f5   : > { %5064 = vrot.lane.b32.xlu1 %v4496_v6, %s6377_s6  ;;  %6124 = vmatmul.mubr.msk.f32.gmra.mrb[20].mxu1 %vm1543_vm2, %v5503_v31  ;;  %v13740_v6 = vld [vmem:[#allocation119_spill] sm:$0xff]  ;;  %v13743_v31 = vld [vmem:[#allocation24_spill] sm:$0xff] }
 0x6f6   : > { %4913 = vrot.lane.b32.xlu0 %v11998_v53, %s6374_s29  ;;  %v5297_v55 = vsel %vm321_vm0, %v13741_v18, %v13740_v6 }
 0x6f7   : > { %v12093_v61 = vpop.permute.xlu1 %4952 }
 0x6f8   : > { %v4904_v46 = vpop.permute.xlu0 %4903 }
 0x6f9   : > { %v12096_v36 = vsel %vm1401_vm9, %v5379_v27, %v4904_v46  ;;  %5264 = vrot.lane.b32.xlu1 %v4494_v16, %s6382_s18  ;;  %v5344_v27 = vsel %vm1350_vm6, %v5328_v8, %v13738_v15 }
 0x6fa   : > { %5113 = vrot.lane.b32.xlu0 %v4486_v42, %s6378_s7  ;;  %v5360_v42 = vsel %vm1367_vm7, %v5344_v27, %v11867_v48  ;;  %v13742_v48 = vld [vmem:[#allocation142_spill] sm:$0xff] }
 0x6fb   : > { %v5153_v30 = vpop.permute.xlu1 %5152  ;;  %v5376_v1 = vsel %vm1384_vm8, %v5360_v42, %v11898_v39 }
 0x6fc   : > { %v12100_v3 = vpop.permute.xlu0 %5103  ;;  %v5392_v14 = vsel %vm1401_vm9, %v5376_v1, %v11952_v35 }
 0x6fd   : > { %4964 = vrot.lane.b32.xlu1 %v4491_v59, %s6375_s30  ;;  %v13735_v59 = vld [vmem:[#allocation156_spill] sm:$0xff]  ;;  %v5408_v39 = vsel %vm1418_vm10, %v5392_v14, %v11967_v40 }
 0x6fe   : > { %4915 = vrot.lane.b32.xlu0 %v4489_v51, %s6374_s29  ;;  %v5316_v23 = vsel %vm1316_vm4, %v5300_v33, %v13735_v59  ;;  %v13748_v33 = vld [vmem:[#allocation10_spill] sm:$0xff]  ;;  %v4503_v14 = vld [vmem:[#allocation2 + $0x222] sm:$0xff] }
 0x6ff   : > { %v12104_v53 = vpop.permute.xlu1 %4954  ;;  %v5332_v2 = vsel %vm1333_vm5, %v5316_v23, %v13737_v34  ;;  %v4500_v23 = vld [vmem:[#allocation2 + $0x221] sm:$0xff] }
 0x700   : > { %v4804_v28 = vpop.permute.xlu0 %4803  ;;  %v5348_v12 = vsel %vm1350_vm6, %v5332_v2, %v13739_v57  ;;  %v4498_v2 = vld [vmem:[#allocation2 + $0x228] sm:$0xff] }
 0x701   : > { %5164 = vrot.lane.b32.xlu1 %v4489_v51, %s6379_s8  ;;  %v5364_v38 = vsel %vm1367_vm7, %v5348_v12, %v4804_v28  ;;  %v4505_v51 = vld [vmem:[#allocation2 + $0x21b] sm:$0xff] }
 0x702   : > { %5115 = vrot.lane.b32.xlu0 %v4499_v5, %s6378_s7  ;;  %v13744_v5 = vld [vmem:[#allocation190_spill] sm:$0xff] }
 0x703   : > { %v12108_v13 = vpop.permute.xlu1 %5154  ;;  %v5313_v28 = vsel %vm1316_vm4, %v5297_v55, %v13744_v5 }
 0x704   : > { %v12110_v32 = vpop.permute.xlu0 %5003  ;;  %v5329_v45 = vsel %vm1333_vm5, %v5313_v28, %v13746_v44 }
 0x705   : > { %5015 = vrot.lane.b32.xlu1 %v4494_v16, %s6376_s5  ;;  %v5301_v16 = vsel %vm321_vm0, %v13743_v31, %v13742_v48  ;;  %v5345_v19 = vsel %vm1350_vm6, %v5329_v45, %v13748_v33  ;;  %v4510_v48 = vld [vmem:[#allocation2 + $0x22c] sm:$0xff] }
 0x706   : > { %4966 = vrot.lane.b32.xlu0 %v4492_v17, %s6375_s30  ;;  %v5361_v52 = vsel %vm1367_vm7, %v5345_v19, %v11881_v37  ;;  %v13754_v19 = vld [vmem:[#allocation16_spill] sm:$0xff] }
 0x707   : > { %v4806_v43 = vpop.permute.xlu1 %4805 }
 0x708   : > { %v5204_v60 = vpop.permute.xlu0 %5203 }
 0x709   : > { %5215 = vrot.lane.b32.xlu1 %v4492_v17, %s6380_s9  ;;  %v13745_v17 = vld [vmem:[#allocation126_spill] sm:$0xff] }
 0x70a   : > { %5166 = vrot.lane.b32.xlu0 %v4502_v4, %s6379_s8  ;;  %v5317_v35 = vsel %vm1316_vm4, %v5301_v16, %v13745_v17  ;;  %v5424_v4 = vsel %vm1435_vm11, %v5408_v39, %v11994_v0  ;;  %v4509_v16 = vld [vmem:[#allocation2 + $0x224] sm:$0xff] }
 0x70b   : > { %v12134_v26 = vpop.permute.xlu1 %5005  ;;  %v5333_v50 = vsel %vm1333_vm5, %v5317_v35, %v13747_v58  ;;  %v5440_v40 = vsel %vm1452_vm12, %v5424_v4, %v12038_v49  ;;  %v13750_v35 = vld [vmem:[#allocation167_spill] sm:$0xff]  ;;  %v13751_v4 = vld [vmem:[#allocation22_spill] sm:$0xff] }
 0x70c   : > { %v4855_v29 = vpop.permute.xlu0 %4854  ;;  %v5349_v59 = vsel %vm1350_vm6, %v5333_v50, %v13749_v47  ;;  %v5456_v0 = vsel %vm1469_vm13, %v5440_v40, %v12087_v11  ;;  %v5302_v44 = vsel %vm321_vm0, %v13751_v4, %v13750_v35  ;;  %v13752_v58 = vld [vmem:[#allocation175_spill] sm:$0xff]  ;;  %v13753_v40 = vld [vmem:[#allocation198_spill] sm:$0xff] }
 0x70d   : > { %v5380_v54 = vsel %vm1384_vm8, %v5364_v38, %v4855_v29  ;;  %5066 = vrot.lane.b32.xlu1 %v4497_v56, %s6377_s6  ;;  %v5472_v8 = vsel %vm1486_vm14, %v5456_v0, %v5153_v30  ;;  %v5365_v49 = vsel %vm1367_vm7, %v5349_v59, %v4806_v43  ;;  %v5377_v56 = vsel %vm1384_vm8, %v5361_v52, %v11932_v41  ;;  %v4501_v41 = vld [vmem:[#allocation2 + $0x229] sm:$0xff] }
 0x70e   : > { %5017 = vrot.lane.b32.xlu0 %v4495_v25, %s6376_s5  ;;  %v5488_v15 = vsel %vm1503_vm15, %v5472_v8, %v5204_v60  ;;  %v5393_v57 = vsel %vm1401_vm9, %v5377_v56, %v11969_v62  ;;  %v4508_v60 = vld [vmem:[#allocation2 + $0x21c] sm:$0xff]  ;;  %v5318_v50 = vsel %vm1316_vm4, %v5302_v44, %v13752_v58 }
 0x70f   : > { %v5206_v46 = vpop.permute.xlu1 %5205  ;;  %v5409_v37 = vsel %vm1418_vm10, %v5393_v57, %v11985_v20  ;;  %v5334_v33 = vsel %vm1333_vm5, %v5318_v50, %v13753_v40  ;;  %v13755_v8 = vld [vmem:[#allocation135_spill] sm:$0xff] }
 0x710   : > { %v12160_v7 = vpop.permute.xlu0 %5054  ;;  %v5425_v30 = vsel %vm1435_vm11, %v5409_v37, %v12013_v24  ;;  %v4504_v24 = vld [vmem:[#allocation2 + $0x22a] sm:$0xff]  ;;  %v5350_v47 = vsel %vm1350_vm6, %v5334_v33, %v13754_v19 }
 0x711   : > { %5266 = vrot.lane.b32.xlu1 %v4495_v25, %s6382_s18  ;;  %v5441_v62 = vsel %vm1452_vm12, %v5425_v30, %v12072_v63  ;;  %v13759_v30 = vld [vmem:[#allocation14_spill] sm:$0xff] }
 0x712   : > { %5217 = vrot.lane.b32.xlu0 %v4505_v51, %s6380_s9  ;;  %v5457_v42 = vsel %vm1469_vm13, %v5441_v62, %v12100_v3  ;;  %v4507_v3 = vld [vmem:[#allocation2 + $0x22b] sm:$0xff] }
 0x713   : > { %v4857_v34 = vpop.permute.xlu1 %4856  ;;  %v5473_v38 = vsel %vm1486_vm14, %v5457_v42, %v12108_v13  ;;  %v4506_v13 = vld [vmem:[#allocation2 + $0x223] sm:$0xff] }
 0x714   : > { %v5381_v27 = vsel %vm1384_vm8, %v5365_v49, %v4857_v34  ;;  %v5255_v11 = vpop.permute.xlu0 %5254  ;;  %v5489_v29 = vsel %vm1503_vm15, %v5473_v38, %v5206_v46  ;;  %v13756_v49 = vld [vmem:[#allocation21_spill] sm:$0xff] }
 0x715   : > { %v5504_v12 = vsel %vm1520_vm1, %v5488_v15, %v5255_v11  ;;  %5117 = vrot.lane.b32.xlu1 %v4500_v23, %s6378_s7  ;;  %v5303_v34 = vsel %vm321_vm0, %v13756_v49, %v13755_v8  ;;  %v13757_v15 = vld [vmem:[#allocation127_spill] sm:$0xff] }
 0x716   : > { %5068 = vrot.lane.b32.xlu0 %v4498_v2, %s6377_s6  ;;  %6126 = vmatprep.mubr.msk.f32.mxu1 %vm1543_vm2, %v5504_v12  ;;  %v5410_v2 = vsel %vm1418_vm10, %v12079_v21, %v12093_v61  ;;  %v13758_v12 = vld [vmem:[#allocation194_spill] sm:$0xff] }
 0x717   : > { %v12194_v43 = vpop.permute.xlu1 %5056  ;;  %v5426_v11 = vsel %vm1435_vm11, %v5410_v2, %v12110_v32 }
 0x718   : > { %v4906_v25 = vpop.permute.xlu0 %4905 }
 0x719   : > { %v12201_v20 = vsel %vm1401_vm9, %v5380_v54, %v4906_v25  ;;  %5119 = vrot.lane.b32.xlu1 %v4501_v41, %s6378_s7  ;;  %v5442_v41 = vsel %vm1452_vm12, %v5426_v11, %v12160_v7  ;;  %v5411_v7 = vsel %vm1418_vm10, %v12096_v36, %v12104_v53 }
 0x71a   : > { %5268 = vrot.lane.b32.xlu0 %v4508_v60, %s6382_s18 }
 0x71b   : > { %v5257_v1 = vpop.permute.xlu1 %5256 }
 0x71c   : > { %v5505_v63 = vsel %vm1520_vm1, %v5489_v29, %v5257_v1  ;;  %v5106_v6 = vpop.permute.xlu0 %5105  ;;  %v5427_v29 = vsel %vm1435_vm11, %v5411_v7, %v12134_v26 }
 0x71d   : > { %5170 = vrot.lane.b32.xlu1 %v4504_v24, %s6379_s8  ;;  %6127 = vmatmul.mubr.msk.f32.gmra.mrb[22].mxu1 %vm1543_vm2, %v5505_v63  ;;  %v5458_v62 = vsel %vm1469_vm13, %v5442_v41, %v5106_v6 }
 0x71e   : > { %5168 = vrot.lane.b32.xlu0 %v4503_v14, %s6379_s8  ;;  %v5443_v14 = vsel %vm1452_vm12, %v5427_v29, %v12194_v43 }
 0x71f   : > { %v12212_v54 = vpop.permute.xlu1 %4956 }
 0x720   : > { %v4908_v18 = vpop.permute.xlu0 %4907 }
 0x721   : > { %v12215_v55 = vsel %vm1401_vm9, %v5381_v27, %v4908_v18  ;;  %5221 = vrot.lane.b32.xlu1 %v4507_v3, %s6380_s9  ;;  %v5319_v27 = vsel %vm1316_vm4, %v5303_v34, %v13757_v15 }
 0x722   : > { %5219 = vrot.lane.b32.xlu0 %v4506_v13, %s6380_s9  ;;  %v5335_v37 = vsel %vm1333_vm5, %v5319_v27, %v13758_v12 }
 0x723   : > { %v5157_v31 = vpop.permute.xlu1 %5156  ;;  %v5351_v60 = vsel %vm1350_vm6, %v5335_v37, %v13759_v30 }
 0x724   : > { %v5108_v39 = vpop.permute.xlu0 %5107  ;;  %v5474_v21 = vsel %vm1486_vm14, %v5458_v62, %v5157_v31 }
 0x725   : > { %5272 = vrot.lane.b32.xlu1 %v4510_v48, %s6382_s18  ;;  %v5459_v6 = vsel %vm1469_vm13, %v5443_v14, %v5108_v39 }
 0x726   : > { %5270 = vrot.lane.b32.xlu0 %v4509_v16, %s6382_s18 }
 0x727   : > { %v12221_v46 = vpop.permute.xlu1 %4958 }
 0x728   : > { %v4808_v51 = vpop.permute.xlu0 %4807 }
 0x729   : > { %v5366_v0 = vsel %vm1367_vm7, %v5350_v47, %v4808_v51 }
 0x72b   : > { %v5159_v5 = vpop.permute.xlu1 %5158 }
 0x72c   : > { %v5008_v28 = vpop.permute.xlu0 %5007  ;;  %v5475_v3 = vsel %vm1486_vm14, %v5459_v6, %v5159_v5 }
 0x72f   : > { %v4810_v17 = vpop.permute.xlu1 %4809 }
 0x730   : > { %v5208_v45 = vpop.permute.xlu0 %5207  ;;  %v5367_v61 = vsel %vm1367_vm7, %v5351_v60, %v4810_v17 }
 0x731   : > { %v5490_v42 = vsel %vm1503_vm15, %v5474_v21, %v5208_v45  ;;  %v5412_v45 = vsel %vm1418_vm10, %v12201_v20, %v12212_v54  ;;  %v5413_v20 = vsel %vm1418_vm10, %v12215_v55, %v12221_v46 }
 0x732   : > { %v5428_v50 = vsel %vm1435_vm11, %v5412_v45, %v5008_v28 }
 0x733   : > { %v5010_v59 = vpop.permute.xlu1 %5009 }
 0x734   : > { %v4859_v23 = vpop.permute.xlu0 %4858  ;;  %v5429_v54 = vsel %vm1435_vm11, %v5413_v20, %v5010_v59  ;;  %v13766_v20 = vld [vmem:[#allocation19_spill] sm:$0xff] }
 0x735   : > { %v12234_v52 = vsel %vm1384_vm8, %v5366_v0, %v4859_v23 }
 0x737   : > { %v5210_v56 = vpop.permute.xlu1 %5209 }
 0x738   : > { %v5059_v57 = vpop.permute.xlu0 %5058  ;;  %v5491_v13 = vsel %vm1503_vm15, %v5475_v3, %v5210_v56 }
 0x739   : > { %v5444_v33 = vsel %vm1452_vm12, %v5428_v50, %v5059_v57  ;;  %v13761_v50 = vld [vmem:[#allocation125_spill] sm:$0xff] }
 0x73b   : > { %v4861_v25 = vpop.permute.xlu1 %4860 }
 0x73c   : > { %v12257_v32 = vsel %vm1384_vm8, %v5367_v61, %v4861_v25  ;;  %v5259_v38 = vpop.permute.xlu0 %5258 }
 0x73d   : > { %v5506_v24 = vsel %vm1520_vm1, %v5490_v42, %v5259_v38 }
 0x73e   : > { %6129 = vmatprep.mubr.msk.f32.mxu1 %vm1543_vm2, %v5506_v24 }
 0x73f   : > { %v5061_v1 = vpop.permute.xlu1 %5060 }
 0x740   : > { %v4910_v63 = vpop.permute.xlu0 %4909  ;;  %v5445_v34 = vsel %vm1452_vm12, %v5429_v54, %v5061_v1  ;;  %v13767_v54 = vld [vmem:[#allocation18_spill] sm:$0xff] }
 0x741   : > { %v5398_v38 = vsel %vm1401_vm9, %v12234_v52, %v4910_v63 }
 0x743   : > { %v5261_v18 = vpop.permute.xlu1 %5260 }
 0x744   : > { %v5507_v48 = vsel %vm1520_vm1, %v5491_v13, %v5261_v18  ;;  %v5110_v36 = vpop.permute.xlu0 %5109 }
 0x745   : > { %6130 = vmatmul.mubr.msk.f32.gmra.mrb[24].mxu1 %vm1543_vm2, %v5507_v48  ;;  %v5460_v19 = vsel %vm1469_vm13, %v5444_v33, %v5110_v36  ;;  %v13763_v33 = vld [vmem:[#allocation170_spill] sm:$0xff] }
 0x747   : > { %v4961_v53 = vpop.permute.xlu1 %4960 }
 0x748   : > { %v12273_v31 = vpop.permute.xlu0 %4911  ;;  %v5414_v24 = vsel %vm1418_vm10, %v5398_v38, %v4961_v53 }
 0x749   : > { %v5399_v52 = vsel %vm1401_vm9, %v12257_v32, %v12273_v31  ;;  %v5304_v32 = vsel %vm321_vm0, %v11731_v9, %v13761_v50  ;;  %v13762_v31 = vld [vmem:[#allocation155_spill] sm:$0xff] }
 0x74b   : > { %v5161_v26 = vpop.permute.xlu1 %5160 }
 0x74c   : > { %v5112_v16 = vpop.permute.xlu0 %5111  ;;  %v5476_v47 = vsel %vm1486_vm14, %v5460_v19, %v5161_v26  ;;  %v5320_v19 = vsel %vm1316_vm4, %v5304_v32, %v13763_v33 }
 0x74d   : > { %v5461_v56 = vsel %vm1469_vm13, %v5445_v34, %v5112_v16 }
 0x74f   : > { %v4963_v51 = vpop.permute.xlu1 %4962 }
 0x750   : > { %v12275_v43 = vpop.permute.xlu0 %4811  ;;  %v5415_v63 = vsel %vm1418_vm10, %v5399_v52, %v4963_v51 }
 0x753   : > { %v5163_v17 = vpop.permute.xlu1 %5162 }
 0x754   : > { %v5012_v39 = vpop.permute.xlu0 %5011  ;;  %v5477_v15 = vsel %vm1486_vm14, %v5461_v56, %v5163_v17 }
 0x755   : > { %v5430_v7 = vsel %vm1435_vm11, %v5414_v24, %v5012_v39  ;;  %v13760_v39 = vld [vmem:[#allocation3_spill] sm:$0xff] }
 0x757   : > { %v12277_v35 = vpop.permute.xlu1 %4813 }
 0x758   : > { %v5212_v5 = vpop.permute.xlu0 %5211 }
 0x759   : > { %v5492_v23 = vsel %vm1503_vm15, %v5476_v47, %v5212_v5  ;;  %v5305_v5 = vsel %vm321_vm0, %v11824_v10, %v13760_v39  ;;  %v13764_v47 = vld [vmem:[#allocation192_spill] sm:$0xff] }
 0x75a   : > { %v5321_v51 = vsel %vm1316_vm4, %v5305_v5, %v13762_v31 }
 0x75b   : > { %v5014_v4 = vpop.permute.xlu1 %5013 }
 0x75c   : > { %v12279_v44 = vpop.permute.xlu0 %4862  ;;  %v5431_v53 = vsel %vm1435_vm11, %v5415_v63, %v5014_v4 }
 0x75f   : > { %v5214_v58 = vpop.permute.xlu1 %5213 }
 0x760   : > { %v5063_v40 = vpop.permute.xlu0 %5062  ;;  %v5493_v27 = vsel %vm1503_vm15, %v5477_v15, %v5214_v58 }
 0x761   : > { %v5446_v1 = vsel %vm1452_vm12, %v5430_v7, %v5063_v40 }
 0x763   : > { %v12288_v0 = vpop.permute.xlu1 %4864 }
 0x764   : > { %v5263_v8 = vpop.permute.xlu0 %5262 }
 0x765   : > { %v5508_v49 = vsel %vm1520_vm1, %v5492_v23, %v5263_v8  ;;  %v5337_v23 = vsel %vm1333_vm5, %v5321_v51, %v13764_v47  ;;  %v13765_v8 = vld [vmem:[#allocation5_spill] sm:$0xff] }
 0x766   : > { %6132 = vmatprep.mubr.msk.f32.mxu1 %vm1543_vm2, %v5508_v49  ;;  %v5336_v49 = vsel %vm1333_vm5, %v5320_v19, %v13765_v8  ;;  %v5353_v9 = vsel %vm1350_vm6, %v5337_v23, %v13766_v20 }
 0x767   : > { %v5065_v28 = vpop.permute.xlu1 %5064  ;;  %v5369_v34 = vsel %vm1367_vm7, %v5353_v9, %v12277_v35 }
 0x768   : > { %v12298_v2 = vpop.permute.xlu0 %4913  ;;  %v5447_v16 = vsel %vm1452_vm12, %v5431_v53, %v5065_v28  ;;  %v5352_v28 = vsel %vm1350_vm6, %v5336_v49, %v13767_v54 }
 0x769   : > { %v5368_v15 = vsel %vm1367_vm7, %v5352_v28, %v12275_v43 }
 0x76b   : > { %v5265_v11 = vpop.permute.xlu1 %5264 }
 0x76c   : > { %v5509_v55 = vsel %vm1520_vm1, %v5493_v27, %v5265_v11  ;;  %v5114_v46 = vpop.permute.xlu0 %5113  ;;  %v5385_v27 = vsel %vm1384_vm8, %v5369_v34, %v12288_v0 }
 0x76d   : > { %6133 = vmatmul.mubr.msk.f32.gmra.mrb[26].mxu1 %vm1543_vm2, %v5509_v55  ;;  %v5462_v6 = vsel %vm1469_vm13, %v5446_v1, %v5114_v46  ;;  %v5384_v55 = vsel %vm1384_vm8, %v5368_v15, %v12279_v44 }
 0x76f   : > { %v4965_v59 = vpop.permute.xlu1 %4964 }
 0x770   : > { %v4916_v57 = vpop.permute.xlu0 %4915 }
 0x771   : > { %v5401_v46 = vsel %vm1401_vm9, %v5385_v27, %v4916_v57 }
 0x773   : > { %v5165_v12 = vpop.permute.xlu1 %5164 }
 0x774   : > { %v5116_v37 = vpop.permute.xlu0 %5115 }
 0x775   : > { %v5463_v17 = vsel %vm1469_vm13, %v5447_v16, %v5116_v37 }
 0x777   : > { %v5016_v41 = vpop.permute.xlu1 %5015 }
 0x778   : > { %v4967_v30 = vpop.permute.xlu0 %4966  ;;  %v6119_v60 = vpop.f32.mrb[16].mxu1 }
 0x779   : > { %v5634_v62 = vadd.f32 %v11726_v22, %v6119_v60  ;;  %v5628_v21 = vpop.f32.mrb[17].mxu1  ;;  %v5417_v37 = vsel %vm1418_vm10, %v5401_v46, %v4967_v30 }
 0x77a   : > { %v5629_v61 = vadd.f32 %v11726_v22, %v5628_v21  ;;  %v5478_v22 = vsel %vm1486_vm14, %v5462_v6, %v5165_v12  ;;  %v5400_v12 = vsel %vm1401_vm9, %v5384_v55, %v12298_v2 }
 0x77b   : > { %5708 = vst.msk [vmem:[%s8702_s13 + $0x188] sm:$0xff] %vm1316_vm4, %v5634_v62  ;;  %v5216_v25 = vpop.permute.xlu1 %5215  ;;  %v5416_v35 = vsel %vm1418_vm10, %v5400_v12, %v4965_v59 }
 0x77c   : > { %5707 = vst.msk [vmem:[%s8702_s13 + $0x180] sm:$0xff] %vm1316_vm4, %v5629_v61  ;;  %v5167_v42 = vpop.permute.xlu0 %5166  ;;  %v5494_v3 = vsel %vm1503_vm15, %v5478_v22, %v5216_v25  ;;  %v5432_v43 = vsel %vm1435_vm11, %v5416_v35, %v5016_v41 }
 0x77d   : > { %v5479_v45 = vsel %vm1486_vm14, %v5463_v17, %v5167_v42 }
 0x77f   : > { %v5067_v29 = vpop.permute.xlu1 %5066 }
 0x780   : > { %v5018_v14 = vpop.permute.xlu0 %5017  ;;  %v5448_v61 = vsel %vm1452_vm12, %v5432_v43, %v5067_v29  ;;  %v6359_v29 = vld [vmem:[%s12414_s3] ss:$0 sm:$0xff] }
 0x781   : > { %v5433_v60 = vsel %vm1435_vm11, %v5417_v37, %v5018_v14 }
 0x783   : > { %v5267_v13 = vpop.permute.xlu1 %5266 }
 0x784   : > { %v5510_v18 = vsel %vm1520_vm1, %v5494_v3, %v5267_v13  ;;  %v5218_v48 = vpop.permute.xlu0 %5217 }
 0x785   : > { %6135 = vmatprep.mubr.msk.f32.mxu1 %vm1543_vm2, %v5510_v18  ;;  %v5495_v4 = vsel %vm1503_vm15, %v5479_v45, %v5218_v48 }
 0x787   : > { %v5118_v36 = vpop.permute.xlu1 %5117 }
 0x788   : > { %v5069_v26 = vpop.permute.xlu0 %5068  ;;  %v5464_v57 = vsel %vm1469_vm13, %v5448_v61, %v5118_v36 }
 0x789   : > { %v5449_v0 = vsel %vm1452_vm12, %v5433_v60, %v5069_v26 }
 0x78b   : > { %v5120_v58 = vpop.permute.xlu1 %5119 }
 0x78c   : > { %v5269_v40 = vpop.permute.xlu0 %5268  ;;  %v5465_v44 = vsel %vm1469_vm13, %v5449_v0, %v5120_v58 }
 0x78d   : > { %v5511_v10 = vsel %vm1520_vm1, %v5495_v4, %v5269_v40 }
 0x78e   : > { %6136 = vmatmul.mubr.msk.f32.gmra.mrb[28].mxu1 %vm1543_vm2, %v5511_v10 }
 0x78f   : > { %v5171_v56 = vpop.permute.xlu1 %5170 }
 0x790   : > { %v5169_v11 = vpop.permute.xlu0 %5168  ;;  %v5481_v2 = vsel %vm1486_vm14, %v5465_v44, %v5171_v56 }
 0x791   : > { %v5480_v59 = vsel %vm1486_vm14, %v5464_v57, %v5169_v11 }
 0x793   : > { %v5222_v62 = vpop.permute.xlu1 %5221 }
 0x794   : > { %v5220_v21 = vpop.permute.xlu0 %5219  ;;  %v5497_v30 = vsel %vm1503_vm15, %v5481_v2, %v5222_v62 }
 0x795   : > { %v5496_v41 = vsel %vm1503_vm15, %v5480_v59, %v5220_v21 }
 0x797   : > { %v5273_v25 = vpop.permute.xlu1 %5272 }
 0x798   : > { %v5513_v42 = vsel %vm1520_vm1, %v5497_v30, %v5273_v25  ;;  %v5271_v38 = vpop.permute.xlu0 %5270 }
 0x799   : > { %v5512_v24 = vsel %vm1520_vm1, %v5496_v41, %v5271_v38 }
 0x79a   : > { %6138 = vmatprep.mubr.msk.f32.mxu1 %vm1543_vm2, %v5512_v24 }
 0x79b   : > { %6139 = vmatmul.mubr.msk.f32.gmra.mrb[30].mxu1 %vm1543_vm2, %v5513_v42 }
 0x7a0   : > { %v6122_v7 = vpop.f32.mrb[18].mxu1 }
 0x7a1   : > { %v5644_v1 = vadd.f32 %v6359_v29, %v6122_v7  ;;  %v5638_v14 = vpop.f32.mrb[19].mxu1 }
 0x7a2   : > { %v5639_v6 = vadd.f32 %v6359_v29, %v5638_v14 }
 0x7a3   : > { %5710 = vst.msk [vmem:[%s8702_s13 + $0x198] sm:$0xff] %vm1316_vm4, %v5644_v1 }
 0x7a4   : > { %5709 = vst.msk [vmem:[%s8702_s13 + $0x190] sm:$0xff] %vm1316_vm4, %v5639_v6 }
 0x7c8   : > { %v6125_v22 = vpop.f32.mrb[20].mxu1 }
 0x7c9   : > { %v5654_v3 = vadd.f32 %v6359_v29, %v6125_v22  ;;  %v5648_v13 = vpop.f32.mrb[21].mxu1 }
 0x7ca   : > { %v5649_v18 = vadd.f32 %v6359_v29, %v5648_v13 }
 0x7cb   : > { %5712 = vst.msk [vmem:[%s8702_s13 + $0x1a8] sm:$0xff] %vm1316_vm4, %v5654_v3 }
 0x7cc   : > { %5711 = vst.msk [vmem:[%s8702_s13 + $0x1a0] sm:$0xff] %vm1316_vm4, %v5649_v18 }
 0x7f0   : > { %v6128_v48 = vpop.f32.mrb[22].mxu1 }
 0x7f1   : > { %v5664_v52 = vadd.f32 %v6359_v29, %v6128_v48  ;;  %v5658_v63 = vpop.f32.mrb[23].mxu1 }
 0x7f2   : > { %v5659_v36 = vadd.f32 %v6359_v29, %v5658_v63 }
 0x7f3   : > { %5714 = vst.msk [vmem:[%s8702_s13 + $0x1b8] sm:$0xff] %vm1316_vm4, %v5664_v52 }
 0x7f4   : > { %5713 = vst.msk [vmem:[%s8702_s13 + $0x1b0] sm:$0xff] %vm1316_vm4, %v5659_v36 }
 0x818   : > { %v6131_v53 = vpop.f32.mrb[24].mxu1 }
 0x819   : > { %v5674_v26 = vadd.f32 %v6359_v29, %v6131_v53  ;;  %v5668_v16 = vpop.f32.mrb[25].mxu1 }
 0x81a   : > { %v5669_v17 = vadd.f32 %v6359_v29, %v5668_v16 }
 0x81b   : > { %5716 = vst.msk [vmem:[%s8702_s13 + $0x1c8] sm:$0xff] %vm1316_vm4, %v5674_v26 }
 0x81c   : > { %5715 = vst.msk [vmem:[%s8702_s13 + $0x1c0] sm:$0xff] %vm1316_vm4, %v5669_v17 }
 0x840   : > { %v6134_v39 = vpop.f32.mrb[26].mxu1 }
 0x841   : > { %v5684_v5 = vadd.f32 %v6359_v29, %v6134_v39  ;;  %v5678_v45 = vpop.f32.mrb[27].mxu1 }
 0x842   : > { %v5679_v58 = vadd.f32 %v6359_v29, %v5678_v45 }
 0x843   : > { %5718 = vst.msk [vmem:[%s8702_s13 + $0x1d8] sm:$0xff] %vm1316_vm4, %v5684_v5 }
 0x844   : > { %5717 = vst.msk [vmem:[%s8702_s13 + $0x1d0] sm:$0xff] %vm1316_vm4, %v5679_v58 }
 0x861   : > { %v6137_v50 = vpop.f32.mrb[28].mxu1 }
 0x862   : > { %v5694_v32 = vadd.f32 %v6359_v29, %v6137_v50  ;;  %v5688_v31 = vpop.f32.mrb[29].mxu1 }
 0x863   : > { %v5689_v51 = vadd.f32 %v6359_v29, %v5688_v31 }
 0x864   : > { %5720 = vst.msk [vmem:[%s8702_s13 + $0x1e8] sm:$0xff] %vm1316_vm4, %v5694_v32 }
 0x865   : > { %5719 = vst.msk [vmem:[%s8702_s13 + $0x1e0] sm:$0xff] %vm1316_vm4, %v5689_v51 }
 0x86e   : > { %v6140_v4 = vpop.f32.mrb[30].mxu1 }
 0x86f   : > { %v5704_v40 = vadd.f32 %v6359_v29, %v6140_v4  ;;  %v5698_v33 = vpop.f32.mrb[31].mxu1 }
 0x870   : > { %v5699_v19 = vadd.f32 %v6359_v29, %v5698_v33 }
 0x871   : > { %5722 = vst.msk [vmem:[%s8702_s13 + $0x1f8] sm:$0xff] %vm1316_vm4, %v5704_v40 }
 0x872   : > { %5721 = vst.msk [vmem:[%s8702_s13 + $0x1f0] sm:$0xff] %vm1316_vm4, %v5699_v19 }
 0x873 PF: > { %s14_s15 = sadd.s32 1, %s6366_s15  }
 0x874   : > { %p11_p6 = scmp.ge.s32.totalorder %s14_s15, 4  }
 0x876   :  { %13 = sbr.rel (!%p11_p6) target bundleno = 1 (0x1), region = 69 }

</bundles_post_ra>
